<compile_context>
chip_gen: v7x
topology: tpu7x:2x2x1
jax: 0.10.0
libtpu: 0.0.40
codegen_flags: <defaults>
</compile_context>

<pallas_src>
import functools

import jax
import jax.numpy as jnp
from jax import lax
from jax.experimental import pallas as pl
from jax.experimental.pallas import tpu as pltpu

_LANE = 128  # channel padding target (lane width)


def _round_up(v, m):
    return -(-v // m) * m


# --------------------------- hardware-aware sizing ---------------------------

def _vmem_capacity_bytes():
    """Per-core VMEM capacity; conservative 64 MiB (v7x) if the query fails."""
    try:
        return int(pltpu.get_tpu_info().vmem_capacity_bytes)
    except Exception:
        return 64 * 1024 * 1024


def _vmem_limit_bytes():
    cap = _vmem_capacity_bytes()
    return max(32 * 1024 * 1024, min((cap * 3) // 4, 96 * 1024 * 1024))


def _pick_row_tile(ho, wo, hp, wp, cp, budget):
    """Largest output row-tile th (dividing ho) whose VMEM estimate fits budget."""
    fixed = (2 * hp * wp * cp * 2          # resident padded image (double-buffered)
             + 2 * 2 * 25 * cp * cp * 2    # two tap-weight stacks (double-buffered)
             + 2 * 2 * cp * 4)             # biases
    cands = [t for t in (128, 64, 32, 16, 8, 4, 2, 1) if ho % t == 0] or [ho]
    for t in cands:
        per = ((t + 4) * (wo + 4) * cp * 2     # y VMEM scratch (bf16)
               + 2 * t * wo * cp * 2           # output block (double-buffered)
               + (t + 4) * wo * cp * 4         # conv1 f32 accumulator
               + t * wo * cp * 4)              # conv2 f32 accumulator
        if fixed + per <= budget:
            return t
    return cands[-1]


# ----------------------------- Pallas kernels ------------------------------

def _mm_bias_relu_kernel(p_ref, w_ref, b_ref, o_ref):
    """out = ReLU(patches @ w + b) -- strided first conv as tiled matmul."""
    acc = jnp.dot(p_ref[...], w_ref[...], preferred_element_type=jnp.float32)
    acc = acc + b_ref[...]
    o_ref[...] = jnp.maximum(acc, 0.0).astype(o_ref.dtype)


def _resblock_kernel(x_ref, w1_ref, b1_ref, w2_ref, b2_ref, o_ref, y_ref):
    """Fused resblock row-tile: out = x + conv5x5(ReLU(conv5x5(x)+b1)) + b2.

    x_ref : (1, H+8, W+8, Cp) bf16  activation halo-padded by 4 (per image)
    w*_ref: (25, Cp, Cp)      bf16  tap-major 5x5 weights
    b*_ref: (1, Cp)           f32   bias
    o_ref : (1, th, W, Cp)    bf16  output row tile
    y_ref : (th+4, W+4, Cp)   bf16  VMEM scratch holding the y band + W halo
    """
    _, th, wo, cp = o_ref.shape
    hy = th + 4                                   # rows of y needed for conv2
    r0 = pl.program_id(1) * th                    # first output row of this tile
    h_total = pl.num_programs(1) * th             # H (th divides H by construction)
    xv = x_ref.at[0]                              # (H+8, W+8, Cp) view

    # ---- conv1 (+bias, ReLU): y rows [r0-2, r0+th+2), cols [0, W) -----------
    # y row iy corresponds to image row (r0 - 2 + iy); its 5x5 window lives at
    # padded rows [r0+iy, r0+iy+4] and, for output col j, padded cols [j+2, j+6].
    acc1 = None
    for ky in range(5):
        for kx in range(5):
            win = xv[pl.ds(r0 + ky, hy), pl.ds(2 + kx, wo), :]   # (hy, wo, Cp) bf16
            part = jnp.dot(win.reshape(hy * wo, cp), w1_ref[ky * 5 + kx],
                           preferred_element_type=jnp.float32)   # f32 accumulate
            acc1 = part if acc1 is None else acc1 + part
    y = jnp.maximum(acc1 + b1_ref[...], 0.0).reshape(hy, wo, cp)

    # y rows outside [0, H) are conv2's zero padding, not conv1 values -> mask.
    yrow = lax.broadcasted_iota(jnp.int32, (hy, wo, cp), 0) + (r0 - 2)
    y = jnp.where((yrow >= 0) & (yrow < h_total), y, 0.0)

    # Stage y in VMEM with a zero column halo of 2 on each side.
    y_ref[:, 0:2, :] = jnp.zeros((hy, 2, cp), y_ref.dtype)
    y_ref[:, wo + 2:wo + 4, :] = jnp.zeros((hy, 2, cp), y_ref.dtype)
    y_ref[:, 2:wo + 2, :] = y.astype(y_ref.dtype)

    # ---- conv2 (+bias) + residual: output rows [r0, r0+th) -------------------
    # Output row io uses y_ref rows [io, io+4]; output col j uses y_ref cols [j, j+4].
    acc2 = None
    for ky in range(5):
        for kx in range(5):
            win = y_ref[pl.ds(ky, th), pl.ds(kx, wo), :]          # (th, wo, Cp) bf16
            part = jnp.dot(win.reshape(th * wo, cp), w2_ref[ky * 5 + kx],
                           preferred_element_type=jnp.float32)
            acc2 = part if acc2 is None else acc2 + part
    # Residual read straight from the interior of the padded input (no extra HBM op).
    res = xv[pl.ds(r0 + 4, th), pl.ds(4, wo), :].reshape(th * wo, cp)
    out = acc2 + b2_ref[...] + res.astype(jnp.float32)
    o_ref[...] = out.reshape(1, th, wo, cp).astype(o_ref.dtype)


# ------------------------------- wrappers -----------------------------------

def resblock_pallas(x, w1_taps, b1, w2_taps, b2):
    """Fused SRN resblock on NHWC bf16 activations (channels padded to Cp)."""
    n, ho, wo, cp = x.shape
    xp = jnp.pad(x, ((0, 0), (4, 4), (4, 4), (0, 0)))   # halo 4 = conv1(2)+conv2(2)
    hp, wp = ho + 8, wo + 8

    vmem_limit = _vmem_limit_bytes()
    th = _pick_row_tile(ho, wo, hp, wp, cp, int(vmem_limit * 0.9))
    grid = (n, ho // th)     # both axes parallel -> megacore-shardable on v7x

    flops = 2 * 25 * cp * cp * n * (ho // th) * ((th + 4) * wo + th * wo)
    bytes_accessed = ((n * hp * wp * cp) * 2          # padded image, read once/image
                      + (w1_taps.size + w2_taps.size) * 2
                      + n * ho * wo * cp * 2          # output
                      + (b1.size + b2.size) * 4)

    return pl.pallas_call(
        _resblock_kernel,
        out_shape=jax.ShapeDtypeStruct((n, ho, wo, cp), jnp.bfloat16),
        grid=grid,
        in_specs=[
            # Per-image padded input: index_map ignores the row axis, so it is
            # DMA'd once per image and stays VMEM-resident while row tiles stream.
            pl.BlockSpec((1, hp, wp, cp), lambda nn, rr: (nn, 0, 0, 0)),
            # Weights / biases: constant index_map -> DMA'd once, VMEM-resident.
            pl.BlockSpec((25, cp, cp), lambda nn, rr: (0, 0, 0)),
            pl.BlockSpec((1, cp), lambda nn, rr: (0, 0)),
            pl.BlockSpec((25, cp, cp), lambda nn, rr: (0, 0, 0)),
            pl.BlockSpec((1, cp), lambda nn, rr: (0, 0)),
        ],
        out_specs=pl.BlockSpec((1, th, wo, cp), lambda nn, rr: (nn, rr, 0, 0)),
        scratch_shapes=[pltpu.VMEM((th + 4, wo + 4, cp), jnp.bfloat16)],
        compiler_params=pltpu.CompilerParams(
            dimension_semantics=("parallel", "parallel"),
            vmem_limit_bytes=vmem_limit),
        cost_estimate=pl.CostEstimate(flops=flops, transcendentals=0,
                                      bytes_accessed=bytes_accessed),
    )(xp, w1_taps, b1, w2_taps, b2)


def _im2col(x_nhwc, k, stride, pad):
    """Extract kxk patches -> (N*Ho*Wo, k*k*Cin) in the INPUT dtype (bf16)."""
    n, h, w, c = x_nhwc.shape
    xp = jnp.pad(x_nhwc, ((0, 0), (pad, pad), (pad, pad), (0, 0)))
    ho = (h + 2 * pad - k) // stride + 1
    wo = (w + 2 * pad - k) // stride + 1
    cols = []
    for ky in range(k):
        for kx in range(k):
            cols.append(xp[:, ky:ky + stride * (ho - 1) + 1:stride,
                              kx:kx + stride * (wo - 1) + 1:stride, :])
    patches = jnp.stack(cols, axis=3)                 # (N, Ho, Wo, k*k, Cin)
    return patches.reshape(n * ho * wo, k * k * c), (n, ho, wo)


def conv5x5_strided_pallas(x_nhwc, w2d, b2d, *, stride):
    """First EBlock conv (stride s, pad 2): bf16 im2col + tiled MXU matmul."""
    patches, (n, ho, wo) = _im2col(x_nhwc.astype(jnp.bfloat16), 5, stride, pad=2)
    m, k = patches.shape
    kp, cp = w2d.shape
    patches = jnp.pad(patches, ((0, 0), (0, kp - k)))

    tm = min(1024, _round_up(m, 128))          # large lane-dense M tiles
    mp = _round_up(m, tm)
    if mp > m:
        patches = jnp.pad(patches, ((0, mp - m), (0, 0)))
    grid = (mp // tm,)

    vmem_limit = _vmem_limit_bytes()
    flops = 2 * mp * kp * cp
    bytes_accessed = (patches.size + w2d.size + mp * cp) * 2 + b2d.size * 4

    out = pl.pallas_call(
        _mm_bias_relu_kernel,
        out_shape=jax.ShapeDtypeStruct((mp, cp), jnp.bfloat16),
        grid=grid,
        in_specs=[pl.BlockSpec((tm, kp), lambda i: (i, 0)),
                  pl.BlockSpec((kp, cp), lambda i: (0, 0)),    # resident weights
                  pl.BlockSpec((1, cp), lambda i: (0, 0))],    # resident bias
        out_specs=pl.BlockSpec((tm, cp), lambda i: (i, 0)),
        compiler_params=pltpu.CompilerParams(
            dimension_semantics=("parallel",),
            vmem_limit_bytes=vmem_limit),
        cost_estimate=pl.CostEstimate(flops=flops, transcendentals=0,
                                      bytes_accessed=bytes_accessed),
    )(patches, w2d, b2d)
    return out[:m].reshape(n, ho, wo, cp)


# ------------------------- parameter preparation ----------------------------

def _prep_mm_weight(w_hwio, b, cp):
    """(5,5,Ci,Co) -> (Kp, Cp) bf16 matmul weight (K and Cout zero-padded)."""
    kh, kw, ci, co = w_hwio.shape
    k = kh * kw * ci
    w2d = w_hwio.reshape(k, co)
    w2d = jnp.pad(w2d, ((0, _round_up(k, _LANE) - k), (0, cp - co)))
    b2d = jnp.pad(b, (0, cp - co)).reshape(1, cp).astype(jnp.float32)
    return w2d.astype(jnp.bfloat16), b2d


def _prep_tap_weight(w_hwio, b, cp):
    """(5,5,Ci,Co) -> (25, Cp, Cp) bf16 tap-major weight (channels zero-padded)."""
    kh, kw, ci, co = w_hwio.shape
    w = jnp.pad(w_hwio, ((0, 0), (0, 0), (0, cp - ci), (0, cp - co)))
    w = w.reshape(kh * kw, cp, cp).astype(jnp.bfloat16)
    b2d = jnp.pad(b, (0, cp - co)).reshape(1, cp).astype(jnp.float32)
    return w, b2d


# ------------------------------- forward -------------------------------------

def eblock_forward(x_nchw, params, stride):
    """EBlock forward: conv5x5+ReLU, then 3 fused resblocks. NCHW in / NCHW out."""
    cout = params["conv_b"].shape[0]
    cp = _round_up(cout, _LANE)                      # lane-dense channel padding

    x = jnp.transpose(x_nchw, (0, 2, 3, 1))          # NCHW -> NHWC (f32)

    w1, b1 = _prep_mm_weight(params["conv_w"], params["conv_b"], cp)
    x = conv5x5_strided_pallas(x, w1, b1, stride=stride)     # bf16 (N,Ho,Wo,Cp)

    for i in range(3):
        wa, ba = _prep_tap_weight(params[f"res{i}_w1"], params[f"res{i}_b1"], cp)
        wb, bb = _prep_tap_weight(params[f"res{i}_w2"], params[f"res{i}_b2"], cp)
        x = resblock_pallas(x, wa, ba, wb, bb)                # one fused call

    out = x[..., :cout].astype(jnp.float32)
    return jnp.transpose(out, (0, 3, 1, 2))          # NHWC -> NCHW


# --------------------------- reference (pure JAX) ----------------------------

def _conv_ref(x_nhwc, w_hwio, b, stride):
    y = lax.conv_general_dilated(
        x_nhwc, w_hwio, window_strides=(stride, stride),
        padding=[(2, 2), (2, 2)],
        dimension_numbers=("NHWC", "HWIO", "NHWC"),
        precision=lax.Precision.HIGHEST)
    return y + b.reshape(1, 1, 1, -1)


def eblock_reference(x_nchw, params, stride):
    x = jnp.transpose(x_nchw, (0, 2, 3, 1))
    x = jax.nn.relu(_conv_ref(x, params["conv_w"], params["conv_b"], stride))
    for i in range(3):
        y = jax.nn.relu(_conv_ref(x, params[f"res{i}_w1"], params[f"res{i}_b1"], 1))
        x = x + _conv_ref(y, params[f"res{i}_w2"], params[f"res{i}_b2"], 1)
    return jnp.transpose(x, (0, 3, 1, 2))


# --------------------------------- params -----------------------------------

def init_eblock_params(key, cin, cout):
    """Deterministic synthetic params (shapes match nn.Conv2d(cin,cout,5))."""
    keys = jax.random.split(key, 14)
    p = {}
    p["conv_w"] = 0.05 * jax.random.normal(keys[0], (5, 5, cin, cout), jnp.float32)
    p["conv_b"] = 0.05 * jax.random.normal(keys[1], (cout,), jnp.float32)
    k = 2
    for i in range(3):
        p[f"res{i}_w1"] = 0.05 * jax.random.normal(keys[k], (5, 5, cout, cout), jnp.float32)
        p[f"res{i}_b1"] = 0.05 * jax.random.normal(keys[k + 1], (cout,), jnp.float32)
        p[f"res{i}_w2"] = 0.05 * jax.random.normal(keys[k + 2], (5, 5, cout, cout), jnp.float32)
        p[f"res{i}_b2"] = 0.05 * jax.random.normal(keys[k + 3], (cout,), jnp.float32)
        k += 4
    return p


# ----------------------------------- main ------------------------------------

if __name__ == "__main__":
    key = jax.random.PRNGKey(0)
    kx, kp = jax.random.split(key)

    in_channels, out_channels, stride = 4, 8, 2
    x = jax.random.normal(kx, (2, in_channels, 16, 16), jnp.float32)  # NCHW
    params = init_eblock_params(kp, in_channels, out_channels)

    fwd = jax.jit(functools.partial(eblock_forward, stride=stride))
    out = jax.block_until_ready(fwd(x, params))

    assert out.shape == (2, out_channels, 8, 8), out.shape
    assert bool(jnp.all(jnp.isfinite(out)))

    ref = eblock_reference(x, params, stride)
    # bf16 MXU inputs / bf16 inter-block activations vs a full-f32 reference.
    max_err = float(jnp.max(jnp.abs(out - ref)))
    assert jnp.allclose(out, ref, atol=5e-2, rtol=5e-2), max_err

    print("KERNEL_OK")
</pallas_src>

<mosaic_0001>
module attributes {stable_mosaic.version = 11 : i64} {
  func.func @_mm_bias_relu_kernel(%arg0: i32, %arg1: memref<128x128xbf16, #tpu.memory_space<vmem>>, %arg2: memref<128x128xbf16, #tpu.memory_space<vmem>>, %arg3: memref<1x128xf32, #tpu.memory_space<vmem>>, %arg4: memref<128x128xbf16, #tpu.memory_space<vmem>>) attributes {dimension_semantics = [#tpu.dimension_semantics<parallel>], iteration_bounds = array<i64: 1>, scalar_prefetch = 0 : i64, scratch_operands = 0 : i64, tpu.core_type = #tpu.core_type<tc>, window_params = [{transform_indices = @transform_0, window_bounds = array<i64: 128, 128>}, {pipeline_mode = #tpu.pipeline_mode<synchronous>, transform_indices = @transform_1, window_bounds = array<i64: 128, 128>}, {pipeline_mode = #tpu.pipeline_mode<synchronous>, transform_indices = @transform_2, window_bounds = array<i64: 1, 128>}, {transform_indices = @transform_3, window_bounds = array<i64: 128, 128>}]} {
    %c0 = arith.constant 0 : index
    %c0_0 = arith.constant 0 : index
    %0 = vector.load %arg1[%c0, %c0_0] : memref<128x128xbf16, #tpu.memory_space<vmem>>, vector<128x128xbf16>
    %c0_1 = arith.constant 0 : index
    %c0_2 = arith.constant 0 : index
    %1 = vector.load %arg2[%c0_1, %c0_2] : memref<128x128xbf16, #tpu.memory_space<vmem>>, vector<128x128xbf16>
    %cst = arith.constant dense<0.000000e+00> : vector<128x128xf32>
    %2 = tpu.matmul %0, %1, %cst {dimension_numbers = #tpu.dot_dimension_numbers<[1], [0], [0], [1], [0, 0, 1, 1], [], []>} : vector<128x128xbf16>, vector<128x128xbf16>, vector<128x128xf32> -> vector<128x128xf32>
    %c0_3 = arith.constant 0 : index
    %c0_4 = arith.constant 0 : index
    %3 = vector.load %arg3[%c0_3, %c0_4] : memref<1x128xf32, #tpu.memory_space<vmem>>, vector<1x128xf32>
    %4 = vector.broadcast %3 : vector<1x128xf32> to vector<128x128xf32>
    %5 = arith.addf %2, %4 : vector<128x128xf32>
    %cst_5 = arith.constant 0.000000e+00 : f32
    %6 = vector.broadcast %cst_5 : f32 to vector<128x128xf32>
    %7 = arith.maximumf %5, %6 : vector<128x128xf32>
    %8 = arith.truncf %7 : vector<128x128xf32> to vector<128x128xbf16>
    %c0_6 = arith.constant 0 : index
    %c0_7 = arith.constant 0 : index
    %9 = vector.load %arg4[%c0_6, %c0_7] : memref<128x128xbf16, #tpu.memory_space<vmem>>, vector<128x128xbf16>
    tpu.vector_store %arg4[%c0_6, %c0_7], %8 {strides = array<i32>} : memref<128x128xbf16, #tpu.memory_space<vmem>>, vector<128x128xbf16>,
    return
  }
  func.func @transform_0(%arg0: i32) -> (i32, i32) {
    %c0_i32 = arith.constant 0 : i32
    %c0_i32_0 = arith.constant 0 : i32
    return %arg0, %c0_i32 : i32, i32
  }
  func.func @transform_1(%arg0: i32) -> (i32, i32) {
    %c0_i32 = arith.constant 0 : i32
    %c0_i32_0 = arith.constant 0 : i32
    %c0_i32_1 = arith.constant 0 : i32
    return %c0_i32, %c0_i32_0 : i32, i32
  }
  func.func @transform_2(%arg0: i32) -> (i32, i32) {
    %c0_i32 = arith.constant 0 : i32
    %c0_i32_0 = arith.constant 0 : i32
    %c0_i32_1 = arith.constant 0 : i32
    return %c0_i32, %c0_i32_0 : i32, i32
  }
  func.func @transform_3(%arg0: i32) -> (i32, i32) {
    %c0_i32 = arith.constant 0 : i32
    %c0_i32_0 = arith.constant 0 : i32
    return %arg0, %c0_i32 : i32, i32
  }
}

module attributes {stable_mosaic.version = 11 : i64} {
  func.func @_resblock_kernel(%arg0: i32, %arg1: i32, %arg2: memref<1x16x16x128xbf16, #tpu.memory_space<vmem>>, %arg3: memref<25x128x128xbf16, #tpu.memory_space<vmem>>, %arg4: memref<1x128xf32, #tpu.memory_space<vmem>>, %arg5: memref<25x128x128xbf16, #tpu.memory_space<vmem>>, %arg6: memref<1x128xf32, #tpu.memory_space<vmem>>, %arg7: memref<1x8x8x128xbf16, #tpu.memory_space<vmem>>, %arg8: memref<12x12x128xbf16, #tpu.memory_space<vmem>>) attributes {dimension_semantics = [#tpu.dimension_semantics<parallel>, #tpu.dimension_semantics<parallel>], iteration_bounds = array<i64: 2, 1>, scalar_prefetch = 0 : i64, scratch_operands = 1 : i64, tpu.core_type = #tpu.core_type<tc>, window_params = [{transform_indices = @transform_0, window_bounds = array<i64: 1, 16, 16, 128>}, {pipeline_mode = #tpu.pipeline_mode<synchronous>, transform_indices = @transform_1, window_bounds = array<i64: 25, 128, 128>}, {pipeline_mode = #tpu.pipeline_mode<synchronous>, transform_indices = @transform_2, window_bounds = array<i64: 1, 128>}, {pipeline_mode = #tpu.pipeline_mode<synchronous>, transform_indices = @transform_3, window_bounds = array<i64: 25, 128, 128>}, {pipeline_mode = #tpu.pipeline_mode<synchronous>, transform_indices = @transform_4, window_bounds = array<i64: 1, 128>}, {transform_indices = @transform_5, window_bounds = array<i64: 1, 8, 8, 128>}]} {
    %c8_i32 = arith.constant 8 : i32
    %0 = arith.muli %arg1, %c8_i32 : i32
    %c0_i32 = arith.constant 0 : i32
    %1 = arith.addi %0, %c0_i32 : i32
    %c0_i32_0 = arith.constant 0 : i32
    %c0_i32_1 = arith.constant 0 : i32
    %c0_i32_2 = arith.constant 0 : i32
    %c0_i32_3 = arith.constant 0 : i32
    %2 = tpu.memref_slice %arg2[%c0_i32_0, %c0_i32_1, %c0_i32_2, %c0_i32_3] : memref<1x16x16x128xbf16, #tpu.memory_space<vmem>> -> memref<1x16x16x128xbf16, #tpu.memory_space<vmem>>
    %3 = tpu.memref_squeeze %2 : memref<1x16x16x128xbf16, #tpu.memory_space<vmem>> -> memref<16x16x128xbf16, #tpu.memory_space<vmem>>
    %4 = arith.index_cast %1 : i32 to index
    %c2 = arith.constant 2 : index
    %c0 = arith.constant 0 : index
    %5 = vector.load %3[%4, %c2, %c0] : memref<16x16x128xbf16, #tpu.memory_space<vmem>>, vector<12x8x128xbf16>
    %6 = vector.shape_cast %5 : vector<12x8x128xbf16> to vector<96x128xbf16>
    %c0_4 = arith.constant 0 : index
    %c0_5 = arith.constant 0 : index
    %c0_6 = arith.constant 0 : index
    %7 = vector.load %arg3[%c0_4, %c0_5, %c0_6] : memref<25x128x128xbf16, #tpu.memory_space<vmem>>, vector<1x128x128xbf16>
    %8 = vector.shape_cast %7 : vector<1x128x128xbf16> to vector<128x128xbf16>
    %cst = arith.constant dense<0.000000e+00> : vector<96x128xf32>
    %9 = tpu.matmul %6, %8, %cst {dimension_numbers = #tpu.dot_dimension_numbers<[1], [0], [0], [1], [0, 0, 1, 1], [], []>} : vector<96x128xbf16>, vector<128x128xbf16>, vector<96x128xf32> -> vector<96x128xf32>
    %c0_i32_7 = arith.constant 0 : i32
    %10 = arith.addi %0, %c0_i32_7 : i32
    %c0_i32_8 = arith.constant 0 : i32
    %c0_i32_9 = arith.constant 0 : i32
    %c0_i32_10 = arith.constant 0 : i32
    %c0_i32_11 = arith.constant 0 : i32
    %11 = tpu.memref_slice %arg2[%c0_i32_8, %c0_i32_9, %c0_i32_10, %c0_i32_11] : memref<1x16x16x128xbf16, #tpu.memory_space<vmem>> -> memref<1x16x16x128xbf16, #tpu.memory_space<vmem>>
    %12 = tpu.memref_squeeze %11 : memref<1x16x16x128xbf16, #tpu.memory_space<vmem>> -> memref<16x16x128xbf16, #tpu.memory_space<vmem>>
    %13 = arith.index_cast %10 : i32 to index
    %c3 = arith.constant 3 : index
    %c0_12 = arith.constant 0 : index
    %14 = vector.load %12[%13, %c3, %c0_12] : memref<16x16x128xbf16, #tpu.memory_space<vmem>>, vector<12x8x128xbf16>
    %15 = vector.shape_cast %14 : vector<12x8x128xbf16> to vector<96x128xbf16>
    %c1 = arith.constant 1 : index
    %c0_13 = arith.constant 0 : index
    %c0_14 = arith.constant 0 : index
    %16 = vector.load %arg3[%c1, %c0_13, %c0_14] : memref<25x128x128xbf16, #tpu.memory_space<vmem>>, vector<1x128x128xbf16>
    %17 = vector.shape_cast %16 : vector<1x128x128xbf16> to vector<128x128xbf16>
    %cst_15 = arith.constant dense<0.000000e+00> : vector<96x128xf32>
    %18 = tpu.matmul %15, %17, %cst_15 {dimension_numbers = #tpu.dot_dimension_numbers<[1], [0], [0], [1], [0, 0, 1, 1], [], []>} : vector<96x128xbf16>, vector<128x128xbf16>, vector<96x128xf32> -> vector<96x128xf32>
    %19 = arith.addf %9, %18 : vector<96x128xf32>
    %c0_i32_16 = arith.constant 0 : i32
    %20 = arith.addi %0, %c0_i32_16 : i32
    %c0_i32_17 = arith.constant 0 : i32
    %c0_i32_18 = arith.constant 0 : i32
    %c0_i32_19 = arith.constant 0 : i32
    %c0_i32_20 = arith.constant 0 : i32
    %21 = tpu.memref_slice %arg2[%c0_i32_17, %c0_i32_18, %c0_i32_19, %c0_i32_20] : memref<1x16x16x128xbf16, #tpu.memory_space<vmem>> -> memref<1x16x16x128xbf16, #tpu.memory_space<vmem>>
    %22 = tpu.memref_squeeze %21 : memref<1x16x16x128xbf16, #tpu.memory_space<vmem>> -> memref<16x16x128xbf16, #tpu.memory_space<vmem>>
    %23 = arith.index_cast %20 : i32 to index
    %c4 = arith.constant 4 : index
    %c0_21 = arith.constant 0 : index
    %24 = vector.load %22[%23, %c4, %c0_21] : memref<16x16x128xbf16, #tpu.memory_space<vmem>>, vector<12x8x128xbf16>
    %25 = vector.shape_cast %24 : vector<12x8x128xbf16> to vector<96x128xbf16>
    %c2_22 = arith.constant 2 : index
    %c0_23 = arith.constant 0 : index
    %c0_24 = arith.constant 0 : index
    %26 = vector.load %arg3[%c2_22, %c0_23, %c0_24] : memref<25x128x128xbf16, #tpu.memory_space<vmem>>, vector<1x128x128xbf16>
    %27 = vector.shape_cast %26 : vector<1x128x128xbf16> to vector<128x128xbf16>
    %cst_25 = arith.constant dense<0.000000e+00> : vector<96x128xf32>
    %28 = tpu.matmul %25, %27, %cst_25 {dimension_numbers = #tpu.dot_dimension_numbers<[1], [0], [0], [1], [0, 0, 1, 1], [], []>} : vector<96x128xbf16>, vector<128x128xbf16>, vector<96x128xf32> -> vector<96x128xf32>
    %29 = arith.addf %19, %28 : vector<96x128xf32>
    %c0_i32_26 = arith.constant 0 : i32
    %30 = arith.addi %0, %c0_i32_26 : i32
    %c0_i32_27 = arith.constant 0 : i32
    %c0_i32_28 = arith.constant 0 : i32
    %c0_i32_29 = arith.constant 0 : i32
    %c0_i32_30 = arith.constant 0 : i32
    %31 = tpu.memref_slice %arg2[%c0_i32_27, %c0_i32_28, %c0_i32_29, %c0_i32_30] : memref<1x16x16x128xbf16, #tpu.memory_space<vmem>> -> memref<1x16x16x128xbf16, #tpu.memory_space<vmem>>
    %32 = tpu.memref_squeeze %31 : memref<1x16x16x128xbf16, #tpu.memory_space<vmem>> -> memref<16x16x128xbf16, #tpu.memory_space<vmem>>
    %33 = arith.index_cast %30 : i32 to index
    %c5 = arith.constant 5 : index
    %c0_31 = arith.constant 0 : index
    %34 = vector.load %32[%33, %c5, %c0_31] : memref<16x16x128xbf16, #tpu.memory_space<vmem>>, vector<12x8x128xbf16>
    %35 = vector.shape_cast %34 : vector<12x8x128xbf16> to vector<96x128xbf16>
    %c3_32 = arith.constant 3 : index
    %c0_33 = arith.constant 0 : index
    %c0_34 = arith.constant 0 : index
    %36 = vector.load %arg3[%c3_32, %c0_33, %c0_34] : memref<25x128x128xbf16, #tpu.memory_space<vmem>>, vector<1x128x128xbf16>
    %37 = vector.shape_cast %36 : vector<1x128x128xbf16> to vector<128x128xbf16>
    %cst_35 = arith.constant dense<0.000000e+00> : vector<96x128xf32>
    %38 = tpu.matmul %35, %37, %cst_35 {dimension_numbers = #tpu.dot_dimension_numbers<[1], [0], [0], [1], [0, 0, 1, 1], [], []>} : vector<96x128xbf16>, vector<128x128xbf16>, vector<96x128xf32> -> vector<96x128xf32>
    %39 = arith.addf %29, %38 : vector<96x128xf32>
    %c0_i32_36 = arith.constant 0 : i32
    %40 = arith.addi %0, %c0_i32_36 : i32
    %c0_i32_37 = arith.constant 0 : i32
    %c0_i32_38 = arith.constant 0 : i32
    %c0_i32_39 = arith.constant 0 : i32
    %c0_i32_40 = arith.constant 0 : i32
    %41 = tpu.memref_slice %arg2[%c0_i32_37, %c0_i32_38, %c0_i32_39, %c0_i32_40] : memref<1x16x16x128xbf16, #tpu.memory_space<vmem>> -> memref<1x16x16x128xbf16, #tpu.memory_space<vmem>>
    %42 = tpu.memref_squeeze %41 : memref<1x16x16x128xbf16, #tpu.memory_space<vmem>> -> memref<16x16x128xbf16, #tpu.memory_space<vmem>>
    %43 = arith.index_cast %40 : i32 to index
    %c6 = arith.constant 6 : index
    %c0_41 = arith.constant 0 : index
    %44 = vector.load %42[%43, %c6, %c0_41] : memref<16x16x128xbf16, #tpu.memory_space<vmem>>, vector<12x8x128xbf16>
    %45 = vector.shape_cast %44 : vector<12x8x128xbf16> to vector<96x128xbf16>
    %c4_42 = arith.constant 4 : index
    %c0_43 = arith.constant 0 : index
    %c0_44 = arith.constant 0 : index
    %46 = vector.load %arg3[%c4_42, %c0_43, %c0_44] : memref<25x128x128xbf16, #tpu.memory_space<vmem>>, vector<1x128x128xbf16>
    %47 = vector.shape_cast %46 : vector<1x128x128xbf16> to vector<128x128xbf16>
    %cst_45 = arith.constant dense<0.000000e+00> : vector<96x128xf32>
    %48 = tpu.matmul %45, %47, %cst_45 {dimension_numbers = #tpu.dot_dimension_numbers<[1], [0], [0], [1], [0, 0, 1, 1], [], []>} : vector<96x128xbf16>, vector<128x128xbf16>, vector<96x128xf32> -> vector<96x128xf32>
    %49 = arith.addf %39, %48 : vector<96x128xf32>
    %c1_i32 = arith.constant 1 : i32
    %50 = arith.addi %0, %c1_i32 : i32
    %c0_i32_46 = arith.constant 0 : i32
    %c0_i32_47 = arith.constant 0 : i32
    %c0_i32_48 = arith.constant 0 : i32
    %c0_i32_49 = arith.constant 0 : i32
    %51 = tpu.memref_slice %arg2[%c0_i32_46, %c0_i32_47, %c0_i32_48, %c0_i32_49] : memref<1x16x16x128xbf16, #tpu.memory_space<vmem>> -> memref<1x16x16x128xbf16, #tpu.memory_space<vmem>>
    %52 = tpu.memref_squeeze %51 : memref<1x16x16x128xbf16, #tpu.memory_space<vmem>> -> memref<16x16x128xbf16, #tpu.memory_space<vmem>>
    %53 = arith.index_cast %50 : i32 to index
    %c2_50 = arith.constant 2 : index
    %c0_51 = arith.constant 0 : index
    %54 = vector.load %52[%53, %c2_50, %c0_51] : memref<16x16x128xbf16, #tpu.memory_space<vmem>>, vector<12x8x128xbf16>
    %55 = vector.shape_cast %54 : vector<12x8x128xbf16> to vector<96x128xbf16>
    %c5_52 = arith.constant 5 : index
    %c0_53 = arith.constant 0 : index
    %c0_54 = arith.constant 0 : index
    %56 = vector.load %arg3[%c5_52, %c0_53, %c0_54] : memref<25x128x128xbf16, #tpu.memory_space<vmem>>, vector<1x128x128xbf16>
    %57 = vector.shape_cast %56 : vector<1x128x128xbf16> to vector<128x128xbf16>
    %cst_55 = arith.constant dense<0.000000e+00> : vector<96x128xf32>
    %58 = tpu.matmul %55, %57, %cst_55 {dimension_numbers = #tpu.dot_dimension_numbers<[1], [0], [0], [1], [0, 0, 1, 1], [], []>} : vector<96x128xbf16>, vector<128x128xbf16>, vector<96x128xf32> -> vector<96x128xf32>
    %59 = arith.addf %49, %58 : vector<96x128xf32>
    %c1_i32_56 = arith.constant 1 : i32
    %60 = arith.addi %0, %c1_i32_56 : i32
    %c0_i32_57 = arith.constant 0 : i32
    %c0_i32_58 = arith.constant 0 : i32
    %c0_i32_59 = arith.constant 0 : i32
    %c0_i32_60 = arith.constant 0 : i32
    %61 = tpu.memref_slice %arg2[%c0_i32_57, %c0_i32_58, %c0_i32_59, %c0_i32_60] : memref<1x16x16x128xbf16, #tpu.memory_space<vmem>> -> memref<1x16x16x128xbf16, #tpu.memory_space<vmem>>
    %62 = tpu.memref_squeeze %61 : memref<1x16x16x128xbf16, #tpu.memory_space<vmem>> -> memref<16x16x128xbf16, #tpu.memory_space<vmem>>
    %63 = arith.index_cast %60 : i32 to index
    %c3_61 = arith.constant 3 : index
    %c0_62 = arith.constant 0 : index
    %64 = vector.load %62[%63, %c3_61, %c0_62] : memref<16x16x128xbf16, #tpu.memory_space<vmem>>, vector<12x8x128xbf16>
    %65 = vector.shape_cast %64 : vector<12x8x128xbf16> to vector<96x128xbf16>
    %c6_63 = arith.constant 6 : index
    %c0_64 = arith.constant 0 : index
    %c0_65 = arith.constant 0 : index
    %66 = vector.load %arg3[%c6_63, %c0_64, %c0_65] : memref<25x128x128xbf16, #tpu.memory_space<vmem>>, vector<1x128x128xbf16>
    %67 = vector.shape_cast %66 : vector<1x128x128xbf16> to vector<128x128xbf16>
    %cst_66 = arith.constant dense<0.000000e+00> : vector<96x128xf32>
    %68 = tpu.matmul %65, %67, %cst_66 {dimension_numbers = #tpu.dot_dimension_numbers<[1], [0], [0], [1], [0, 0, 1, 1], [], []>} : vector<96x128xbf16>, vector<128x128xbf16>, vector<96x128xf32> -> vector<96x128xf32>
    %69 = arith.addf %59, %68 : vector<96x128xf32>
    %c1_i32_67 = arith.constant 1 : i32
    %70 = arith.addi %0, %c1_i32_67 : i32
    %c0_i32_68 = arith.constant 0 : i32
    %c0_i32_69 = arith.constant 0 : i32
    %c0_i32_70 = arith.constant 0 : i32
    %c0_i32_71 = arith.constant 0 : i32
    %71 = tpu.memref_slice %arg2[%c0_i32_68, %c0_i32_69, %c0_i32_70, %c0_i32_71] : memref<1x16x16x128xbf16, #tpu.memory_space<vmem>> -> memref<1x16x16x128xbf16, #tpu.memory_space<vmem>>
    %72 = tpu.memref_squeeze %71 : memref<1x16x16x128xbf16, #tpu.memory_space<vmem>> -> memref<16x16x128xbf16, #tpu.memory_space<vmem>>
    %73 = arith.index_cast %70 : i32 to index
    %c4_72 = arith.constant 4 : index
    %c0_73 = arith.constant 0 : index
    %74 = vector.load %72[%73, %c4_72, %c0_73] : memref<16x16x128xbf16, #tpu.memory_space<vmem>>, vector<12x8x128xbf16>
    %75 = vector.shape_cast %74 : vector<12x8x128xbf16> to vector<96x128xbf16>
    %c7 = arith.constant 7 : index
    %c0_74 = arith.constant 0 : index
    %c0_75 = arith.constant 0 : index
    %76 = vector.load %arg3[%c7, %c0_74, %c0_75] : memref<25x128x128xbf16, #tpu.memory_space<vmem>>, vector<1x128x128xbf16>
    %77 = vector.shape_cast %76 : vector<1x128x128xbf16> to vector<128x128xbf16>
    %cst_76 = arith.constant dense<0.000000e+00> : vector<96x128xf32>
    %78 = tpu.matmul %75, %77, %cst_76 {dimension_numbers = #tpu.dot_dimension_numbers<[1], [0], [0], [1], [0, 0, 1, 1], [], []>} : vector<96x128xbf16>, vector<128x128xbf16>, vector<96x128xf32> -> vector<96x128xf32>
    %79 = arith.addf %69, %78 : vector<96x128xf32>
    %c1_i32_77 = arith.constant 1 : i32
    %80 = arith.addi %0, %c1_i32_77 : i32
    %c0_i32_78 = arith.constant 0 : i32
    %c0_i32_79 = arith.constant 0 : i32
    %c0_i32_80 = arith.constant 0 : i32
    %c0_i32_81 = arith.constant 0 : i32
    %81 = tpu.memref_slice %arg2[%c0_i32_78, %c0_i32_79, %c0_i32_80, %c0_i32_81] : memref<1x16x16x128xbf16, #tpu.memory_space<vmem>> -> memref<1x16x16x128xbf16, #tpu.memory_space<vmem>>
    %82 = tpu.memref_squeeze %81 : memref<1x16x16x128xbf16, #tpu.memory_space<vmem>> -> memref<16x16x128xbf16, #tpu.memory_space<vmem>>
    %83 = arith.index_cast %80 : i32 to index
    %c5_82 = arith.constant 5 : index
    %c0_83 = arith.constant 0 : index
    %84 = vector.load %82[%83, %c5_82, %c0_83] : memref<16x16x128xbf16, #tpu.memory_space<vmem>>, vector<12x8x128xbf16>
    %85 = vector.shape_cast %84 : vector<12x8x128xbf16> to vector<96x128xbf16>
    %c8 = arith.constant 8 : index
    %c0_84 = arith.constant 0 : index
    %c0_85 = arith.constant 0 : index
    %86 = vector.load %arg3[%c8, %c0_84, %c0_85] : memref<25x128x128xbf16, #tpu.memory_space<vmem>>, vector<1x128x128xbf16>
    %87 = vector.shape_cast %86 : vector<1x128x128xbf16> to vector<128x128xbf16>
    %cst_86 = arith.constant dense<0.000000e+00> : vector<96x128xf32>
    %88 = tpu.matmul %85, %87, %cst_86 {dimension_numbers = #tpu.dot_dimension_numbers<[1], [0], [0], [1], [0, 0, 1, 1], [], []>} : vector<96x128xbf16>, vector<128x128xbf16>, vector<96x128xf32> -> vector<96x128xf32>
    %89 = arith.addf %79, %88 : vector<96x128xf32>
    %c1_i32_87 = arith.constant 1 : i32
    %90 = arith.addi %0, %c1_i32_87 : i32
    %c0_i32_88 = arith.constant 0 : i32
    %c0_i32_89 = arith.constant 0 : i32
    %c0_i32_90 = arith.constant 0 : i32
    %c0_i32_91 = arith.constant 0 : i32
    %91 = tpu.memref_slice %arg2[%c0_i32_88, %c0_i32_89, %c0_i32_90, %c0_i32_91] : memref<1x16x16x128xbf16, #tpu.memory_space<vmem>> -> memref<1x16x16x128xbf16, #tpu.memory_space<vmem>>
    %92 = tpu.memref_squeeze %91 : memref<1x16x16x128xbf16, #tpu.memory_space<vmem>> -> memref<16x16x128xbf16, #tpu.memory_space<vmem>>
    %93 = arith.index_cast %90 : i32 to index
    %c6_92 = arith.constant 6 : index
    %c0_93 = arith.constant 0 : index
    %94 = vector.load %92[%93, %c6_92, %c0_93] : memref<16x16x128xbf16, #tpu.memory_space<vmem>>, vector<12x8x128xbf16>
    %95 = vector.shape_cast %94 : vector<12x8x128xbf16> to vector<96x128xbf16>
    %c9 = arith.constant 9 : index
    %c0_94 = arith.constant 0 : index
    %c0_95 = arith.constant 0 : index
    %96 = vector.load %arg3[%c9, %c0_94, %c0_95] : memref<25x128x128xbf16, #tpu.memory_space<vmem>>, vector<1x128x128xbf16>
    %97 = vector.shape_cast %96 : vector<1x128x128xbf16> to vector<128x128xbf16>
    %cst_96 = arith.constant dense<0.000000e+00> : vector<96x128xf32>
    %98 = tpu.matmul %95, %97, %cst_96 {dimension_numbers = #tpu.dot_dimension_numbers<[1], [0], [0], [1], [0, 0, 1, 1], [], []>} : vector<96x128xbf16>, vector<128x128xbf16>, vector<96x128xf32> -> vector<96x128xf32>
    %99 = arith.addf %89, %98 : vector<96x128xf32>
    %c2_i32 = arith.constant 2 : i32
    %100 = arith.addi %0, %c2_i32 : i32
    %c0_i32_97 = arith.constant 0 : i32
    %c0_i32_98 = arith.constant 0 : i32
    %c0_i32_99 = arith.constant 0 : i32
    %c0_i32_100 = arith.constant 0 : i32
    %101 = tpu.memref_slice %arg2[%c0_i32_97, %c0_i32_98, %c0_i32_99, %c0_i32_100] : memref<1x16x16x128xbf16, #tpu.memory_space<vmem>> -> memref<1x16x16x128xbf16, #tpu.memory_space<vmem>>
    %102 = tpu.memref_squeeze %101 : memref<1x16x16x128xbf16, #tpu.memory_space<vmem>> -> memref<16x16x128xbf16, #tpu.memory_space<vmem>>
    %103 = arith.index_cast %100 : i32 to index
    %c2_101 = arith.constant 2 : index
    %c0_102 = arith.constant 0 : index
    %104 = vector.load %102[%103, %c2_101, %c0_102] : memref<16x16x128xbf16, #tpu.memory_space<vmem>>, vector<12x8x128xbf16>
    %105 = vector.shape_cast %104 : vector<12x8x128xbf16> to vector<96x128xbf16>
    %c10 = arith.constant 10 : index
    %c0_103 = arith.constant 0 : index
    %c0_104 = arith.constant 0 : index
    %106 = vector.load %arg3[%c10, %c0_103, %c0_104] : memref<25x128x128xbf16, #tpu.memory_space<vmem>>, vector<1x128x128xbf16>
    %107 = vector.shape_cast %106 : vector<1x128x128xbf16> to vector<128x128xbf16>
    %cst_105 = arith.constant dense<0.000000e+00> : vector<96x128xf32>
    %108 = tpu.matmul %105, %107, %cst_105 {dimension_numbers = #tpu.dot_dimension_numbers<[1], [0], [0], [1], [0, 0, 1, 1], [], []>} : vector<96x128xbf16>, vector<128x128xbf16>, vector<96x128xf32> -> vector<96x128xf32>
    %109 = arith.addf %99, %108 : vector<96x128xf32>
    %c2_i32_106 = arith.constant 2 : i32
    %110 = arith.addi %0, %c2_i32_106 : i32
    %c0_i32_107 = arith.constant 0 : i32
    %c0_i32_108 = arith.constant 0 : i32
    %c0_i32_109 = arith.constant 0 : i32
    %c0_i32_110 = arith.constant 0 : i32
    %111 = tpu.memref_slice %arg2[%c0_i32_107, %c0_i32_108, %c0_i32_109, %c0_i32_110] : memref<1x16x16x128xbf16, #tpu.memory_space<vmem>> -> memref<1x16x16x128xbf16, #tpu.memory_space<vmem>>
    %112 = tpu.memref_squeeze %111 : memref<1x16x16x128xbf16, #tpu.memory_space<vmem>> -> memref<16x16x128xbf16, #tpu.memory_space<vmem>>
    %113 = arith.index_cast %110 : i32 to index
    %c3_111 = arith.constant 3 : index
    %c0_112 = arith.constant 0 : index
    %114 = vector.load %112[%113, %c3_111, %c0_112] : memref<16x16x128xbf16, #tpu.memory_space<vmem>>, vector<12x8x128xbf16>
    %115 = vector.shape_cast %114 : vector<12x8x128xbf16> to vector<96x128xbf16>
    %c11 = arith.constant 11 : index
    %c0_113 = arith.constant 0 : index
    %c0_114 = arith.constant 0 : index
    %116 = vector.load %arg3[%c11, %c0_113, %c0_114] : memref<25x128x128xbf16, #tpu.memory_space<vmem>>, vector<1x128x128xbf16>
    %117 = vector.shape_cast %116 : vector<1x128x128xbf16> to vector<128x128xbf16>
    %cst_115 = arith.constant dense<0.000000e+00> : vector<96x128xf32>
    %118 = tpu.matmul %115, %117, %cst_115 {dimension_numbers = #tpu.dot_dimension_numbers<[1], [0], [0], [1], [0, 0, 1, 1], [], []>} : vector<96x128xbf16>, vector<128x128xbf16>, vector<96x128xf32> -> vector<96x128xf32>
    %119 = arith.addf %109, %118 : vector<96x128xf32>
    %c2_i32_116 = arith.constant 2 : i32
    %120 = arith.addi %0, %c2_i32_116 : i32
    %c0_i32_117 = arith.constant 0 : i32
    %c0_i32_118 = arith.constant 0 : i32
    %c0_i32_119 = arith.constant 0 : i32
    %c0_i32_120 = arith.constant 0 : i32
    %121 = tpu.memref_slice %arg2[%c0_i32_117, %c0_i32_118, %c0_i32_119, %c0_i32_120] : memref<1x16x16x128xbf16, #tpu.memory_space<vmem>> -> memref<1x16x16x128xbf16, #tpu.memory_space<vmem>>
    %122 = tpu.memref_squeeze %121 : memref<1x16x16x128xbf16, #tpu.memory_space<vmem>> -> memref<16x16x128xbf16, #tpu.memory_space<vmem>>
    %123 = arith.index_cast %120 : i32 to index
    %c4_121 = arith.constant 4 : index
    %c0_122 = arith.constant 0 : index
    %124 = vector.load %122[%123, %c4_121, %c0_122] : memref<16x16x128xbf16, #tpu.memory_space<vmem>>, vector<12x8x128xbf16>
    %125 = vector.shape_cast %124 : vector<12x8x128xbf16> to vector<96x128xbf16>
    %c12 = arith.constant 12 : index
    %c0_123 = arith.constant 0 : index
    %c0_124 = arith.constant 0 : index
    %126 = vector.load %arg3[%c12, %c0_123, %c0_124] : memref<25x128x128xbf16, #tpu.memory_space<vmem>>, vector<1x128x128xbf16>
    %127 = vector.shape_cast %126 : vector<1x128x128xbf16> to vector<128x128xbf16>
    %cst_125 = arith.constant dense<0.000000e+00> : vector<96x128xf32>
    %128 = tpu.matmul %125, %127, %cst_125 {dimension_numbers = #tpu.dot_dimension_numbers<[1], [0], [0], [1], [0, 0, 1, 1], [], []>} : vector<96x128xbf16>, vector<128x128xbf16>, vector<96x128xf32> -> vector<96x128xf32>
    %129 = arith.addf %119, %128 : vector<96x128xf32>
    %c2_i32_126 = arith.constant 2 : i32
    %130 = arith.addi %0, %c2_i32_126 : i32
    %c0_i32_127 = arith.constant 0 : i32
    %c0_i32_128 = arith.constant 0 : i32
    %c0_i32_129 = arith.constant 0 : i32
    %c0_i32_130 = arith.constant 0 : i32
    %131 = tpu.memref_slice %arg2[%c0_i32_127, %c0_i32_128, %c0_i32_129, %c0_i32_130] : memref<1x16x16x128xbf16, #tpu.memory_space<vmem>> -> memref<1x16x16x128xbf16, #tpu.memory_space<vmem>>
    %132 = tpu.memref_squeeze %131 : memref<1x16x16x128xbf16, #tpu.memory_space<vmem>> -> memref<16x16x128xbf16, #tpu.memory_space<vmem>>
    %133 = arith.index_cast %130 : i32 to index
    %c5_131 = arith.constant 5 : index
    %c0_132 = arith.constant 0 : index
    %134 = vector.load %132[%133, %c5_131, %c0_132] : memref<16x16x128xbf16, #tpu.memory_space<vmem>>, vector<12x8x128xbf16>
    %135 = vector.shape_cast %134 : vector<12x8x128xbf16> to vector<96x128xbf16>
    %c13 = arith.constant 13 : index
    %c0_133 = arith.constant 0 : index
    %c0_134 = arith.constant 0 : index
    %136 = vector.load %arg3[%c13, %c0_133, %c0_134] : memref<25x128x128xbf16, #tpu.memory_space<vmem>>, vector<1x128x128xbf16>
    %137 = vector.shape_cast %136 : vector<1x128x128xbf16> to vector<128x128xbf16>
    %cst_135 = arith.constant dense<0.000000e+00> : vector<96x128xf32>
    %138 = tpu.matmul %135, %137, %cst_135 {dimension_numbers = #tpu.dot_dimension_numbers<[1], [0], [0], [1], [0, 0, 1, 1], [], []>} : vector<96x128xbf16>, vector<128x128xbf16>, vector<96x128xf32> -> vector<96x128xf32>
    %139 = arith.addf %129, %138 : vector<96x128xf32>
    %c2_i32_136 = arith.constant 2 : i32
    %140 = arith.addi %0, %c2_i32_136 : i32
    %c0_i32_137 = arith.constant 0 : i32
    %c0_i32_138 = arith.constant 0 : i32
    %c0_i32_139 = arith.constant 0 : i32
    %c0_i32_140 = arith.constant 0 : i32
    %141 = tpu.memref_slice %arg2[%c0_i32_137, %c0_i32_138, %c0_i32_139, %c0_i32_140] : memref<1x16x16x128xbf16, #tpu.memory_space<vmem>> -> memref<1x16x16x128xbf16, #tpu.memory_space<vmem>>
    %142 = tpu.memref_squeeze %141 : memref<1x16x16x128xbf16, #tpu.memory_space<vmem>> -> memref<16x16x128xbf16, #tpu.memory_space<vmem>>
    %143 = arith.index_cast %140 : i32 to index
    %c6_141 = arith.constant 6 : index
    %c0_142 = arith.constant 0 : index
    %144 = vector.load %142[%143, %c6_141, %c0_142] : memref<16x16x128xbf16, #tpu.memory_space<vmem>>, vector<12x8x128xbf16>
    %145 = vector.shape_cast %144 : vector<12x8x128xbf16> to vector<96x128xbf16>
    %c14 = arith.constant 14 : index
    %c0_143 = arith.constant 0 : index
    %c0_144 = arith.constant 0 : index
    %146 = vector.load %arg3[%c14, %c0_143, %c0_144] : memref<25x128x128xbf16, #tpu.memory_space<vmem>>, vector<1x128x128xbf16>
    %147 = vector.shape_cast %146 : vector<1x128x128xbf16> to vector<128x128xbf16>
    %cst_145 = arith.constant dense<0.000000e+00> : vector<96x128xf32>
    %148 = tpu.matmul %145, %147, %cst_145 {dimension_numbers = #tpu.dot_dimension_numbers<[1], [0], [0], [1], [0, 0, 1, 1], [], []>} : vector<96x128xbf16>, vector<128x128xbf16>, vector<96x128xf32> -> vector<96x128xf32>
    %149 = arith.addf %139, %148 : vector<96x128xf32>
    %c3_i32 = arith.constant 3 : i32
    %150 = arith.addi %0, %c3_i32 : i32
    %c0_i32_146 = arith.constant 0 : i32
    %c0_i32_147 = arith.constant 0 : i32
    %c0_i32_148 = arith.constant 0 : i32
    %c0_i32_149 = arith.constant 0 : i32
    %151 = tpu.memref_slice %arg2[%c0_i32_146, %c0_i32_147, %c0_i32_148, %c0_i32_149] : memref<1x16x16x128xbf16, #tpu.memory_space<vmem>> -> memref<1x16x16x128xbf16, #tpu.memory_space<vmem>>
    %152 = tpu.memref_squeeze %151 : memref<1x16x16x128xbf16, #tpu.memory_space<vmem>> -> memref<16x16x128xbf16, #tpu.memory_space<vmem>>
    %153 = arith.index_cast %150 : i32 to index
    %c2_150 = arith.constant 2 : index
    %c0_151 = arith.constant 0 : index
    %154 = vector.load %152[%153, %c2_150, %c0_151] : memref<16x16x128xbf16, #tpu.memory_space<vmem>>, vector<12x8x128xbf16>
    %155 = vector.shape_cast %154 : vector<12x8x128xbf16> to vector<96x128xbf16>
    %c15 = arith.constant 15 : index
    %c0_152 = arith.constant 0 : index
    %c0_153 = arith.constant 0 : index
    %156 = vector.load %arg3[%c15, %c0_152, %c0_153] : memref<25x128x128xbf16, #tpu.memory_space<vmem>>, vector<1x128x128xbf16>
    %157 = vector.shape_cast %156 : vector<1x128x128xbf16> to vector<128x128xbf16>
    %cst_154 = arith.constant dense<0.000000e+00> : vector<96x128xf32>
    %158 = tpu.matmul %155, %157, %cst_154 {dimension_numbers = #tpu.dot_dimension_numbers<[1], [0], [0], [1], [0, 0, 1, 1], [], []>} : vector<96x128xbf16>, vector<128x128xbf16>, vector<96x128xf32> -> vector<96x128xf32>
    %159 = arith.addf %149, %158 : vector<96x128xf32>
    %c3_i32_155 = arith.constant 3 : i32
    %160 = arith.addi %0, %c3_i32_155 : i32
    %c0_i32_156 = arith.constant 0 : i32
    %c0_i32_157 = arith.constant 0 : i32
    %c0_i32_158 = arith.constant 0 : i32
    %c0_i32_159 = arith.constant 0 : i32
    %161 = tpu.memref_slice %arg2[%c0_i32_156, %c0_i32_157, %c0_i32_158, %c0_i32_159] : memref<1x16x16x128xbf16, #tpu.memory_space<vmem>> -> memref<1x16x16x128xbf16, #tpu.memory_space<vmem>>
    %162 = tpu.memref_squeeze %161 : memref<1x16x16x128xbf16, #tpu.memory_space<vmem>> -> memref<16x16x128xbf16, #tpu.memory_space<vmem>>
    %163 = arith.index_cast %160 : i32 to index
    %c3_160 = arith.constant 3 : index
    %c0_161 = arith.constant 0 : index
    %164 = vector.load %162[%163, %c3_160, %c0_161] : memref<16x16x128xbf16, #tpu.memory_space<vmem>>, vector<12x8x128xbf16>
    %165 = vector.shape_cast %164 : vector<12x8x128xbf16> to vector<96x128xbf16>
    %c16 = arith.constant 16 : index
    %c0_162 = arith.constant 0 : index
    %c0_163 = arith.constant 0 : index
    %166 = vector.load %arg3[%c16, %c0_162, %c0_163] : memref<25x128x128xbf16, #tpu.memory_space<vmem>>, vector<1x128x128xbf16>
    %167 = vector.shape_cast %166 : vector<1x128x128xbf16> to vector<128x128xbf16>
    %cst_164 = arith.constant dense<0.000000e+00> : vector<96x128xf32>
    %168 = tpu.matmul %165, %167, %cst_164 {dimension_numbers = #tpu.dot_dimension_numbers<[1], [0], [0], [1], [0, 0, 1, 1], [], []>} : vector<96x128xbf16>, vector<128x128xbf16>, vector<96x128xf32> -> vector<96x128xf32>
    %169 = arith.addf %159, %168 : vector<96x128xf32>
    %c3_i32_165 = arith.constant 3 : i32
    %170 = arith.addi %0, %c3_i32_165 : i32
    %c0_i32_166 = arith.constant 0 : i32
    %c0_i32_167 = arith.constant 0 : i32
    %c0_i32_168 = arith.constant 0 : i32
    %c0_i32_169 = arith.constant 0 : i32
    %171 = tpu.memref_slice %arg2[%c0_i32_166, %c0_i32_167, %c0_i32_168, %c0_i32_169] : memref<1x16x16x128xbf16, #tpu.memory_space<vmem>> -> memref<1x16x16x128xbf16, #tpu.memory_space<vmem>>
    %172 = tpu.memref_squeeze %171 : memref<1x16x16x128xbf16, #tpu.memory_space<vmem>> -> memref<16x16x128xbf16, #tpu.memory_space<vmem>>
    %173 = arith.index_cast %170 : i32 to index
    %c4_170 = arith.constant 4 : index
    %c0_171 = arith.constant 0 : index
    %174 = vector.load %172[%173, %c4_170, %c0_171] : memref<16x16x128xbf16, #tpu.memory_space<vmem>>, vector<12x8x128xbf16>
    %175 = vector.shape_cast %174 : vector<12x8x128xbf16> to vector<96x128xbf16>
    %c17 = arith.constant 17 : index
    %c0_172 = arith.constant 0 : index
    %c0_173 = arith.constant 0 : index
    %176 = vector.load %arg3[%c17, %c0_172, %c0_173] : memref<25x128x128xbf16, #tpu.memory_space<vmem>>, vector<1x128x128xbf16>
    %177 = vector.shape_cast %176 : vector<1x128x128xbf16> to vector<128x128xbf16>
    %cst_174 = arith.constant dense<0.000000e+00> : vector<96x128xf32>
    %178 = tpu.matmul %175, %177, %cst_174 {dimension_numbers = #tpu.dot_dimension_numbers<[1], [0], [0], [1], [0, 0, 1, 1], [], []>} : vector<96x128xbf16>, vector<128x128xbf16>, vector<96x128xf32> -> vector<96x128xf32>
    %179 = arith.addf %169, %178 : vector<96x128xf32>
    %c3_i32_175 = arith.constant 3 : i32
    %180 = arith.addi %0, %c3_i32_175 : i32
    %c0_i32_176 = arith.constant 0 : i32
    %c0_i32_177 = arith.constant 0 : i32
    %c0_i32_178 = arith.constant 0 : i32
    %c0_i32_179 = arith.constant 0 : i32
    %181 = tpu.memref_slice %arg2[%c0_i32_176, %c0_i32_177, %c0_i32_178, %c0_i32_179] : memref<1x16x16x128xbf16, #tpu.memory_space<vmem>> -> memref<1x16x16x128xbf16, #tpu.memory_space<vmem>>
    %182 = tpu.memref_squeeze %181 : memref<1x16x16x128xbf16, #tpu.memory_space<vmem>> -> memref<16x16x128xbf16, #tpu.memory_space<vmem>>
    %183 = arith.index_cast %180 : i32 to index
    %c5_180 = arith.constant 5 : index
    %c0_181 = arith.constant 0 : index
    %184 = vector.load %182[%183, %c5_180, %c0_181] : memref<16x16x128xbf16, #tpu.memory_space<vmem>>, vector<12x8x128xbf16>
    %185 = vector.shape_cast %184 : vector<12x8x128xbf16> to vector<96x128xbf16>
    %c18 = arith.constant 18 : index
    %c0_182 = arith.constant 0 : index
    %c0_183 = arith.constant 0 : index
    %186 = vector.load %arg3[%c18, %c0_182, %c0_183] : memref<25x128x128xbf16, #tpu.memory_space<vmem>>, vector<1x128x128xbf16>
    %187 = vector.shape_cast %186 : vector<1x128x128xbf16> to vector<128x128xbf16>
    %cst_184 = arith.constant dense<0.000000e+00> : vector<96x128xf32>
    %188 = tpu.matmul %185, %187, %cst_184 {dimension_numbers = #tpu.dot_dimension_numbers<[1], [0], [0], [1], [0, 0, 1, 1], [], []>} : vector<96x128xbf16>, vector<128x128xbf16>, vector<96x128xf32> -> vector<96x128xf32>
    %189 = arith.addf %179, %188 : vector<96x128xf32>
    %c3_i32_185 = arith.constant 3 : i32
    %190 = arith.addi %0, %c3_i32_185 : i32
    %c0_i32_186 = arith.constant 0 : i32
    %c0_i32_187 = arith.constant 0 : i32
    %c0_i32_188 = arith.constant 0 : i32
    %c0_i32_189 = arith.constant 0 : i32
    %191 = tpu.memref_slice %arg2[%c0_i32_186, %c0_i32_187, %c0_i32_188, %c0_i32_189] : memref<1x16x16x128xbf16, #tpu.memory_space<vmem>> -> memref<1x16x16x128xbf16, #tpu.memory_space<vmem>>
    %192 = tpu.memref_squeeze %191 : memref<1x16x16x128xbf16, #tpu.memory_space<vmem>> -> memref<16x16x128xbf16, #tpu.memory_space<vmem>>
    %193 = arith.index_cast %190 : i32 to index
    %c6_190 = arith.constant 6 : index
    %c0_191 = arith.constant 0 : index
    %194 = vector.load %192[%193, %c6_190, %c0_191] : memref<16x16x128xbf16, #tpu.memory_space<vmem>>, vector<12x8x128xbf16>
    %195 = vector.shape_cast %194 : vector<12x8x128xbf16> to vector<96x128xbf16>
    %c19 = arith.constant 19 : index
    %c0_192 = arith.constant 0 : index
    %c0_193 = arith.constant 0 : index
    %196 = vector.load %arg3[%c19, %c0_192, %c0_193] : memref<25x128x128xbf16, #tpu.memory_space<vmem>>, vector<1x128x128xbf16>
    %197 = vector.shape_cast %196 : vector<1x128x128xbf16> to vector<128x128xbf16>
    %cst_194 = arith.constant dense<0.000000e+00> : vector<96x128xf32>
    %198 = tpu.matmul %195, %197, %cst_194 {dimension_numbers = #tpu.dot_dimension_numbers<[1], [0], [0], [1], [0, 0, 1, 1], [], []>} : vector<96x128xbf16>, vector<128x128xbf16>, vector<96x128xf32> -> vector<96x128xf32>
    %199 = arith.addf %189, %198 : vector<96x128xf32>
    %c4_i32 = arith.constant 4 : i32
    %200 = arith.addi %0, %c4_i32 : i32
    %c0_i32_195 = arith.constant 0 : i32
    %c0_i32_196 = arith.constant 0 : i32
    %c0_i32_197 = arith.constant 0 : i32
    %c0_i32_198 = arith.constant 0 : i32
    %201 = tpu.memref_slice %arg2[%c0_i32_195, %c0_i32_196, %c0_i32_197, %c0_i32_198] : memref<1x16x16x128xbf16, #tpu.memory_space<vmem>> -> memref<1x16x16x128xbf16, #tpu.memory_space<vmem>>
    %202 = tpu.memref_squeeze %201 : memref<1x16x16x128xbf16, #tpu.memory_space<vmem>> -> memref<16x16x128xbf16, #tpu.memory_space<vmem>>
    %203 = arith.index_cast %200 : i32 to index
    %c2_199 = arith.constant 2 : index
    %c0_200 = arith.constant 0 : index
    %204 = vector.load %202[%203, %c2_199, %c0_200] : memref<16x16x128xbf16, #tpu.memory_space<vmem>>, vector<12x8x128xbf16>
    %205 = vector.shape_cast %204 : vector<12x8x128xbf16> to vector<96x128xbf16>
    %c20 = arith.constant 20 : index
    %c0_201 = arith.constant 0 : index
    %c0_202 = arith.constant 0 : index
    %206 = vector.load %arg3[%c20, %c0_201, %c0_202] : memref<25x128x128xbf16, #tpu.memory_space<vmem>>, vector<1x128x128xbf16>
    %207 = vector.shape_cast %206 : vector<1x128x128xbf16> to vector<128x128xbf16>
    %cst_203 = arith.constant dense<0.000000e+00> : vector<96x128xf32>
    %208 = tpu.matmul %205, %207, %cst_203 {dimension_numbers = #tpu.dot_dimension_numbers<[1], [0], [0], [1], [0, 0, 1, 1], [], []>} : vector<96x128xbf16>, vector<128x128xbf16>, vector<96x128xf32> -> vector<96x128xf32>
    %209 = arith.addf %199, %208 : vector<96x128xf32>
    %c4_i32_204 = arith.constant 4 : i32
    %210 = arith.addi %0, %c4_i32_204 : i32
    %c0_i32_205 = arith.constant 0 : i32
    %c0_i32_206 = arith.constant 0 : i32
    %c0_i32_207 = arith.constant 0 : i32
    %c0_i32_208 = arith.constant 0 : i32
    %211 = tpu.memref_slice %arg2[%c0_i32_205, %c0_i32_206, %c0_i32_207, %c0_i32_208] : memref<1x16x16x128xbf16, #tpu.memory_space<vmem>> -> memref<1x16x16x128xbf16, #tpu.memory_space<vmem>>
    %212 = tpu.memref_squeeze %211 : memref<1x16x16x128xbf16, #tpu.memory_space<vmem>> -> memref<16x16x128xbf16, #tpu.memory_space<vmem>>
    %213 = arith.index_cast %210 : i32 to index
    %c3_209 = arith.constant 3 : index
    %c0_210 = arith.constant 0 : index
    %214 = vector.load %212[%213, %c3_209, %c0_210] : memref<16x16x128xbf16, #tpu.memory_space<vmem>>, vector<12x8x128xbf16>
    %215 = vector.shape_cast %214 : vector<12x8x128xbf16> to vector<96x128xbf16>
    %c21 = arith.constant 21 : index
    %c0_211 = arith.constant 0 : index
    %c0_212 = arith.constant 0 : index
    %216 = vector.load %arg3[%c21, %c0_211, %c0_212] : memref<25x128x128xbf16, #tpu.memory_space<vmem>>, vector<1x128x128xbf16>
    %217 = vector.shape_cast %216 : vector<1x128x128xbf16> to vector<128x128xbf16>
    %cst_213 = arith.constant dense<0.000000e+00> : vector<96x128xf32>
    %218 = tpu.matmul %215, %217, %cst_213 {dimension_numbers = #tpu.dot_dimension_numbers<[1], [0], [0], [1], [0, 0, 1, 1], [], []>} : vector<96x128xbf16>, vector<128x128xbf16>, vector<96x128xf32> -> vector<96x128xf32>
    %219 = arith.addf %209, %218 : vector<96x128xf32>
    %c4_i32_214 = arith.constant 4 : i32
    %220 = arith.addi %0, %c4_i32_214 : i32
    %c0_i32_215 = arith.constant 0 : i32
    %c0_i32_216 = arith.constant 0 : i32
    %c0_i32_217 = arith.constant 0 : i32
    %c0_i32_218 = arith.constant 0 : i32
    %221 = tpu.memref_slice %arg2[%c0_i32_215, %c0_i32_216, %c0_i32_217, %c0_i32_218] : memref<1x16x16x128xbf16, #tpu.memory_space<vmem>> -> memref<1x16x16x128xbf16, #tpu.memory_space<vmem>>
    %222 = tpu.memref_squeeze %221 : memref<1x16x16x128xbf16, #tpu.memory_space<vmem>> -> memref<16x16x128xbf16, #tpu.memory_space<vmem>>
    %223 = arith.index_cast %220 : i32 to index
    %c4_219 = arith.constant 4 : index
    %c0_220 = arith.constant 0 : index
    %224 = vector.load %222[%223, %c4_219, %c0_220] : memref<16x16x128xbf16, #tpu.memory_space<vmem>>, vector<12x8x128xbf16>
    %225 = vector.shape_cast %224 : vector<12x8x128xbf16> to vector<96x128xbf16>
    %c22 = arith.constant 22 : index
    %c0_221 = arith.constant 0 : index
    %c0_222 = arith.constant 0 : index
    %226 = vector.load %arg3[%c22, %c0_221, %c0_222] : memref<25x128x128xbf16, #tpu.memory_space<vmem>>, vector<1x128x128xbf16>
    %227 = vector.shape_cast %226 : vector<1x128x128xbf16> to vector<128x128xbf16>
    %cst_223 = arith.constant dense<0.000000e+00> : vector<96x128xf32>
    %228 = tpu.matmul %225, %227, %cst_223 {dimension_numbers = #tpu.dot_dimension_numbers<[1], [0], [0], [1], [0, 0, 1, 1], [], []>} : vector<96x128xbf16>, vector<128x128xbf16>, vector<96x128xf32> -> vector<96x128xf32>
    %229 = arith.addf %219, %228 : vector<96x128xf32>
    %c4_i32_224 = arith.constant 4 : i32
    %230 = arith.addi %0, %c4_i32_224 : i32
    %c0_i32_225 = arith.constant 0 : i32
    %c0_i32_226 = arith.constant 0 : i32
    %c0_i32_227 = arith.constant 0 : i32
    %c0_i32_228 = arith.constant 0 : i32
    %231 = tpu.memref_slice %arg2[%c0_i32_225, %c0_i32_226, %c0_i32_227, %c0_i32_228] : memref<1x16x16x128xbf16, #tpu.memory_space<vmem>> -> memref<1x16x16x128xbf16, #tpu.memory_space<vmem>>
    %232 = tpu.memref_squeeze %231 : memref<1x16x16x128xbf16, #tpu.memory_space<vmem>> -> memref<16x16x128xbf16, #tpu.memory_space<vmem>>
    %233 = arith.index_cast %230 : i32 to index
    %c5_229 = arith.constant 5 : index
    %c0_230 = arith.constant 0 : index
    %234 = vector.load %232[%233, %c5_229, %c0_230] : memref<16x16x128xbf16, #tpu.memory_space<vmem>>, vector<12x8x128xbf16>
    %235 = vector.shape_cast %234 : vector<12x8x128xbf16> to vector<96x128xbf16>
    %c23 = arith.constant 23 : index
    %c0_231 = arith.constant 0 : index
    %c0_232 = arith.constant 0 : index
    %236 = vector.load %arg3[%c23, %c0_231, %c0_232] : memref<25x128x128xbf16, #tpu.memory_space<vmem>>, vector<1x128x128xbf16>
    %237 = vector.shape_cast %236 : vector<1x128x128xbf16> to vector<128x128xbf16>
    %cst_233 = arith.constant dense<0.000000e+00> : vector<96x128xf32>
    %238 = tpu.matmul %235, %237, %cst_233 {dimension_numbers = #tpu.dot_dimension_numbers<[1], [0], [0], [1], [0, 0, 1, 1], [], []>} : vector<96x128xbf16>, vector<128x128xbf16>, vector<96x128xf32> -> vector<96x128xf32>
    %239 = arith.addf %229, %238 : vector<96x128xf32>
    %c4_i32_234 = arith.constant 4 : i32
    %240 = arith.addi %0, %c4_i32_234 : i32
    %c0_i32_235 = arith.constant 0 : i32
    %c0_i32_236 = arith.constant 0 : i32
    %c0_i32_237 = arith.constant 0 : i32
    %c0_i32_238 = arith.constant 0 : i32
    %241 = tpu.memref_slice %arg2[%c0_i32_235, %c0_i32_236, %c0_i32_237, %c0_i32_238] : memref<1x16x16x128xbf16, #tpu.memory_space<vmem>> -> memref<1x16x16x128xbf16, #tpu.memory_space<vmem>>
    %242 = tpu.memref_squeeze %241 : memref<1x16x16x128xbf16, #tpu.memory_space<vmem>> -> memref<16x16x128xbf16, #tpu.memory_space<vmem>>
    %243 = arith.index_cast %240 : i32 to index
    %c6_239 = arith.constant 6 : index
    %c0_240 = arith.constant 0 : index
    %244 = vector.load %242[%243, %c6_239, %c0_240] : memref<16x16x128xbf16, #tpu.memory_space<vmem>>, vector<12x8x128xbf16>
    %245 = vector.shape_cast %244 : vector<12x8x128xbf16> to vector<96x128xbf16>
    %c24 = arith.constant 24 : index
    %c0_241 = arith.constant 0 : index
    %c0_242 = arith.constant 0 : index
    %246 = vector.load %arg3[%c24, %c0_241, %c0_242] : memref<25x128x128xbf16, #tpu.memory_space<vmem>>, vector<1x128x128xbf16>
    %247 = vector.shape_cast %246 : vector<1x128x128xbf16> to vector<128x128xbf16>
    %cst_243 = arith.constant dense<0.000000e+00> : vector<96x128xf32>
    %248 = tpu.matmul %245, %247, %cst_243 {dimension_numbers = #tpu.dot_dimension_numbers<[1], [0], [0], [1], [0, 0, 1, 1], [], []>} : vector<96x128xbf16>, vector<128x128xbf16>, vector<96x128xf32> -> vector<96x128xf32>
    %249 = arith.addf %239, %248 : vector<96x128xf32>
    %c0_244 = arith.constant 0 : index
    %c0_245 = arith.constant 0 : index
    %250 = vector.load %arg4[%c0_244, %c0_245] : memref<1x128xf32, #tpu.memory_space<vmem>>, vector<1x128xf32>
    %251 = vector.broadcast %250 : vector<1x128xf32> to vector<96x128xf32>
    %252 = arith.addf %249, %251 : vector<96x128xf32>
    %cst_246 = arith.constant 0.000000e+00 : f32
    %253 = vector.broadcast %cst_246 : f32 to vector<96x128xf32>
    %254 = arith.maximumf %252, %253 : vector<96x128xf32>
    %255 = vector.shape_cast %254 : vector<96x128xf32> to vector<12x8x128xf32>
    %256 = tpu.iota {dimensions = array<i32: 0>} : vector<12x8x128xi32>
    %c2_i32_247 = arith.constant 2 : i32
    %257 = arith.subi %0, %c2_i32_247 : i32
    %258 = vector.broadcast %257 : i32 to vector<12x8x128xi32>
    %259 = arith.addi %256, %258 : vector<12x8x128xi32>
    %c0_i32_248 = arith.constant 0 : i32
    %260 = vector.broadcast %c0_i32_248 : i32 to vector<12x8x128xi32>
    %261 = arith.cmpi sge, %259, %260 : vector<12x8x128xi32>
    %c8_i32_249 = arith.constant 8 : i32
    %262 = vector.broadcast %c8_i32_249 : i32 to vector<12x8x128xi32>
    %263 = arith.cmpi slt, %259, %262 : vector<12x8x128xi32>
    %264 = arith.andi %261, %263 : vector<12x8x128xi1>
    %cst_250 = arith.constant 0.000000e+00 : f32
    %265 = vector.broadcast %cst_250 : f32 to vector<12x8x128xf32>
    %266 = arith.select %264, %255, %265 : vector<12x8x128xi1>, vector<12x8x128xf32>
    %cst_251 = arith.constant 0.000000e+00 : bf16
    %267 = vector.broadcast %cst_251 : bf16 to vector<12x2x128xbf16>
    %c0_252 = arith.constant 0 : index
    %c0_253 = arith.constant 0 : index
    %c0_254 = arith.constant 0 : index
    %268 = vector.load %arg8[%c0_252, %c0_253, %c0_254] : memref<12x12x128xbf16, #tpu.memory_space<vmem>>, vector<12x2x128xbf16>
    tpu.vector_store %arg8[%c0_252, %c0_253, %c0_254], %267 {strides = array<i32>} : memref<12x12x128xbf16, #tpu.memory_space<vmem>>, vector<12x2x128xbf16>,
    %cst_255 = arith.constant 0.000000e+00 : bf16
    %269 = vector.broadcast %cst_255 : bf16 to vector<12x2x128xbf16>
    %c0_256 = arith.constant 0 : index
    %c10_257 = arith.constant 10 : index
    %c0_258 = arith.constant 0 : index
    %270 = vector.load %arg8[%c0_256, %c10_257, %c0_258] : memref<12x12x128xbf16, #tpu.memory_space<vmem>>, vector<12x2x128xbf16>
    tpu.vector_store %arg8[%c0_256, %c10_257, %c0_258], %269 {strides = array<i32>} : memref<12x12x128xbf16, #tpu.memory_space<vmem>>, vector<12x2x128xbf16>,
    %271 = arith.truncf %266 : vector<12x8x128xf32> to vector<12x8x128xbf16>
    %c0_259 = arith.constant 0 : index
    %c2_260 = arith.constant 2 : index
    %c0_261 = arith.constant 0 : index
    %272 = vector.load %arg8[%c0_259, %c2_260, %c0_261] : memref<12x12x128xbf16, #tpu.memory_space<vmem>>, vector<12x8x128xbf16>
    tpu.vector_store %arg8[%c0_259, %c2_260, %c0_261], %271 {strides = array<i32>} : memref<12x12x128xbf16, #tpu.memory_space<vmem>>, vector<12x8x128xbf16>,
    %c0_262 = arith.constant 0 : index
    %c0_263 = arith.constant 0 : index
    %c0_264 = arith.constant 0 : index
    %273 = vector.load %arg8[%c0_262, %c0_263, %c0_264] : memref<12x12x128xbf16, #tpu.memory_space<vmem>>, vector<8x8x128xbf16>
    %274 = vector.shape_cast %273 : vector<8x8x128xbf16> to vector<64x128xbf16>
    %c0_265 = arith.constant 0 : index
    %c0_266 = arith.constant 0 : index
    %c0_267 = arith.constant 0 : index
    %275 = vector.load %arg5[%c0_265, %c0_266, %c0_267] : memref<25x128x128xbf16, #tpu.memory_space<vmem>>, vector<1x128x128xbf16>
    %276 = vector.shape_cast %275 : vector<1x128x128xbf16> to vector<128x128xbf16>
    %cst_268 = arith.constant dense<0.000000e+00> : vector<64x128xf32>
    %277 = tpu.matmul %274, %276, %cst_268 {dimension_numbers = #tpu.dot_dimension_numbers<[1], [0], [0], [1], [0, 0, 1, 1], [], []>} : vector<64x128xbf16>, vector<128x128xbf16>, vector<64x128xf32> -> vector<64x128xf32>
    %c0_269 = arith.constant 0 : index
    %c1_270 = arith.constant 1 : index
    %c0_271 = arith.constant 0 : index
    %278 = vector.load %arg8[%c0_269, %c1_270, %c0_271] : memref<12x12x128xbf16, #tpu.memory_space<vmem>>, vector<8x8x128xbf16>
    %279 = vector.shape_cast %278 : vector<8x8x128xbf16> to vector<64x128xbf16>
    %c1_272 = arith.constant 1 : index
    %c0_273 = arith.constant 0 : index
    %c0_274 = arith.constant 0 : index
    %280 = vector.load %arg5[%c1_272, %c0_273, %c0_274] : memref<25x128x128xbf16, #tpu.memory_space<vmem>>, vector<1x128x128xbf16>
    %281 = vector.shape_cast %280 : vector<1x128x128xbf16> to vector<128x128xbf16>
    %cst_275 = arith.constant dense<0.000000e+00> : vector<64x128xf32>
    %282 = tpu.matmul %279, %281, %cst_275 {dimension_numbers = #tpu.dot_dimension_numbers<[1], [0], [0], [1], [0, 0, 1, 1], [], []>} : vector<64x128xbf16>, vector<128x128xbf16>, vector<64x128xf32> -> vector<64x128xf32>
    %283 = arith.addf %277, %282 : vector<64x128xf32>
    %c0_276 = arith.constant 0 : index
    %c2_277 = arith.constant 2 : index
    %c0_278 = arith.constant 0 : index
    %284 = vector.load %arg8[%c0_276, %c2_277, %c0_278] : memref<12x12x128xbf16, #tpu.memory_space<vmem>>, vector<8x8x128xbf16>
    %285 = vector.shape_cast %284 : vector<8x8x128xbf16> to vector<64x128xbf16>
    %c2_279 = arith.constant 2 : index
    %c0_280 = arith.constant 0 : index
    %c0_281 = arith.constant 0 : index
    %286 = vector.load %arg5[%c2_279, %c0_280, %c0_281] : memref<25x128x128xbf16, #tpu.memory_space<vmem>>, vector<1x128x128xbf16>
    %287 = vector.shape_cast %286 : vector<1x128x128xbf16> to vector<128x128xbf16>
    %cst_282 = arith.constant dense<0.000000e+00> : vector<64x128xf32>
    %288 = tpu.matmul %285, %287, %cst_282 {dimension_numbers = #tpu.dot_dimension_numbers<[1], [0], [0], [1], [0, 0, 1, 1], [], []>} : vector<64x128xbf16>, vector<128x128xbf16>, vector<64x128xf32> -> vector<64x128xf32>
    %289 = arith.addf %283, %288 : vector<64x128xf32>
    %c0_283 = arith.constant 0 : index
    %c3_284 = arith.constant 3 : index
    %c0_285 = arith.constant 0 : index
    %290 = vector.load %arg8[%c0_283, %c3_284, %c0_285] : memref<12x12x128xbf16, #tpu.memory_space<vmem>>, vector<8x8x128xbf16>
    %291 = vector.shape_cast %290 : vector<8x8x128xbf16> to vector<64x128xbf16>
    %c3_286 = arith.constant 3 : index
    %c0_287 = arith.constant 0 : index
    %c0_288 = arith.constant 0 : index
    %292 = vector.load %arg5[%c3_286, %c0_287, %c0_288] : memref<25x128x128xbf16, #tpu.memory_space<vmem>>, vector<1x128x128xbf16>
    %293 = vector.shape_cast %292 : vector<1x128x128xbf16> to vector<128x128xbf16>
    %cst_289 = arith.constant dense<0.000000e+00> : vector<64x128xf32>
    %294 = tpu.matmul %291, %293, %cst_289 {dimension_numbers = #tpu.dot_dimension_numbers<[1], [0], [0], [1], [0, 0, 1, 1], [], []>} : vector<64x128xbf16>, vector<128x128xbf16>, vector<64x128xf32> -> vector<64x128xf32>
    %295 = arith.addf %289, %294 : vector<64x128xf32>
    %c0_290 = arith.constant 0 : index
    %c4_291 = arith.constant 4 : index
    %c0_292 = arith.constant 0 : index
    %296 = vector.load %arg8[%c0_290, %c4_291, %c0_292] : memref<12x12x128xbf16, #tpu.memory_space<vmem>>, vector<8x8x128xbf16>
    %297 = vector.shape_cast %296 : vector<8x8x128xbf16> to vector<64x128xbf16>
    %c4_293 = arith.constant 4 : index
    %c0_294 = arith.constant 0 : index
    %c0_295 = arith.constant 0 : index
    %298 = vector.load %arg5[%c4_293, %c0_294, %c0_295] : memref<25x128x128xbf16, #tpu.memory_space<vmem>>, vector<1x128x128xbf16>
    %299 = vector.shape_cast %298 : vector<1x128x128xbf16> to vector<128x128xbf16>
    %cst_296 = arith.constant dense<0.000000e+00> : vector<64x128xf32>
    %300 = tpu.matmul %297, %299, %cst_296 {dimension_numbers = #tpu.dot_dimension_numbers<[1], [0], [0], [1], [0, 0, 1, 1], [], []>} : vector<64x128xbf16>, vector<128x128xbf16>, vector<64x128xf32> -> vector<64x128xf32>
    %301 = arith.addf %295, %300 : vector<64x128xf32>
    %c1_297 = arith.constant 1 : index
    %c0_298 = arith.constant 0 : index
    %c0_299 = arith.constant 0 : index
    %302 = vector.load %arg8[%c1_297, %c0_298, %c0_299] : memref<12x12x128xbf16, #tpu.memory_space<vmem>>, vector<8x8x128xbf16>
    %303 = vector.shape_cast %302 : vector<8x8x128xbf16> to vector<64x128xbf16>
    %c5_300 = arith.constant 5 : index
    %c0_301 = arith.constant 0 : index
    %c0_302 = arith.constant 0 : index
    %304 = vector.load %arg5[%c5_300, %c0_301, %c0_302] : memref<25x128x128xbf16, #tpu.memory_space<vmem>>, vector<1x128x128xbf16>
    %305 = vector.shape_cast %304 : vector<1x128x128xbf16> to vector<128x128xbf16>
    %cst_303 = arith.constant dense<0.000000e+00> : vector<64x128xf32>
    %306 = tpu.matmul %303, %305, %cst_303 {dimension_numbers = #tpu.dot_dimension_numbers<[1], [0], [0], [1], [0, 0, 1, 1], [], []>} : vector<64x128xbf16>, vector<128x128xbf16>, vector<64x128xf32> -> vector<64x128xf32>
    %307 = arith.addf %301, %306 : vector<64x128xf32>
    %c1_304 = arith.constant 1 : index
    %c1_305 = arith.constant 1 : index
    %c0_306 = arith.constant 0 : index
    %308 = vector.load %arg8[%c1_304, %c1_305, %c0_306] : memref<12x12x128xbf16, #tpu.memory_space<vmem>>, vector<8x8x128xbf16>
    %309 = vector.shape_cast %308 : vector<8x8x128xbf16> to vector<64x128xbf16>
    %c6_307 = arith.constant 6 : index
    %c0_308 = arith.constant 0 : index
    %c0_309 = arith.constant 0 : index
    %310 = vector.load %arg5[%c6_307, %c0_308, %c0_309] : memref<25x128x128xbf16, #tpu.memory_space<vmem>>, vector<1x128x128xbf16>
    %311 = vector.shape_cast %310 : vector<1x128x128xbf16> to vector<128x128xbf16>
    %cst_310 = arith.constant dense<0.000000e+00> : vector<64x128xf32>
    %312 = tpu.matmul %309, %311, %cst_310 {dimension_numbers = #tpu.dot_dimension_numbers<[1], [0], [0], [1], [0, 0, 1, 1], [], []>} : vector<64x128xbf16>, vector<128x128xbf16>, vector<64x128xf32> -> vector<64x128xf32>
    %313 = arith.addf %307, %312 : vector<64x128xf32>
    %c1_311 = arith.constant 1 : index
    %c2_312 = arith.constant 2 : index
    %c0_313 = arith.constant 0 : index
    %314 = vector.load %arg8[%c1_311, %c2_312, %c0_313] : memref<12x12x128xbf16, #tpu.memory_space<vmem>>, vector<8x8x128xbf16>
    %315 = vector.shape_cast %314 : vector<8x8x128xbf16> to vector<64x128xbf16>
    %c7_314 = arith.constant 7 : index
    %c0_315 = arith.constant 0 : index
    %c0_316 = arith.constant 0 : index
    %316 = vector.load %arg5[%c7_314, %c0_315, %c0_316] : memref<25x128x128xbf16, #tpu.memory_space<vmem>>, vector<1x128x128xbf16>
    %317 = vector.shape_cast %316 : vector<1x128x128xbf16> to vector<128x128xbf16>
    %cst_317 = arith.constant dense<0.000000e+00> : vector<64x128xf32>
    %318 = tpu.matmul %315, %317, %cst_317 {dimension_numbers = #tpu.dot_dimension_numbers<[1], [0], [0], [1], [0, 0, 1, 1], [], []>} : vector<64x128xbf16>, vector<128x128xbf16>, vector<64x128xf32> -> vector<64x128xf32>
    %319 = arith.addf %313, %318 : vector<64x128xf32>
    %c1_318 = arith.constant 1 : index
    %c3_319 = arith.constant 3 : index
    %c0_320 = arith.constant 0 : index
    %320 = vector.load %arg8[%c1_318, %c3_319, %c0_320] : memref<12x12x128xbf16, #tpu.memory_space<vmem>>, vector<8x8x128xbf16>
    %321 = vector.shape_cast %320 : vector<8x8x128xbf16> to vector<64x128xbf16>
    %c8_321 = arith.constant 8 : index
    %c0_322 = arith.constant 0 : index
    %c0_323 = arith.constant 0 : index
    %322 = vector.load %arg5[%c8_321, %c0_322, %c0_323] : memref<25x128x128xbf16, #tpu.memory_space<vmem>>, vector<1x128x128xbf16>
    %323 = vector.shape_cast %322 : vector<1x128x128xbf16> to vector<128x128xbf16>
    %cst_324 = arith.constant dense<0.000000e+00> : vector<64x128xf32>
    %324 = tpu.matmul %321, %323, %cst_324 {dimension_numbers = #tpu.dot_dimension_numbers<[1], [0], [0], [1], [0, 0, 1, 1], [], []>} : vector<64x128xbf16>, vector<128x128xbf16>, vector<64x128xf32> -> vector<64x128xf32>
    %325 = arith.addf %319, %324 : vector<64x128xf32>
    %c1_325 = arith.constant 1 : index
    %c4_326 = arith.constant 4 : index
    %c0_327 = arith.constant 0 : index
    %326 = vector.load %arg8[%c1_325, %c4_326, %c0_327] : memref<12x12x128xbf16, #tpu.memory_space<vmem>>, vector<8x8x128xbf16>
    %327 = vector.shape_cast %326 : vector<8x8x128xbf16> to vector<64x128xbf16>
    %c9_328 = arith.constant 9 : index
    %c0_329 = arith.constant 0 : index
    %c0_330 = arith.constant 0 : index
    %328 = vector.load %arg5[%c9_328, %c0_329, %c0_330] : memref<25x128x128xbf16, #tpu.memory_space<vmem>>, vector<1x128x128xbf16>
    %329 = vector.shape_cast %328 : vector<1x128x128xbf16> to vector<128x128xbf16>
    %cst_331 = arith.constant dense<0.000000e+00> : vector<64x128xf32>
    %330 = tpu.matmul %327, %329, %cst_331 {dimension_numbers = #tpu.dot_dimension_numbers<[1], [0], [0], [1], [0, 0, 1, 1], [], []>} : vector<64x128xbf16>, vector<128x128xbf16>, vector<64x128xf32> -> vector<64x128xf32>
    %331 = arith.addf %325, %330 : vector<64x128xf32>
    %c2_332 = arith.constant 2 : index
    %c0_333 = arith.constant 0 : index
    %c0_334 = arith.constant 0 : index
    %332 = vector.load %arg8[%c2_332, %c0_333, %c0_334] : memref<12x12x128xbf16, #tpu.memory_space<vmem>>, vector<8x8x128xbf16>
    %333 = vector.shape_cast %332 : vector<8x8x128xbf16> to vector<64x128xbf16>
    %c10_335 = arith.constant 10 : index
    %c0_336 = arith.constant 0 : index
    %c0_337 = arith.constant 0 : index
    %334 = vector.load %arg5[%c10_335, %c0_336, %c0_337] : memref<25x128x128xbf16, #tpu.memory_space<vmem>>, vector<1x128x128xbf16>
    %335 = vector.shape_cast %334 : vector<1x128x128xbf16> to vector<128x128xbf16>
    %cst_338 = arith.constant dense<0.000000e+00> : vector<64x128xf32>
    %336 = tpu.matmul %333, %335, %cst_338 {dimension_numbers = #tpu.dot_dimension_numbers<[1], [0], [0], [1], [0, 0, 1, 1], [], []>} : vector<64x128xbf16>, vector<128x128xbf16>, vector<64x128xf32> -> vector<64x128xf32>
    %337 = arith.addf %331, %336 : vector<64x128xf32>
    %c2_339 = arith.constant 2 : index
    %c1_340 = arith.constant 1 : index
    %c0_341 = arith.constant 0 : index
    %338 = vector.load %arg8[%c2_339, %c1_340, %c0_341] : memref<12x12x128xbf16, #tpu.memory_space<vmem>>, vector<8x8x128xbf16>
    %339 = vector.shape_cast %338 : vector<8x8x128xbf16> to vector<64x128xbf16>
    %c11_342 = arith.constant 11 : index
    %c0_343 = arith.constant 0 : index
    %c0_344 = arith.constant 0 : index
    %340 = vector.load %arg5[%c11_342, %c0_343, %c0_344] : memref<25x128x128xbf16, #tpu.memory_space<vmem>>, vector<1x128x128xbf16>
    %341 = vector.shape_cast %340 : vector<1x128x128xbf16> to vector<128x128xbf16>
    %cst_345 = arith.constant dense<0.000000e+00> : vector<64x128xf32>
    %342 = tpu.matmul %339, %341, %cst_345 {dimension_numbers = #tpu.dot_dimension_numbers<[1], [0], [0], [1], [0, 0, 1, 1], [], []>} : vector<64x128xbf16>, vector<128x128xbf16>, vector<64x128xf32> -> vector<64x128xf32>
    %343 = arith.addf %337, %342 : vector<64x128xf32>
    %c2_346 = arith.constant 2 : index
    %c2_347 = arith.constant 2 : index
    %c0_348 = arith.constant 0 : index
    %344 = vector.load %arg8[%c2_346, %c2_347, %c0_348] : memref<12x12x128xbf16, #tpu.memory_space<vmem>>, vector<8x8x128xbf16>
    %345 = vector.shape_cast %344 : vector<8x8x128xbf16> to vector<64x128xbf16>
    %c12_349 = arith.constant 12 : index
    %c0_350 = arith.constant 0 : index
    %c0_351 = arith.constant 0 : index
    %346 = vector.load %arg5[%c12_349, %c0_350, %c0_351] : memref<25x128x128xbf16, #tpu.memory_space<vmem>>, vector<1x128x128xbf16>
    %347 = vector.shape_cast %346 : vector<1x128x128xbf16> to vector<128x128xbf16>
    %cst_352 = arith.constant dense<0.000000e+00> : vector<64x128xf32>
    %348 = tpu.matmul %345, %347, %cst_352 {dimension_numbers = #tpu.dot_dimension_numbers<[1], [0], [0], [1], [0, 0, 1, 1], [], []>} : vector<64x128xbf16>, vector<128x128xbf16>, vector<64x128xf32> -> vector<64x128xf32>
    %349 = arith.addf %343, %348 : vector<64x128xf32>
    %c2_353 = arith.constant 2 : index
    %c3_354 = arith.constant 3 : index
    %c0_355 = arith.constant 0 : index
    %350 = vector.load %arg8[%c2_353, %c3_354, %c0_355] : memref<12x12x128xbf16, #tpu.memory_space<vmem>>, vector<8x8x128xbf16>
    %351 = vector.shape_cast %350 : vector<8x8x128xbf16> to vector<64x128xbf16>
    %c13_356 = arith.constant 13 : index
    %c0_357 = arith.constant 0 : index
    %c0_358 = arith.constant 0 : index
    %352 = vector.load %arg5[%c13_356, %c0_357, %c0_358] : memref<25x128x128xbf16, #tpu.memory_space<vmem>>, vector<1x128x128xbf16>
    %353 = vector.shape_cast %352 : vector<1x128x128xbf16> to vector<128x128xbf16>
    %cst_359 = arith.constant dense<0.000000e+00> : vector<64x128xf32>
    %354 = tpu.matmul %351, %353, %cst_359 {dimension_numbers = #tpu.dot_dimension_numbers<[1], [0], [0], [1], [0, 0, 1, 1], [], []>} : vector<64x128xbf16>, vector<128x128xbf16>, vector<64x128xf32> -> vector<64x128xf32>
    %355 = arith.addf %349, %354 : vector<64x128xf32>
    %c2_360 = arith.constant 2 : index
    %c4_361 = arith.constant 4 : index
    %c0_362 = arith.constant 0 : index
    %356 = vector.load %arg8[%c2_360, %c4_361, %c0_362] : memref<12x12x128xbf16, #tpu.memory_space<vmem>>, vector<8x8x128xbf16>
    %357 = vector.shape_cast %356 : vector<8x8x128xbf16> to vector<64x128xbf16>
    %c14_363 = arith.constant 14 : index
    %c0_364 = arith.constant 0 : index
    %c0_365 = arith.constant 0 : index
    %358 = vector.load %arg5[%c14_363, %c0_364, %c0_365] : memref<25x128x128xbf16, #tpu.memory_space<vmem>>, vector<1x128x128xbf16>
    %359 = vector.shape_cast %358 : vector<1x128x128xbf16> to vector<128x128xbf16>
    %cst_366 = arith.constant dense<0.000000e+00> : vector<64x128xf32>
    %360 = tpu.matmul %357, %359, %cst_366 {dimension_numbers = #tpu.dot_dimension_numbers<[1], [0], [0], [1], [0, 0, 1, 1], [], []>} : vector<64x128xbf16>, vector<128x128xbf16>, vector<64x128xf32> -> vector<64x128xf32>
    %361 = arith.addf %355, %360 : vector<64x128xf32>
    %c3_367 = arith.constant 3 : index
    %c0_368 = arith.constant 0 : index
    %c0_369 = arith.constant 0 : index
    %362 = vector.load %arg8[%c3_367, %c0_368, %c0_369] : memref<12x12x128xbf16, #tpu.memory_space<vmem>>, vector<8x8x128xbf16>
    %363 = vector.shape_cast %362 : vector<8x8x128xbf16> to vector<64x128xbf16>
    %c15_370 = arith.constant 15 : index
    %c0_371 = arith.constant 0 : index
    %c0_372 = arith.constant 0 : index
    %364 = vector.load %arg5[%c15_370, %c0_371, %c0_372] : memref<25x128x128xbf16, #tpu.memory_space<vmem>>, vector<1x128x128xbf16>
    %365 = vector.shape_cast %364 : vector<1x128x128xbf16> to vector<128x128xbf16>
    %cst_373 = arith.constant dense<0.000000e+00> : vector<64x128xf32>
    %366 = tpu.matmul %363, %365, %cst_373 {dimension_numbers = #tpu.dot_dimension_numbers<[1], [0], [0], [1], [0, 0, 1, 1], [], []>} : vector<64x128xbf16>, vector<128x128xbf16>, vector<64x128xf32> -> vector<64x128xf32>
    %367 = arith.addf %361, %366 : vector<64x128xf32>
    %c3_374 = arith.constant 3 : index
    %c1_375 = arith.constant 1 : index
    %c0_376 = arith.constant 0 : index
    %368 = vector.load %arg8[%c3_374, %c1_375, %c0_376] : memref<12x12x128xbf16, #tpu.memory_space<vmem>>, vector<8x8x128xbf16>
    %369 = vector.shape_cast %368 : vector<8x8x128xbf16> to vector<64x128xbf16>
    %c16_377 = arith.constant 16 : index
    %c0_378 = arith.constant 0 : index
    %c0_379 = arith.constant 0 : index
    %370 = vector.load %arg5[%c16_377, %c0_378, %c0_379] : memref<25x128x128xbf16, #tpu.memory_space<vmem>>, vector<1x128x128xbf16>
    %371 = vector.shape_cast %370 : vector<1x128x128xbf16> to vector<128x128xbf16>
    %cst_380 = arith.constant dense<0.000000e+00> : vector<64x128xf32>
    %372 = tpu.matmul %369, %371, %cst_380 {dimension_numbers = #tpu.dot_dimension_numbers<[1], [0], [0], [1], [0, 0, 1, 1], [], []>} : vector<64x128xbf16>, vector<128x128xbf16>, vector<64x128xf32> -> vector<64x128xf32>
    %373 = arith.addf %367, %372 : vector<64x128xf32>
    %c3_381 = arith.constant 3 : index
    %c2_382 = arith.constant 2 : index
    %c0_383 = arith.constant 0 : index
    %374 = vector.load %arg8[%c3_381, %c2_382, %c0_383] : memref<12x12x128xbf16, #tpu.memory_space<vmem>>, vector<8x8x128xbf16>
    %375 = vector.shape_cast %374 : vector<8x8x128xbf16> to vector<64x128xbf16>
    %c17_384 = arith.constant 17 : index
    %c0_385 = arith.constant 0 : index
    %c0_386 = arith.constant 0 : index
    %376 = vector.load %arg5[%c17_384, %c0_385, %c0_386] : memref<25x128x128xbf16, #tpu.memory_space<vmem>>, vector<1x128x128xbf16>
    %377 = vector.shape_cast %376 : vector<1x128x128xbf16> to vector<128x128xbf16>
    %cst_387 = arith.constant dense<0.000000e+00> : vector<64x128xf32>
    %378 = tpu.matmul %375, %377, %cst_387 {dimension_numbers = #tpu.dot_dimension_numbers<[1], [0], [0], [1], [0, 0, 1, 1], [], []>} : vector<64x128xbf16>, vector<128x128xbf16>, vector<64x128xf32> -> vector<64x128xf32>
    %379 = arith.addf %373, %378 : vector<64x128xf32>
    %c3_388 = arith.constant 3 : index
    %c3_389 = arith.constant 3 : index
    %c0_390 = arith.constant 0 : index
    %380 = vector.load %arg8[%c3_388, %c3_389, %c0_390] : memref<12x12x128xbf16, #tpu.memory_space<vmem>>, vector<8x8x128xbf16>
    %381 = vector.shape_cast %380 : vector<8x8x128xbf16> to vector<64x128xbf16>
    %c18_391 = arith.constant 18 : index
    %c0_392 = arith.constant 0 : index
    %c0_393 = arith.constant 0 : index
    %382 = vector.load %arg5[%c18_391, %c0_392, %c0_393] : memref<25x128x128xbf16, #tpu.memory_space<vmem>>, vector<1x128x128xbf16>
    %383 = vector.shape_cast %382 : vector<1x128x128xbf16> to vector<128x128xbf16>
    %cst_394 = arith.constant dense<0.000000e+00> : vector<64x128xf32>
    %384 = tpu.matmul %381, %383, %cst_394 {dimension_numbers = #tpu.dot_dimension_numbers<[1], [0], [0], [1], [0, 0, 1, 1], [], []>} : vector<64x128xbf16>, vector<128x128xbf16>, vector<64x128xf32> -> vector<64x128xf32>
    %385 = arith.addf %379, %384 : vector<64x128xf32>
    %c3_395 = arith.constant 3 : index
    %c4_396 = arith.constant 4 : index
    %c0_397 = arith.constant 0 : index
    %386 = vector.load %arg8[%c3_395, %c4_396, %c0_397] : memref<12x12x128xbf16, #tpu.memory_space<vmem>>, vector<8x8x128xbf16>
    %387 = vector.shape_cast %386 : vector<8x8x128xbf16> to vector<64x128xbf16>
    %c19_398 = arith.constant 19 : index
    %c0_399 = arith.constant 0 : index
    %c0_400 = arith.constant 0 : index
    %388 = vector.load %arg5[%c19_398, %c0_399, %c0_400] : memref<25x128x128xbf16, #tpu.memory_space<vmem>>, vector<1x128x128xbf16>
    %389 = vector.shape_cast %388 : vector<1x128x128xbf16> to vector<128x128xbf16>
    %cst_401 = arith.constant dense<0.000000e+00> : vector<64x128xf32>
    %390 = tpu.matmul %387, %389, %cst_401 {dimension_numbers = #tpu.dot_dimension_numbers<[1], [0], [0], [1], [0, 0, 1, 1], [], []>} : vector<64x128xbf16>, vector<128x128xbf16>, vector<64x128xf32> -> vector<64x128xf32>
    %391 = arith.addf %385, %390 : vector<64x128xf32>
    %c4_402 = arith.constant 4 : index
    %c0_403 = arith.constant 0 : index
    %c0_404 = arith.constant 0 : index
    %392 = vector.load %arg8[%c4_402, %c0_403, %c0_404] : memref<12x12x128xbf16, #tpu.memory_space<vmem>>, vector<8x8x128xbf16>
    %393 = vector.shape_cast %392 : vector<8x8x128xbf16> to vector<64x128xbf16>
    %c20_405 = arith.constant 20 : index
    %c0_406 = arith.constant 0 : index
    %c0_407 = arith.constant 0 : index
    %394 = vector.load %arg5[%c20_405, %c0_406, %c0_407] : memref<25x128x128xbf16, #tpu.memory_space<vmem>>, vector<1x128x128xbf16>
    %395 = vector.shape_cast %394 : vector<1x128x128xbf16> to vector<128x128xbf16>
    %cst_408 = arith.constant dense<0.000000e+00> : vector<64x128xf32>
    %396 = tpu.matmul %393, %395, %cst_408 {dimension_numbers = #tpu.dot_dimension_numbers<[1], [0], [0], [1], [0, 0, 1, 1], [], []>} : vector<64x128xbf16>, vector<128x128xbf16>, vector<64x128xf32> -> vector<64x128xf32>
    %397 = arith.addf %391, %396 : vector<64x128xf32>
    %c4_409 = arith.constant 4 : index
    %c1_410 = arith.constant 1 : index
    %c0_411 = arith.constant 0 : index
    %398 = vector.load %arg8[%c4_409, %c1_410, %c0_411] : memref<12x12x128xbf16, #tpu.memory_space<vmem>>, vector<8x8x128xbf16>
    %399 = vector.shape_cast %398 : vector<8x8x128xbf16> to vector<64x128xbf16>
    %c21_412 = arith.constant 21 : index
    %c0_413 = arith.constant 0 : index
    %c0_414 = arith.constant 0 : index
    %400 = vector.load %arg5[%c21_412, %c0_413, %c0_414] : memref<25x128x128xbf16, #tpu.memory_space<vmem>>, vector<1x128x128xbf16>
    %401 = vector.shape_cast %400 : vector<1x128x128xbf16> to vector<128x128xbf16>
    %cst_415 = arith.constant dense<0.000000e+00> : vector<64x128xf32>
    %402 = tpu.matmul %399, %401, %cst_415 {dimension_numbers = #tpu.dot_dimension_numbers<[1], [0], [0], [1], [0, 0, 1, 1], [], []>} : vector<64x128xbf16>, vector<128x128xbf16>, vector<64x128xf32> -> vector<64x128xf32>
    %403 = arith.addf %397, %402 : vector<64x128xf32>
    %c4_416 = arith.constant 4 : index
    %c2_417 = arith.constant 2 : index
    %c0_418 = arith.constant 0 : index
    %404 = vector.load %arg8[%c4_416, %c2_417, %c0_418] : memref<12x12x128xbf16, #tpu.memory_space<vmem>>, vector<8x8x128xbf16>
    %405 = vector.shape_cast %404 : vector<8x8x128xbf16> to vector<64x128xbf16>
    %c22_419 = arith.constant 22 : index
    %c0_420 = arith.constant 0 : index
    %c0_421 = arith.constant 0 : index
    %406 = vector.load %arg5[%c22_419, %c0_420, %c0_421] : memref<25x128x128xbf16, #tpu.memory_space<vmem>>, vector<1x128x128xbf16>
    %407 = vector.shape_cast %406 : vector<1x128x128xbf16> to vector<128x128xbf16>
    %cst_422 = arith.constant dense<0.000000e+00> : vector<64x128xf32>
    %408 = tpu.matmul %405, %407, %cst_422 {dimension_numbers = #tpu.dot_dimension_numbers<[1], [0], [0], [1], [0, 0, 1, 1], [], []>} : vector<64x128xbf16>, vector<128x128xbf16>, vector<64x128xf32> -> vector<64x128xf32>
    %409 = arith.addf %403, %408 : vector<64x128xf32>
    %c4_423 = arith.constant 4 : index
    %c3_424 = arith.constant 3 : index
    %c0_425 = arith.constant 0 : index
    %410 = vector.load %arg8[%c4_423, %c3_424, %c0_425] : memref<12x12x128xbf16, #tpu.memory_space<vmem>>, vector<8x8x128xbf16>
    %411 = vector.shape_cast %410 : vector<8x8x128xbf16> to vector<64x128xbf16>
    %c23_426 = arith.constant 23 : index
    %c0_427 = arith.constant 0 : index
    %c0_428 = arith.constant 0 : index
    %412 = vector.load %arg5[%c23_426, %c0_427, %c0_428] : memref<25x128x128xbf16, #tpu.memory_space<vmem>>, vector<1x128x128xbf16>
    %413 = vector.shape_cast %412 : vector<1x128x128xbf16> to vector<128x128xbf16>
    %cst_429 = arith.constant dense<0.000000e+00> : vector<64x128xf32>
    %414 = tpu.matmul %411, %413, %cst_429 {dimension_numbers = #tpu.dot_dimension_numbers<[1], [0], [0], [1], [0, 0, 1, 1], [], []>} : vector<64x128xbf16>, vector<128x128xbf16>, vector<64x128xf32> -> vector<64x128xf32>
    %415 = arith.addf %409, %414 : vector<64x128xf32>
    %c4_430 = arith.constant 4 : index
    %c4_431 = arith.constant 4 : index
    %c0_432 = arith.constant 0 : index
    %416 = vector.load %arg8[%c4_430, %c4_431, %c0_432] : memref<12x12x128xbf16, #tpu.memory_space<vmem>>, vector<8x8x128xbf16>
    %417 = vector.shape_cast %416 : vector<8x8x128xbf16> to vector<64x128xbf16>
    %c24_433 = arith.constant 24 : index
    %c0_434 = arith.constant 0 : index
    %c0_435 = arith.constant 0 : index
    %418 = vector.load %arg5[%c24_433, %c0_434, %c0_435] : memref<25x128x128xbf16, #tpu.memory_space<vmem>>, vector<1x128x128xbf16>
    %419 = vector.shape_cast %418 : vector<1x128x128xbf16> to vector<128x128xbf16>
    %cst_436 = arith.constant dense<0.000000e+00> : vector<64x128xf32>
    %420 = tpu.matmul %417, %419, %cst_436 {dimension_numbers = #tpu.dot_dimension_numbers<[1], [0], [0], [1], [0, 0, 1, 1], [], []>} : vector<64x128xbf16>, vector<128x128xbf16>, vector<64x128xf32> -> vector<64x128xf32>
    %421 = arith.addf %415, %420 : vector<64x128xf32>
    %c4_i32_437 = arith.constant 4 : i32
    %422 = arith.addi %0, %c4_i32_437 : i32
    %c0_i32_438 = arith.constant 0 : i32
    %c0_i32_439 = arith.constant 0 : i32
    %c0_i32_440 = arith.constant 0 : i32
    %c0_i32_441 = arith.constant 0 : i32
    %423 = tpu.memref_slice %arg2[%c0_i32_438, %c0_i32_439, %c0_i32_440, %c0_i32_441] : memref<1x16x16x128xbf16, #tpu.memory_space<vmem>> -> memref<1x16x16x128xbf16, #tpu.memory_space<vmem>>
    %424 = tpu.memref_squeeze %423 : memref<1x16x16x128xbf16, #tpu.memory_space<vmem>> -> memref<16x16x128xbf16, #tpu.memory_space<vmem>>
    %425 = arith.index_cast %422 : i32 to index
    %c4_442 = arith.constant 4 : index
    %c0_443 = arith.constant 0 : index
    %426 = vector.load %424[%425, %c4_442, %c0_443] : memref<16x16x128xbf16, #tpu.memory_space<vmem>>, vector<8x8x128xbf16>
    %427 = vector.shape_cast %426 : vector<8x8x128xbf16> to vector<64x128xbf16>
    %c0_444 = arith.constant 0 : index
    %c0_445 = arith.constant 0 : index
    %428 = vector.load %arg6[%c0_444, %c0_445] : memref<1x128xf32, #tpu.memory_space<vmem>>, vector<1x128xf32>
    %429 = vector.broadcast %428 : vector<1x128xf32> to vector<64x128xf32>
    %430 = arith.addf %421, %429 : vector<64x128xf32>
    %431 = arith.extf %427 : vector<64x128xbf16> to vector<64x128xf32>
    %432 = arith.addf %430, %431 : vector<64x128xf32>
    %433 = vector.shape_cast %432 : vector<64x128xf32> to vector<1x8x8x128xf32>
    %434 = arith.truncf %433 : vector<1x8x8x128xf32> to vector<1x8x8x128xbf16>
    %c0_446 = arith.constant 0 : index
    %c0_447 = arith.constant 0 : index
    %c0_448 = arith.constant 0 : index
    %c0_449 = arith.constant 0 : index
    %435 = vector.load %arg7[%c0_446, %c0_447, %c0_448, %c0_449] : memref<1x8x8x128xbf16, #tpu.memory_space<vmem>>, vector<1x8x8x128xbf16>
    tpu.vector_store %arg7[%c0_446, %c0_447, %c0_448, %c0_449], %434 {strides = array<i32>} : memref<1x8x8x128xbf16, #tpu.memory_space<vmem>>, vector<1x8x8x128xbf16>,
    return
  }
  func.func @transform_0(%arg0: i32, %arg1: i32) -> (i32, i32, i32, i32) {
    %c0_i32 = arith.constant 0 : i32
    %c0_i32_0 = arith.constant 0 : i32
    %c0_i32_1 = arith.constant 0 : i32
    %c0_i32_2 = arith.constant 0 : i32
    return %arg0, %c0_i32, %c0_i32_0, %c0_i32_1 : i32, i32, i32, i32
  }
  func.func @transform_1(%arg0: i32, %arg1: i32) -> (i32, i32, i32) {
    %c0_i32 = arith.constant 0 : i32
    %c0_i32_0 = arith.constant 0 : i32
    %c0_i32_1 = arith.constant 0 : i32
    %c0_i32_2 = arith.constant 0 : i32
    return %c0_i32, %c0_i32_0, %c0_i32_1 : i32, i32, i32
  }
  func.func @transform_2(%arg0: i32, %arg1: i32) -> (i32, i32) {
    %c0_i32 = arith.constant 0 : i32
    %c0_i32_0 = arith.constant 0 : i32
    %c0_i32_1 = arith.constant 0 : i32
    return %c0_i32, %c0_i32_0 : i32, i32
  }
  func.func @transform_3(%arg0: i32, %arg1: i32) -> (i32, i32, i32) {
    %c0_i32 = arith.constant 0 : i32
    %c0_i32_0 = arith.constant 0 : i32
    %c0_i32_1 = arith.constant 0 : i32
    %c0_i32_2 = arith.constant 0 : i32
    return %c0_i32, %c0_i32_0, %c0_i32_1 : i32, i32, i32
  }
  func.func @transform_4(%arg0: i32, %arg1: i32) -> (i32, i32) {
    %c0_i32 = arith.constant 0 : i32
    %c0_i32_0 = arith.constant 0 : i32
    %c0_i32_1 = arith.constant 0 : i32
    return %c0_i32, %c0_i32_0 : i32, i32
  }
  func.func @transform_5(%arg0: i32, %arg1: i32) -> (i32, i32, i32, i32) {
    %c0_i32 = arith.constant 0 : i32
    %c0_i32_0 = arith.constant 0 : i32
    %c0_i32_1 = arith.constant 0 : i32
    return %arg0, %arg1, %c0_i32, %c0_i32_0 : i32, i32, i32, i32
  }
}

</mosaic_0001>

<bundles_post_ra>
// kernel: eblock_forward.4
= control target key start
LH: loop header
LB: loop body
LE: loop exit
PB: predicated region body
PF: predicated region fallthrough
CT: control target
= control target key end

     0   :  { %s618_s1 = inlined_call_operand.vmem [shape: bf16[128,128], index: 1, kind: input, shape index: {}]   ;;  %s619_s0 = inlined_call_operand.vmem [shape: bf16[128,128], index: 0, kind: input, shape index: {}]   ;;  %s620_s2 = inlined_call_operand.vmem [shape: f32[1,128], index: 2, kind: input, shape index: {}]   ;;  %s621_s3 = inlined_call_operand.vmem [shape: bf16[128,128], index: 3, kind: output, shape index: {}]  }
   0x1   :  { %v507_v0 = vld [vmem:[%s618_s1] sm:$0xff]   ;;  %v508_v1 = vld [vmem:[%s618_s1 + $0x8] sm:$0xff]   ;;  %v509_v2 = vld [vmem:[%s618_s1 + $0x10] sm:$0xff]  }
   0x2   :  { %459 = vmatprep.subr.bf16.mxu0 %v507_v0  ;;  %491 = vmatprep.subr.bf16.mxu1 %v507_v0  ;;  %v510_v3 = vld [vmem:[%s618_s1 + $0x18] sm:$0xff]   ;;  %v515_v4 = vld [vmem:[%s619_s0] sm:$0xff]   ;;  %v512_v7 = vld [vmem:[%s618_s1 + $0x28] sm:$0xff]  }
   0x3   :  { %460 = vmatpush3.bf16.msra.mxu0 %v507_v0  ;;  %499 = vmatpush3.bf16.msra.mxu1 %v507_v0  ;;  %v516_v5 = vld [vmem:[%s619_s0 + $0x20] sm:$0xff]   ;;  %v513_v8 = vld [vmem:[%s618_s1 + $0x30] sm:$0xff]   ;;  %v514_v9 = vld [vmem:[%s618_s1 + $0x38] sm:$0xff]  }
   0x4   :  { %461 = vmatprep.subr.bf16.mxu0 %v508_v1  ;;  %492 = vmatprep.subr.bf16.mxu1 %v508_v1  ;;  %v511_v6 = vld [vmem:[%s618_s1 + $0x20] sm:$0xff]   ;;  %v517_v10 = vld [vmem:[%s619_s0 + $0x8] sm:$0xff]   ;;  %v519_v12 = vld [vmem:[%s619_s0 + $0x10] sm:$0xff]  }
   0x5   :  { %475 = vmatprep.mubr.bf16.mxu0 %v515_v4  ;;  %483 = vmatprep.mubr.bf16.mxu1 %v516_v5  ;;  %v518_v11 = vld [vmem:[%s619_s0 + $0x28] sm:$0xff]   ;;  %v520_v13 = vld [vmem:[%s619_s0 + $0x30] sm:$0xff]   ;;  %v521_v14 = vld [vmem:[%s619_s0 + $0x18] sm:$0xff]  }
   0x6   :  { %v522_v15 = vld [vmem:[%s619_s0 + $0x38] sm:$0xff]   ;;  %v347_v16 = vld [vmem:[%s620_s2] ss:$0 sm:$0xff] }
   0x7   :  { %462 = vmatpush3.bf16.msra.mxu0 %v508_v1  ;;  %500 = vmatpush3.bf16.msra.mxu1 %v508_v1 }
   0x8   :  { %463 = vmatprep.subr.bf16.mxu0 %v509_v2  ;;  %493 = vmatprep.subr.bf16.mxu1 %v509_v2 }
   0xb   :  { %464 = vmatpush3.bf16.msra.mxu0 %v509_v2  ;;  %501 = vmatpush3.bf16.msra.mxu1 %v509_v2 }
   0xc   :  { %465 = vmatprep.subr.bf16.mxu0 %v510_v3  ;;  %494 = vmatprep.subr.bf16.mxu1 %v510_v3 }
   0xf   :  { %466 = vmatpush3.bf16.msra.mxu0 %v510_v3  ;;  %502 = vmatpush3.bf16.msra.mxu1 %v510_v3 }
  0x10   :  { %467 = vmatprep.subr.bf16.mxu0 %v511_v6  ;;  %495 = vmatprep.subr.bf16.mxu1 %v511_v6 }
  0x13   :  { %468 = vmatpush3.bf16.msra.mxu0 %v511_v6  ;;  %503 = vmatpush3.bf16.msra.mxu1 %v511_v6 }
  0x14   :  { %469 = vmatprep.subr.bf16.mxu0 %v512_v7  ;;  %496 = vmatprep.subr.bf16.mxu1 %v512_v7 }
  0x17   :  { %470 = vmatpush3.bf16.msra.mxu0 %v512_v7  ;;  %504 = vmatpush3.bf16.msra.mxu1 %v512_v7 }
  0x18   :  { %471 = vmatprep.subr.bf16.mxu0 %v513_v8  ;;  %497 = vmatprep.subr.bf16.mxu1 %v513_v8 }
  0x1b   :  { %472 = vmatpush3.bf16.msra.mxu0 %v513_v8  ;;  %505 = vmatpush3.bf16.msra.mxu1 %v513_v8 }
  0x1c   :  { %473 = vmatprep.subr.bf16.mxu0 %v514_v9  ;;  %498 = vmatprep.subr.bf16.mxu1 %v514_v9 }
  0x1f   :  { %474 = vmatpush3.bf16.msra.mxu0 %v514_v9  ;;  %506 = vmatpush3.bf16.msra.mxu1 %v514_v9 }
  0x22   :  { %476 = vmatmul.mubr.bf16.vlgmr.msra.gmra.mrb[0].mxu0 %v517_v10  ;;  %484 = vmatmul.mubr.bf16.vlgmr.msra.gmra.mrb[0].mxu1 %v518_v11 }
  0x23   :  { %479 = vmatprep.mubr.bf16.mxu0 %v519_v12  ;;  %487 = vmatprep.mubr.bf16.mxu1 %v520_v13 }
  0x2a   :  { %480 = vmatmul.mubr.bf16.gmra.mrb[4].mxu0 %v521_v14  ;;  %488 = vmatmul.mubr.bf16.gmra.mrb[4].mxu1 %v522_v15 }
  0xf5   :  { %v477_v17 = vpop.f32.mrb[0].mxu0  ;;  %v485_v18 = vpop.f32.mrb[0].mxu1 }
  0xf6   :  { %v193_v19 = vadd.f32 %v477_v17, %v347_v16  ;;  %v225_v20 = vadd.f32 %v485_v18, %v347_v16  ;;  %v184_v21 = vpop.f32.mrb[1].mxu0  ;;  %v216_v22 = vpop.f32.mrb[1].mxu1 }
  0xf7   :  { %v185_v23 = vadd.f32 %v347_v16, %v184_v21  ;;  %v217_v24 = vadd.f32 %v347_v16, %v216_v22  ;;  %v478_v25 = vpop.f32.mrb[2].mxu0  ;;  %v486_v26 = vpop.f32.mrb[2].mxu1 }
  0xf8   :  { %v196_v27 = vadd.f32 %v478_v25, %v347_v16  ;;  %v228_v28 = vadd.f32 %v486_v26, %v347_v16  ;;  %v187_v29 = vpop.f32.mrb[3].mxu0  ;;  %v219_v30 = vpop.f32.mrb[3].mxu1  ;;  %v249_v33 = vmax.f32 %v193_v19, 0.0  ;;  %v257_v34 = vmax.f32 %v225_v20, 0.0 }
  0xf9   :  { %v188_v31 = vadd.f32 %v347_v16, %v187_v29  ;;  %v220_v32 = vadd.f32 %v347_v16, %v219_v30  ;;  %v247_v37 = vmax.f32 %v185_v23, 0.0  ;;  %v255_v38 = vmax.f32 %v217_v24, 0.0 }
  0xfa   :  { %v250_v35 = vmax.f32 %v196_v27, 0.0  ;;  %v258_v36 = vmax.f32 %v228_v28, 0.0 }
  0xfb   :  { %v248_v39 = vmax.f32 %v188_v31, 0.0  ;;  %v256_v40 = vmax.f32 %v220_v32, 0.0 }
  0xfc   :  { %v404_v41 = vpack.c.bf16 %v250_v35, %v249_v33  ;;  %v424_v42 = vpack.c.bf16 %v258_v36, %v257_v34 }
  0xfd   :  { %v399_v43 = vpack.c.bf16 %v248_v39, %v247_v37  ;;  %v419_v44 = vpack.c.bf16 %v256_v40, %v255_v38  ;;  %v481_v45 = vpop.f32.mrb[4].mxu0  ;;  %v489_v46 = vpop.f32.mrb[4].mxu1 }
  0xfe   :  { %436 = vst [vmem:[%s621_s3 + $0x8] sm:$0xff] %v404_v41   ;;  %440 = vst [vmem:[%s621_s3 + $0x28] sm:$0xff] %v424_v42   ;;  %v209_v47 = vadd.f32 %v481_v45, %v347_v16  ;;  %v241_v48 = vadd.f32 %v489_v46, %v347_v16  ;;  %v200_v49 = vpop.f32.mrb[5].mxu0  ;;  %v232_v50 = vpop.f32.mrb[5].mxu1 }
  0xff   :  { %400 = vst [vmem:[%s621_s3] sm:$0xff] %v399_v43   ;;  %439 = vst [vmem:[%s621_s3 + $0x20] sm:$0xff] %v419_v44   ;;  %v201_v51 = vadd.f32 %v347_v16, %v200_v49  ;;  %v233_v52 = vadd.f32 %v347_v16, %v232_v50  ;;  %v482_v53 = vpop.f32.mrb[6].mxu0  ;;  %v490_v54 = vpop.f32.mrb[6].mxu1 }
 0x100   :  { %v212_v55 = vadd.f32 %v482_v53, %v347_v16  ;;  %v244_v56 = vadd.f32 %v490_v54, %v347_v16  ;;  %v203_v57 = vpop.f32.mrb[7].mxu0  ;;  %v235_v58 = vpop.f32.mrb[7].mxu1  ;;  %v253_v61 = vmax.f32 %v209_v47, 0.0  ;;  %v261_v62 = vmax.f32 %v241_v48, 0.0 }
 0x101   :  { %v204_v59 = vadd.f32 %v347_v16, %v203_v57  ;;  %v236_v60 = vadd.f32 %v347_v16, %v235_v58  ;;  %v251_v1 = vmax.f32 %v201_v51, 0.0  ;;  %v259_v2 = vmax.f32 %v233_v52, 0.0 }
 0x102   :  { %v254_v63 = vmax.f32 %v212_v55, 0.0  ;;  %v262_v0 = vmax.f32 %v244_v56, 0.0 }
 0x103   :  { %v252_v3 = vmax.f32 %v204_v59, 0.0  ;;  %v260_v4 = vmax.f32 %v236_v60, 0.0 }
 0x104   :  { %v414_v5 = vpack.c.bf16 %v254_v63, %v253_v61  ;;  %v434_v6 = vpack.c.bf16 %v262_v0, %v261_v62 }
 0x105   :  { %v409_v7 = vpack.c.bf16 %v252_v3, %v251_v1  ;;  %v429_v8 = vpack.c.bf16 %v260_v4, %v259_v2 }
 0x106   :  { %438 = vst [vmem:[%s621_s3 + $0x18] sm:$0xff] %v414_v5   ;;  %442 = vst [vmem:[%s621_s3 + $0x38] sm:$0xff] %v434_v6  }
 0x107   :  { %437 = vst [vmem:[%s621_s3 + $0x10] sm:$0xff] %v409_v7   ;;  %441 = vst [vmem:[%s621_s3 + $0x30] sm:$0xff] %v429_v8  }

// kernel: eblock_forward.5
= control target key start
LH: loop header
LB: loop body
LE: loop exit
PB: predicated region body
PF: predicated region fallthrough
CT: control target
= control target key end

     0   :  { %s19522_s18 = smov 0   ;;  %s19524_s19 = smov 0   ;;  %s24919_s0 = inlined_call_operand.vmem [shape: bf16[2,16,16,128], index: 0, kind: input, shape index: {}]   ;;  %s24920_s1 = inlined_call_operand.vmem [shape: bf16[25,128,128], index: 1, kind: input, shape index: {}]   ;;  %s24921_s2 = inlined_call_operand.vmem [shape: f32[1,128], index: 2, kind: input, shape index: {}]   ;;  %s24922_s3 = inlined_call_operand.vmem [shape: bf16[25,128,128], index: 3, kind: input, shape index: {}]   ;;  %s24923_s4 = inlined_call_operand.vmem [shape: f32[1,128], index: 4, kind: input, shape index: {}]   ;;  %s24924_s5 = inlined_call_operand.vmem [shape: bf16[2,8,8,128], index: 5, kind: output, shape index: {}]  }
   0x1   :  { %s19526_s20 = smov 0  }
   0x2 LB: > { %s27_s21 = sadd.s32 1, %s19484_s19  ;;  %p14739_p0 = scmp.ge.s32.totalorder %s19488_s20, 1  ;;  %s19488_s20 = sphi %s19526_s20, %s15_s20   ;;  %s19484_s19 = sphi %s19524_s19, %s25017_s19   ;;  %s19480_s18 = sphi %s19522_s18, %s25016_s18  }
   0x3   : > { %p29_p1 = scmp.ge.s32.totalorder %s27_s21, 2  ;;  %p201_p2 = scmp.lt.s32.totalorder %s19488_s20, 3 }
   0x5   : > { %s25019_s21 = smov (%p29_p1, %s27_s21), 0  ;;  %p202_p3 = pnand %p14739_p0, %p201_p2 }
   0x7   : > { %205 = sbr.rel (%p202_p3) target bundleno = 2059 (0x80b), region = 40 }
   0xe   : > { %v19047_v0 = vld [vmem:[%s24920_s1 + $0x40] sm:$0xff]   ;;  %p233_p4 = scmp.lt.s32.totalorder %s19480_s18, 1  ;;  %v19048_v1 = vld [vmem:[%s24920_s1 + $0x48] sm:$0xff]   ;;  %v19049_v2 = vld [vmem:[%s24920_s1 + $0x50] sm:$0xff]   ;;  %vm380_vm0 = vsmask.f32 2304 }
   0xf   : > { %17433 = vmatprep.subr.bf16.mxu0 %v19047_v0  ;;  %v19050_v3 = vld [vmem:[%s24920_s1 + $0x58] sm:$0xff]   ;;  %vm381_vm1 = vsmask.f32 6416  ;;  %v19051_v8 = vld [vmem:[%s24920_s1 + $0x60] sm:$0xff]   ;;  %v19052_v28 = vld [vmem:[%s24920_s1 + $0x68] sm:$0xff]   ;;  %vm301_vm3 = vcmask 1042432  }
  0x10   : > { %s25021_s18 = smov (!%p233_p4, %s19480_s18), 1  ;;  %17434 = vmatpush3.bf16.msra.mxu0 %v19047_v0  ;;  %vm19599_vm2 = vmor %vm380_vm0, %vm381_vm1  ;;  %v19053_v55 = vld [vmem:[%s24920_s1 + $0x70] sm:$0xff]   ;;  %vm302_vm4 = vcmask 1046532   ;;  %vm958_vm5 = vcmask 1041408   ;;  %vm959_vm6 = vcmask 1045508   ;;  %vm1640_vm12 = vcmask 1040384  }
  0x11   : > { %17435 = vmatprep.subr.bf16.mxu0 %v19048_v1  ;;  %s16750_s28 = sshll.u32 %s25021_s18, 7  ;;  %vm19744_vm7 = vmor %vm301_vm3, %vm302_vm4  ;;  %vm1203_vm9 = vsmask.f32 1280  ;;  %vm1204_vm10 = vsmask.f32 5392  ;;  %vm1641_vm13 = vcmask 1044484  }
  0x12   : > { %s19555_s6 = scalar_lea.vmem %s24919_s0, %s16750_s28  ;;  %vm19802_vm8 = vmor %vm958_vm5, %vm959_vm6  ;;  %vm8677_vm15 = vsmask.f32 3328  ;;  %vm8678_vm0 = vsmask.f32 7440  ;;  %s16751_s29 = sshll.u32 %s25021_s18, 5 }
  0x13   : > { %v19561_v4 = vld [vmem:[%s19555_s6] sm:$0xe]  ;;  %v19564_v5 = vld [vmem:[%s19555_s6 + $0x8] sm:$0xe]  ;;  %v19567_v6 = vld [vmem:[%s19555_s6 + $0x4] sm:$0x3]  ;;  %s246_s7 = scalar_lea.vmem %s24924_s5, %s16751_s29 }
  0x14   : > { %17436 = vmatpush3.bf16.msra.mxu0 %v19048_v1  ;;  %v19570_v7 = vld [vmem:[%s19555_s6 + $0xc] sm:$0x3]  ;;  %v384_v9 = vshrl.u32 %v19561_v4, 16  ;;  %v387_v10 = vshll.u32 %v19561_v4, 16  ;;  %v393_v11 = vshrl.u32 %v19567_v6, 16  ;;  %v396_v12 = vshll.u32 %v19567_v6, 16  ;;  %vm19992_vm11 = vmor %vm1203_vm9, %vm1204_vm10 }
  0x15   : > { %17437 = vmatprep.subr.bf16.mxu0 %v19049_v2  ;;  %v402_v13 = vshrl.u32 %v19564_v5, 16  ;;  %v405_v14 = vshll.u32 %v19564_v5, 16  ;;  %v411_v15 = vshrl.u32 %v19570_v7, 16  ;;  %v414_v16 = vshll.u32 %v19570_v7, 16  ;;  %v19584_v17 = vld [vmem:[%s19555_s6 + $0x10] sm:$0xe]  ;;  %vm20128_vm14 = vmor %vm1640_vm12, %vm1641_vm13 }
  0x16   : > { %v386_v18 = vrot.slane %v384_v9, 5  ;;  %v389_v19 = vrot.slane %v387_v10, 6  ;;  %v395_v20 = vrot.slane %v393_v11, 5  ;;  %v398_v21 = vrot.slane %v396_v12, 6  ;;  %v19587_v22 = vld [vmem:[%s19555_s6 + $0x18] sm:$0xe]  ;;  %vm23384_vm1 = vmor %vm8677_vm15, %vm8678_vm0 }
  0x17   : > { %v404_v23 = vrot.slane %v402_v13, 5  ;;  %v407_v24 = vrot.slane %v405_v14, 6  ;;  %v413_v25 = vrot.slane %v411_v15, 5  ;;  %v416_v26 = vrot.slane %v414_v16, 6  ;;  %v19590_v27 = vld [vmem:[%s19555_s6 + $0x14] sm:$0x3] }
  0x18   : > { %17438 = vmatpush3.bf16.msra.mxu0 %v19049_v2  ;;  %v390_v29 = vor.u32 %v389_v19, %v386_v18  ;;  %v399_v30 = vor.u32 %v398_v21, %v395_v20  ;;  %v14746_v31 = vrot.slane %v19584_v17, 9  ;;  %v14747_v32 = vrot.slane %v19587_v22, 9  ;;  %v19604_v36 = vld [vmem:[%s19555_s6 + $0x1c] sm:$0x3]  ;;  %v19623_v60 = vld [vmem:[%s19555_s6 + $0x20] sm:$0xe] }
  0x19   : > { %17439 = vmatprep.subr.bf16.mxu0 %v19050_v3  ;;  %v408_v34 = vor.u32 %v407_v24, %v404_v23  ;;  %v417_v35 = vor.u32 %v416_v26, %v413_v25  ;;  %v420_v37 = vshrl.u32 %v19584_v17, 16  ;;  %v423_v38 = vshll.u32 %v19584_v17, 16  ;;  %v19627_v1 = vld [vmem:[%s19555_s6 + $0x28] sm:$0xe]  ;;  %v19054_v14 = vld [vmem:[%s24920_s1 + $0x78] sm:$0xff]   ;;  %v19063_v17 = vld [vmem:[%s24920_s1 + $0x80] sm:$0xff]  }
  0x1a   : > { %v391_v39 = vrot.slane %v390_v29, 4  ;;  %v429_v40 = vshrl.u32 %v19590_v27, 16  ;;  %v432_v41 = vshll.u32 %v19590_v27, 16  ;;  %v438_v42 = vshrl.u32 %v19587_v22, 16  ;;  %v19646_v20 = vld [vmem:[%s19555_s6 + $0x30] sm:$0xe] }
  0x1b   : > { %v409_v43 = vrot.slane %v408_v34, 4  ;;  %v422_v44 = vrot.slane %v420_v37, 5  ;;  %v425_v45 = vrot.slane %v423_v38, 6  ;;  %v441_v46 = vshll.u32 %v19587_v22, 16  ;;  %v19651_v26 = vld [vmem:[%s19555_s6 + $0x38] sm:$0xe] }
  0x1c   : > { %17440 = vmatpush3.bf16.msra.mxu0 %v19050_v3  ;;  %v400_v47 = vsel %vm19599_vm2, %v391_v39, %v399_v30  ;;  %v431_v48 = vrot.slane %v429_v40, 5  ;;  %v434_v49 = vrot.slane %v432_v41, 6  ;;  %v440_v50 = vrot.slane %v438_v42, 5  ;;  %v19630_v3 = vld [vmem:[%s19555_s6 + $0x24] sm:$0x3] }
  0x1d   : > { %17441 = vmatprep.subr.bf16.mxu0 %v19051_v8  ;;  %v418_v51 = vsel %vm19599_vm2, %v409_v43, %v417_v35  ;;  %v426_v52 = vor.u32 %v425_v45, %v422_v44  ;;  %v443_v53 = vrot.slane %v441_v46, 6  ;;  %v447_v54 = vshrl.u32 %v19604_v36, 16  ;;  %v19657_v35 = vld [vmem:[%s19555_s6 + $0x34] sm:$0x3]  ;;  %v19660_v41 = vld [vmem:[%s19555_s6 + $0x3c] sm:$0x3] }
  0x1e   : > { %v14772_v56 = vcombine.low %v400_v47, %v418_v51  ;;  %v435_v57 = vor.u32 %v434_v49, %v431_v48  ;;  %v450_v58 = vshll.u32 %v19604_v36, 16  ;;  %v971_v59 = vrot.slane %v19590_v27, 6  ;;  %v19055_v42 = vld [vmem:[%s24920_s1] sm:$0xff]  }
  0x1f   : > { %v427_v61 = vrot.slane %v426_v52, 4  ;;  %v444_v62 = vor.u32 %v443_v53, %v440_v50  ;;  %v449_v63 = vrot.slane %v447_v54, 5  ;;  %v975_v0 = vrot.slane %v19604_v36, 6 }
  0x20   : > { %17442 = vmatpush3.bf16.msra.mxu0 %v19051_v8  ;;  %17449 = vmatprep.mubr.bf16.mxu0 %v14772_v56  ;;  %v452_v2 = vrot.slane %v450_v58, 6  ;;  %v19633_v8 = vld [vmem:[%s19555_s6 + $0x2c] sm:$0x3]  ;;  %v456_v9 = vshrl.u32 %v19623_v60, 16  ;;  %v459_v12 = vshll.u32 %v19623_v60, 16  ;;  %v465_v13 = vshrl.u32 %v19630_v3, 16 }
  0x21   : > { %17443 = vmatprep.subr.bf16.mxu0 %v19052_v28  ;;  %v436_v10 = vsel %vm19599_vm2, %v427_v61, %v435_v57  ;;  %v445_v11 = vrot.slane %v444_v62, 4  ;;  %v468_v18 = vshll.u32 %v19630_v3, 16  ;;  %v474_v19 = vshrl.u32 %v19627_v1, 16  ;;  %v19056_v62 = vld [vmem:[%s24920_s1 + $0x8] sm:$0xff]  }
  0x22   : > { %v453_v15 = vor.u32 %v452_v2, %v449_v63  ;;  %v458_v16 = vrot.slane %v456_v9, 5  ;;  %v461_v21 = vrot.slane %v459_v12, 6  ;;  %v467_v23 = vrot.slane %v465_v13, 5 }
  0x23   : > { %v477_v24 = vshll.u32 %v19627_v1, 16  ;;  %v483_v25 = vshrl.u32 %v19633_v8, 16  ;;  %v470_v29 = vrot.slane %v468_v18, 6  ;;  %v476_v30 = vrot.slane %v474_v19, 5  ;;  %v19057_v18 = vld [vmem:[%s24920_s1 + $0x10] sm:$0xff]  }
  0x24   : > { %17444 = vmatpush3.bf16.msra.mxu0 %v19052_v28  ;;  %v454_v28 = vsel %vm19599_vm2, %v445_v11, %v453_v15  ;;  %v486_v34 = vshll.u32 %v19633_v8, 16  ;;  %v462_v38 = vor.u32 %v461_v21, %v458_v16  ;;  %v492_v45 = vshrl.u32 %v19646_v20, 16  ;;  %v19681_v11 = vld [vmem:[%s19555_s6 + $0x44] sm:$0x3]  ;;  %v19687_v15 = vld [vmem:[%s19555_s6 + $0x48] sm:$0xe] }
  0x25   : > { %17445 = vmatprep.subr.bf16.mxu0 %v19053_v55  ;;  %v14773_v37 = vcombine.low %v436_v10, %v454_v28  ;;  %v479_v39 = vrot.slane %v477_v24, 6  ;;  %v485_v40 = vrot.slane %v483_v25, 5  ;;  %v471_v43 = vor.u32 %v470_v29, %v467_v23  ;;  %v19694_v28 = vld [vmem:[%s19555_s6 + $0x4c] sm:$0x3] }
  0x26   : > { %v488_v44 = vrot.slane %v486_v34, 6  ;;  %v495_v46 = vshll.u32 %v19646_v20, 16  ;;  %v463_v47 = vrot.slane %v462_v38, 4  ;;  %v501_v49 = vshrl.u32 %v19657_v35, 16 }
  0x27   : > { %v480_v48 = vor.u32 %v479_v39, %v476_v30  ;;  %v504_v50 = vshll.u32 %v19657_v35, 16  ;;  %v494_v52 = vrot.slane %v492_v45, 5  ;;  %v510_v54 = vshrl.u32 %v19651_v26, 16 }
  0x28   : > { %17446 = vmatpush3.bf16.msra.mxu0 %v19053_v55  ;;  %v489_v51 = vor.u32 %v488_v44, %v485_v40  ;;  %v497_v53 = vrot.slane %v495_v46, 6  ;;  %v19671_v55 = vld [vmem:[%s19555_s6 + $0x40] sm:$0xe]  ;;  %v472_v56 = vsel %vm19599_vm2, %v463_v47, %v471_v43  ;;  %v503_v58 = vrot.slane %v501_v49, 5  ;;  %v19707_v47 = vld [vmem:[%s19555_s6 + $0x54] sm:$0x3] }
  0x29   : > { %17447 = vmatprep.subr.bf16.mxu0 %v19054_v14  ;;  %v481_v57 = vrot.slane %v480_v48, 4  ;;  %v506_v61 = vrot.slane %v504_v50, 6  ;;  %v512_v2 = vrot.slane %v510_v54, 5  ;;  %v513_v9 = vshll.u32 %v19651_v26, 16 }
  0x2a   : > { %v498_v63 = vor.u32 %v497_v53, %v494_v52  ;;  %v519_v10 = vshrl.u32 %v19660_v41, 16  ;;  %v528_v16 = vshrl.u32 %v19671_v55, 16  ;;  %v531_v30 = vshll.u32 %v19671_v55, 16 }
  0x2b   : > { %v490_v12 = vsel %vm19599_vm2, %v481_v57, %v489_v51  ;;  %v507_v13 = vor.u32 %v506_v61, %v503_v58  ;;  %v515_v23 = vrot.slane %v513_v9, 6  ;;  %v537_v34 = vshrl.u32 %v19681_v11, 16  ;;  %v19058_v57 = vld [vmem:[%s24920_s1 + $0x18] sm:$0xff]  }
  0x2c   : > { %17448 = vmatpush3.bf16.msra.mxu0 %v19054_v14  ;;  %v522_v14 = vshll.u32 %v19660_v41, 16  ;;  %v14774_v19 = vcombine.low %v472_v56, %v490_v12  ;;  %v499_v21 = vrot.slane %v498_v63, 4  ;;  %v521_v24 = vrot.slane %v519_v10, 5 }
  0x2d   : > { %17461 = vmatprep.subr.bf16.mxu0 %v19055_v42  ;;  %v530_v29 = vrot.slane %v528_v16, 5  ;;  %v516_v38 = vor.u32 %v515_v23, %v512_v2  ;;  %v540_v39 = vshll.u32 %v19681_v11, 16  ;;  %v546_v40 = vshrl.u32 %v19687_v15, 16  ;;  %v19718_v2 = vld [vmem:[%s19555_s6 + $0x58] sm:$0xe] }
  0x2e   : > { %v524_v25 = vrot.slane %v522_v14, 6  ;;  %v533_v44 = vrot.slane %v531_v30, 6  ;;  %v539_v45 = vrot.slane %v537_v34, 5  ;;  %v549_v46 = vshll.u32 %v19687_v15, 16  ;;  %v19722_v14 = vld [vmem:[%s19555_s6 + $0x5c] sm:$0x3] }
  0x2f   : > { %17450 = vmatmul.mubr.bf16.vlgmr.msra.gmra.mrb[0].mxu0 %v14773_v37  ;;  %v508_v37 = vsel %vm19599_vm2, %v499_v21, %v507_v13  ;;  %v517_v48 = vrot.slane %v516_v38, 4  ;;  %v542_v49 = vrot.slane %v540_v39, 6  ;;  %v548_v50 = vrot.slane %v546_v40, 5 }
  0x30   : > { %17462 = vmatpush3.bf16.msra.mxu0 %v19055_v42  ;;  %17453 = vmatprep.mubr.bf16.mxu0 %v14774_v19  ;;  %v19703_v42 = vld [vmem:[%s19555_s6 + $0x50] sm:$0xe]  ;;  %v525_v43 = vor.u32 %v524_v25, %v521_v24  ;;  %v555_v51 = vshrl.u32 %v19694_v28, 16  ;;  %v534_v52 = vor.u32 %v533_v44, %v530_v29  ;;  %v551_v53 = vrot.slane %v549_v46, 6  ;;  %v254_v24 = vld [vmem:[%s19555_s6 + $0x4] sm:$0x1] }
  0x31   : > { %17463 = vmatprep.subr.bf16.mxu0 %v19056_v62  ;;  %v558_v54 = vshll.u32 %v19694_v28, 16  ;;  %v564_v56 = vshrl.u32 %v19703_v42, 16  ;;  %v543_v61 = vor.u32 %v542_v49, %v539_v45  ;;  %v573_v21 = vshrl.u32 %v19707_v47, 16  ;;  %v19060_v49 = vld [vmem:[%s24920_s1 + $0x28] sm:$0xff]  }
  0x32   : > { %v526_v58 = vsel %vm19599_vm2, %v517_v48, %v525_v43  ;;  %v557_v63 = vrot.slane %v555_v51, 5  ;;  %v535_v10 = vrot.slane %v534_v52, 4  ;;  %v552_v12 = vor.u32 %v551_v53, %v548_v50  ;;  %v256_v48 = vld [vmem:[%s19555_s6 + $0xc] sm:$0x1] }
  0x33   : > { %v14775_v9 = vcombine.low %v508_v37, %v526_v58  ;;  %v560_v13 = vrot.slane %v558_v54, 6  ;;  %v566_v16 = vrot.slane %v564_v56, 5  ;;  %v576_v23 = vshll.u32 %v19707_v47, 16  ;;  %v19059_v37 = vld [vmem:[%s24920_s1 + $0x20] sm:$0xff]   ;;  %v19453_v58 = vld [vmem:[%s24922_s3 + $0x5d8] sm:$0xff]  }
  0x34   : > { %17464 = vmatpush3.bf16.msra.mxu0 %v19056_v62  ;;  %v567_v62 = vshll.u32 %v19703_v42, 16  ;;  %v544_v25 = vsel %vm19599_vm2, %v535_v10, %v543_v61  ;;  %v553_v29 = vrot.slane %v552_v12, 4  ;;  %v582_v34 = vshrl.u32 %v19718_v2, 16 }
  0x35   : > { %17465 = vmatprep.subr.bf16.mxu0 %v19057_v18  ;;  %v561_v30 = vor.u32 %v560_v13, %v557_v63  ;;  %v575_v39 = vrot.slane %v573_v21, 5  ;;  %v578_v40 = vrot.slane %v576_v23, 6  ;;  %v585_v43 = vshll.u32 %v19718_v2, 16  ;;  %v260_v13 = vld [vmem:[%s19555_s6 + $0x1c] sm:$0x1] }
  0x36   : > { %v569_v19 = vrot.slane %v567_v62, 6  ;;  %v584_v44 = vrot.slane %v582_v34, 5  ;;  %v591_v45 = vshrl.u32 %v19722_v14, 16  ;;  %v594_v46 = vshll.u32 %v19722_v14, 16  ;;  %v258_v62 = vld [vmem:[%s19555_s6 + $0x14] sm:$0x1] }
  0x37   : > { %17454 = vmatmul.mubr.bf16.gmra.mrb[4].mxu0 %v14775_v9  ;;  %v579_v52 = vor.u32 %v578_v40, %v575_v39  ;;  %v587_v53 = vrot.slane %v585_v43, 6  ;;  %v14744_v61 = vrot.slane %v19561_v4, 9  ;;  %v306_v63 = vrot.slane %v254_v24, 5  ;;  %v262_v23 = vld [vmem:[%s19555_s6 + $0x24] sm:$0x1] }
  0x38   : > { %17466 = vmatpush3.bf16.msra.mxu0 %v19057_v18  ;;  %v570_v38 = vor.u32 %v569_v19, %v566_v16  ;;  %v562_v18 = vsel %vm19599_vm2, %v553_v29, %v561_v30  ;;  %v593_v54 = vrot.slane %v591_v45, 5  ;;  %v596_v56 = vrot.slane %v594_v46, 6  ;;  %v264_v24 = vld [vmem:[%s19555_s6 + $0x2c] sm:$0x1]  ;;  %v19061_v30 = vld [vmem:[%s24920_s1 + $0x30] sm:$0xff]   ;;  %v19062_v45 = vld [vmem:[%s24920_s1 + $0x38] sm:$0xff]  }
  0x39   : > { %17467 = vmatprep.subr.bf16.mxu0 %v19058_v57  ;;  %v14776_v50 = vcombine.low %v544_v25, %v562_v18  ;;  %v588_v9 = vor.u32 %v587_v53, %v584_v44  ;;  %v310_v10 = vrot.slane %v256_v48, 5  ;;  %v307_v4 = vsel %vm19744_vm7, %v14744_v61, %v306_v63  ;;  %v19761_v25 = vld [vmem:[%s19555_s6 + $0x34] sm:$0x1]  ;;  %v19774_v44 = vld [vmem:[%s19555_s6 + $0x44] sm:$0x1] }
  0x3a   : > { %v571_v51 = vrot.slane %v570_v38, 4  ;;  %v597_v12 = vor.u32 %v596_v56, %v593_v54  ;;  %v314_v34 = vrot.slane %v258_v62, 5  ;;  %v318_v38 = vrot.slane %v260_v13, 5  ;;  %v19798_v56 = vld [vmem:[%s19555_s6] sm:$0xc] }
  0x3b   : > { %17457 = vmatprep.mubr.bf16.mxu0 %v14776_v50  ;;  %v589_v19 = vrot.slane %v588_v9, 4  ;;  %v14748_v39 = vrot.slane %v19623_v60, 9  ;;  %v322_v43 = vrot.slane %v262_v23, 5  ;;  %v14749_v18 = vrot.slane %v19627_v1, 9  ;;  %v19781_v50 = vld [vmem:[%s19555_s6 + $0x4c] sm:$0x1] }
  0x3c   : > { %17468 = vmatpush3.bf16.msra.mxu0 %v19058_v57  ;;  %v14745_v57 = vrot.slane %v19564_v5, 9  ;;  %v580_v16 = vsel %vm19599_vm2, %v571_v51, %v579_v52  ;;  %v19764_v5 = vld [vmem:[%s19555_s6 + $0x3c] sm:$0x1]  ;;  %v326_v46 = vrot.slane %v264_v24, 5  ;;  %v14750_v48 = vrot.slane %v19646_v20, 9 }
  0x3d   : > { %17469 = vmatprep.subr.bf16.mxu0 %v19059_v37  ;;  %v598_v29 = vsel %vm19599_vm2, %v589_v19, %v597_v12  ;;  %v330_v60 = vrot.slane %v19761_v25, 5  ;;  %v14751_v51 = vrot.slane %v19651_v26, 9  ;;  %v334_v1 = vrot.slane %v19764_v5, 5  ;;  %v19819_v63 = vld [vmem:[%s19555_s6 + $0x10] sm:$0xc] }
  0x3e   : > { %v311_v21 = vsel %vm19744_vm7, %v14745_v57, %v310_v10  ;;  %v14777_v40 = vcombine.low %v580_v16, %v598_v29  ;;  %v14752_v52 = vrot.slane %v19671_v55, 9  ;;  %v315_v53 = vsel %vm19744_vm7, %v14746_v31, %v314_v34  ;;  %v19825_v10 = vld [vmem:[%s19555_s6 + $0x18] sm:$0xc]  ;;  %v19843_v23 = vld [vmem:[%s19555_s6 + $0x20] sm:$0xc] }
  0x3f   : > { %v338_v26 = vrot.slane %v19774_v44, 5  ;;  %v14753_v54 = vrot.slane %v19687_v15, 9  ;;  %v24946_v55 = vmov 0  ;;  %v323_v22 = vsel %vm19744_vm7, %v14748_v39, %v322_v43  ;;  %v19853_v25 = vld [vmem:[%s19555_s6 + $0x28] sm:$0xc] }
  0x40   : > { %17470 = vmatpush3.bf16.msra.mxu0 %v19059_v37  ;;  %v14786_v37 = vcombine.low %v307_v4, %v311_v21  ;;  %v24947_v55 = vsel %vm19802_vm8, 4294967295, %v24946_v55  ;;  %v327_v31 = vsel %vm19744_vm7, %v14749_v18, %v326_v46  ;;  %v14800_v15 = vrot.slane %v19798_v56, 10  ;;  %v19858_v29 = vld [vmem:[%s19555_s6 + $0x30] sm:$0xc] }
  0x41   : > { %17471 = vmatprep.subr.bf16.mxu0 %v19060_v49  ;;  %17458 = vmatmul.mubr.bf16.gmra.mrb[8].mxu0 %v14777_v40  ;;  %24948 = vst [vmem:[#allocation3_spill] sm:$0xff] %v24947_v55  ;;  %v963_v61 = vrot.slane %v19567_v6, 6  ;;  %v342_v62 = vrot.slane %v19781_v50, 5  ;;  %v967_v57 = vrot.slane %v19570_v7, 6  ;;  %v14802_v12 = vrot.slane %v19819_v63, 10  ;;  %v19065_v50 = vld [vmem:[%s24920_s1 + $0x90] sm:$0xff]  }
  0x42   : > { %17477 = vmatprep.mubr.bf16.mxu0 %v14786_v37  ;;  %v14803_v13 = vrot.slane %v19825_v10, 10  ;;  %v979_v16 = vrot.slane %v19630_v3, 6  ;;  %v14788_v4 = vcombine.low %v323_v22, %v327_v31  ;;  %v14804_v5 = vrot.slane %v19843_v23, 10  ;;  %v19066_v31 = vld [vmem:[%s24920_s1 + $0x98] sm:$0xff]  }
  0x43   : > { %v19830_v6 = vsel %vm19802_vm8, %v14800_v15, %v963_v61  ;;  %v19840_v21 = vsel %vm19802_vm8, %v14802_v12, %v971_v59  ;;  %v983_v27 = vrot.slane %v19633_v8, 6  ;;  %v19064_v59 = vld [vmem:[%s24920_s1 + $0x88] sm:$0xff]   ;;  %v14806_v34 = vrot.slane %v19858_v29, 10  ;;  %v19069_v15 = vld [vmem:[%s24920_s1 + $0xb0] sm:$0xff]   ;;  %v19070_v61 = vld [vmem:[%s24920_s1 + $0xb8] sm:$0xff]  }
  0x44   : > { %17472 = vmatpush3.bf16.msra.mxu0 %v19060_v49  ;;  %v319_v49 = vsel %vm19744_vm7, %v14747_v32, %v318_v38  ;;  %v19814_v32 = vld [vmem:[%s19555_s6 + $0x8] sm:$0xc]  ;;  %v19850_v3 = vsel %vm19802_vm8, %v14803_v13, %v975_v0  ;;  %v19867_v0 = vld [vmem:[%s19555_s6 + $0x38] sm:$0xc]  ;;  %v987_v38 = vrot.slane %v19657_v35, 6  ;;  %v19873_v8 = vsel %vm19802_vm8, %v14804_v5, %v979_v16 }
  0x45   : > { %17473 = vmatprep.subr.bf16.mxu0 %v19061_v30  ;;  %v14801_v9 = vrot.slane %v19814_v32, 10  ;;  %v14787_v19 = vcombine.low %v315_v53, %v319_v49  ;;  %v14829_v36 = vcombine.low %v19840_v21, %v19850_v3  ;;  %v14807_v39 = vrot.slane %v19867_v0, 10  ;;  %v276_v49 = vld [vmem:[%s19555_s6 + $0x5c] sm:$0x1]  ;;  %v19935_v12 = vld [vmem:[%s19555_s6 + $0xc] sm:$0x7] }
  0x46   : > { %v991_v40 = vrot.slane %v19660_v41, 6  ;;  %v19883_v43 = vsel %vm19802_vm8, %v14806_v34, %v987_v38  ;;  %v331_v41 = vsel %vm19744_vm7, %v14750_v48, %v330_v60  ;;  %v335_v44 = vsel %vm19744_vm7, %v14751_v51, %v334_v1  ;;  %v19940_v16 = vld [vmem:[%s19555_s6 + $0x40] sm:$0xc]  ;;  %v19985_v3 = vld [vmem:[%s19555_s6 + $0x1c] sm:$0x7] }
  0x47   : > { %v968_v7 = vsel %vm19802_vm8, %v14801_v9, %v967_v57  ;;  %v339_v53 = vsel %vm19744_vm7, %v14752_v52, %v338_v26  ;;  %v343_v20 = vsel %vm19744_vm7, %v14753_v54, %v342_v62  ;;  %v14754_v48 = vrot.slane %v19703_v42, 9  ;;  %v19068_v54 = vld [vmem:[%s24920_s1 + $0xa8] sm:$0xff]   ;;  %v19932_v57 = vld [vmem:[%s19555_s6 + $0x4] sm:$0x7] }
  0x48   : > { %17474 = vmatpush3.bf16.msra.mxu0 %v19061_v30  ;;  %v14828_v24 = vcombine.low %v19830_v6, %v968_v7  ;;  %v14805_v30 = vrot.slane %v19853_v25, 10  ;;  %v19889_v18 = vsel %vm19802_vm8, %v14807_v39, %v991_v40  ;;  %v14789_v60 = vcombine.low %v331_v41, %v335_v44  ;;  %v19955_v39 = vld [vmem:[%s19555_s6 + $0x50] sm:$0xc]  ;;  %v19960_v44 = vld [vmem:[%s19555_s6 + $0x58] sm:$0xc] }
  0x49   : > { %17475 = vmatprep.subr.bf16.mxu0 %v19062_v45  ;;  %v14831_v46 = vcombine.low %v19883_v43, %v19889_v18  ;;  %v14790_v51 = vcombine.low %v339_v53, %v343_v20  ;;  %v350_v22 = vrot.slane %v276_v49, 5  ;;  %v1207_v62 = vshrl.u32 %v19798_v56, 16  ;;  %v19072_v53 = vld [vmem:[%s24920_s1 + $0xc8] sm:$0xff]   ;;  %v19075_v18 = vld [vmem:[%s24920_s1 + $0xe0] sm:$0xff]  }
  0x4a   : > { %v19879_v37 = vsel %vm19802_vm8, %v14805_v30, %v983_v27  ;;  %v1210_v9 = vshll.u32 %v19798_v56, 16  ;;  %v1225_v6 = vshrl.u32 %v19814_v32, 16  ;;  %v1228_v13 = vshll.u32 %v19814_v32, 16  ;;  %v19071_v32 = vld [vmem:[%s24920_s1 + $0xc0] sm:$0xff]  }
  0x4b   : > { %v14830_v35 = vcombine.low %v19873_v8, %v19879_v37  ;;  %v1216_v56 = vshrl.u32 %v19932_v57, 16  ;;  %v1234_v5 = vshrl.u32 %v19935_v12, 16  ;;  %v1237_v27 = vshll.u32 %v19935_v12, 16 }
  0x4c   : > { %17476 = vmatpush3.bf16.msra.mxu0 %v19062_v45  ;;  %v274_v45 = vld [vmem:[%s19555_s6 + $0x54] sm:$0x1]  ;;  %v1212_v7 = vrot.slane %v1210_v9, 7  ;;  %v1230_v30 = vrot.slane %v1228_v13, 7  ;;  %v14808_v34 = vrot.slane %v19940_v16, 10  ;;  %v995_v38 = vrot.slane %v19681_v11, 6 }
  0x4d   : > { %17489 = vmatprep.subr.bf16.mxu0 %v19063_v17  ;;  %v346_v1 = vrot.slane %v274_v45, 5  ;;  %v999_v41 = vrot.slane %v19694_v28, 6  ;;  %v1218_v45 = vrot.slane %v1216_v56, 6  ;;  %v1236_v49 = vrot.slane %v1234_v5, 6 }
  0x4e   : > { %v1243_v11 = vshrl.u32 %v19819_v63, 16  ;;  %v1246_v28 = vshll.u32 %v19819_v63, 16  ;;  %v1270_v13 = vshrl.u32 %v19985_v3, 16  ;;  %v1300_v5 = vshll.u32 %v19853_v25, 16 }
  0x4f   : > { %17478 = vmatmul.mubr.bf16.vlgmr.msra.gmra.mrb[12].mxu0 %v14787_v19  ;;  %v347_v52 = vsel %vm19744_vm7, %v14754_v48, %v346_v1  ;;  %v19943_v19 = vld [vmem:[%s19555_s6 + $0x48] sm:$0xc]  ;;  %v1239_v48 = vrot.slane %v1237_v27, 7  ;;  %v996_v1 = vsel %vm19802_vm8, %v14808_v34, %v995_v38  ;;  %v20021_v34 = vld [vmem:[%s19555_s6 + $0x2c] sm:$0x7] }
  0x50   : > { %17490 = vmatpush3.bf16.msra.mxu0 %v19063_v17  ;;  %17481 = vmatprep.mubr.bf16.mxu0 %v14788_v4  ;;  %v14755_v17 = vrot.slane %v19718_v2, 9  ;;  %v19067_v2 = vld [vmem:[%s24920_s1 + $0xa0] sm:$0xff]   ;;  %v1209_v4 = vrot.slane %v1207_v62, 6  ;;  %v14809_v40 = vrot.slane %v19943_v19, 10  ;;  %v1248_v37 = vrot.slane %v1246_v28, 7 }
  0x51   : > { %17491 = vmatprep.subr.bf16.mxu0 %v19064_v59  ;;  %v1240_v21 = vor.u32 %v1239_v48, %v1236_v49  ;;  %v1282_v62 = vshll.u32 %v19843_v23, 16  ;;  %v1302_v48 = vrot.slane %v1300_v5, 7 }
  0x52   : > { %v351_v42 = vsel %vm19744_vm7, %v14755_v17, %v350_v22  ;;  %v1213_v20 = vor.u32 %v1212_v7, %v1209_v4  ;;  %v1000_v17 = vsel %vm19802_vm8, %v14809_v40, %v999_v41  ;;  %v1003_v22 = vrot.slane %v19707_v47, 6  ;;  %v19073_v47 = vld [vmem:[%s24920_s1 + $0xd0] sm:$0xff]   ;;  %v20007_v7 = vld [vmem:[%s19555_s6 + $0x24] sm:$0x7] }
  0x53   : > { %v14791_v26 = vcombine.low %v347_v52, %v351_v42  ;;  %v1007_v52 = vrot.slane %v19722_v14, 6  ;;  %v19979_v42 = vld [vmem:[%s19555_s6 + $0x14] sm:$0x7]  ;;  %v24949_v14 = vmov 0  ;;  %v14832_v9 = vcombine.low %v996_v1, %v1000_v17 }
  0x54   : > { %17492 = vmatpush3.bf16.msra.mxu0 %v19064_v59  ;;  %v1227_v59 = vrot.slane %v1225_v6, 6  ;;  %v1214_v63 = vrot.slane %v1213_v20, 4  ;;  %v24950_v14 = vsel %vm19992_vm11, 4294967295, %v24949_v14  ;;  %v1273_v4 = vshll.u32 %v19985_v3, 16 }
  0x55   : > { %17493 = vmatprep.subr.bf16.mxu0 %v19065_v50  ;;  %24951 = vst [vmem:[#allocation4_spill] sm:$0xff] %v24950_v14  ;;  %v1284_v40 = vrot.slane %v1282_v62, 7  ;;  %v1288_v41 = vshrl.u32 %v20007_v7, 16  ;;  %v1354_v62 = vshll.u32 %v19940_v16, 16 }
  0x56   : > { %v20034_v20 = vrot.slane %v1273_v4, 7 }
  0x57   : > { %17482 = vmatmul.mubr.bf16.gmra.mrb[4].mxu0 %v14789_v60  ;;  %v14810_v60 = vrot.slane %v19955_v39, 10  ;;  %v1290_v17 = vrot.slane %v1288_v41, 6 }
  0x58   : > { %17494 = vmatpush3.bf16.msra.mxu0 %v19065_v50  ;;  %17485 = vmatprep.mubr.bf16.mxu0 %v14790_v51  ;;  %v1231_v51 = vor.u32 %v1230_v30, %v1227_v59 }
  0x59   : > { %17495 = vmatprep.subr.bf16.mxu0 %v19066_v31  ;;  %v1004_v6 = vsel %vm19802_vm8, %v14810_v60, %v1003_v22  ;;  %v1309_v60 = vshll.u32 %v20021_v34, 16 }
  0x5a   : > { %v1232_v8 = vrot.slane %v1231_v51, 4 }
  0x5c   : > { %17496 = vmatpush3.bf16.msra.mxu0 %v19066_v31  ;;  %v14811_v31 = vrot.slane %v19960_v44, 10  ;;  %v1241_v27 = vsel %vm19992_vm11, %v1232_v8, %v1240_v21  ;;  %v1315_v21 = vshrl.u32 %v19858_v29, 16 }
  0x5d   : > { %17497 = vmatprep.subr.bf16.mxu0 %v19067_v2 }
  0x5e   : > { %v1008_v56 = vsel %vm19802_vm8, %v14811_v31, %v1007_v52  ;;  %v20042_v31 = vld [vmem:[%s19555_s6 + $0x34] sm:$0x7]  ;;  %v1317_v4 = vrot.slane %v1315_v21, 6 }
  0x5f   : > { %17486 = vmatmul.mubr.bf16.gmra.mrb[16].mxu0 %v14791_v26  ;;  %v1264_v26 = vshll.u32 %v19825_v10, 16  ;;  %v14833_v43 = vcombine.low %v1004_v6, %v1008_v56  ;;  %v1369_v6 = vshrl.u32 %v19943_v19, 16  ;;  %v1324_v56 = vshrl.u32 %v20042_v31, 16 }
  0x60   : > { %17498 = vmatpush3.bf16.msra.mxu0 %v19067_v2  ;;  %17505 = vmatprep.mubr.bf16.mxu0 %v14828_v24  ;;  %v1219_v24 = vshll.u32 %v19932_v57, 16 }
  0x61   : > { %17499 = vmatprep.subr.bf16.mxu0 %v19068_v54  ;;  %v1266_v30 = vrot.slane %v1264_v26, 7  ;;  %v1333_v26 = vshrl.u32 %v19867_v0, 16 }
  0x62   : > { %v1221_v50 = vrot.slane %v1219_v24, 7  ;;  %v1297_v24 = vshrl.u32 %v19853_v25, 16 }
  0x63   : > { %v1335_v5 = vrot.slane %v1333_v26, 6 }
  0x64   : > { %17500 = vmatpush3.bf16.msra.mxu0 %v19068_v54  ;;  %v1222_v2 = vor.u32 %v1221_v50, %v1218_v45  ;;  %v1252_v54 = vshrl.u32 %v19979_v42, 16  ;;  %v1291_v45 = vshll.u32 %v20007_v7, 16  ;;  %v1299_v49 = vrot.slane %v1297_v24, 6  ;;  %v20065_v24 = vld [vmem:[%s19555_s6 + $0x44] sm:$0x7] }
  0x65   : > { %17501 = vmatprep.subr.bf16.mxu0 %v19069_v15  ;;  %v1360_v41 = vshrl.u32 %v20065_v24, 16 }
  0x66   : > { %v20028_v25 = vrot.slane %v1252_v54, 6  ;;  %v1293_v22 = vrot.slane %v1291_v45, 7  ;;  %v1303_v8 = vor.u32 %v1302_v48, %v1299_v49  ;;  %v1363_v45 = vshll.u32 %v20065_v24, 16 }
  0x68   : > { %17502 = vmatpush3.bf16.msra.mxu0 %v19069_v15  ;;  %v1255_v15 = vshll.u32 %v19979_v42, 16 }
  0x69   : > { %17503 = vmatprep.subr.bf16.mxu0 %v19070_v61 }
  0x6a   : > { %v20030_v50 = vrot.slane %v1255_v15, 7  ;;  %v1336_v15 = vshll.u32 %v19867_v0, 16  ;;  %v1304_v0 = vrot.slane %v1303_v8, 4  ;;  %v20091_v8 = vld [vmem:[%s19555_s6 + $0x54] sm:$0x7] }
  0x6c   : > { %17504 = vmatpush3.bf16.msra.mxu0 %v19070_v61  ;;  %v1279_v61 = vshrl.u32 %v19843_v23, 16  ;;  %v1223_v23 = vsel %vm19992_vm11, %v1214_v63, %v1222_v2  ;;  %v1258_v52 = vor.u32 %v20030_v50, %v20028_v25  ;;  %v20049_v2 = vld [vmem:[%s19555_s6 + $0x3c] sm:$0x7]  ;;  %v1371_v25 = vrot.slane %v1369_v6, 6 }
  0x6d   : > { %17517 = vmatprep.subr.bf16.mxu0 %v19071_v32 }
  0x6e   : > { %v1281_v38 = vrot.slane %v1279_v61, 6  ;;  %v1351_v61 = vshrl.u32 %v19940_v16, 16 }
  0x6f   : > { %17506 = vmatmul.mubr.bf16.vlgmr.msra.gmra.mrb[20].mxu0 %v14829_v36  ;;  %v1245_v36 = vrot.slane %v1243_v11, 6  ;;  %v1306_v11 = vshrl.u32 %v20021_v34, 16 }
  0x70   : > { %17518 = vmatpush3.bf16.msra.mxu0 %v19071_v32  ;;  %17509 = vmatprep.mubr.bf16.mxu0 %v14830_v35  ;;  %v1261_v35 = vshrl.u32 %v19825_v10, 16  ;;  %v19074_v10 = vld [vmem:[%s24920_s1 + $0xd8] sm:$0xff]   ;;  %v1285_v1 = vor.u32 %v1284_v40, %v1281_v38  ;;  %v1353_v38 = vrot.slane %v1351_v61, 6  ;;  %v1356_v40 = vrot.slane %v1354_v62, 7  ;;  %v19079_v62 = vld [vmem:[%s24920_s1 + $0x100] sm:$0xff]  }
  0x71   : > { %17519 = vmatprep.subr.bf16.mxu0 %v19072_v53  ;;  %v1249_v32 = vor.u32 %v1248_v37, %v1245_v36  ;;  %v1318_v36 = vshll.u32 %v19858_v29, 16  ;;  %v1308_v37 = vrot.slane %v1306_v11, 6  ;;  %v1408_v61 = vshll.u32 %v19960_v44, 16 }
  0x72   : > { %v1263_v59 = vrot.slane %v1261_v35, 6  ;;  %v1311_v35 = vrot.slane %v1309_v60, 7  ;;  %v1286_v29 = vrot.slane %v1285_v1, 4 }
  0x73   : > { %v1250_v28 = vrot.slane %v1249_v32, 4  ;;  %v20069_v32 = vld [vmem:[%s19555_s6 + $0x4c] sm:$0x7] }
  0x74   : > { %17520 = vmatpush3.bf16.msra.mxu0 %v19072_v53  ;;  %v20032_v53 = vrot.slane %v1270_v13, 6  ;;  %v1267_v51 = vor.u32 %v1266_v30, %v1263_v59  ;;  %v1372_v13 = vshll.u32 %v19943_v19, 16  ;;  %v1312_v16 = vor.u32 %v1311_v35, %v1308_v37  ;;  %v19077_v19 = vld [vmem:[%s24920_s1 + $0xf0] sm:$0xff]  }
  0x75   : > { %17521 = vmatprep.subr.bf16.mxu0 %v19073_v47  ;;  %v1338_v59 = vrot.slane %v1336_v15, 7  ;;  %v1345_v30 = vshll.u32 %v20049_v2, 16  ;;  %v1378_v49 = vshrl.u32 %v20069_v32, 16  ;;  %v1381_v48 = vshll.u32 %v20069_v32, 16 }
  0x76   : > { %v1276_v63 = vor.u32 %v20034_v20, %v20032_v53  ;;  %v1268_v54 = vrot.slane %v1267_v51, 4  ;;  %v1374_v50 = vrot.slane %v1372_v13, 7  ;;  %v1259_v53 = vsel %vm19992_vm11, %v1250_v28, %v1258_v52 }
  0x77   : > { %17510 = vmatmul.mubr.bf16.gmra.mrb[4].mxu0 %v14831_v46  ;;  %v14858_v46 = vcombine.low %v1223_v23, %v1241_v27  ;;  %v1327_v23 = vshll.u32 %v20042_v31, 16  ;;  %v1342_v27 = vshrl.u32 %v20049_v2, 16  ;;  %v1313_v51 = vsel %vm19992_vm11, %v1304_v0, %v1312_v16 }
  0x78   : > { %17522 = vmatpush3.bf16.msra.mxu0 %v19073_v47  ;;  %17513 = vmatprep.mubr.bf16.mxu0 %v14832_v9  ;;  %v19076_v47 = vld [vmem:[%s24920_s1 + $0xe8] sm:$0xff]   ;;  %v1294_v9 = vor.u32 %v1293_v22, %v1290_v17  ;;  %v1277_v20 = vsel %vm19992_vm11, %v1268_v54, %v1276_v63  ;;  %v1339_v28 = vor.u32 %v1338_v59, %v1335_v5  ;;  %v1347_v17 = vrot.slane %v1345_v30, 7 }
  0x79   : > { %17523 = vmatprep.subr.bf16.mxu0 %v19074_v10  ;;  %v1344_v1 = vrot.slane %v1342_v27, 6  ;;  %v1357_v22 = vor.u32 %v1356_v40, %v1353_v38  ;;  %v1362_v52 = vrot.slane %v1360_v41, 6  ;;  %v1365_v63 = vrot.slane %v1363_v45, 7  ;;  %v19080_v38 = vld [vmem:[%s24920_s1 + $0x108] sm:$0xff]   ;;  %v19081_v45 = vld [vmem:[%s24920_s1 + $0x110] sm:$0xff]  }
  0x7a   : > { %v1295_v11 = vsel %vm19992_vm11, %v1286_v29, %v1294_v9  ;;  %v1375_v21 = vor.u32 %v1374_v50, %v1371_v25  ;;  %v1387_v37 = vshrl.u32 %v19955_v39, 16  ;;  %v1390_v35 = vshll.u32 %v19955_v39, 16 }
  0x7b   : > { %v14859_v26 = vcombine.low %v1259_v53, %v1277_v20  ;;  %v1405_v15 = vshrl.u32 %v19960_v44, 16  ;;  %v14860_v29 = vcombine.low %v1295_v11, %v1313_v51  ;;  %v1340_v6 = vrot.slane %v1339_v28, 4 }
  0x7c   : > { %17524 = vmatpush3.bf16.msra.mxu0 %v19074_v10  ;;  %v1320_v10 = vrot.slane %v1318_v36, 7  ;;  %v1380_v36 = vrot.slane %v1378_v49, 6  ;;  %v1348_v13 = vor.u32 %v1347_v17, %v1344_v1  ;;  %v1376_v39 = vrot.slane %v1375_v21, 4 }
  0x7d   : > { %17525 = vmatprep.subr.bf16.mxu0 %v19075_v18  ;;  %v1366_v0 = vor.u32 %v1365_v63, %v1362_v52  ;;  %v1389_v44 = vrot.slane %v1387_v37, 6  ;;  %v1392_v5 = vrot.slane %v1390_v35, 7  ;;  %v1407_v27 = vrot.slane %v1405_v15, 6  ;;  %v19082_v52 = vld [vmem:[%s24920_s1 + $0x118] sm:$0xff]  }
  0x7e   : > { %v1321_v60 = vor.u32 %v1320_v10, %v1317_v4  ;;  %v20101_v4 = vld [vmem:[%s19555_s6 + $0x5c] sm:$0x7]  ;;  %v1358_v10 = vrot.slane %v1357_v22, 4  ;;  %v1349_v41 = vsel %vm19992_vm11, %v1340_v6, %v1348_v13  ;;  %v1645_v21 = vrot.slane %v19932_v57, 7  ;;  %v19083_v57 = vld [vmem:[%s24920_s1 + $0x120] sm:$0xff]  }
  0x7f   : > { %17514 = vmatmul.mubr.bf16.gmra.mrb[24].mxu0 %v14833_v43  ;;  %v1326_v43 = vrot.slane %v1324_v56, 6  ;;  %v1396_v56 = vshrl.u32 %v20091_v8, 16  ;;  %v1414_v59 = vshrl.u32 %v20101_v4, 16  ;;  %v1417_v30 = vshll.u32 %v20101_v4, 16  ;;  %v1607_v6 = vld [vmem:[%s19555_s6 + $0x18] sm:$0x8] }
  0x80   : > { %17526 = vmatpush3.bf16.msra.mxu0 %v19075_v18  ;;  %17533 = vmatprep.mubr.bf16.mxu0 %v14858_v46  ;;  %v1329_v18 = vrot.slane %v1327_v23, 7  ;;  %v19078_v46 = vld [vmem:[%s24920_s1 + $0xf8] sm:$0xff]   ;;  %v1322_v54 = vrot.slane %v1321_v60, 4  ;;  %v1399_v23 = vshll.u32 %v20091_v8, 16  ;;  %v1367_v25 = vsel %vm19992_vm11, %v1358_v10, %v1366_v0  ;;  %v1608_v13 = vld [vmem:[%s19555_s6 + $0x20] sm:$0x8] }
  0x81   : > { %17527 = vmatprep.subr.bf16.mxu0 %v19076_v47  ;;  %v1398_v53 = vrot.slane %v1396_v56, 6  ;;  %v1393_v49 = vor.u32 %v1392_v5, %v1389_v44  ;;  %v1416_v11 = vrot.slane %v1414_v59, 6  ;;  %v1419_v60 = vrot.slane %v1417_v30, 7  ;;  %v1609_v10 = vld [vmem:[%s19555_s6 + $0x28] sm:$0x8] }
  0x82   : > { %v1330_v9 = vor.u32 %v1329_v18, %v1326_v43  ;;  %v1401_v20 = vrot.slane %v1399_v23, 7  ;;  %v1604_v43 = vld [vmem:[%s19555_s6] sm:$0x8]  ;;  %v1605_v18 = vld [vmem:[%s19555_s6 + $0x8] sm:$0x8]  ;;  %v24952_v37 = vmov 0 }
  0x83   : > { %v1394_v28 = vrot.slane %v1393_v49, 4  ;;  %v1420_v22 = vor.u32 %v1419_v60, %v1416_v11  ;;  %v14872_v63 = vrot.slane %v1604_v43, 11  ;;  %v24953_v37 = vsel %vm20128_vm14, 4294967295, %v24952_v37  ;;  %v1610_v30 = vld [vmem:[%s19555_s6 + $0x30] sm:$0x8] }
  0x84   : > { %17528 = vmatpush3.bf16.msra.mxu0 %v19076_v47  ;;  %v1383_v47 = vrot.slane %v1381_v48, 7  ;;  %v1331_v40 = vsel %vm19992_vm11, %v1322_v54, %v1330_v9  ;;  %v1402_v1 = vor.u32 %v1401_v20, %v1398_v53  ;;  %24954 = vst [vmem:[#allocation5_spill] sm:$0xff] %v24953_v37  ;;  %v1606_v9 = vld [vmem:[%s19555_s6 + $0x10] sm:$0x8]  ;;  %v1653_v23 = vrot.slane %v19979_v42, 7 }
  0x85   : > { %17529 = vmatprep.subr.bf16.mxu0 %v19077_v19  ;;  %v14874_v56 = vrot.slane %v1606_v9, 11  ;;  %v14875_v0 = vrot.slane %v1607_v6, 11  ;;  %v14876_v44 = vrot.slane %v1608_v13, 11  ;;  %v1661_v5 = vrot.slane %v20007_v7, 7  ;;  %v20222_v6 = vld [vmem:[%s19555_s6 + $0x18] sm:$0xe] }
  0x86   : > { %v1384_v16 = vor.u32 %v1383_v47, %v1380_v36  ;;  %v14873_v36 = vrot.slane %v1605_v18, 11  ;;  %v1649_v47 = vrot.slane %v19935_v12, 7  ;;  %v1403_v35 = vsel %vm19992_vm11, %v1394_v28, %v1402_v1  ;;  %v20196_v1 = vld [vmem:[%s19555_s6 + $0x8] sm:$0xe]  ;;  %v14919_v13 = vld [vmem:[%s19555_s6 + $0x1c] sm:$0x1] }
  0x87   : > { %v1646_v12 = vsel %vm20128_vm14, %v14872_v63, %v1645_v21  ;;  %v1654_v59 = vsel %vm20128_vm14, %v14874_v56, %v1653_v23  ;;  %v1669_v20 = vrot.slane %v20042_v31, 7  ;;  %v1677_v60 = vrot.slane %v20065_v24, 7  ;;  %v1615_v24 = vld [vmem:[%s19555_s6 + $0x58] sm:$0x8]  ;;  %v14921_v56 = vld [vmem:[%s19555_s6 + $0x24] sm:$0x1] }
  0x88   : > { %17530 = vmatpush3.bf16.msra.mxu0 %v19077_v19  ;;  %v1410_v19 = vrot.slane %v1408_v61, 7  ;;  %v1385_v50 = vsel %vm19992_vm11, %v1376_v39, %v1384_v16  ;;  %v1650_v54 = vsel %vm20128_vm14, %v14873_v36, %v1649_v47  ;;  %v19086_v39 = vld [vmem:[%s24920_s1 + $0x138] sm:$0xff]   ;;  %v1657_v16 = vrot.slane %v19985_v3, 7  ;;  %v19087_v3 = vld [vmem:[%s24920_s1 + $0x140] sm:$0xff]   ;;  %v19092_v23 = vld [vmem:[%s24920_s1 + $0x168] sm:$0xff]  }
  0x89   : > { %17531 = vmatprep.subr.bf16.mxu0 %v19078_v46  ;;  %v14862_v51 = vcombine.low %v1367_v25, %v1385_v50  ;;  %v14900_v61 = vcombine.low %v1646_v12, %v1650_v54  ;;  %v14878_v25 = vrot.slane %v1610_v30, 11  ;;  %v19088_v50 = vld [vmem:[%s24920_s1 + $0x148] sm:$0xff]   ;;  %v1681_v18 = vrot.slane %v20069_v32, 7  ;;  %v14925_v30 = vld [vmem:[%s19555_s6 + $0x34] sm:$0x1] }
  0x8a   : > { %v1411_v48 = vor.u32 %v1410_v19, %v1407_v27  ;;  %v14877_v27 = vrot.slane %v1609_v10, 11  ;;  %v1665_v19 = vrot.slane %v20021_v34, 7  ;;  %v1658_v42 = vsel %vm20128_vm14, %v14875_v0, %v1657_v16  ;;  %v1611_v34 = vld [vmem:[%s19555_s6 + $0x38] sm:$0x8]  ;;  %v20226_v10 = vld [vmem:[%s19555_s6 + $0x20] sm:$0xe] }
  0x8b   : > { %v14879_v49 = vrot.slane %v1611_v34, 11  ;;  %v1670_v31 = vsel %vm20128_vm14, %v14878_v25, %v1669_v20  ;;  %v1685_v47 = vrot.slane %v20091_v8, 7  ;;  %v14938_v12 = vrot.slane %v20196_v1, 9  ;;  %v14929_v34 = vld [vmem:[%s19555_s6 + $0x44] sm:$0x1] }
  0x8c   : > { %17532 = vmatpush3.bf16.msra.mxu0 %v19078_v46  ;;  %v14861_v46 = vcombine.low %v1331_v40, %v1349_v41  ;;  %v1412_v17 = vrot.slane %v1411_v48, 4  ;;  %v1666_v7 = vsel %vm20128_vm14, %v14877_v27, %v1665_v19  ;;  %v1612_v40 = vld [vmem:[%s19555_s6 + $0x40] sm:$0x8]  ;;  %v1613_v41 = vld [vmem:[%s19555_s6 + $0x48] sm:$0x8]  ;;  %v1673_v48 = vrot.slane %v20049_v2, 7 }
  0x8d   : > { %17545 = vmatprep.subr.bf16.mxu0 %v19079_v62  ;;  %v14880_v11 = vrot.slane %v1612_v40, 11  ;;  %v14881_v43 = vrot.slane %v1613_v41, 11  ;;  %v14940_v16 = vrot.slane %v20222_v6, 9  ;;  %v14923_v27 = vld [vmem:[%s19555_s6 + $0x2c] sm:$0x1]  ;;  %v19093_v40 = vld [vmem:[%s24920_s1 + $0x170] sm:$0xff]  }
  0x8e   : > { %v1674_v2 = vsel %vm20128_vm14, %v14879_v49, %v1673_v48  ;;  %v20238_v19 = vld [vmem:[%s19555_s6 + $0x30] sm:$0xe] }
  0x8f   : > { %17534 = vmatmul.mubr.bf16.vlgmr.msra.gmra.mrb[28].mxu0 %v14859_v26  ;;  %v1421_v26 = vsel %vm19992_vm11, %v1412_v17, %v1420_v22  ;;  %v1678_v28 = vsel %vm20128_vm14, %v14880_v11, %v1677_v60  ;;  %v1682_v32 = vsel %vm20128_vm14, %v14881_v43, %v1681_v18  ;;  %v14915_v17 = vld [vmem:[%s19555_s6 + $0xc] sm:$0x1]  ;;  %v20200_v22 = vld [vmem:[%s19555_s6 + $0x10] sm:$0xe]  ;;  %v14903_v63 = vcombine.low %v1670_v31, %v1674_v2  ;;  %v20265_v18 = vld [vmem:[%s19555_s6 + $0x48] sm:$0xe] }
  0x90   : > { %17546 = vmatpush3.bf16.msra.mxu0 %v19079_v62  ;;  %17537 = vmatprep.mubr.bf16.mxu0 %v14860_v29  ;;  %v14863_v15 = vcombine.low %v1403_v35, %v1421_v26  ;;  %v19084_v62 = vld [vmem:[%s24920_s1 + $0x128] sm:$0xff]   ;;  %v19085_v29 = vld [vmem:[%s24920_s1 + $0x130] sm:$0xff]   ;;  %v14904_v36 = vcombine.low %v1678_v28, %v1682_v32  ;;  %v14883_v35 = vrot.slane %v1615_v24, 11  ;;  %v1689_v26 = vrot.slane %v20101_v4, 7 }
  0x91   : > { %17547 = vmatprep.subr.bf16.mxu0 %v19080_v38  ;;  %v1927_v54 = vrot.slane %v14915_v17, 5  ;;  %v14943_v25 = vrot.slane %v20238_v19, 9  ;;  %v1955_v11 = vrot.slane %v14929_v34, 5  ;;  %v14931_v31 = vld [vmem:[%s19555_s6 + $0x4c] sm:$0x1] }
  0x92   : > { %v1690_v4 = vsel %vm20128_vm14, %v14883_v35, %v1689_v26  ;;  %v20269_v2 = vld [vmem:[%s19555_s6 + $0xc] sm:$0x3]  ;;  %v20274_v24 = vld [vmem:[%s19555_s6 + $0x50] sm:$0xe]  ;;  %v20277_v28 = vld [vmem:[%s19555_s6 + $0x14] sm:$0x3] }
  0x93   : > { %v2180_v35 = vshll.u32 %v20269_v2, 16  ;;  %v20292_v26 = vld [vmem:[%s19555_s6 + $0x5c] sm:$0x1] }
  0x94   : > { %17548 = vmatpush3.bf16.msra.mxu0 %v19080_v38  ;;  %v1662_v38 = vsel %vm20128_vm14, %v14876_v44, %v1661_v5  ;;  %v1935_v44 = vrot.slane %v14919_v13, 5  ;;  %v20234_v5 = vld [vmem:[%s19555_s6 + $0x28] sm:$0xe]  ;;  %v14937_v13 = vld [vmem:[%s19555_s6 + $0x64] sm:$0x1] }
  0x95   : > { %17549 = vmatprep.subr.bf16.mxu0 %v19081_v45  ;;  %v14902_v53 = vcombine.low %v1662_v38, %v1666_v7  ;;  %v14927_v38 = vld [vmem:[%s19555_s6 + $0x3c] sm:$0x1]  ;;  %v20247_v7 = vld [vmem:[%s19555_s6 + $0x40] sm:$0xe]  ;;  %v14942_v41 = vrot.slane %v20234_v5, 9 }
  0x96   : > { %v1951_v49 = vrot.slane %v14927_v38, 5  ;;  %v14945_v48 = vrot.slane %v20247_v7, 9  ;;  %v1936_v60 = vsel %vm19744_vm7, %v14940_v16, %v1935_v44  ;;  %v1967_v44 = vrot.slane %v20292_v26, 5 }
  0x97   : > { %17538 = vmatmul.mubr.bf16.gmra.mrb[4].mxu0 %v14861_v46  ;;  %v19089_v46 = vld [vmem:[%s24920_s1 + $0x150] sm:$0xff]   ;;  %v2182_v38 = vrot.slane %v2180_v35, 6 }
  0x98   : > { %17550 = vmatpush3.bf16.msra.mxu0 %v19081_v45  ;;  %17541 = vmatprep.mubr.bf16.mxu0 %v14862_v51  ;;  %v14901_v45 = vcombine.low %v1654_v59, %v1658_v42  ;;  %v1614_v51 = vld [vmem:[%s19555_s6 + $0x50] sm:$0x8]  ;;  %v14941_v59 = vrot.slane %v20226_v10, 9  ;;  %v1939_v42 = vrot.slane %v14921_v56, 5  ;;  %v1956_v16 = vsel %vm19744_vm7, %v14945_v48, %v1955_v11 }
  0x99   : > { %17551 = vmatprep.subr.bf16.mxu0 %v19082_v52  ;;  %v14882_v21 = vrot.slane %v1614_v51, 11  ;;  %v2171_v51 = vshll.u32 %v20196_v1, 16 }
  0x9a   : > { %v1940_v43 = vsel %vm19744_vm7, %v14941_v59, %v1939_v42  ;;  %v20312_v59 = vld [vmem:[%s19555_s6 + $0x1c] sm:$0x3]  ;;  %v19096_v42 = vld [vmem:[%s24920_s1 + $0x188] sm:$0xff]  }
  0x9b   : > { %v1686_v8 = vsel %vm20128_vm14, %v14882_v21, %v1685_v47  ;;  %v2189_v21 = vshll.u32 %v20200_v22, 16  ;;  %v20287_v47 = vld [vmem:[%s19555_s6 + $0x58] sm:$0xe] }
  0x9c   : > { %17552 = vmatpush3.bf16.msra.mxu0 %v19082_v52  ;;  %v14917_v52 = vld [vmem:[%s19555_s6 + $0x14] sm:$0x1] }
  0x9d   : > { %17553 = vmatprep.subr.bf16.mxu0 %v19083_v57 }
  0x9f   : > { %17542 = vmatmul.mubr.bf16.gmra.mrb[32].mxu0 %v14863_v15  ;;  %v14939_v15 = vrot.slane %v20200_v22, 9 }
  0xa0   : > { %17554 = vmatpush3.bf16.msra.mxu0 %v19083_v57  ;;  %17561 = vmatprep.mubr.bf16.mxu0 %v14900_v61  ;;  %v19090_v57 = vld [vmem:[%s24920_s1 + $0x158] sm:$0xff]   ;;  %v1931_v61 = vrot.slane %v14917_v52, 5  ;;  %v14933_v52 = vld [vmem:[%s19555_s6 + $0x54] sm:$0x1] }
  0xa1   : > { %17555 = vmatprep.subr.bf16.mxu0 %v19084_v62 }
  0xa2   : > { %v1932_v9 = vsel %vm19744_vm7, %v14939_v15, %v1931_v61  ;;  %v2198_v15 = vshll.u32 %v20277_v28, 16 }
  0xa4   : > { %17556 = vmatpush3.bf16.msra.mxu0 %v19084_v62  ;;  %v19091_v62 = vld [vmem:[%s24920_s1 + $0x160] sm:$0xff]  }
  0xa5   : > { %17557 = vmatprep.subr.bf16.mxu0 %v19085_v29 }
  0xa8   : > { %17558 = vmatpush3.bf16.msra.mxu0 %v19085_v29  ;;  %v1928_v29 = vsel %vm19744_vm7, %v14938_v12, %v1927_v54  ;;  %v2173_v12 = vrot.slane %v2171_v51, 6  ;;  %v2195_v54 = vshrl.u32 %v20277_v28, 16 }
  0xa9   : > { %17559 = vmatprep.subr.bf16.mxu0 %v19086_v39  ;;  %v14966_v0 = vcombine.low %v1928_v29, %v1932_v9  ;;  %v20302_v29 = vld [vmem:[%s19555_s6 + $0x60] sm:$0xe]  ;;  %v1963_v9 = vrot.slane %v14933_v52, 5  ;;  %v2216_v52 = vshll.u32 %v20312_v59, 16 }
  0xaa   : > { %v2197_v34 = vrot.slane %v2195_v54, 5  ;;  %v2258_v54 = vshrl.u32 %v20238_v19, 16 }
  0xac   : > { %17560 = vmatpush3.bf16.msra.mxu0 %v19086_v39  ;;  %v14905_v39 = vcombine.low %v1686_v8, %v1690_v4  ;;  %v14946_v8 = vrot.slane %v20265_v18, 9  ;;  %v1959_v4 = vrot.slane %v14931_v31, 5  ;;  %v19097_v31 = vld [vmem:[%s24920_s1 + $0x190] sm:$0xff]  }
  0xad   : > { %17573 = vmatprep.subr.bf16.mxu0 %v19087_v3 }
  0xae   : > { %v1960_v48 = vsel %vm19744_vm7, %v14946_v8, %v1959_v4  ;;  %v19098_v4 = vld [vmem:[%s24920_s1 + $0x198] sm:$0xff]  }
  0xaf   : > { %17562 = vmatmul.mubr.bf16.vlgmr.msra.gmra.mrb[36].mxu0 %v14901_v45  ;;  %v1943_v45 = vrot.slane %v14923_v27, 5 }
  0xb0   : > { %17574 = vmatpush3.bf16.msra.mxu0 %v19087_v3  ;;  %17565 = vmatprep.mubr.bf16.mxu0 %v14902_v53  ;;  %v20243_v3 = vld [vmem:[%s19555_s6 + $0x38] sm:$0xe] }
  0xb1   : > { %17575 = vmatprep.subr.bf16.mxu0 %v19088_v50  ;;  %v19094_v53 = vld [vmem:[%s24920_s1 + $0x178] sm:$0xff]   ;;  %v14944_v20 = vrot.slane %v20243_v3, 9  ;;  %v1944_v32 = vsel %vm19744_vm7, %v14942_v41, %v1943_v45  ;;  %v14949_v41 = vrot.slane %v20302_v29, 9  ;;  %v2204_v45 = vshrl.u32 %v20222_v6, 16 }
  0xb4   : > { %17576 = vmatpush3.bf16.msra.mxu0 %v19088_v50  ;;  %v1947_v50 = vrot.slane %v14925_v30, 5 }
  0xb5   : > { %17577 = vmatprep.subr.bf16.mxu0 %v19089_v46 }
  0xb6   : > { %v1948_v17 = vsel %vm19744_vm7, %v14943_v25, %v1947_v50 }
  0xb7   : > { %17566 = vmatmul.mubr.bf16.gmra.mrb[4].mxu0 %v14903_v63  ;;  %v2186_v63 = vshrl.u32 %v20200_v22, 16  ;;  %v19095_v22 = vld [vmem:[%s24920_s1 + $0x180] sm:$0xff]   ;;  %v14968_v61 = vcombine.low %v1944_v32, %v1948_v17  ;;  %v2213_v32 = vshrl.u32 %v20312_v59, 16  ;;  %v2206_v17 = vrot.slane %v2204_v45, 5 }
  0xb8   : > { %17578 = vmatpush3.bf16.msra.mxu0 %v19089_v46  ;;  %17569 = vmatprep.mubr.bf16.mxu0 %v14904_v36  ;;  %v2168_v46 = vshrl.u32 %v20196_v1, 16  ;;  %v14967_v36 = vcombine.low %v1936_v60, %v1940_v43  ;;  %v2177_v1 = vshrl.u32 %v20269_v2, 16  ;;  %v1971_v60 = vrot.slane %v14937_v13, 5  ;;  %v19099_v45 = vld [vmem:[%s24920_s1 + $0x1a0] sm:$0xff]  }
  0xb9   : > { %17579 = vmatprep.subr.bf16.mxu0 %v19090_v57  ;;  %v2188_v56 = vrot.slane %v2186_v63, 5  ;;  %v2225_v43 = vshll.u32 %v20226_v10, 16  ;;  %v20335_v63 = vld [vmem:[%s19555_s6 + $0x2c] sm:$0x3] }
  0xba   : > { %v2179_v27 = vrot.slane %v2177_v1, 5  ;;  %v2252_v8 = vshll.u32 %v20335_v63, 16 }
  0xbc   : > { %17580 = vmatpush3.bf16.msra.mxu0 %v19090_v57  ;;  %v2170_v57 = vrot.slane %v2168_v46, 5  ;;  %v2183_v46 = vor.u32 %v2182_v38, %v2179_v27 }
  0xbd   : > { %17581 = vmatprep.subr.bf16.mxu0 %v19091_v62 }
  0xbe   : > { %v2174_v30 = vor.u32 %v2173_v12, %v2170_v57  ;;  %v2227_v57 = vrot.slane %v2225_v43, 6 }
  0xbf   : > { %17570 = vmatmul.mubr.bf16.gmra.mrb[40].mxu0 %v14905_v39  ;;  %v14948_v39 = vrot.slane %v20287_v47, 9 }
  0xc0   : > { %17582 = vmatpush3.bf16.msra.mxu0 %v19091_v62  ;;  %17589 = vmatprep.mubr.bf16.mxu0 %v14966_v0  ;;  %v14947_v62 = vrot.slane %v20274_v24, 9  ;;  %v1952_v0 = vsel %vm19744_vm7, %v14944_v20, %v1951_v49  ;;  %v20320_v20 = vld [vmem:[%s19555_s6 + $0x24] sm:$0x3]  ;;  %v2207_v49 = vshll.u32 %v20222_v6, 16  ;;  %v2175_v6 = vrot.slane %v2174_v30, 4 }
  0xc1   : > { %17583 = vmatprep.subr.bf16.mxu0 %v19092_v23  ;;  %v14969_v25 = vcombine.low %v1952_v0, %v1956_v16  ;;  %v2231_v26 = vshrl.u32 %v20320_v20, 16  ;;  %v2234_v12 = vshll.u32 %v20320_v20, 16  ;;  %v20358_v0 = vrot.slane %v2216_v52, 6  ;;  %v20361_v16 = vld [vmem:[%s19555_s6 + $0x34] sm:$0x3] }
  0xc2   : > { %v1964_v11 = vsel %vm19744_vm7, %v14947_v62, %v1963_v9  ;;  %v2209_v1 = vrot.slane %v2207_v49, 6  ;;  %v1972_v62 = vsel %vm19744_vm7, %v14949_v41, %v1971_v60  ;;  %v20352_v9 = vrot.slane %v2213_v32, 5  ;;  %v20372_v49 = vld [vmem:[%s19555_s6 + $0x3c] sm:$0x3]  ;;  %v19100_v32 = vld [vmem:[%s24920_s1 + $0x1a8] sm:$0xff]  }
  0xc3   : > { %v20365_v27 = vrot.slane %v2234_v12, 6  ;;  %v2279_v60 = vshll.u32 %v20243_v3, 16 }
  0xc4   : > { %17584 = vmatpush3.bf16.msra.mxu0 %v19092_v23  ;;  %v2191_v23 = vrot.slane %v2189_v21, 6  ;;  %v2240_v21 = vshrl.u32 %v20234_v5, 16 }
  0xc5   : > { %17585 = vmatprep.subr.bf16.mxu0 %v19093_v40  ;;  %v2281_v12 = vrot.slane %v2279_v60, 6 }
  0xc6   : > { %v2192_v50 = vor.u32 %v2191_v23, %v2188_v56  ;;  %v2184_v56 = vsel %vm19599_vm2, %v2175_v6, %v2183_v46  ;;  %v2210_v23 = vor.u32 %v2209_v1, %v2206_v17  ;;  %v2312_v1 = vshrl.u32 %v20265_v18, 16 }
  0xc8   : > { %17586 = vmatpush3.bf16.msra.mxu0 %v19093_v40  ;;  %v2200_v40 = vrot.slane %v2198_v15, 6  ;;  %v2261_v15 = vshll.u32 %v20238_v19, 16  ;;  %v2242_v19 = vrot.slane %v2240_v21, 5  ;;  %v2211_v43 = vrot.slane %v2210_v23, 4 }
  0xc9   : > { %17587 = vmatprep.subr.bf16.mxu0 %v19094_v53  ;;  %v2297_v21 = vshll.u32 %v20247_v7, 16 }
  0xca   : > { %v2201_v51 = vor.u32 %v2200_v40, %v2197_v34  ;;  %v2263_v30 = vrot.slane %v2261_v15, 6  ;;  %v2254_v40 = vrot.slane %v2252_v8, 6  ;;  %v20393_v15 = vld [vmem:[%s19555_s6 + $0x4c] sm:$0x3]  ;;  %v2330_v8 = vshrl.u32 %v20274_v24, 16 }
  0xcb   : > { %v2324_v23 = vshll.u32 %v20393_v15, 16 }
  0xcc   : > { %17588 = vmatpush3.bf16.msra.mxu0 %v19094_v53  ;;  %v2222_v53 = vshrl.u32 %v20226_v10, 16  ;;  %v2243_v10 = vshll.u32 %v20234_v5, 16  ;;  %v2249_v5 = vshrl.u32 %v20335_v63, 16 }
  0xcd   : > { %17601 = vmatprep.subr.bf16.mxu0 %v19095_v22  ;;  %v2326_v60 = vrot.slane %v2324_v23, 6 }
  0xce   : > { %v2224_v35 = vrot.slane %v2222_v53, 5  ;;  %v2245_v13 = vrot.slane %v2243_v10, 6  ;;  %v2251_v34 = vrot.slane %v2249_v5, 5  ;;  %v20400_v5 = vld [vmem:[%s19555_s6 + $0x54] sm:$0x3] }
  0xcf   : > { %17590 = vmatmul.mubr.bf16.vlgmr.msra.gmra.mrb[44].mxu0 %v14967_v36  ;;  %v2193_v36 = vrot.slane %v2192_v50, 4 }
  0xd0   : > { %17602 = vmatpush3.bf16.msra.mxu0 %v19095_v22  ;;  %17593 = vmatprep.mubr.bf16.mxu0 %v14968_v61  ;;  %v14970_v22 = vcombine.low %v1960_v48, %v1964_v11  ;;  %v1968_v61 = vsel %vm19744_vm7, %v14948_v39, %v1967_v44  ;;  %v20363_v44 = vrot.slane %v2231_v26, 5  ;;  %v2228_v38 = vor.u32 %v2227_v57, %v2224_v35 }
  0xd1   : > { %17603 = vmatprep.subr.bf16.mxu0 %v19096_v42  ;;  %v2202_v39 = vsel %vm19599_vm2, %v2193_v36, %v2201_v51  ;;  %v14971_v41 = vcombine.low %v1968_v61, %v1972_v62  ;;  %v2246_v50 = vor.u32 %v2245_v13, %v2242_v19  ;;  %v2270_v48 = vshll.u32 %v20361_v16, 16  ;;  %v20382_v51 = vld [vmem:[%s19555_s6 + $0x44] sm:$0x3] }
  0xd2   : > { %v15008_v53 = vcombine.low %v2184_v56, %v2202_v39  ;;  %v2276_v11 = vshrl.u32 %v20243_v3, 16  ;;  %v2237_v6 = vor.u32 %v20365_v27, %v20363_v44  ;;  %v2229_v17 = vrot.slane %v2228_v38, 4 }
  0xd3   : > { %v2255_v52 = vor.u32 %v2254_v40, %v2251_v34  ;;  %v2294_v3 = vshrl.u32 %v20247_v7, 16  ;;  %v2247_v10 = vrot.slane %v2246_v50, 4  ;;  %v2315_v35 = vshll.u32 %v20265_v18, 16 }
  0xd4   : > { %17604 = vmatpush3.bf16.msra.mxu0 %v19096_v42  ;;  %v2260_v42 = vrot.slane %v2258_v54, 5  ;;  %v2272_v26 = vrot.slane %v2270_v48, 6  ;;  %v2278_v57 = vrot.slane %v2276_v11, 5  ;;  %v2285_v54 = vshrl.u32 %v20372_v49, 16 }
  0xd5   : > { %17605 = vmatprep.subr.bf16.mxu0 %v19097_v31  ;;  %v2288_v61 = vshll.u32 %v20372_v49, 16  ;;  %v2333_v18 = vshll.u32 %v20274_v24, 16  ;;  %v2299_v62 = vrot.slane %v2297_v21, 6  ;;  %v2306_v19 = vshll.u32 %v20382_v51, 16 }
  0xd6   : > { %v2264_v46 = vor.u32 %v2263_v30, %v2260_v42  ;;  %v2314_v13 = vrot.slane %v2312_v1, 5  ;;  %v2317_v56 = vrot.slane %v2315_v35, 6  ;;  %v2321_v39 = vshrl.u32 %v20393_v15, 16  ;;  %v19103_v35 = vld [vmem:[%s24920_s1 + $0x1c0] sm:$0xff]  }
  0xd7   : > { %17594 = vmatmul.mubr.bf16.gmra.mrb[4].mxu0 %v14969_v25  ;;  %v2267_v25 = vshrl.u32 %v20361_v16, 16  ;;  %v2339_v24 = vshrl.u32 %v20400_v5, 16  ;;  %v2342_v27 = vshll.u32 %v20400_v5, 16  ;;  %v2238_v42 = vsel %vm19599_vm2, %v2229_v17, %v2237_v6 }
  0xd8   : > { %17606 = vmatpush3.bf16.msra.mxu0 %v19097_v31  ;;  %17597 = vmatprep.mubr.bf16.mxu0 %v14970_v22  ;;  %v2219_v31 = vor.u32 %v20358_v0, %v20352_v9  ;;  %v19101_v22 = vld [vmem:[%s24920_s1 + $0x1b0] sm:$0xff]   ;;  %v2265_v7 = vrot.slane %v2264_v46, 4  ;;  %v2303_v9 = vshrl.u32 %v20382_v51, 16  ;;  %v2256_v30 = vsel %vm19599_vm2, %v2247_v10, %v2255_v52 }
  0xd9   : > { %17607 = vmatprep.subr.bf16.mxu0 %v19098_v4  ;;  %v2269_v36 = vrot.slane %v2267_v25, 5  ;;  %v2332_v38 = vrot.slane %v2330_v8, 5  ;;  %v2335_v34 = vrot.slane %v2333_v18, 6  ;;  %v2282_v40 = vor.u32 %v2281_v12, %v2278_v57  ;;  %v19102_v25 = vld [vmem:[%s24920_s1 + $0x1b8] sm:$0xff]  }
  0xda   : > { %v2220_v0 = vsel %vm19599_vm2, %v2211_v43, %v2219_v31  ;;  %v2305_v50 = vrot.slane %v2303_v9, 5  ;;  %v2308_v48 = vrot.slane %v2306_v19, 6  ;;  %v2323_v11 = vrot.slane %v2321_v39, 5  ;;  %v20420_v43 = vld [vmem:[%s19555_s6 + $0x5c] sm:$0x3]  ;;  %v19104_v39 = vld [vmem:[%s24920_s1 + $0x1c8] sm:$0xff]  }
  0xdb   : > { %v2273_v44 = vor.u32 %v2272_v26, %v2269_v36  ;;  %v2318_v6 = vor.u32 %v2317_v56, %v2314_v13  ;;  %v2341_v46 = vrot.slane %v2339_v24, 5  ;;  %v2336_v17 = vor.u32 %v2335_v34, %v2332_v38 }
  0xdc   : > { %17608 = vmatpush3.bf16.msra.mxu0 %v19098_v4  ;;  %v2296_v4 = vrot.slane %v2294_v3, 5  ;;  %v2348_v52 = vshrl.u32 %v20287_v47, 16  ;;  %v2351_v3 = vshll.u32 %v20287_v47, 16  ;;  %v15009_v21 = vcombine.low %v2220_v0, %v2238_v42 }
  0xdd   : > { %17609 = vmatprep.subr.bf16.mxu0 %v19099_v45  ;;  %v2274_v31 = vsel %vm19599_vm2, %v2265_v7, %v2273_v44  ;;  %v2283_v10 = vrot.slane %v2282_v40, 4  ;;  %v2366_v36 = vshrl.u32 %v20302_v29, 16  ;;  %v2369_v1 = vshll.u32 %v20302_v29, 16  ;;  %v20432_v7 = vld [vmem:[%s19555_s6 + $0x64] sm:$0x3] }
  0xde   : > { %v15010_v26 = vcombine.low %v2256_v30, %v2274_v31  ;;  %v2327_v47 = vor.u32 %v2326_v60, %v2323_v11  ;;  %v2360_v8 = vshll.u32 %v20420_v43, 16  ;;  %v2337_v18 = vrot.slane %v2336_v17, 4 }
  0xdf   : > { %17598 = vmatmul.mubr.bf16.gmra.mrb[48].mxu0 %v14971_v41  ;;  %v2287_v41 = vrot.slane %v2285_v54, 5  ;;  %v2309_v54 = vor.u32 %v2308_v48, %v2305_v50  ;;  %v2350_v29 = vrot.slane %v2348_v52, 5  ;;  %v2368_v9 = vrot.slane %v2366_v36, 5  ;;  %v20456_v50 = vld [vmem:[%s19555_s6 + $0x10] sm:$0xc]  ;;  %v19106_v48 = vld [vmem:[%s24920_s1 + $0x1d8] sm:$0xff]  }
  0xe0   : > { %17610 = vmatpush3.bf16.msra.mxu0 %v19099_v45  ;;  %17617 = vmatprep.mubr.bf16.mxu0 %v15008_v53  ;;  %v2290_v45 = vrot.slane %v2288_v61, 6  ;;  %v2300_v53 = vor.u32 %v2299_v62, %v2296_v4  ;;  %v2319_v61 = vrot.slane %v2318_v6, 4  ;;  %v2353_v62 = vrot.slane %v2351_v3, 6  ;;  %v20473_v36 = vld [vmem:[%s19555_s6 + $0x20] sm:$0xc] }
  0xe1   : > { %17611 = vmatprep.subr.bf16.mxu0 %v19100_v32  ;;  %v2371_v19 = vrot.slane %v2369_v1, 6  ;;  %v2375_v13 = vshrl.u32 %v20432_v7, 16  ;;  %v2378_v56 = vshll.u32 %v20432_v7, 16  ;;  %v2362_v42 = vrot.slane %v2360_v8, 6 }
  0xe2   : > { %v2291_v57 = vor.u32 %v2290_v45, %v2287_v41  ;;  %v2301_v12 = vrot.slane %v2300_v53, 4  ;;  %v2328_v44 = vsel %vm19599_vm2, %v2319_v61, %v2327_v47  ;;  %v2354_v30 = vor.u32 %v2353_v62, %v2350_v29  ;;  %v19105_v41 = vld [vmem:[%s24920_s1 + $0x1d0] sm:$0xff]   ;;  %v20453_v45 = vld [vmem:[%s19555_s6 + $0x8] sm:$0xc] }
  0xe3   : > { %v2372_v38 = vor.u32 %v2371_v19, %v2368_v9  ;;  %v2377_v34 = vrot.slane %v2375_v13, 5  ;;  %v2380_v40 = vrot.slane %v2378_v56, 6  ;;  %v15035_v17 = vrot.slane %v20456_v50, 10  ;;  %v19108_v47 = vld [vmem:[%s24920_s1 + $0x1e8] sm:$0xff]   ;;  %v19109_v62 = vld [vmem:[%s24920_s1 + $0x1f0] sm:$0xff]  }
  0xe4   : > { %17612 = vmatpush3.bf16.msra.mxu0 %v19100_v32  ;;  %v2344_v32 = vrot.slane %v2342_v27, 6  ;;  %v2292_v23 = vsel %vm19599_vm2, %v2283_v10, %v2291_v57  ;;  %v2310_v0 = vsel %vm19599_vm2, %v2301_v12, %v2309_v54  ;;  %v2355_v11 = vrot.slane %v2354_v30, 4  ;;  %v20470_v10 = vld [vmem:[%s19555_s6 + $0x18] sm:$0xc] }
  0xe5   : > { %17613 = vmatprep.subr.bf16.mxu0 %v19101_v22  ;;  %v2373_v31 = vrot.slane %v2372_v38, 4  ;;  %v2381_v6 = vor.u32 %v2380_v40, %v2377_v34  ;;  %v2607_v52 = vrot.slane %v20277_v28, 6  ;;  %v15036_v12 = vrot.slane %v20470_v10, 10  ;;  %v20503_v9 = vld [vmem:[%s19555_s6 + $0x38] sm:$0xc] }
  0xe6   : > { %v2345_v4 = vor.u32 %v2344_v32, %v2341_v46  ;;  %v15034_v46 = vrot.slane %v20453_v45, 10  ;;  %v2603_v32 = vrot.slane %v20269_v2, 6  ;;  %v19107_v2 = vld [vmem:[%s24920_s1 + $0x1e0] sm:$0xff]   ;;  %v2611_v54 = vrot.slane %v20312_v59, 6  ;;  %v20536_v40 = vld [vmem:[%s19555_s6 + $0x50] sm:$0xc] }
  0xe7   : > { %v2608_v1 = vsel %vm19802_vm8, %v15035_v17, %v2607_v52  ;;  %v15037_v61 = vrot.slane %v20473_v36, 10  ;;  %v2615_v8 = vrot.slane %v20320_v20, 6  ;;  %v2623_v59 = vrot.slane %v20361_v16, 6  ;;  %v20506_v20 = vld [vmem:[%s19555_s6 + $0x40] sm:$0xc] }
  0xe8   : > { %17614 = vmatpush3.bf16.msra.mxu0 %v19101_v22  ;;  %v2357_v22 = vshrl.u32 %v20420_v43, 16  ;;  %v2346_v24 = vsel %vm19599_vm2, %v2337_v18, %v2345_v4  ;;  %v2604_v28 = vsel %vm19802_vm8, %v15034_v46, %v2603_v32  ;;  %v2619_v4 = vrot.slane %v20335_v63, 6 }
  0xe9   : > { %17615 = vmatprep.subr.bf16.mxu0 %v19102_v25  ;;  %v15012_v53 = vcombine.low %v2328_v44, %v2346_v24  ;;  %v2612_v16 = vsel %vm19802_vm8, %v15036_v12, %v2611_v54  ;;  %v2616_v56 = vsel %vm19802_vm8, %v15037_v61, %v2615_v8  ;;  %v20526_v44 = vld [vmem:[%s19555_s6 + $0xc] sm:$0x7]  ;;  %v2627_v30 = vrot.slane %v20372_v49, 6  ;;  %v20548_v49 = vld [vmem:[%s19555_s6 + $0x14] sm:$0x7] }
  0xea   : > { %v2359_v27 = vrot.slane %v2357_v22, 5  ;;  %v15062_v22 = vcombine.low %v2604_v28, %v2608_v1  ;;  %v15041_v38 = vrot.slane %v20506_v20, 10  ;;  %v2631_v34 = vrot.slane %v20382_v51, 6 }
  0xeb   : > { %v2862_v51 = vshrl.u32 %v20456_v50, 16  ;;  %v2853_v46 = vshrl.u32 %v20526_v44, 16  ;;  %v2856_v32 = vshll.u32 %v20526_v44, 16  ;;  %v2871_v28 = vshrl.u32 %v20548_v49, 16 }
  0xec   : > { %17616 = vmatpush3.bf16.msra.mxu0 %v19102_v25  ;;  %v15011_v25 = vcombine.low %v2292_v23, %v2310_v0  ;;  %v2363_v60 = vor.u32 %v2362_v42, %v2359_v27  ;;  %v20523_v0 = vld [vmem:[%s19555_s6 + $0x48] sm:$0xc]  ;;  %v19110_v27 = vld [vmem:[%s24920_s1 + $0x1f8] sm:$0xff]   ;;  %v15040_v42 = vrot.slane %v20503_v9, 10  ;;  %v20562_v52 = vsel %vm19802_vm8, %v15041_v38, %v2631_v34 }
  0xed   : > { %17629 = vmatprep.subr.bf16.mxu0 %v19103_v35  ;;  %v2874_v1 = vshll.u32 %v20548_v49, 16  ;;  %v2880_v54 = vshrl.u32 %v20470_v10, 16  ;;  %v2883_v61 = vshll.u32 %v20470_v10, 16  ;;  %v2858_v8 = vrot.slane %v2856_v32, 7 }
  0xee   : > { %v2364_v3 = vsel %vm19599_vm2, %v2355_v11, %v2363_v60  ;;  %v20545_v60 = vld [vmem:[%s19555_s6 + $0x58] sm:$0xc]  ;;  %v20558_v17 = vsel %vm19802_vm8, %v15040_v42, %v2627_v30  ;;  %v2643_v10 = vrot.slane %v20420_v43, 6  ;;  %v19113_v43 = vld [vmem:[%s24920_s1 + $0x210] sm:$0xff]   ;;  %v2647_v34 = vrot.slane %v20432_v7, 6 }
  0xef   : > { %17618 = vmatmul.mubr.bf16.vlgmr.msra.gmra.mrb[52].mxu0 %v15009_v21  ;;  %v2382_v21 = vsel %vm19599_vm2, %v2373_v31, %v2381_v6  ;;  %v2865_v31 = vshll.u32 %v20456_v50, 16  ;;  %v15042_v6 = vrot.slane %v20523_v0, 10  ;;  %v15043_v50 = vrot.slane %v20536_v40, 10 }
  0xf0   : > { %17630 = vmatpush3.bf16.msra.mxu0 %v19103_v35  ;;  %17621 = vmatprep.mubr.bf16.mxu0 %v15010_v26  ;;  %v20483_v35 = vld [vmem:[%s19555_s6 + $0x28] sm:$0xc]  ;;  %v20486_v26 = vld [vmem:[%s19555_s6 + $0x30] sm:$0xc]  ;;  %v15013_v57 = vcombine.low %v2364_v3, %v2382_v21  ;;  %v2639_v3 = vrot.slane %v20400_v5, 6  ;;  %v15065_v5 = vcombine.low %v20558_v17, %v20562_v52  ;;  %v2885_v42 = vrot.slane %v2883_v61, 7 }
  0xf1   : > { %17631 = vmatprep.subr.bf16.mxu0 %v19104_v39  ;;  %v15038_v18 = vrot.slane %v20483_v35, 10  ;;  %v15039_v29 = vrot.slane %v20486_v26, 10  ;;  %v20567_v21 = vld [vmem:[%s19555_s6 + $0x1c] sm:$0x7]  ;;  %v2867_v12 = vrot.slane %v2865_v31, 7 }
  0xf2   : > { %v2892_v30 = vshll.u32 %v20567_v21, 16 }
  0xf3   : > { %v2624_v23 = vsel %vm19802_vm8, %v15039_v29, %v2623_v59  ;;  %v20582_v29 = vld [vmem:[%s19555_s6 + $0x60] sm:$0xc]  ;;  %v2898_v59 = vshrl.u32 %v20473_v36, 16 }
  0xf4   : > { %17632 = vmatpush3.bf16.msra.mxu0 %v19104_v39  ;;  %v20518_v39 = vsel %vm19802_vm8, %v15038_v18, %v2619_v4  ;;  %v19112_v18 = vld [vmem:[%s24920_s1 + $0x208] sm:$0xff]   ;;  %v15045_v38 = vrot.slane %v20582_v29, 10  ;;  %v2894_v52 = vrot.slane %v2892_v30, 7 }
  0xf5   : > { %17633 = vmatprep.subr.bf16.mxu0 %v19105_v41  ;;  %v15064_v11 = vcombine.low %v20518_v39, %v2624_v23  ;;  %v20588_v39 = vld [vmem:[%s19555_s6 + $0x24] sm:$0x7]  ;;  %v2889_v23 = vshrl.u32 %v20567_v21, 16 }
  0xf7   : > { %17622 = vmatmul.mubr.bf16.gmra.mrb[4].mxu0 %v15011_v25  ;;  %v2847_v25 = vshll.u32 %v20453_v45, 16 }
  0xf8   : > { %17634 = vmatpush3.bf16.msra.mxu0 %v19105_v41  ;;  %17625 = vmatprep.mubr.bf16.mxu0 %v15012_v53  ;;  %v2844_v41 = vshrl.u32 %v20453_v45, 16  ;;  %v15063_v53 = vcombine.low %v2612_v16, %v2616_v56  ;;  %v2635_v45 = vrot.slane %v20393_v15, 6  ;;  %v2873_v16 = vrot.slane %v2871_v28, 6  ;;  %v19114_v28 = vld [vmem:[%s24920_s1 + $0x218] sm:$0xff]  }
  0xf9   : > { %17635 = vmatprep.subr.bf16.mxu0 %v19106_v48  ;;  %v2876_v56 = vrot.slane %v2874_v1, 7 }
  0xfa   : > { %v2846_v15 = vrot.slane %v2844_v41, 6  ;;  %v2636_v4 = vsel %vm19802_vm8, %v15042_v6, %v2635_v45  ;;  %v2891_v6 = vrot.slane %v2889_v23, 6  ;;  %v2916_v45 = vshrl.u32 %v20483_v35, 16 }
  0xfb   : > { %v2877_v17 = vor.u32 %v2876_v56, %v2873_v16 }
  0xfc   : > { %17636 = vmatpush3.bf16.msra.mxu0 %v19106_v48  ;;  %v19111_v48 = vld [vmem:[%s24920_s1 + $0x200] sm:$0xff]   ;;  %v2918_v61 = vrot.slane %v2916_v45, 6 }
  0xfd   : > { %17637 = vmatprep.subr.bf16.mxu0 %v19107_v2  ;;  %v20642_v45 = vld [vmem:[%s19555_s6 + $0x44] sm:$0x7] }
  0xff   : > { %17626 = vmatmul.mubr.bf16.gmra.mrb[56].mxu0 %v15013_v57  ;;  %v2864_v57 = vrot.slane %v2862_v51, 6  ;;  %v2907_v51 = vshrl.u32 %v20588_v39, 16 }
 0x100   : > { %17638 = vmatpush3.bf16.msra.mxu0 %v19107_v2  ;;  %17645 = vmatprep.mubr.bf16.mxu0 %v15062_v22  ;;  %v2849_v2 = vrot.slane %v2847_v25, 7  ;;  %v2855_v22 = vrot.slane %v2853_v46, 6  ;;  %v2900_v25 = vrot.slane %v2898_v59, 6  ;;  %v2919_v46 = vshll.u32 %v20483_v35, 16 }
 0x101   : > { %17639 = vmatprep.subr.bf16.mxu0 %v19108_v47  ;;  %v2648_v35 = vsel %vm19802_vm8, %v15045_v38, %v2647_v34 }
 0x102   : > { %v20508_v63 = vpop.f32.mrb[0].mxu0  ;;  %v2859_v41 = vor.u32 %v2858_v8, %v2855_v22  ;;  %v2921_v22 = vrot.slane %v2919_v46, 7  ;;  %v2955_v46 = vshll.u32 %v20503_v9, 16 }
 0x103   : > { %v722_v19 = vpop.f32.mrb[1].mxu0 }
 0x104   : > { %v20510_v13 = vpop.f32.mrb[2].mxu0  ;;  %17640 = vmatpush3.bf16.msra.mxu0 %v19108_v47  ;;  %v15044_v47 = vrot.slane %v20545_v60, 10  ;;  %v2850_v19 = vor.u32 %v2849_v2, %v2846_v15  ;;  %v2934_v15 = vshrl.u32 %v20486_v26, 16  ;;  %v2937_v2 = vshll.u32 %v20486_v26, 16 }
 0x105   : > { %v725_v24 = vpop.f32.mrb[3].mxu0  ;;  %17641 = vmatprep.subr.bf16.mxu0 %v19109_v62 }
 0x106   : > { %v2868_v24 = vor.u32 %v2867_v12, %v2864_v57  ;;  %v2851_v31 = vrot.slane %v2850_v19, 4  ;;  %v2909_v57 = vrot.slane %v2907_v51, 6  ;;  %v2936_v19 = vrot.slane %v2934_v15, 6 }
 0x107   : > { %v2939_v16 = vrot.slane %v2937_v2, 7  ;;  %v2952_v51 = vshrl.u32 %v20503_v9, 16  ;;  %v2988_v2 = vshrl.u32 %v20523_v0, 16  ;;  %v2991_v9 = vshll.u32 %v20523_v0, 16 }
 0x108   : > { %17642 = vmatpush3.bf16.msra.mxu0 %v19109_v62  ;;  %v2901_v62 = vshll.u32 %v20473_v36, 16  ;;  %v2640_v36 = vsel %vm19802_vm8, %v15043_v50, %v2639_v3  ;;  %v2869_v32 = vrot.slane %v2868_v24, 4  ;;  %v2644_v3 = vsel %vm19802_vm8, %v15044_v47, %v2643_v10 }
 0x109   : > { %17643 = vmatprep.subr.bf16.mxu0 %v19110_v27  ;;  %v15066_v50 = vcombine.low %v2636_v4, %v2640_v36  ;;  %v2860_v26 = vsel %vm19992_vm11, %v2851_v31, %v2859_v41  ;;  %v2895_v10 = vor.u32 %v2894_v52, %v2891_v6  ;;  %v15067_v41 = vcombine.low %v2644_v3, %v2648_v35 }
 0x10a   : > { %v2970_v52 = vshrl.u32 %v20506_v20, 16  ;;  %v2954_v35 = vrot.slane %v2952_v51, 6 }
 0x10c   : > { %17644 = vmatpush3.bf16.msra.mxu0 %v19110_v27  ;;  %v2882_v27 = vrot.slane %v2880_v54, 6  ;;  %v20616_v54 = vld [vmem:[%s19555_s6 + $0x34] sm:$0x7] }
 0x10d   : > { %17657 = vmatprep.subr.bf16.mxu0 %v19111_v48  ;;  %v2946_v56 = vshll.u32 %v20616_v54, 16 }
 0x10e   : > { %v2886_v7 = vor.u32 %v2885_v42, %v2882_v27  ;;  %v20632_v42 = vld [vmem:[%s19555_s6 + $0x3c] sm:$0x7] }
 0x10f   : > { %17646 = vmatmul.mubr.bf16.vlgmr.msra.gmra.mrb[60].mxu0 %v15063_v53  ;;  %v2903_v53 = vrot.slane %v2901_v62, 7  ;;  %v19115_v62 = vld [vmem:[%s24920_s1 + $0x220] sm:$0xff]   ;;  %v2948_v6 = vrot.slane %v2946_v56, 7 }
 0x110   : > { %17658 = vmatpush3.bf16.msra.mxu0 %v19111_v48  ;;  %17649 = vmatprep.mubr.bf16.mxu0 %v15064_v11  ;;  %v2910_v48 = vshll.u32 %v20588_v39, 16  ;;  %v20602_v11 = vld [vmem:[%s19555_s6 + $0x2c] sm:$0x7]  ;;  %v2887_v4 = vrot.slane %v2886_v7, 4  ;;  %v2961_v7 = vshrl.u32 %v20632_v42, 16 }
 0x111   : > { %17659 = vmatprep.subr.bf16.mxu0 %v19112_v18  ;;  %v2904_v1 = vor.u32 %v2903_v53, %v2900_v25  ;;  %v2925_v47 = vshrl.u32 %v20602_v11, 16  ;;  %v2928_v8 = vshll.u32 %v20602_v11, 16 }
 0x112   : > { %v2912_v12 = vrot.slane %v2910_v48, 7  ;;  %v20638_v53 = vsel %vm19992_vm11, %v2887_v4, %v2895_v10  ;;  %v2940_v48 = vor.u32 %v2939_v16, %v2936_v19  ;;  %v2979_v4 = vshrl.u32 %v20642_v45, 16  ;;  %v20672_v10 = vld [vmem:[%s19555_s6 + $0x54] sm:$0x7] }
 0x113   : > { %v2905_v24 = vrot.slane %v2904_v1, 4  ;;  %v2927_v36 = vrot.slane %v2925_v47, 6  ;;  %v2930_v38 = vrot.slane %v2928_v8, 7  ;;  %v2964_v1 = vshll.u32 %v20632_v42, 16 }
 0x114   : > { %17660 = vmatpush3.bf16.msra.mxu0 %v19112_v18  ;;  %v2878_v18 = vsel %vm19992_vm11, %v2869_v32, %v2877_v17  ;;  %v17459_v59 = vpop.f32.mrb[8].mxu0  ;;  %v2913_v27 = vor.u32 %v2912_v12, %v2909_v57  ;;  %v19116_v32 = vld [vmem:[%s24920_s1 + $0x228] sm:$0xff]   ;;  %v3006_v12 = vshrl.u32 %v20536_v40, 16  ;;  %v2957_v47 = vrot.slane %v2955_v46, 7 }
 0x115   : > { %17661 = vmatprep.subr.bf16.mxu0 %v19113_v43  ;;  %v20629_v23 = vpop.f32.mrb[9].mxu0  ;;  %v15104_v25 = vcombine.low %v2860_v26, %v2878_v18  ;;  %v2931_v15 = vor.u32 %v2930_v38, %v2927_v36  ;;  %v20662_v57 = vld [vmem:[%s19555_s6 + $0x4c] sm:$0x7]  ;;  %v20668_v8 = vrot.slane %v2961_v7, 6  ;;  %v2972_v26 = vrot.slane %v2970_v52, 6  ;;  %v19118_v36 = vld [vmem:[%s24920_s1 + $0x238] sm:$0xff]  }
 0x116   : > { %v17460_v30 = vpop.f32.mrb[10].mxu0  ;;  %v20650_v17 = vsel %vm19992_vm11, %v2905_v24, %v2913_v27  ;;  %v2990_v19 = vrot.slane %v2988_v2, 6  ;;  %v2993_v16 = vrot.slane %v2991_v9, 7  ;;  %v2966_v24 = vrot.slane %v2964_v1, 7 }
 0x117   : > { %17650 = vmatmul.mubr.bf16.gmra.mrb[4].mxu0 %v15065_v5  ;;  %v2943_v5 = vshrl.u32 %v20616_v54, 16  ;;  %v20634_v34 = vpop.f32.mrb[11].mxu0  ;;  %v15105_v0 = vcombine.low %v20638_v53, %v20650_v17  ;;  %v3008_v27 = vrot.slane %v3006_v12, 6  ;;  %v3000_v51 = vshll.u32 %v20662_v57, 16 }
 0x118   : > { %17662 = vmatpush3.bf16.msra.mxu0 %v19113_v43  ;;  %17653 = vmatprep.mubr.bf16.mxu0 %v15066_v50  ;;  %v2922_v43 = vor.u32 %v2921_v22, %v2918_v61  ;;  %v2973_v50 = vshll.u32 %v20506_v20, 16  ;;  %v3009_v20 = vshll.u32 %v20536_v40, 16  ;;  %v2941_v61 = vrot.slane %v2940_v48, 4 }
 0x119   : > { %17663 = vmatprep.subr.bf16.mxu0 %v19114_v28  ;;  %v2945_v31 = vrot.slane %v2943_v5, 6  ;;  %v3015_v46 = vshrl.u32 %v20672_v10, 16  ;;  %v3027_v9 = vshll.u32 %v20545_v60, 16  ;;  %v3002_v12 = vrot.slane %v3000_v51, 7 }
 0x11a   : > { %v2923_v3 = vrot.slane %v2922_v43, 4  ;;  %v2975_v18 = vrot.slane %v2973_v50, 7  ;;  %v3011_v30 = vrot.slane %v3009_v20, 7  ;;  %v2994_v50 = vor.u32 %v2993_v16, %v2990_v19  ;;  %v20702_v20 = vld [vmem:[%s19555_s6 + $0x64] sm:$0x7] }
 0x11b   : > { %v2949_v22 = vor.u32 %v2948_v6, %v2945_v31  ;;  %v2981_v6 = vrot.slane %v2979_v4, 6  ;;  %v3029_v19 = vrot.slane %v3027_v9, 7 }
 0x11c   : > { %17664 = vmatpush3.bf16.msra.mxu0 %v19114_v28  ;;  %v19117_v28 = vld [vmem:[%s24920_s1 + $0x230] sm:$0xff]   ;;  %v20676_v40 = vsel %vm19992_vm11, %v2923_v3, %v2931_v15  ;;  %v2976_v7 = vor.u32 %v2975_v18, %v2972_v26  ;;  %v3024_v3 = vshrl.u32 %v20545_v60, 16  ;;  %v2967_v15 = vor.u32 %v2966_v24, %v20668_v8 }
 0x11d   : > { %17665 = vmatprep.subr.bf16.mxu0 %v19115_v62  ;;  %v2950_v38 = vsel %vm19992_vm11, %v2941_v61, %v2949_v22  ;;  %v3012_v2 = vor.u32 %v3011_v30, %v3008_v27  ;;  %v3045_v61 = vshll.u32 %v20582_v29, 16  ;;  %v19119_v22 = vld [vmem:[%s24920_s1 + $0x240] sm:$0xff]   ;;  %v2995_v4 = vrot.slane %v2994_v50, 4 }
 0x11e   : > { %v2977_v18 = vrot.slane %v2976_v7, 4  ;;  %v15106_v24 = vcombine.low %v20676_v40, %v2950_v38  ;;  %v3054_v30 = vshll.u32 %v20702_v20, 16  ;;  %v15119_v7 = vld [vmem:[%s19555_s6 + $0x10] sm:$0x8] }
 0x11f   : > { %17654 = vmatmul.mubr.bf16.gmra.mrb[64].mxu0 %v15067_v41  ;;  %v2958_v41 = vor.u32 %v2957_v47, %v2954_v35  ;;  %v3017_v47 = vrot.slane %v3015_v46, 6  ;;  %v3047_v27 = vrot.slane %v3045_v61, 7 }
 0x120   : > { %17666 = vmatpush3.bf16.msra.mxu0 %v19115_v62  ;;  %17673 = vmatprep.mubr.bf16.mxu0 %v15104_v25  ;;  %v2982_v62 = vshll.u32 %v20642_v45, 16  ;;  %v2997_v25 = vshrl.u32 %v20662_v57, 16 }
 0x121   : > { %17667 = vmatprep.subr.bf16.mxu0 %v19116_v32  ;;  %v2959_v35 = vrot.slane %v2958_v41, 4 }
 0x122   : > { %v17479_v59 = vpop.f32.mrb[12].mxu0  ;;  %v2984_v52 = vrot.slane %v2982_v62, 7  ;;  %v2999_v1 = vrot.slane %v2997_v25, 6  ;;  %v3013_v62 = vrot.slane %v3012_v2, 4  ;;  %v19122_v2 = vld [vmem:[%s24920_s1 + $0x258] sm:$0xff]  }
 0x123   : > { %v20680_v5 = vadd.f32 %v17479_v59, %v20508_v63  ;;  %v875_v56 = vpop.f32.mrb[13].mxu0  ;;  %v20690_v63 = vld [vmem:[%s19555_s6 + $0x5c] sm:$0x7]  ;;  %v3026_v59 = vrot.slane %v3024_v3, 6 }
 0x124   : > { %v17480_v43 = vpop.f32.mrb[14].mxu0  ;;  %17668 = vmatpush3.bf16.msra.mxu0 %v19116_v32  ;;  %v3018_v32 = vshll.u32 %v20672_v10, 16  ;;  %v3033_v26 = vshrl.u32 %v20690_v63, 16  ;;  %v3036_v60 = vshll.u32 %v20690_v63, 16  ;;  %v3051_v56 = vshrl.u32 %v20702_v20, 16 }
 0x125   : > { %v20693_v48 = vadd.f32 %v17480_v43, %v20510_v13  ;;  %v878_v31 = vpop.f32.mrb[15].mxu0  ;;  %17669 = vmatprep.subr.bf16.mxu0 %v19117_v28  ;;  %v3042_v13 = vshrl.u32 %v20582_v29, 16  ;;  %v19120_v29 = vld [vmem:[%s24920_s1 + $0x248] sm:$0xff]   ;;  %v3003_v43 = vor.u32 %v3002_v12, %v2999_v1  ;;  %v15131_v1 = vrot.slane %v15119_v7, 11  ;;  %v19127_v7 = vld [vmem:[%s24920_s1 + $0x280] sm:$0xff]  }
 0x126   : > { %v3020_v8 = vrot.slane %v3018_v32, 7  ;;  %v3035_v25 = vrot.slane %v3033_v26, 6  ;;  %v3038_v51 = vrot.slane %v3036_v60, 7  ;;  %v15118_v31 = vld [vmem:[%s19555_s6 + $0x8] sm:$0x8]  ;;  %v3053_v46 = vrot.slane %v3051_v56, 6 }
 0x127   : > { %v3044_v16 = vrot.slane %v3042_v13, 6  ;;  %v3056_v32 = vrot.slane %v3054_v30, 7  ;;  %v3004_v53 = vsel %vm19992_vm11, %v2995_v4, %v3003_v43  ;;  %v15130_v3 = vrot.slane %v15118_v31, 11  ;;  %v15122_v56 = vld [vmem:[%s19555_s6 + $0x28] sm:$0x8] }
 0x128   : > { %17670 = vmatpush3.bf16.msra.mxu0 %v19117_v28  ;;  %v2985_v28 = vor.u32 %v2984_v52, %v2981_v6  ;;  %v3021_v41 = vor.u32 %v3020_v8, %v3017_v47  ;;  %v2968_v6 = vsel %vm19992_vm11, %v2959_v35, %v2967_v15  ;;  %v19121_v52 = vld [vmem:[%s24920_s1 + $0x250] sm:$0xff]   ;;  %v3039_v13 = vor.u32 %v3038_v51, %v3035_v25 }
 0x129   : > { %17671 = vmatprep.subr.bf16.mxu0 %v19118_v36  ;;  %v3048_v38 = vor.u32 %v3047_v27, %v3044_v16  ;;  %v3279_v35 = vrot.slane %v20526_v44, 7  ;;  %v3057_v8 = vor.u32 %v3056_v32, %v3053_v46  ;;  %v3283_v60 = vrot.slane %v20548_v49, 7  ;;  %v19123_v49 = vld [vmem:[%s24920_s1 + $0x260] sm:$0xff]  }
 0x12a   : > { %v2986_v40 = vsel %vm19992_vm11, %v2977_v18, %v2985_v28  ;;  %v3022_v17 = vsel %vm19992_vm11, %v3013_v62, %v3021_v41  ;;  %v15120_v62 = vld [vmem:[%s19555_s6 + $0x18] sm:$0x8]  ;;  %v15121_v16 = vld [vmem:[%s19555_s6 + $0x20] sm:$0x8]  ;;  %v3287_v51 = vrot.slane %v20567_v21, 7  ;;  %v3295_v46 = vrot.slane %v20602_v11, 7 }
 0x12b   : > { %v15107_v50 = vcombine.low %v2968_v6, %v2986_v40  ;;  %v3049_v47 = vrot.slane %v3048_v38, 4  ;;  %v3284_v28 = vsel %vm20128_vm14, %v15131_v1, %v3283_v60  ;;  %v15132_v41 = vrot.slane %v15120_v62, 11  ;;  %v20830_v62 = vld [vmem:[%s19555_s6 + $0x2c] sm:$0x1] }
 0x12c   : > { %17672 = vmatpush3.bf16.msra.mxu0 %v19118_v36  ;;  %v3030_v36 = vor.u32 %v3029_v19, %v3026_v59  ;;  %v19125_v19 = vld [vmem:[%s24920_s1 + $0x270] sm:$0xff]   ;;  %v15133_v31 = vrot.slane %v15121_v16, 11  ;;  %v3291_v6 = vrot.slane %v20588_v39, 7  ;;  %v15134_v40 = vrot.slane %v15122_v56, 11 }
 0x12d   : > { %17685 = vmatprep.subr.bf16.mxu0 %v19119_v22  ;;  %v3299_v39 = vrot.slane %v20616_v54, 7  ;;  %v3315_v60 = vrot.slane %v20672_v10, 7 }
 0x12e   : > { %v3031_v9 = vrot.slane %v3030_v36, 4  ;;  %v3292_v32 = vsel %vm20128_vm14, %v15133_v31, %v3291_v6  ;;  %v3296_v11 = vsel %vm20128_vm14, %v15134_v40, %v3295_v46  ;;  %v20849_v6 = vld [vmem:[%s19555_s6 + $0x3c] sm:$0x1]  ;;  %v20852_v40 = vld [vmem:[%s19555_s6 + $0x40] sm:$0xe] }
 0x12f   : > { %17674 = vmatmul.mubr.bf16.vlgmr.msra.gmra.mrb[68].mxu0 %v15105_v0 }
 0x130   : > { %17686 = vmatpush3.bf16.msra.mxu0 %v19119_v22  ;;  %17677 = vmatprep.mubr.bf16.mxu0 %v15106_v24  ;;  %v15108_v22 = vcombine.low %v3004_v53, %v3022_v17  ;;  %v3040_v44 = vsel %vm19992_vm11, %v3031_v9, %v3039_v13  ;;  %v15123_v24 = vld [vmem:[%s19555_s6 + $0x30] sm:$0x8]  ;;  %v15125_v53 = vld [vmem:[%s19555_s6 + $0x40] sm:$0x8]  ;;  %v15126_v17 = vld [vmem:[%s19555_s6 + $0x48] sm:$0x8] }
 0x131   : > { %17687 = vmatprep.subr.bf16.mxu0 %v19120_v29  ;;  %v15135_v21 = vrot.slane %v15123_v24, 11  ;;  %v19128_v9 = vld [vmem:[%s24920_s1 + $0x288] sm:$0xff]   ;;  %v15137_v1 = vrot.slane %v15125_v53, 11 }
 0x132   : > { %v17487_v0 = vpop.f32.mrb[16].mxu0 }
 0x133   : > { %v907_v15 = vpop.f32.mrb[17].mxu0  ;;  %v3300_v54 = vsel %vm20128_vm14, %v15135_v21, %v3299_v39  ;;  %v15127_v0 = vld [vmem:[%s19555_s6 + $0x50] sm:$0x8]  ;;  %v20859_v21 = vld [vmem:[%s19555_s6 + $0x44] sm:$0x1] }
 0x134   : > { %v20737_v12 = vadd.f32 %v907_v15, %v20629_v23  ;;  %v17488_v61 = vpop.f32.mrb[18].mxu0  ;;  %17688 = vmatpush3.bf16.msra.mxu0 %v19120_v29  ;;  %v3058_v23 = vsel %vm19992_vm11, %v3049_v47, %v3057_v8  ;;  %v19124_v29 = vld [vmem:[%s24920_s1 + $0x268] sm:$0xff]   ;;  %v15160_v13 = vcombine.low %v3296_v11, %v3300_v54  ;;  %v15138_v47 = vrot.slane %v15126_v17, 11 }
 0x135   : > { %v910_v26 = vpop.f32.mrb[19].mxu0  ;;  %17689 = vmatprep.subr.bf16.mxu0 %v19121_v52  ;;  %v15109_v4 = vcombine.low %v3040_v44, %v3058_v23  ;;  %v3307_v61 = vrot.slane %v20642_v45, 7  ;;  %v3311_v8 = vrot.slane %v20662_v57, 7  ;;  %v15173_v44 = vld [vmem:[%s19555_s6 + $0x14] sm:$0x1] }
 0x136   : > { %v20741_v18 = vadd.f32 %v910_v26, %v20634_v34  ;;  %v3280_v34 = vsel %vm20128_vm14, %v15130_v3, %v3279_v35  ;;  %v3303_v35 = vrot.slane %v20632_v42, 7  ;;  %v15139_v26 = vrot.slane %v15127_v0, 11  ;;  %v20808_v23 = vld [vmem:[%s19555_s6 + $0x18] sm:$0xe]  ;;  %v15175_v42 = vld [vmem:[%s19555_s6 + $0x1c] sm:$0x1] }
 0x137   : > { %17678 = vmatmul.mubr.bf16.gmra.mrb[4].mxu0 %v15107_v50  ;;  %v15158_v59 = vcombine.low %v3280_v34, %v3284_v28  ;;  %v15128_v50 = vld [vmem:[%s19555_s6 + $0x58] sm:$0x8]  ;;  %v19129_v45 = vld [vmem:[%s24920_s1 + $0x290] sm:$0xff]   ;;  %v20818_v57 = vld [vmem:[%s19555_s6 + $0x24] sm:$0x1]  ;;  %v3308_v28 = vsel %vm20128_vm14, %v15137_v1, %v3307_v61  ;;  %v3312_v16 = vsel %vm20128_vm14, %v15138_v47, %v3311_v8  ;;  %v3565_v31 = vrot.slane %v15175_v42, 5 }
 0x138   : > { %17690 = vmatpush3.bf16.msra.mxu0 %v19121_v52  ;;  %17681 = vmatprep.mubr.bf16.mxu0 %v15108_v22  ;;  %v15124_v52 = vld [vmem:[%s19555_s6 + $0x38] sm:$0x8]  ;;  %v20802_v22 = vld [vmem:[%s19555_s6 + $0x10] sm:$0xe]  ;;  %v15140_v34 = vrot.slane %v15128_v50, 11  ;;  %v3316_v56 = vsel %vm20128_vm14, %v15139_v26, %v3315_v60  ;;  %v19131_v1 = vld [vmem:[%s24920_s1 + $0x2a0] sm:$0xff]  }
 0x139   : > { %17691 = vmatprep.subr.bf16.mxu0 %v19122_v2  ;;  %v15136_v15 = vrot.slane %v15124_v52, 11  ;;  %v15196_v24 = vrot.slane %v20802_v22, 9  ;;  %v20866_v52 = vld [vmem:[%s19555_s6 + $0x48] sm:$0xe]  ;;  %v20869_v11 = vld [vmem:[%s19555_s6 + $0x4c] sm:$0x1] }
 0x13a   : > { %v20877_v50 = vld [vmem:[%s19555_s6 + $0x50] sm:$0xe]  ;;  %v3581_v47 = vrot.slane %v20849_v6, 5  ;;  %v15202_v8 = vrot.slane %v20852_v40, 9  ;;  %v3585_v26 = vrot.slane %v20859_v21, 5  ;;  %v15203_v60 = vrot.slane %v20866_v52, 9 }
 0x13b   : > { %v3304_v10 = vsel %vm20128_vm14, %v15136_v15, %v3303_v35  ;;  %v20890_v35 = vld [vmem:[%s19555_s6 + $0x58] sm:$0xe]  ;;  %v20905_v42 = vld [vmem:[%s19555_s6 + $0x5c] sm:$0x1] }
 0x13c   : > { %17692 = vmatpush3.bf16.msra.mxu0 %v19122_v2  ;;  %v20794_v2 = vld [vmem:[%s19555_s6 + $0x60] sm:$0x8] }
 0x13d   : > { %17693 = vmatprep.subr.bf16.mxu0 %v19123_v49 }
 0x13f   : > { %17682 = vmatmul.mubr.bf16.gmra.mrb[72].mxu0 %v15109_v4  ;;  %v3319_v4 = vrot.slane %v20690_v63, 7  ;;  %v3323_v63 = vrot.slane %v20702_v20, 7  ;;  %v19130_v20 = vld [vmem:[%s24920_s1 + $0x298] sm:$0xff]  }
 0x140   : > { %17694 = vmatpush3.bf16.msra.mxu0 %v19123_v49  ;;  %17701 = vmatprep.mubr.bf16.mxu0 %v15158_v59  ;;  %v20812_v49 = vld [vmem:[%s19555_s6 + $0x20] sm:$0xe]  ;;  %v15141_v59 = vrot.slane %v20794_v2, 11 }
 0x141   : > { %17695 = vmatprep.subr.bf16.mxu0 %v19124_v29  ;;  %v15198_v46 = vrot.slane %v20812_v49, 9  ;;  %v3320_v53 = vsel %vm20128_vm14, %v15140_v34, %v3319_v4  ;;  %v15204_v34 = vrot.slane %v20877_v50, 9  ;;  %v3838_v6 = vshrl.u32 %v20812_v49, 16 }
 0x142   : > { %v17507_v27 = vpop.f32.mrb[20].mxu0  ;;  %v3324_v15 = vsel %vm20128_vm14, %v15141_v59, %v3323_v63  ;;  %v19132_v59 = vld [vmem:[%s24920_s1 + $0x2a8] sm:$0xff]   ;;  %v3805_v63 = vshll.u32 %v20802_v22, 16 }
 0x143   : > { %v20765_v30 = vadd.f32 %v17507_v27, %v20680_v5  ;;  %v1132_v43 = vpop.f32.mrb[21].mxu0  ;;  %v19126_v5 = vld [vmem:[%s24920_s1 + $0x278] sm:$0xff]   ;;  %v20842_v27 = vld [vmem:[%s19555_s6 + $0x34] sm:$0x1]  ;;  %v15163_v4 = vcombine.low %v3320_v53, %v3324_v15 }
 0x144   : > { %v17508_v25 = vpop.f32.mrb[22].mxu0  ;;  %17696 = vmatpush3.bf16.msra.mxu0 %v19124_v29  ;;  %v20827_v29 = vld [vmem:[%s19555_s6 + $0x28] sm:$0xe]  ;;  %v20845_v43 = vld [vmem:[%s19555_s6 + $0x38] sm:$0xe]  ;;  %v3577_v2 = vrot.slane %v20842_v27, 5 }
 0x145   : > { %v20770_v36 = vadd.f32 %v17508_v25, %v20693_v48  ;;  %v1135_v38 = vpop.f32.mrb[23].mxu0  ;;  %17697 = vmatprep.subr.bf16.mxu0 %v19125_v19  ;;  %v3288_v48 = vsel %vm20128_vm14, %v15132_v41, %v3287_v51  ;;  %v3561_v25 = vrot.slane %v15173_v44, 5  ;;  %v15197_v51 = vrot.slane %v20808_v23, 9  ;;  %v19134_v27 = vld [vmem:[%s24920_s1 + $0x2b8] sm:$0xff]  }
 0x146   : > { %v15159_v3 = vcombine.low %v3288_v48, %v3292_v32  ;;  %v15162_v32 = vcombine.low %v3312_v16, %v3316_v56  ;;  %v15199_v17 = vrot.slane %v20827_v29, 9  ;;  %v3589_v44 = vrot.slane %v20869_v11, 5  ;;  %v20920_v16 = vld [vmem:[%s19555_s6 + $0x68] sm:$0xe] }
 0x147   : > { %v3566_v61 = vsel %vm19744_vm7, %v15197_v51, %v3565_v31  ;;  %v3802_v56 = vshrl.u32 %v20802_v22, 16  ;;  %v20929_v31 = vld [vmem:[%s19555_s6 + $0x14] sm:$0x3]  ;;  %v3892_v21 = vshrl.u32 %v20845_v43, 16 }
 0x148   : > { %17698 = vmatpush3.bf16.msra.mxu0 %v19125_v19  ;;  %v20833_v19 = vld [vmem:[%s19555_s6 + $0x30] sm:$0xe] }
 0x149   : > { %17699 = vmatprep.subr.bf16.mxu0 %v19126_v5  ;;  %v15200_v0 = vrot.slane %v20833_v19, 9  ;;  %v19133_v22 = vld [vmem:[%s24920_s1 + $0x2b0] sm:$0xff]   ;;  %v3877_v51 = vshll.u32 %v20833_v19, 16 }
 0x14c   : > { %17700 = vmatpush3.bf16.msra.mxu0 %v19126_v5  ;;  %v15161_v5 = vcombine.low %v3304_v10, %v3308_v28  ;;  %v20911_v28 = vld [vmem:[%s19555_s6 + $0x60] sm:$0xe]  ;;  %v21007_v10 = vld [vmem:[%s19555_s6 + $0x34] sm:$0x3] }
 0x14d   : > { %17713 = vmatprep.subr.bf16.mxu0 %v19127_v7 }
 0x14f   : > { %17702 = vmatmul.mubr.bf16.vlgmr.msra.gmra.mrb[76].mxu0 %v15159_v3 }
 0x150   : > { %17714 = vmatpush3.bf16.msra.mxu0 %v19127_v7  ;;  %17705 = vmatprep.mubr.bf16.mxu0 %v15160_v13  ;;  %v3569_v7 = vrot.slane %v20818_v57, 5  ;;  %v20887_v13 = vld [vmem:[%s19555_s6 + $0x54] sm:$0x1] }
 0x151   : > { %17715 = vmatprep.subr.bf16.mxu0 %v19128_v9  ;;  %v3593_v57 = vrot.slane %v20887_v13, 5 }
 0x152   : > { %v17515_v41 = vpop.f32.mrb[24].mxu0 }
 0x153   : > { %v1164_v38 = vpop.f32.mrb[25].mxu0  ;;  %v3823_v41 = vshll.u32 %v20808_v23, 16 }
 0x154   : > { %v20862_v39 = vadd.f32 %v1164_v38, %v20737_v12  ;;  %v17516_v48 = vpop.f32.mrb[26].mxu0  ;;  %17716 = vmatpush3.bf16.msra.mxu0 %v19128_v9  ;;  %v3573_v12 = vrot.slane %v20830_v62, 5  ;;  %v15201_v9 = vrot.slane %v20845_v43, 9  ;;  %v3841_v38 = vshll.u32 %v20812_v49, 16  ;;  %v20947_v49 = vld [vmem:[%s19555_s6 + $0x1c] sm:$0x3] }
 0x155   : > { %v1167_v54 = vpop.f32.mrb[27].mxu0  ;;  %17717 = vmatprep.subr.bf16.mxu0 %v19129_v45  ;;  %v3825_v15 = vrot.slane %v3823_v41, 6 }
 0x156   : > { %v20880_v3 = vadd.f32 %v1167_v54, %v20741_v18  ;;  %v3562_v18 = vsel %vm19744_vm7, %v15196_v24, %v3561_v25  ;;  %v3820_v24 = vshrl.u32 %v20808_v23, 16  ;;  %v20938_v23 = vsel %vm19744_vm7, %v15198_v46, %v3569_v7 }
 0x157   : > { %17706 = vmatmul.mubr.bf16.gmra.mrb[4].mxu0 %v15161_v5  ;;  %v15224_v62 = vcombine.low %v3562_v18, %v3566_v61  ;;  %v20942_v5 = vsel %vm19744_vm7, %v15199_v17, %v3573_v12  ;;  %v3807_v54 = vrot.slane %v3805_v63, 6  ;;  %v3811_v46 = vshrl.u32 %v20929_v31, 16  ;;  %v20952_v17 = vld [vmem:[%s19555_s6 + $0x24] sm:$0x3]  ;;  %v20957_v61 = vld [vmem:[%s19555_s6 + $0x6c] sm:$0x1] }
 0x158   : > { %17718 = vmatpush3.bf16.msra.mxu0 %v19129_v45  ;;  %17709 = vmatprep.mubr.bf16.mxu0 %v15162_v32  ;;  %v20914_v45 = vld [vmem:[%s19555_s6 + $0x64] sm:$0x1]  ;;  %v3804_v32 = vrot.slane %v3802_v56, 5  ;;  %v3822_v53 = vrot.slane %v3820_v24, 5  ;;  %v3814_v7 = vshll.u32 %v20929_v31, 16  ;;  %v15225_v18 = vcombine.low %v20938_v23, %v20942_v5 }
 0x159   : > { %17719 = vmatprep.subr.bf16.mxu0 %v19130_v20  ;;  %v20969_v24 = vsel %vm19744_vm7, %v15200_v0, %v3577_v2  ;;  %v20975_v41 = vsel %vm19744_vm7, %v15201_v9, %v3581_v47  ;;  %v3856_v0 = vshrl.u32 %v20827_v29, 16  ;;  %v3859_v2 = vshll.u32 %v20827_v29, 16 }
 0x15a   : > { %v3847_v47 = vshrl.u32 %v20952_v17, 16  ;;  %v3894_v5 = vrot.slane %v3892_v21, 5  ;;  %v3931_v21 = vshll.u32 %v20866_v52, 16 }
 0x15c   : > { %17720 = vmatpush3.bf16.msra.mxu0 %v19130_v20 }
 0x15d   : > { %17721 = vmatprep.subr.bf16.mxu0 %v19131_v1 }
 0x15f   : > { %17710 = vmatmul.mubr.bf16.gmra.mrb[80].mxu0 %v15163_v4  ;;  %v3840_v4 = vrot.slane %v3838_v6, 5  ;;  %v3832_v6 = vshll.u32 %v20947_v49, 16 }
 0x160   : > { %17722 = vmatpush3.bf16.msra.mxu0 %v19131_v1  ;;  %17729 = vmatprep.mubr.bf16.mxu0 %v15224_v62  ;;  %v3829_v1 = vshrl.u32 %v20947_v49, 16  ;;  %v3843_v62 = vrot.slane %v3841_v38, 6  ;;  %v20979_v38 = vld [vmem:[%s19555_s6 + $0x2c] sm:$0x3] }
 0x161   : > { %17723 = vmatprep.subr.bf16.mxu0 %v19132_v59 }
 0x162   : > { %v17535_v12 = vpop.f32.mrb[28].mxu0  ;;  %v3844_v20 = vor.u32 %v3843_v62, %v3840_v4  ;;  %v3858_v4 = vrot.slane %v3856_v0, 5  ;;  %v3861_v62 = vrot.slane %v3859_v2, 6  ;;  %v21025_v2 = vld [vmem:[%s19555_s6 + $0x3c] sm:$0x3] }
 0x163   : > { %v20961_v56 = vadd.f32 %v17535_v12, %v20765_v30  ;;  %v1545_v63 = vpop.f32.mrb[29].mxu0  ;;  %v3808_v12 = vor.u32 %v3807_v54, %v3804_v32  ;;  %v3850_v32 = vshll.u32 %v20952_v17, 16  ;;  %v3865_v54 = vshrl.u32 %v20979_v38, 16 }
 0x164   : > { %v17536_v30 = vpop.f32.mrb[30].mxu0  ;;  %17724 = vmatpush3.bf16.msra.mxu0 %v19132_v59  ;;  %v3826_v63 = vor.u32 %v3825_v15, %v3822_v53  ;;  %v3874_v59 = vshrl.u32 %v20833_v19, 16  ;;  %v3868_v53 = vshll.u32 %v20979_v38, 16  ;;  %v20998_v15 = vrot.slane %v3814_v7, 6 }
 0x165   : > { %v20987_v48 = vadd.f32 %v17536_v30, %v20770_v36  ;;  %v1548_v9 = vpop.f32.mrb[31].mxu0  ;;  %17725 = vmatprep.subr.bf16.mxu0 %v19133_v22  ;;  %v20996_v36 = vrot.slane %v3811_v46, 5  ;;  %v21000_v30 = vrot.slane %v3829_v1, 5  ;;  %v21004_v19 = vrot.slane %v3832_v6, 6  ;;  %v19135_v46 = vld [vmem:[%s24920_s1 + $0x2c0] sm:$0xff]  }
 0x166   : > { %v21002_v9 = vrot.slane %v3808_v12, 4  ;;  %v21012_v29 = vrot.slane %v3826_v63, 4  ;;  %v21014_v7 = vrot.slane %v3847_v47, 5  ;;  %v3876_v1 = vrot.slane %v3874_v59, 5  ;;  %v19136_v63 = vld [vmem:[%s24920_s1 + $0x2c8] sm:$0xff]  }
 0x167   : > { %v21016_v25 = vrot.slane %v3844_v20, 4  ;;  %v21018_v12 = vrot.slane %v3850_v32, 6  ;;  %v21020_v6 = vrot.slane %v3865_v54, 5  ;;  %v21022_v0 = vrot.slane %v3868_v53, 6  ;;  %v21051_v53 = vld [vmem:[%s19555_s6 + $0x44] sm:$0x3] }
 0x168   : > { %17726 = vmatpush3.bf16.msra.mxu0 %v19133_v22  ;;  %v3879_v22 = vrot.slane %v3877_v51, 6  ;;  %v15226_v47 = vcombine.low %v20969_v24, %v20975_v41  ;;  %v3586_v51 = vsel %vm19744_vm7, %v15202_v8, %v3585_v26  ;;  %v3883_v20 = vshrl.u32 %v21007_v10, 16 }
 0x169   : > { %17727 = vmatprep.subr.bf16.mxu0 %v19134_v27  ;;  %v3886_v59 = vshll.u32 %v21007_v10, 16  ;;  %v3590_v32 = vsel %vm19744_vm7, %v15203_v60, %v3589_v44  ;;  %v3862_v24 = vor.u32 %v3861_v62, %v3858_v4  ;;  %v3895_v41 = vshll.u32 %v20845_v43, 16 }
 0x16a   : > { %v3880_v54 = vor.u32 %v3879_v22, %v3876_v1  ;;  %v3901_v8 = vshrl.u32 %v21025_v2, 16  ;;  %v3904_v26 = vshll.u32 %v21025_v2, 16  ;;  %v15227_v11 = vcombine.low %v3586_v51, %v3590_v32  ;;  %v19138_v32 = vld [vmem:[%s24920_s1 + $0x2d8] sm:$0xff]  }
 0x16b   : > { %v3594_v43 = vsel %vm19744_vm7, %v15204_v34, %v3593_v57  ;;  %v24955_v60 = vrot.slane %v20905_v42, 5  ;;  %v24956_v44 = vrot.slane %v20890_v35, 9  ;;  %v3817_v62 = vor.u32 %v20998_v15, %v20996_v36  ;;  %v19137_v42 = vld [vmem:[%s24920_s1 + $0x2d0] sm:$0xff]  }
 0x16c   : > { %17728 = vmatpush3.bf16.msra.mxu0 %v19134_v27  ;;  %v21054_v27 = vld [vmem:[%s19555_s6 + $0x4c] sm:$0x3]  ;;  %v21073_v23 = vrot.slane %v3862_v24, 4  ;;  %v21075_v13 = vrot.slane %v3883_v20, 5  ;;  %v21080_v34 = vrot.slane %v3880_v54, 4  ;;  %v21082_v57 = vrot.slane %v3886_v59, 6 }
 0x16d   : > { %17741 = vmatprep.subr.bf16.mxu0 %v19135_v46  ;;  %v3598_v4 = vsel %vm19744_vm7, %v24956_v44, %v24955_v60  ;;  %v21084_v1 = vrot.slane %v3901_v8, 5  ;;  %v3910_v36 = vshrl.u32 %v20852_v40, 16  ;;  %v3913_v22 = vshll.u32 %v20852_v40, 16 }
 0x16e   : > { %v3922_v51 = vshll.u32 %v21051_v53, 16  ;;  %v3835_v59 = vor.u32 %v21004_v19, %v21000_v30  ;;  %v3928_v24 = vshrl.u32 %v20866_v52, 16  ;;  %v15228_v8 = vcombine.low %v3594_v43, %v3598_v4 }
 0x16f   : > { %17730 = vmatmul.mubr.bf16.vlgmr.msra.gmra.mrb[84].mxu0 %v15225_v18  ;;  %v3897_v18 = vrot.slane %v3895_v41, 6  ;;  %v3937_v41 = vshrl.u32 %v21054_v27, 16  ;;  %v3946_v60 = vshrl.u32 %v20877_v50, 16  ;;  %v3949_v30 = vshll.u32 %v20877_v50, 16 }
 0x170   : > { %17742 = vmatpush3.bf16.msra.mxu0 %v19135_v46  ;;  %17733 = vmatprep.mubr.bf16.mxu0 %v15226_v47  ;;  %v21087_v46 = vrot.slane %v3904_v26, 6  ;;  %v3919_v47 = vshrl.u32 %v21051_v53, 16  ;;  %v24957_v52 = vrot.slane %v20914_v45, 5  ;;  %v24959_v43 = vrot.slane %v20957_v61, 5 }
 0x171   : > { %17743 = vmatprep.subr.bf16.mxu0 %v19136_v63  ;;  %v3898_v26 = vor.u32 %v3897_v18, %v3894_v5  ;;  %v24960_v4 = vrot.slane %v20920_v16, 9  ;;  %v3818_v50 = vsel %vm19599_vm2, %v21002_v9, %v3817_v62  ;;  %v21128_v18 = vrot.slane %v3913_v22, 6  ;;  %v19139_v9 = vld [vmem:[%s24920_s1 + $0x2e0] sm:$0xff]  }
 0x172   : > { %v17543_v15 = vpop.f32.mrb[32].mxu0  ;;  %v21130_v61 = vrot.slane %v3919_v47, 5  ;;  %v21138_v62 = vrot.slane %v3922_v51, 6  ;;  %v21145_v22 = vrot.slane %v3937_v41, 5  ;;  %v3940_v47 = vshll.u32 %v21054_v27, 16 }
 0x173   : > { %v1577_v20 = vpop.f32.mrb[33].mxu0  ;;  %v3606_v5 = vsel %vm19744_vm7, %v24960_v4, %v24959_v43  ;;  %v3899_v45 = vrot.slane %v3898_v26, 4  ;;  %v21133_v15 = vld [vmem:[%s19555_s6 + $0x54] sm:$0x3]  ;;  %v21154_v26 = vld [vmem:[%s19555_s6 + $0x5c] sm:$0x3]  ;;  %v3889_v4 = vor.u32 %v21082_v57, %v21075_v13 }
 0x174   : > { %v21101_v40 = vadd.f32 %v1577_v20, %v20862_v39  ;;  %v17544_v54 = vpop.f32.mrb[34].mxu0  ;;  %17744 = vmatpush3.bf16.msra.mxu0 %v19136_v63  ;;  %v24958_v39 = vrot.slane %v20911_v28, 9  ;;  %v3948_v20 = vrot.slane %v3946_v60, 5  ;;  %v3955_v51 = vshrl.u32 %v21133_v15, 16  ;;  %v19142_v43 = vld [vmem:[%s24920_s1 + $0x2f8] sm:$0xff]  }
 0x175   : > { %v1580_v44 = vpop.f32.mrb[35].mxu0  ;;  %17745 = vmatprep.subr.bf16.mxu0 %v19137_v42  ;;  %v3853_v60 = vor.u32 %v21018_v12, %v21014_v7 }
 0x176   : > { %v21106_v19 = vadd.f32 %v1580_v44, %v20880_v3  ;;  %v3602_v63 = vsel %vm19744_vm7, %v24958_v39, %v24957_v52  ;;  %v3836_v3 = vsel %vm19599_vm2, %v21012_v29, %v3835_v59  ;;  %v21140_v29 = vrot.slane %v3928_v24, 5  ;;  %v19141_v52 = vld [vmem:[%s24920_s1 + $0x2f0] sm:$0xff]  }
 0x177   : > { %17734 = vmatmul.mubr.bf16.gmra.mrb[4].mxu0 %v15227_v11  ;;  %v21126_v11 = vrot.slane %v3910_v36, 5  ;;  %v3964_v36 = vshrl.u32 %v20890_v35, 16  ;;  %v3951_v59 = vrot.slane %v3949_v30, 6  ;;  %v15229_v54 = vcombine.low %v3602_v63, %v3606_v5 }
 0x178   : > { %17746 = vmatpush3.bf16.msra.mxu0 %v19137_v42  ;;  %17737 = vmatprep.mubr.bf16.mxu0 %v15228_v8  ;;  %v21142_v42 = vrot.slane %v3931_v21, 6  ;;  %v19140_v8 = vld [vmem:[%s24920_s1 + $0x2e8] sm:$0xff]   ;;  %v3958_v24 = vshll.u32 %v21133_v15, 16  ;;  %v15266_v21 = vcombine.low %v3818_v50, %v3836_v3  ;;  %v3967_v44 = vshll.u32 %v20890_v35, 16 }
 0x179   : > { %17747 = vmatprep.subr.bf16.mxu0 %v19138_v32  ;;  %v3966_v41 = vrot.slane %v3964_v36, 5  ;;  %v3871_v30 = vor.u32 %v21022_v0, %v21020_v6  ;;  %v3976_v39 = vshll.u32 %v21154_v26, 16  ;;  %v3854_v7 = vsel %vm19599_vm2, %v21016_v25, %v3853_v60 }
 0x17a   : > { %v3969_v6 = vrot.slane %v3967_v44, 6  ;;  %v3907_v5 = vor.u32 %v21087_v46, %v21084_v1  ;;  %v3982_v25 = vshrl.u32 %v20911_v28, 16  ;;  %v4000_v36 = vshrl.u32 %v20920_v16, 16 }
 0x17b   : > { %v3872_v12 = vsel %vm19599_vm2, %v21073_v23, %v3871_v30  ;;  %v21184_v23 = vld [vmem:[%s19555_s6 + $0x64] sm:$0x3]  ;;  %v3916_v57 = vor.u32 %v21128_v18, %v21126_v11  ;;  %v3934_v1 = vor.u32 %v21142_v42, %v21140_v29  ;;  %v3952_v46 = vor.u32 %v3951_v59, %v3948_v20  ;;  %v21203_v11 = vld [vmem:[%s19555_s6 + $0x6c] sm:$0x3] }
 0x17c   : > { %17748 = vmatpush3.bf16.msra.mxu0 %v19138_v32  ;;  %v3973_v32 = vshrl.u32 %v21154_v26, 16  ;;  %v15267_v13 = vcombine.low %v3854_v7, %v3872_v12  ;;  %v3957_v44 = vrot.slane %v3955_v51, 5  ;;  %v3960_v60 = vrot.slane %v3958_v24, 6  ;;  %v19144_v51 = vld [vmem:[%s24920_s1 + $0x308] sm:$0xff]  }
 0x17d   : > { %17749 = vmatprep.subr.bf16.mxu0 %v19139_v9  ;;  %v4003_v18 = vshll.u32 %v20920_v16, 16  ;;  %v3978_v42 = vrot.slane %v3976_v39, 6  ;;  %v3935_v20 = vrot.slane %v3934_v1, 4  ;;  %v3984_v59 = vrot.slane %v3982_v25, 5  ;;  %v21232_v1 = vld [vmem:[%s19555_s6 + $0x18] sm:$0xc] }
 0x17e   : > { %v3975_v29 = vrot.slane %v3973_v32, 5  ;;  %v4009_v30 = vshrl.u32 %v21203_v11, 16  ;;  %v3961_v7 = vor.u32 %v3960_v60, %v3957_v44 }
 0x17f   : > { %17738 = vmatmul.mubr.bf16.gmra.mrb[88].mxu0 %v15229_v54  ;;  %v3925_v54 = vor.u32 %v21138_v62, %v21130_v61  ;;  %v3994_v61 = vshll.u32 %v21184_v23, 16  ;;  %v3917_v62 = vrot.slane %v3916_v57, 4  ;;  %v4005_v39 = vrot.slane %v4003_v18, 6 }
 0x180   : > { %17750 = vmatpush3.bf16.msra.mxu0 %v19139_v9  ;;  %17757 = vmatprep.mubr.bf16.mxu0 %v15266_v21  ;;  %v3942_v21 = vrot.slane %v3940_v47, 6  ;;  %v3953_v47 = vrot.slane %v3952_v46, 4  ;;  %v3979_v12 = vor.u32 %v3978_v42, %v3975_v29  ;;  %v4011_v25 = vrot.slane %v4009_v30, 5  ;;  %v21242_v42 = vld [vmem:[%s19555_s6 + $0x20] sm:$0xc] }
 0x181   : > { %17751 = vmatprep.subr.bf16.mxu0 %v19140_v8  ;;  %v4245_v30 = vrot.slane %v20952_v17, 6 }
 0x182   : > { %v17563_v35 = vpop.f32.mrb[36].mxu0  ;;  %v3943_v32 = vor.u32 %v3942_v21, %v21145_v22 }
 0x183   : > { %v21173_v0 = vadd.f32 %v17563_v35, %v20961_v56  ;;  %v1814_v63 = vpop.f32.mrb[37].mxu0  ;;  %v3985_v56 = vshll.u32 %v20911_v28, 16  ;;  %v3890_v28 = vsel %vm19599_vm2, %v21080_v34, %v3889_v4  ;;  %v19143_v34 = vld [vmem:[%s24920_s1 + $0x300] sm:$0xff]   ;;  %v4012_v35 = vshll.u32 %v21203_v11, 16 }
 0x184   : > { %v17564_v50 = vpop.f32.mrb[38].mxu0  ;;  %17752 = vmatpush3.bf16.msra.mxu0 %v19140_v8  ;;  %v3970_v8 = vor.u32 %v3969_v6, %v3966_v41  ;;  %v4002_v41 = vrot.slane %v4000_v36, 5  ;;  %v3996_v63 = vrot.slane %v3994_v61, 6  ;;  %v3926_v4 = vsel %vm19599_vm2, %v3917_v62, %v3925_v54 }
 0x185   : > { %v21188_v3 = vadd.f32 %v17564_v50, %v20987_v48  ;;  %v1817_v9 = vpop.f32.mrb[39].mxu0  ;;  %17753 = vmatprep.subr.bf16.mxu0 %v19141_v52  ;;  %v3908_v48 = vsel %vm19599_vm2, %v3899_v45, %v3907_v5  ;;  %v3991_v45 = vshrl.u32 %v21184_v23, 16  ;;  %v3987_v24 = vrot.slane %v3985_v56, 6  ;;  %v21222_v56 = vld [vmem:[%s19555_s6 + $0x10] sm:$0xc] }
 0x186   : > { %v3971_v16 = vrot.slane %v3970_v8, 4  ;;  %v3944_v22 = vsel %vm19599_vm2, %v3935_v20, %v3943_v32  ;;  %v4014_v50 = vrot.slane %v4012_v35, 6  ;;  %v19145_v9 = vld [vmem:[%s24920_s1 + $0x310] sm:$0xff]   ;;  %v3962_v36 = vsel %vm19599_vm2, %v3953_v47, %v3961_v7  ;;  %v21248_v47 = vld [vmem:[%s19555_s6 + $0x28] sm:$0xc] }
 0x187   : > { %v3993_v6 = vrot.slane %v3991_v45, 5  ;;  %v3988_v5 = vor.u32 %v3987_v24, %v3984_v59  ;;  %v15292_v21 = vrot.slane %v21222_v56, 10  ;;  %v4237_v61 = vrot.slane %v20929_v31, 6  ;;  %v21278_v35 = vld [vmem:[%s19555_s6 + $0x48] sm:$0xc] }
 0x188   : > { %17754 = vmatpush3.bf16.msra.mxu0 %v19141_v52  ;;  %v15268_v52 = vcombine.low %v3890_v28, %v3908_v48  ;;  %v15269_v28 = vcombine.low %v3926_v4, %v3944_v22  ;;  %v19146_v48 = vld [vmem:[%s24920_s1 + $0x318] sm:$0xff]   ;;  %v4015_v29 = vor.u32 %v4014_v50, %v4011_v25  ;;  %v15293_v62 = vrot.slane %v21232_v1, 10  ;;  %v21302_v25 = vld [vmem:[%s19555_s6 + $0x50] sm:$0xc] }
 0x189   : > { %17755 = vmatprep.subr.bf16.mxu0 %v19142_v43  ;;  %v3989_v54 = vrot.slane %v3988_v5, 4  ;;  %v3997_v8 = vor.u32 %v3996_v63, %v3993_v6  ;;  %v4241_v20 = vrot.slane %v20947_v49, 6  ;;  %v19147_v49 = vld [vmem:[%s24920_s1 + $0x320] sm:$0xff]   ;;  %v4249_v32 = vrot.slane %v20979_v38, 6 }
 0x18a   : > { %v4253_v63 = vrot.slane %v21007_v10, 6  ;;  %v4257_v38 = vrot.slane %v21025_v2, 6  ;;  %v4261_v5 = vrot.slane %v21051_v53, 6  ;;  %v19149_v10 = vld [vmem:[%s24920_s1 + $0x330] sm:$0xff]  }
 0x18b   : > { %v3998_v59 = vsel %vm19599_vm2, %v3989_v54, %v3997_v8  ;;  %v4242_v24 = vsel %vm19802_vm8, %v15293_v62, %v4241_v20  ;;  %v4478_v54 = vshrl.u32 %v21222_v56, 16  ;;  %v4481_v8 = vshll.u32 %v21222_v56, 16  ;;  %v21343_v62 = vld [vmem:[%s19555_s6 + $0x1c] sm:$0x7]  ;;  %v19151_v20 = vld [vmem:[%s24920_s1 + $0x340] sm:$0xff]  }
 0x18c   : > { %17756 = vmatpush3.bf16.msra.mxu0 %v19142_v43  ;;  %v4006_v43 = vor.u32 %v4005_v39, %v4002_v41  ;;  %v15294_v41 = vrot.slane %v21242_v42, 10  ;;  %v21275_v39 = vld [vmem:[%s19555_s6 + $0x40] sm:$0xc] }
 0x18d   : > { %17769 = vmatprep.subr.bf16.mxu0 %v19143_v34  ;;  %v15298_v22 = vrot.slane %v21275_v39, 10 }
 0x18e   : > { %v21295_v2 = vsel %vm19802_vm8, %v15294_v41, %v4245_v30 }
 0x18f   : > { %17758 = vmatmul.mubr.bf16.vlgmr.msra.gmra.mrb[92].mxu0 %v15267_v13  ;;  %v3980_v13 = vsel %vm19599_vm2, %v3971_v16, %v3979_v12  ;;  %v21261_v16 = vld [vmem:[%s19555_s6 + $0x38] sm:$0xc]  ;;  %v19148_v12 = vld [vmem:[%s24920_s1 + $0x328] sm:$0xff]  }
 0x190   : > { %17770 = vmatpush3.bf16.msra.mxu0 %v19143_v34  ;;  %17761 = vmatprep.mubr.bf16.mxu0 %v15268_v52  ;;  %v15270_v18 = vcombine.low %v3962_v36, %v3980_v13  ;;  %v4007_v34 = vrot.slane %v4006_v43, 4  ;;  %v15295_v52 = vrot.slane %v21248_v47, 10  ;;  %v15297_v17 = vrot.slane %v21261_v16, 10 }
 0x191   : > { %17771 = vmatprep.subr.bf16.mxu0 %v19144_v51  ;;  %v15299_v43 = vrot.slane %v21278_v35, 10 }
 0x192   : > { %v17571_v57 = vpop.f32.mrb[40].mxu0  ;;  %v4016_v31 = vsel %vm19599_vm2, %v4007_v34, %v4015_v29  ;;  %v21299_v53 = vsel %vm19802_vm8, %v15295_v52, %v4249_v32  ;;  %v4496_v34 = vshrl.u32 %v21232_v1, 16  ;;  %v4499_v29 = vshll.u32 %v21232_v1, 16 }
 0x193   : > { %v1846_v46 = vpop.f32.mrb[41].mxu0  ;;  %v15271_v7 = vcombine.low %v3998_v59, %v4016_v31  ;;  %v21309_v57 = vld [vmem:[%s19555_s6 + $0x58] sm:$0xc]  ;;  %v4258_v56 = vsel %vm19802_vm8, %v15297_v17, %v4257_v38  ;;  %v4269_v1 = vrot.slane %v21133_v15, 6  ;;  %v4273_v31 = vrot.slane %v21154_v26, 6 }
 0x194   : > { %v21239_v44 = vadd.f32 %v1846_v46, %v21101_v40  ;;  %v17572_v60 = vpop.f32.mrb[42].mxu0  ;;  %17772 = vmatpush3.bf16.msra.mxu0 %v19144_v51  ;;  %v21258_v51 = vld [vmem:[%s19555_s6 + $0x30] sm:$0xc]  ;;  %v15301_v59 = vrot.slane %v21309_v57, 10  ;;  %v4498_v52 = vrot.slane %v4496_v34, 6  ;;  %v4501_v32 = vrot.slane %v4499_v29, 7 }
 0x195   : > { %v1849_v45 = vpop.f32.mrb[43].mxu0  ;;  %17773 = vmatprep.subr.bf16.mxu0 %v19145_v9  ;;  %v15296_v6 = vrot.slane %v21258_v51, 10  ;;  %v4508_v15 = vshll.u32 %v21343_v62, 16  ;;  %v4517_v17 = vshll.u32 %v21242_v42, 16  ;;  %v4281_v38 = vrot.slane %v21203_v11, 6 }
 0x196   : > { %v21251_v40 = vadd.f32 %v1849_v45, %v21106_v19  ;;  %v4238_v19 = vsel %vm19802_vm8, %v15292_v21, %v4237_v61  ;;  %v19150_v21 = vld [vmem:[%s24920_s1 + $0x338] sm:$0xff]   ;;  %v15300_v61 = vrot.slane %v21302_v25, 10  ;;  %v21378_v11 = vld [vmem:[%s19555_s6 + $0x68] sm:$0xc] }
 0x197   : > { %17762 = vmatmul.mubr.bf16.gmra.mrb[4].mxu0 %v15269_v28  ;;  %v15320_v4 = vcombine.low %v4238_v19, %v4242_v24  ;;  %v15321_v28 = vcombine.low %v21295_v2, %v21299_v53  ;;  %v4254_v60 = vsel %vm19802_vm8, %v15296_v6, %v4253_v63  ;;  %v4480_v19 = vrot.slane %v4478_v54, 6  ;;  %v21359_v6 = vld [vmem:[%s19555_s6 + $0x24] sm:$0x7] }
 0x198   : > { %17774 = vmatpush3.bf16.msra.mxu0 %v19145_v9  ;;  %17765 = vmatprep.mubr.bf16.mxu0 %v15270_v18  ;;  %v4265_v9 = vrot.slane %v21054_v27, 6  ;;  %v21327_v18 = vld [vmem:[%s19555_s6 + $0x14] sm:$0x7]  ;;  %v4483_v24 = vrot.slane %v4481_v8, 7  ;;  %v4514_v63 = vshrl.u32 %v21242_v42, 16  ;;  %v4502_v42 = vor.u32 %v4501_v32, %v4498_v52 }
 0x199   : > { %17775 = vmatprep.subr.bf16.mxu0 %v19146_v48  ;;  %v4487_v41 = vshrl.u32 %v21327_v18, 16  ;;  %v4490_v30 = vshll.u32 %v21327_v18, 16  ;;  %v4519_v8 = vrot.slane %v4517_v17, 7 }
 0x19a   : > { %v21339_v45 = vsel %vm19802_vm8, %v15299_v43, %v4265_v9  ;;  %v21369_v43 = vsel %vm19802_vm8, %v15300_v61, %v4269_v1  ;;  %v4516_v54 = vrot.slane %v4514_v63, 6  ;;  %v4550_v1 = vshrl.u32 %v21258_v51, 16 }
 0x19b   : > { %v4489_v2 = vrot.slane %v4487_v41, 6  ;;  %v4492_v53 = vrot.slane %v4490_v30, 7 }
 0x19c   : > { %17776 = vmatpush3.bf16.msra.mxu0 %v19146_v48  ;;  %v21314_v48 = vld [vmem:[%s19555_s6 + $0x60] sm:$0xc]  ;;  %v4520_v32 = vor.u32 %v4519_v8, %v4516_v54 }
 0x19d   : > { %17777 = vmatprep.subr.bf16.mxu0 %v19147_v49 }
 0x19f   : > { %17766 = vmatmul.mubr.bf16.gmra.mrb[96].mxu0 %v15271_v7  ;;  %v4505_v7 = vshrl.u32 %v21343_v62, 16 }
 0x1a0   : > { %17778 = vmatpush3.bf16.msra.mxu0 %v19147_v49  ;;  %17785 = vmatprep.mubr.bf16.mxu0 %v15320_v4  ;;  %v15302_v49 = vrot.slane %v21314_v48, 10  ;;  %v4277_v4 = vrot.slane %v21184_v23, 6  ;;  %v19152_v23 = vld [vmem:[%s24920_s1 + $0x348] sm:$0xff]  }
 0x1a1   : > { %17779 = vmatprep.subr.bf16.mxu0 %v19148_v12  ;;  %v4507_v9 = vrot.slane %v4505_v7, 6 }
 0x1a2   : > { %v17591_v50 = vpop.f32.mrb[44].mxu0  ;;  %v21395_v52 = vsel %vm19802_vm8, %v15302_v49, %v4277_v4  ;;  %v4571_v4 = vshll.u32 %v21261_v16, 16 }
 0x1a3   : > { %v21306_v36 = vadd.f32 %v17591_v50, %v21173_v0  ;;  %v2096_v13 = vpop.f32.mrb[45].mxu0  ;;  %v21372_v50 = vld [vmem:[%s19555_s6 + $0x2c] sm:$0x7] }
 0x1a4   : > { %v17592_v46 = vpop.f32.mrb[46].mxu0  ;;  %17780 = vmatpush3.bf16.msra.mxu0 %v19148_v12  ;;  %v15322_v12 = vcombine.low %v4254_v60, %v4258_v56  ;;  %v4523_v13 = vshrl.u32 %v21359_v6, 16  ;;  %v4541_v34 = vshrl.u32 %v21372_v50, 16  ;;  %v4544_v29 = vshll.u32 %v21372_v50, 16 }
 0x1a5   : > { %v21319_v27 = vadd.f32 %v17592_v46, %v21188_v3  ;;  %v2099_v0 = vpop.f32.mrb[47].mxu0  ;;  %17781 = vmatprep.subr.bf16.mxu0 %v19149_v10  ;;  %v21335_v3 = vsel %vm19802_vm8, %v15298_v22, %v4261_v5  ;;  %v4532_v5 = vshrl.u32 %v21248_v47, 16  ;;  %v4535_v22 = vshll.u32 %v21248_v47, 16 }
 0x1a6   : > { %v15323_v26 = vcombine.low %v21335_v3, %v21339_v45  ;;  %v4510_v47 = vrot.slane %v4508_v15, 7  ;;  %v4274_v46 = vsel %vm19802_vm8, %v15301_v59, %v4273_v31  ;;  %v4526_v0 = vshll.u32 %v21359_v6, 16  ;;  %v21398_v15 = vld [vmem:[%s19555_s6 + $0x34] sm:$0x7] }
 0x1a7   : > { %v4537_v60 = vrot.slane %v4535_v22, 7  ;;  %v15303_v56 = vrot.slane %v21378_v11, 10  ;;  %v4553_v59 = vshll.u32 %v21258_v51, 16  ;;  %v4493_v31 = vor.u32 %v4492_v53, %v4489_v2  ;;  %v21401_v51 = vld [vmem:[%s19555_s6 + $0x3c] sm:$0x7] }
 0x1a8   : > { %17782 = vmatpush3.bf16.msra.mxu0 %v19149_v10  ;;  %v4484_v10 = vor.u32 %v4483_v24, %v4480_v19  ;;  %v4503_v19 = vrot.slane %v4502_v42, 4  ;;  %v4511_v24 = vor.u32 %v4510_v47, %v4507_v9  ;;  %v4525_v41 = vrot.slane %v4523_v13, 6  ;;  %v19154_v42 = vld [vmem:[%s24920_s1 + $0x358] sm:$0xff]  }
 0x1a9   : > { %17783 = vmatprep.subr.bf16.mxu0 %v19150_v21  ;;  %v15324_v30 = vcombine.low %v21369_v43, %v4274_v46  ;;  %v4528_v7 = vrot.slane %v4526_v0, 7  ;;  %v4543_v17 = vrot.slane %v4541_v34, 6  ;;  %v4568_v22 = vshrl.u32 %v21261_v16, 16 }
 0x1aa   : > { %v4485_v61 = vrot.slane %v4484_v10, 4  ;;  %v4552_v2 = vrot.slane %v4550_v1, 6  ;;  %v4555_v49 = vrot.slane %v4553_v59, 7  ;;  %v4282_v9 = vsel %vm19802_vm8, %v15303_v56, %v4281_v38 }
 0x1ab   : > { %v4521_v16 = vrot.slane %v4520_v32, 4  ;;  %v4562_v46 = vshll.u32 %v21398_v15, 16  ;;  %v4577_v54 = vshrl.u32 %v21401_v51, 16  ;;  %v4529_v38 = vor.u32 %v4528_v7, %v4525_v41 }
 0x1ac   : > { %17784 = vmatpush3.bf16.msra.mxu0 %v19150_v21  ;;  %v4534_v21 = vrot.slane %v4532_v5, 6  ;;  %v4546_v5 = vrot.slane %v4544_v29, 7  ;;  %v4494_v47 = vsel %vm19992_vm11, %v4485_v61, %v4493_v31  ;;  %v4573_v34 = vrot.slane %v4571_v4, 7  ;;  %v19155_v29 = vld [vmem:[%s24920_s1 + $0x360] sm:$0xff]  }
 0x1ad   : > { %17797 = vmatprep.subr.bf16.mxu0 %v19151_v20  ;;  %v21431_v61 = vld [vmem:[%s19555_s6 + $0x44] sm:$0x7]  ;;  %v15325_v3 = vcombine.low %v21395_v52, %v4282_v9  ;;  %v4579_v1 = vrot.slane %v4577_v54, 6  ;;  %v21436_v59 = vsel %vm19992_vm11, %v4521_v16, %v4529_v38  ;;  %v4589_v52 = vshll.u32 %v21275_v39, 16 }
 0x1ae   : > { %v4538_v63 = vor.u32 %v4537_v60, %v4534_v21  ;;  %v4547_v0 = vor.u32 %v4546_v5, %v4543_v17  ;;  %v4580_v21 = vshll.u32 %v21401_v51, 16  ;;  %v4556_v60 = vor.u32 %v4555_v49, %v4552_v2 }
 0x1af   : > { %17786 = vmatmul.mubr.bf16.vlgmr.msra.gmra.mrb[100].mxu0 %v15321_v28  ;;  %v19153_v28 = vld [vmem:[%s24920_s1 + $0x350] sm:$0xff]   ;;  %v4595_v32 = vshrl.u32 %v21431_v61, 16  ;;  %v4604_v7 = vshrl.u32 %v21278_v35, 16  ;;  %v4625_v17 = vshll.u32 %v21302_v25, 16  ;;  %v4643_v2 = vshll.u32 %v21309_v57, 16 }
 0x1b0   : > { %17798 = vmatpush3.bf16.msra.mxu0 %v19151_v20  ;;  %17789 = vmatprep.mubr.bf16.mxu0 %v15322_v12  ;;  %v4539_v8 = vrot.slane %v4538_v63, 4  ;;  %v4582_v31 = vrot.slane %v4580_v21, 7  ;;  %v4557_v41 = vrot.slane %v4556_v60, 4  ;;  %v4622_v63 = vshrl.u32 %v21302_v25, 16 }
 0x1b1   : > { %17799 = vmatprep.subr.bf16.mxu0 %v19152_v23  ;;  %v21468_v9 = vrot.slane %v4595_v32, 6  ;;  %v4627_v38 = vrot.slane %v4625_v17, 7 }
 0x1b2   : > { %v17599_v20 = vpop.f32.mrb[48].mxu0  ;;  %v4624_v16 = vrot.slane %v4622_v63, 6  ;;  %v4661_v63 = vshll.u32 %v21314_v48, 16 }
 0x1b3   : > { %v2128_v12 = vpop.f32.mrb[49].mxu0 }
 0x1b4   : > { %v21405_v10 = vadd.f32 %v2128_v12, %v21239_v44  ;;  %v17600_v43 = vpop.f32.mrb[50].mxu0  ;;  %17800 = vmatpush3.bf16.msra.mxu0 %v19152_v23  ;;  %v4512_v44 = vsel %vm19992_vm11, %v4503_v19, %v4511_v24  ;;  %v4559_v23 = vshrl.u32 %v21398_v15, 16  ;;  %v4586_v19 = vshrl.u32 %v21275_v39, 16  ;;  %v19156_v24 = vld [vmem:[%s24920_s1 + $0x368] sm:$0xff]   ;;  %v19157_v39 = vld [vmem:[%s24920_s1 + $0x370] sm:$0xff]  }
 0x1b5   : > { %v2131_v53 = vpop.f32.mrb[51].mxu0  ;;  %17801 = vmatprep.subr.bf16.mxu0 %v19153_v28  ;;  %v15362_v45 = vcombine.low %v4494_v47, %v4512_v44  ;;  %v4607_v12 = vshll.u32 %v21278_v35, 16  ;;  %v4640_v43 = vshrl.u32 %v21309_v57, 16  ;;  %v4583_v35 = vor.u32 %v4582_v31, %v4579_v1 }
 0x1b6   : > { %v21419_v13 = vadd.f32 %v2131_v53, %v21251_v40  ;;  %v4570_v40 = vrot.slane %v4568_v22, 6  ;;  %v4561_v56 = vrot.slane %v4559_v23, 6  ;;  %v21456_v22 = vld [vmem:[%s19555_s6 + $0x54] sm:$0x7]  ;;  %v4588_v4 = vrot.slane %v4586_v19, 6  ;;  %v19158_v19 = vld [vmem:[%s24920_s1 + $0x378] sm:$0xff]  }
 0x1b7   : > { %17790 = vmatmul.mubr.bf16.gmra.mrb[4].mxu0 %v15323_v26  ;;  %v4564_v26 = vrot.slane %v4562_v46, 7  ;;  %v21466_v53 = vld [vmem:[%s19555_s6 + $0x5c] sm:$0x7]  ;;  %v4598_v57 = vshll.u32 %v21431_v61, 16  ;;  %v4606_v47 = vrot.slane %v4604_v7, 6  ;;  %v4609_v44 = vrot.slane %v4607_v12, 7 }
 0x1b8   : > { %17802 = vmatpush3.bf16.msra.mxu0 %v19153_v28  ;;  %17793 = vmatprep.mubr.bf16.mxu0 %v15324_v30  ;;  %v21440_v28 = vsel %vm19992_vm11, %v4539_v8, %v4547_v0  ;;  %v4574_v20 = vor.u32 %v4573_v34, %v4570_v40  ;;  %v21447_v30 = vld [vmem:[%s19555_s6 + $0x4c] sm:$0x7]  ;;  %v4642_v8 = vrot.slane %v4640_v43, 6  ;;  %v4645_v0 = vrot.slane %v4643_v2, 7  ;;  %v21493_v7 = vld [vmem:[%s19555_s6 + $0x64] sm:$0x7] }
 0x1b9   : > { %17803 = vmatprep.subr.bf16.mxu0 %v19154_v42  ;;  %v4565_v5 = vor.u32 %v4564_v26, %v4561_v56  ;;  %v15363_v49 = vcombine.low %v21436_v59, %v21440_v28  ;;  %v4613_v23 = vshrl.u32 %v21447_v30, 16  ;;  %v4616_v40 = vshll.u32 %v21447_v30, 16  ;;  %v15376_v59 = vld [vmem:[%s19555_s6 + $0x10] sm:$0x8] }
 0x1ba   : > { %v4575_v25 = vrot.slane %v4574_v20, 4  ;;  %v4631_v34 = vshrl.u32 %v21456_v22, 16  ;;  %v4649_v26 = vshrl.u32 %v21466_v53, 16  ;;  %v4652_v1 = vshll.u32 %v21466_v53, 16  ;;  %v19161_v28 = vld [vmem:[%s24920_s1 + $0x390] sm:$0xff]  }
 0x1bb   : > { %v21474_v54 = vsel %vm19992_vm11, %v4557_v41, %v4565_v5  ;;  %v4615_v20 = vrot.slane %v4613_v23, 6  ;;  %v4646_v32 = vor.u32 %v4645_v0, %v4642_v8  ;;  %v4658_v12 = vshrl.u32 %v21314_v48, 16 }
 0x1bc   : > { %17804 = vmatpush3.bf16.msra.mxu0 %v19154_v42  ;;  %v4591_v42 = vrot.slane %v4589_v52, 7  ;;  %v4628_v52 = vor.u32 %v4627_v38, %v4624_v16  ;;  %v4633_v17 = vrot.slane %v4631_v34, 6  ;;  %v4676_v43 = vshrl.u32 %v21378_v11, 16  ;;  %v19160_v38 = vld [vmem:[%s24920_s1 + $0x388] sm:$0xff]  }
 0x1bd   : > { %17805 = vmatprep.subr.bf16.mxu0 %v19155_v29  ;;  %v4670_v23 = vshll.u32 %v21493_v7, 16  ;;  %v4647_v16 = vrot.slane %v4646_v32, 4 }
 0x1be   : > { %v4592_v41 = vor.u32 %v4591_v42, %v4588_v4  ;;  %v4654_v4 = vrot.slane %v4652_v1, 7  ;;  %v4679_v42 = vshll.u32 %v21378_v11, 16  ;;  %v4678_v0 = vrot.slane %v4676_v43, 6 }
 0x1bf   : > { %17794 = vmatmul.mubr.bf16.gmra.mrb[104].mxu0 %v15325_v3  ;;  %v4584_v3 = vsel %vm19992_vm11, %v4575_v25, %v4583_v35  ;;  %v4651_v35 = vrot.slane %v4649_v26, 6  ;;  %v21500_v25 = vld [vmem:[%s19555_s6 + $0x6c] sm:$0x7]  ;;  %v4672_v26 = vrot.slane %v4670_v23, 7  ;;  %v4913_v43 = vrot.slane %v21327_v18, 7 }
 0x1c0   : > { %17806 = vmatpush3.bf16.msra.mxu0 %v19155_v29  ;;  %17813 = vmatprep.mubr.bf16.mxu0 %v15362_v45  ;;  %v4634_v29 = vshll.u32 %v21456_v22, 16  ;;  %v4600_v45 = vrot.slane %v4598_v57, 7  ;;  %v19159_v57 = vld [vmem:[%s24920_s1 + $0x380] sm:$0xff]   ;;  %v4593_v48 = vrot.slane %v4592_v41, 4 }
 0x1c1   : > { %17807 = vmatprep.subr.bf16.mxu0 %v19156_v24  ;;  %v4655_v34 = vor.u32 %v4654_v4, %v4651_v35 }
 0x1c2   : > { %v17619_v46 = vpop.f32.mrb[52].mxu0  ;;  %v4636_v5 = vrot.slane %v4634_v29, 7  ;;  %v4601_v2 = vor.u32 %v4600_v45, %v21468_v9  ;;  %v4660_v9 = vrot.slane %v4658_v12, 6  ;;  %v4681_v29 = vrot.slane %v4679_v42, 7  ;;  %v15377_v12 = vld [vmem:[%s19555_s6 + $0x18] sm:$0x8] }
 0x1c3   : > { %v21477_v21 = vadd.f32 %v17619_v46, %v21306_v36  ;;  %v2506_v60 = vpop.f32.mrb[53].mxu0  ;;  %v4663_v46 = vrot.slane %v4661_v63, 7 }
 0x1c4   : > { %v17620_v56 = vpop.f32.mrb[54].mxu0  ;;  %17808 = vmatpush3.bf16.msra.mxu0 %v19156_v24  ;;  %v4610_v24 = vor.u32 %v4609_v44, %v4606_v47  ;;  %v4667_v44 = vshrl.u32 %v21493_v7, 16  ;;  %v4637_v8 = vor.u32 %v4636_v5, %v4633_v17  ;;  %v4685_v60 = vshrl.u32 %v21500_v25, 16 }
 0x1c5   : > { %v21487_v36 = vadd.f32 %v17620_v56, %v21319_v27  ;;  %v2509_v31 = vpop.f32.mrb[55].mxu0  ;;  %17809 = vmatprep.subr.bf16.mxu0 %v19157_v39  ;;  %v4618_v27 = vrot.slane %v4616_v40, 7  ;;  %v15364_v40 = vcombine.low %v21474_v54, %v4584_v3  ;;  %v4688_v56 = vshll.u32 %v21500_v25, 16 }
 0x1c6   : > { %v4611_v47 = vrot.slane %v4610_v24, 4  ;;  %v4669_v45 = vrot.slane %v4667_v44, 6  ;;  %v4664_v1 = vor.u32 %v4663_v46, %v4660_v9  ;;  %v4602_v31 = vsel %vm19992_vm11, %v4593_v48, %v4601_v2  ;;  %v19164_v46 = vld [vmem:[%s24920_s1 + $0x3a8] sm:$0xff]  }
 0x1c7   : > { %v4619_v11 = vor.u32 %v4618_v27, %v4615_v20  ;;  %v4682_v41 = vor.u32 %v4681_v29, %v4678_v0  ;;  %v4687_v24 = vrot.slane %v4685_v60, 6  ;;  %v4690_v20 = vrot.slane %v4688_v56, 7  ;;  %v19162_v27 = vld [vmem:[%s24920_s1 + $0x398] sm:$0xff]   ;;  %v15379_v0 = vld [vmem:[%s19555_s6 + $0x28] sm:$0x8] }
 0x1c8   : > { %17810 = vmatpush3.bf16.msra.mxu0 %v19157_v39  ;;  %v4629_v39 = vrot.slane %v4628_v52, 4  ;;  %v4665_v32 = vrot.slane %v4664_v1, 4  ;;  %v15388_v5 = vrot.slane %v15376_v59, 11  ;;  %v4917_v2 = vrot.slane %v21343_v62, 7  ;;  %v15380_v60 = vld [vmem:[%s19555_s6 + $0x30] sm:$0x8] }
 0x1c9   : > { %17811 = vmatprep.subr.bf16.mxu0 %v19158_v19  ;;  %v4620_v54 = vsel %vm19992_vm11, %v4611_v47, %v4619_v11  ;;  %v4673_v42 = vor.u32 %v4672_v26, %v4669_v45  ;;  %v4691_v48 = vor.u32 %v4690_v20, %v4687_v24  ;;  %v15389_v44 = vrot.slane %v15377_v12, 11  ;;  %v15383_v24 = vld [vmem:[%s19555_s6 + $0x48] sm:$0x8] }
 0x1ca   : > { %v4638_v3 = vsel %vm19992_vm11, %v4629_v39, %v4637_v8  ;;  %v15365_v52 = vcombine.low %v4602_v31, %v4620_v54  ;;  %v19163_v39 = vld [vmem:[%s24920_s1 + $0x3a0] sm:$0xff]   ;;  %v4921_v11 = vrot.slane %v21359_v6, 7  ;;  %v15391_v29 = vrot.slane %v15379_v0, 11 }
 0x1cb   : > { %v4674_v18 = vsel %vm19992_vm11, %v4665_v32, %v4673_v42  ;;  %v4925_v56 = vrot.slane %v21372_v50, 7  ;;  %v15392_v45 = vrot.slane %v15380_v60, 11  ;;  %v4929_v31 = vrot.slane %v21398_v15, 7  ;;  %v15384_v15 = vld [vmem:[%s19555_s6 + $0x50] sm:$0x8] }
 0x1cc   : > { %17812 = vmatpush3.bf16.msra.mxu0 %v19158_v19  ;;  %v4656_v19 = vsel %vm19992_vm11, %v4647_v16, %v4655_v34  ;;  %v4918_v16 = vsel %vm20128_vm14, %v15389_v44, %v4917_v2  ;;  %v19165_v34 = vld [vmem:[%s24920_s1 + $0x3b0] sm:$0xff]   ;;  %v15395_v12 = vrot.slane %v15383_v24, 11  ;;  %v21602_v42 = vld [vmem:[%s19555_s6 + $0x1c] sm:$0x1]  ;;  %v4949_v44 = vrot.slane %v21466_v53, 7 }
 0x1cd   : > { %17825 = vmatprep.subr.bf16.mxu0 %v19159_v57  ;;  %v15366_v17 = vcombine.low %v4638_v3, %v4656_v19  ;;  %v4933_v3 = vrot.slane %v21401_v51, 7  ;;  %v4926_v59 = vsel %vm20128_vm14, %v15391_v29, %v4925_v56  ;;  %v21650_v29 = vld [vmem:[%s19555_s6 + $0x40] sm:$0xe]  ;;  %v21665_v24 = vld [vmem:[%s19555_s6 + $0x48] sm:$0xe] }
 0x1cf   : > { %17814 = vmatmul.mubr.bf16.vlgmr.msra.gmra.mrb[108].mxu0 %v15363_v49 }
 0x1d0   : > { %17826 = vmatpush3.bf16.msra.mxu0 %v19159_v57  ;;  %17817 = vmatprep.mubr.bf16.mxu0 %v15364_v40  ;;  %v4683_v57 = vrot.slane %v4682_v41, 4  ;;  %v15381_v40 = vld [vmem:[%s19555_s6 + $0x38] sm:$0x8]  ;;  %v15382_v41 = vld [vmem:[%s19555_s6 + $0x40] sm:$0x8] }
 0x1d1   : > { %17827 = vmatprep.subr.bf16.mxu0 %v19160_v38  ;;  %v15393_v54 = vrot.slane %v15381_v40, 11  ;;  %v15394_v32 = vrot.slane %v15382_v41, 11 }
 0x1d2   : > { %v17627_v49 = vpop.f32.mrb[56].mxu0  ;;  %v4692_v62 = vsel %vm19992_vm11, %v4683_v57, %v4691_v48  ;;  %v21605_v57 = vld [vmem:[%s19555_s6 + $0x20] sm:$0xe]  ;;  %v4945_v48 = vrot.slane %v21456_v22, 7  ;;  %v5195_v22 = vrot.slane %v21602_v42, 5 }
 0x1d3   : > { %v2538_v63 = vpop.f32.mrb[57].mxu0  ;;  %v15367_v9 = vcombine.low %v4674_v18, %v4692_v62  ;;  %v4930_v49 = vsel %vm20128_vm14, %v15392_v45, %v4929_v31  ;;  %v4953_v62 = vrot.slane %v21493_v7, 7  ;;  %v15455_v53 = vrot.slane %v21605_v57, 9  ;;  %v21632_v7 = vld [vmem:[%s19555_s6 + $0x34] sm:$0x1] }
 0x1d4   : > { %v21536_v35 = vadd.f32 %v2538_v63, %v21405_v10  ;;  %v17628_v4 = vpop.f32.mrb[58].mxu0  ;;  %17828 = vmatpush3.bf16.msra.mxu0 %v19160_v38  ;;  %v15378_v10 = vld [vmem:[%s19555_s6 + $0x20] sm:$0x8]  ;;  %v15385_v63 = vld [vmem:[%s19555_s6 + $0x58] sm:$0x8] }
 0x1d5   : > { %v2541_v47 = vpop.f32.mrb[59].mxu0  ;;  %17829 = vmatprep.subr.bf16.mxu0 %v19161_v28  ;;  %v15390_v38 = vrot.slane %v15378_v10, 11  ;;  %v21659_v31 = vld [vmem:[%s19555_s6 + $0x44] sm:$0x1] }
 0x1d6   : > { %v21539_v23 = vadd.f32 %v2541_v47, %v21419_v13  ;;  %v4914_v13 = vsel %vm20128_vm14, %v15388_v5, %v4913_v43  ;;  %v21596_v5 = vld [vmem:[%s19555_s6 + $0x68] sm:$0x8]  ;;  %v21599_v43 = vld [vmem:[%s19555_s6 + $0x18] sm:$0xe]  ;;  %v15397_v47 = vrot.slane %v15385_v63, 11 }
 0x1d7   : > { %17818 = vmatmul.mubr.bf16.gmra.mrb[4].mxu0 %v15365_v52  ;;  %v15416_v8 = vcombine.low %v4914_v13, %v4918_v16  ;;  %v4922_v51 = vsel %vm20128_vm14, %v15390_v38, %v4921_v11  ;;  %v4934_v52 = vsel %vm20128_vm14, %v15393_v54, %v4933_v3  ;;  %v15399_v10 = vrot.slane %v21596_v5, 11  ;;  %v21617_v13 = vld [vmem:[%s19555_s6 + $0x24] sm:$0x1]  ;;  %v21629_v38 = vld [vmem:[%s19555_s6 + $0x30] sm:$0xe] }
 0x1d8   : > { %17830 = vmatpush3.bf16.msra.mxu0 %v19161_v28  ;;  %17821 = vmatprep.mubr.bf16.mxu0 %v15366_v17  ;;  %v4937_v28 = vrot.slane %v21431_v61, 7  ;;  %v15396_v17 = vrot.slane %v15384_v15, 11  ;;  %v21593_v61 = vld [vmem:[%s19555_s6 + $0x60] sm:$0x8]  ;;  %v15417_v2 = vcombine.low %v4922_v51, %v4926_v59  ;;  %v15418_v4 = vcombine.low %v4930_v49, %v4934_v52  ;;  %v21638_v11 = vld [vmem:[%s19555_s6 + $0x38] sm:$0xe] }
 0x1d9   : > { %17831 = vmatprep.subr.bf16.mxu0 %v19162_v27  ;;  %v15398_v18 = vrot.slane %v21593_v61, 11  ;;  %v15454_v16 = vrot.slane %v21599_v43, 9  ;;  %v5199_v40 = vrot.slane %v21617_v13, 5  ;;  %v5207_v3 = vrot.slane %v21632_v7, 5  ;;  %v19170_v15 = vld [vmem:[%s24920_s1 + $0x3d8] sm:$0xff]  }
 0x1da   : > { %v4938_v0 = vsel %vm20128_vm14, %v15394_v32, %v4937_v28  ;;  %v4946_v56 = vsel %vm20128_vm14, %v15396_v17, %v4945_v48  ;;  %v15459_v51 = vrot.slane %v21650_v29, 9  ;;  %v21672_v59 = vld [vmem:[%s19555_s6 + $0x4c] sm:$0x1]  ;;  %v5215_v52 = vrot.slane %v21659_v31, 5  ;;  %v21679_v32 = vld [vmem:[%s19555_s6 + $0x50] sm:$0xe] }
 0x1db   : > { %v21686_v17 = vld [vmem:[%s19555_s6 + $0x58] sm:$0xe]  ;;  %v21689_v61 = vld [vmem:[%s19555_s6 + $0x5c] sm:$0x1]  ;;  %v21695_v5 = vld [vmem:[%s19555_s6 + $0x60] sm:$0xe]  ;;  %v4954_v42 = vsel %vm20128_vm14, %v15398_v18, %v4953_v62  ;;  %v5200_v13 = vsel %vm19744_vm7, %v15455_v53, %v5199_v40 }
 0x1dc   : > { %17832 = vmatpush3.bf16.msra.mxu0 %v19162_v27  ;;  %v4941_v27 = vrot.slane %v21447_v30, 7  ;;  %v19168_v30 = vld [vmem:[%s24920_s1 + $0x3c8] sm:$0xff]   ;;  %v5219_v48 = vrot.slane %v21672_v59, 5  ;;  %v15462_v62 = vrot.slane %v21686_v17, 9  ;;  %v5227_v7 = vrot.slane %v21689_v61, 5 }
 0x1dd   : > { %17833 = vmatprep.subr.bf16.mxu0 %v19163_v39  ;;  %v5436_v53 = vshrl.u32 %v21599_v43, 16  ;;  %v19172_v40 = vld [vmem:[%s24920_s1 + $0x3e8] sm:$0xff]   ;;  %v5529_v59 = vshll.u32 %v21650_v29, 16 }
 0x1de   : > { %v4942_v60 = vsel %vm20128_vm14, %v15395_v12, %v4941_v27  ;;  %v21682_v12 = vld [vmem:[%s19555_s6 + $0x54] sm:$0x1]  ;;  %v15460_v27 = vrot.slane %v21665_v24, 9 }
 0x1df   : > { %17822 = vmatmul.mubr.bf16.gmra.mrb[112].mxu0 %v15367_v9  ;;  %v21623_v9 = vld [vmem:[%s19555_s6 + $0x28] sm:$0xe]  ;;  %v5223_v18 = vrot.slane %v21682_v12, 5 }
 0x1e0   : > { %17834 = vmatpush3.bf16.msra.mxu0 %v19163_v39  ;;  %17841 = vmatprep.mubr.bf16.mxu0 %v15416_v8  ;;  %v4957_v39 = vrot.slane %v21500_v25, 7  ;;  %v19169_v25 = vld [vmem:[%s24920_s1 + $0x3d0] sm:$0xff]   ;;  %v21641_v8 = vld [vmem:[%s19555_s6 + $0x3c] sm:$0x1] }
 0x1e1   : > { %17835 = vmatprep.subr.bf16.mxu0 %v19164_v46  ;;  %v5211_v41 = vrot.slane %v21641_v8, 5 }
 0x1e2   : > { %v17647_v6 = vpop.f32.mrb[60].mxu0 }
 0x1e3   : > { %v21565_v26 = vadd.f32 %v17647_v6, %v21477_v21  ;;  %v2772_v1 = vpop.f32.mrb[61].mxu0  ;;  %v19166_v21 = vld [vmem:[%s24920_s1 + $0x3b8] sm:$0xff]   ;;  %v4950_v6 = vsel %vm20128_vm14, %v15397_v47, %v4949_v44  ;;  %v15461_v47 = vrot.slane %v21679_v32, 9  ;;  %v5196_v44 = vsel %vm19744_vm7, %v15454_v16, %v5195_v22 }
 0x1e4   : > { %v17648_v19 = vpop.f32.mrb[62].mxu0  ;;  %17836 = vmatpush3.bf16.msra.mxu0 %v19164_v46  ;;  %v21626_v46 = vld [vmem:[%s19555_s6 + $0x2c] sm:$0x1]  ;;  %v15457_v1 = vrot.slane %v21629_v38, 9  ;;  %v15420_v49 = vcombine.low %v4946_v56, %v4950_v6 }
 0x1e5   : > { %v21572_v20 = vadd.f32 %v17648_v19, %v21487_v36  ;;  %v2775_v50 = vpop.f32.mrb[63].mxu0  ;;  %17837 = vmatprep.subr.bf16.mxu0 %v19165_v34  ;;  %v19167_v36 = vld [vmem:[%s24920_s1 + $0x3c0] sm:$0xff]   ;;  %v5203_v45 = vrot.slane %v21626_v46, 5  ;;  %v15458_v19 = vrot.slane %v21638_v11, 9  ;;  %v19173_v46 = vld [vmem:[%s24920_s1 + $0x3f0] sm:$0xff]  }
 0x1e8   : > { %17838 = vmatpush3.bf16.msra.mxu0 %v19165_v34  ;;  %v15456_v34 = vrot.slane %v21623_v9, 9 }
 0x1e9   : > { %17839 = vmatprep.subr.bf16.mxu0 %v19166_v21 }
 0x1ec   : > { %17840 = vmatpush3.bf16.msra.mxu0 %v19166_v21  ;;  %v15419_v21 = vcombine.low %v4938_v0, %v4942_v60  ;;  %v5439_v0 = vshll.u32 %v21599_v43, 16  ;;  %v5472_v43 = vshrl.u32 %v21623_v9, 16 }
 0x1ed   : > { %17853 = vmatprep.subr.bf16.mxu0 %v19167_v36 }
 0x1ef   : > { %17842 = vmatmul.mubr.bf16.vlgmr.msra.gmra.mrb[116].mxu0 %v15417_v2  ;;  %v21698_v2 = vld [vmem:[%s19555_s6 + $0x64] sm:$0x1] }
 0x1f0   : > { %17854 = vmatpush3.bf16.msra.mxu0 %v19167_v36  ;;  %17845 = vmatprep.mubr.bf16.mxu0 %v15418_v4  ;;  %v21701_v4 = vld [vmem:[%s19555_s6 + $0x68] sm:$0xe]  ;;  %v5231_v16 = vrot.slane %v21698_v2, 5 }
 0x1f1   : > { %17855 = vmatprep.subr.bf16.mxu0 %v19168_v30 }
 0x1f2   : > { %v17655_v54 = vpop.f32.mrb[64].mxu0 }
 0x1f3   : > { %v2804_v50 = vpop.f32.mrb[65].mxu0  ;;  %v15482_v54 = vcombine.low %v5196_v44, %v5200_v13  ;;  %v5493_v44 = vshll.u32 %v21629_v38, 16  ;;  %v21767_v13 = vld [vmem:[%s19555_s6 + $0x2c] sm:$0x3] }
 0x1f4   : > { %v21675_v28 = vadd.f32 %v2804_v50, %v21536_v35  ;;  %v17656_v36 = vpop.f32.mrb[66].mxu0  ;;  %17856 = vmatpush3.bf16.msra.mxu0 %v19168_v30  ;;  %v4958_v30 = vsel %vm20128_vm14, %v15399_v10, %v4957_v39  ;;  %v21719_v10 = vld [vmem:[%s19555_s6 + $0x6c] sm:$0x1]  ;;  %v21722_v39 = vld [vmem:[%s19555_s6 + $0x70] sm:$0xe] }
 0x1f5   : > { %v2807_v63 = vpop.f32.mrb[67].mxu0  ;;  %17857 = vmatprep.subr.bf16.mxu0 %v19169_v25  ;;  %v15421_v60 = vcombine.low %v4954_v42, %v4958_v30  ;;  %v21736_v50 = vld [vmem:[%s19555_s6 + $0x1c] sm:$0x3]  ;;  %v5457_v36 = vshll.u32 %v21605_v57, 16  ;;  %v5438_v42 = vrot.slane %v5436_v53, 5  ;;  %v5441_v30 = vrot.slane %v5439_v0, 6 }
 0x1f6   : > { %v21692_v35 = vadd.f32 %v2807_v63, %v21539_v23  ;;  %v19171_v23 = vld [vmem:[%s24920_s1 + $0x3e0] sm:$0xff]   ;;  %v5475_v63 = vshll.u32 %v21623_v9, 16  ;;  %v5445_v9 = vshrl.u32 %v21736_v50, 16  ;;  %v21770_v53 = vld [vmem:[%s19555_s6 + $0x74] sm:$0x1] }
 0x1f7   : > { %17846 = vmatmul.mubr.bf16.gmra.mrb[4].mxu0 %v15419_v21  ;;  %v5454_v21 = vshrl.u32 %v21605_v57, 16  ;;  %v21757_v57 = vsel %vm19744_vm7, %v15457_v1, %v5207_v3  ;;  %v5459_v3 = vrot.slane %v5457_v36, 6  ;;  %v21773_v0 = vld [vmem:[%s19555_s6 + $0x34] sm:$0x3] }
 0x1f8   : > { %17858 = vmatpush3.bf16.msra.mxu0 %v19169_v25  ;;  %17849 = vmatprep.mubr.bf16.mxu0 %v15420_v49  ;;  %v21741_v49 = vld [vmem:[%s19555_s6 + $0x24] sm:$0x3]  ;;  %v5477_v6 = vrot.slane %v5475_v63, 6 }
 0x1f9   : > { %17859 = vmatprep.subr.bf16.mxu0 %v19170_v15  ;;  %v5456_v1 = vrot.slane %v5454_v21, 5  ;;  %v21795_v21 = vld [vmem:[%s19555_s6 + $0x3c] sm:$0x3] }
 0x1fb   : > { %v5460_v31 = vor.u32 %v5459_v3, %v5456_v1  ;;  %v19175_v3 = vld [vmem:[%s24920_s1 + $0x400] sm:$0xff]  }
 0x1fc   : > { %17860 = vmatpush3.bf16.msra.mxu0 %v19170_v15  ;;  %v21751_v15 = vsel %vm19744_vm7, %v15456_v34, %v5203_v45  ;;  %v5448_v34 = vshll.u32 %v21736_v50, 16  ;;  %v5490_v45 = vshrl.u32 %v21629_v38, 16  ;;  %v21783_v38 = vsel %vm19744_vm7, %v15458_v19, %v5211_v41 }
 0x1fd   : > { %17861 = vmatprep.subr.bf16.mxu0 %v19171_v23  ;;  %v15483_v56 = vcombine.low %v21751_v15, %v21757_v57  ;;  %v5495_v19 = vrot.slane %v5493_v44, 6  ;;  %v5466_v15 = vshll.u32 %v21741_v49, 16  ;;  %v5508_v57 = vshrl.u32 %v21638_v11, 16 }
 0x1fe   : > { %v5492_v63 = vrot.slane %v5490_v45, 5  ;;  %v21812_v45 = vrot.slane %v5445_v9, 5 }
 0x1ff   : > { %17850 = vmatmul.mubr.bf16.gmra.mrb[120].mxu0 %v15421_v60  ;;  %v5474_v60 = vrot.slane %v5472_v43, 5  ;;  %v5442_v43 = vor.u32 %v5441_v30, %v5438_v42  ;;  %v5481_v42 = vshrl.u32 %v21767_v13, 16  ;;  %v21826_v9 = vrot.slane %v5466_v15, 6 }
 0x200   : > { %17862 = vmatpush3.bf16.msra.mxu0 %v19171_v23  ;;  %17869 = vmatprep.mubr.bf16.mxu0 %v15482_v54  ;;  %v21791_v23 = vsel %vm19744_vm7, %v15459_v51, %v5215_v52  ;;  %v5463_v54 = vshrl.u32 %v21741_v49, 16  ;;  %v5511_v51 = vshll.u32 %v21638_v11, 16  ;;  %v5499_v11 = vshrl.u32 %v21773_v0, 16 }
 0x201   : > { %17863 = vmatprep.subr.bf16.mxu0 %v19172_v40  ;;  %v5496_v1 = vor.u32 %v5495_v19, %v5492_v63  ;;  %v21828_v30 = vrot.slane %v5460_v31, 4  ;;  %v5520_v15 = vshll.u32 %v21795_v21, 16  ;;  %v19176_v31 = vld [vmem:[%s24920_s1 + $0x408] sm:$0xff]  }
 0x202   : > { %v17675_v22 = vpop.f32.mrb[68].mxu0  ;;  %v21818_v44 = vrot.slane %v5463_v54, 5  ;;  %v21832_v54 = vrot.slane %v5481_v42, 5  ;;  %v21839_v19 = vrot.slane %v5499_v11, 5  ;;  %v5224_v11 = vsel %vm19744_vm7, %v15461_v47, %v5223_v18  ;;  %v19177_v47 = vld [vmem:[%s24920_s1 + $0x410] sm:$0xff]  }
 0x203   : > { %v21798_v8 = vadd.f32 %v17675_v22, %v21565_v26  ;;  %v3182_v36 = vpop.f32.mrb[69].mxu0  ;;  %v19174_v26 = vld [vmem:[%s24920_s1 + $0x3f8] sm:$0xff]   ;;  %v5478_v22 = vor.u32 %v5477_v6, %v5474_v60  ;;  %v5517_v6 = vshrl.u32 %v21795_v21, 16  ;;  %v21824_v60 = vrot.slane %v5442_v43, 4 }
 0x204   : > { %v17676_v41 = vpop.f32.mrb[70].mxu0  ;;  %17864 = vmatpush3.bf16.msra.mxu0 %v19172_v40  ;;  %v5484_v40 = vshll.u32 %v21767_v13, 16  ;;  %v5510_v36 = vrot.slane %v5508_v57, 5  ;;  %v5526_v57 = vshrl.u32 %v21650_v29, 16  ;;  %v21856_v42 = vrot.slane %v5496_v1, 4 }
 0x205   : > { %v21804_v52 = vadd.f32 %v17676_v41, %v21572_v20  ;;  %v3185_v25 = vpop.f32.mrb[71].mxu0  ;;  %17865 = vmatprep.subr.bf16.mxu0 %v19173_v46  ;;  %v5502_v20 = vshll.u32 %v21773_v0, 16  ;;  %v5513_v41 = vrot.slane %v5511_v51, 6  ;;  %v15484_v51 = vcombine.low %v21783_v38, %v21791_v23 }
 0x206   : > { %v21816_v25 = vrot.slane %v5448_v34, 6  ;;  %v21830_v34 = vrot.slane %v5478_v22, 4  ;;  %v21834_v63 = vrot.slane %v5484_v40, 6  ;;  %v5220_v22 = vsel %vm19744_vm7, %v15460_v27, %v5219_v48 }
 0x207   : > { %v21841_v43 = vrot.slane %v5502_v20, 6  ;;  %v21858_v40 = vrot.slane %v5517_v6, 5  ;;  %v5514_v38 = vor.u32 %v5513_v41, %v5510_v36  ;;  %v21869_v20 = vld [vmem:[%s19555_s6 + $0x4c] sm:$0x3]  ;;  %v5544_v48 = vshrl.u32 %v21665_v24, 16 }
 0x208   : > { %17866 = vmatpush3.bf16.msra.mxu0 %v19173_v46  ;;  %v21837_v46 = vld [vmem:[%s19555_s6 + $0x44] sm:$0x3]  ;;  %v15485_v12 = vcombine.low %v5220_v22, %v5224_v11  ;;  %v5228_v29 = vsel %vm19744_vm7, %v15462_v62, %v5227_v7  ;;  %v24962_v18 = vrot.slane %v21695_v5, 9  ;;  %v5451_v1 = vor.u32 %v21816_v25, %v21812_v45  ;;  %v21904_v22 = vld [vmem:[%s19555_s6 + $0x5c] sm:$0x3] }
 0x209   : > { %17867 = vmatprep.subr.bf16.mxu0 %v19174_v26  ;;  %v5535_v23 = vshrl.u32 %v21837_v46, 16  ;;  %v5538_v27 = vshll.u32 %v21837_v46, 16  ;;  %v21893_v6 = vrot.slane %v5514_v38, 4  ;;  %v21895_v61 = vrot.slane %v5520_v15, 6  ;;  %v19178_v11 = vld [vmem:[%s24920_s1 + $0x418] sm:$0xff]  }
 0x20a   : > { %v5528_v36 = vrot.slane %v5526_v57, 5  ;;  %v5531_v41 = vrot.slane %v5529_v59, 6  ;;  %v5547_v7 = vshll.u32 %v21665_v24, 16  ;;  %v21906_v25 = vrot.slane %v5544_v48, 5 }
 0x20b   : > { %v21897_v62 = vrot.slane %v5535_v23, 5  ;;  %v21899_v2 = vrot.slane %v5538_v27, 6  ;;  %v5562_v15 = vshrl.u32 %v21679_v32, 16  ;;  %v5565_v57 = vshll.u32 %v21679_v32, 16 }
 0x20c   : > { %17868 = vmatpush3.bf16.msra.mxu0 %v19174_v26  ;;  %v21874_v26 = vld [vmem:[%s19555_s6 + $0x54] sm:$0x3]  ;;  %v5469_v24 = vor.u32 %v21826_v9, %v21818_v44  ;;  %v5580_v23 = vshrl.u32 %v21686_v17, 16  ;;  %v5589_v14 = vshrl.u32 %v21904_v22, 16  ;;  %v24963_v9 = vrot.slane %v21719_v10, 5 }
 0x20d   : > { %17881 = vmatprep.subr.bf16.mxu0 %v19175_v3  ;;  %24961 = vst [vmem:[#allocation6_spill] sm:$0xff] %v21874_v26  ;;  %v5571_v38 = vshrl.u32 %v21874_v26, 16  ;;  %v5574_v59 = vshll.u32 %v21874_v26, 16  ;;  %v24964_v26 = vrot.slane %v21701_v4, 9 }
 0x20f   : > { %17870 = vmatmul.mubr.bf16.vlgmr.msra.gmra.mrb[124].mxu0 %v15483_v56  ;;  %v5232_v56 = vsel %vm19744_vm7, %v24962_v18, %v5231_v16  ;;  %v5553_v16 = vshrl.u32 %v21869_v20, 16  ;;  %v5532_v18 = vor.u32 %v5531_v41, %v5528_v36  ;;  %v21960_v36 = vrot.slane %v5571_v38, 5 }
 0x210   : > { %17882 = vmatpush3.bf16.msra.mxu0 %v19175_v3  ;;  %17873 = vmatprep.mubr.bf16.mxu0 %v15484_v51  ;;  %v5556_v3 = vshll.u32 %v21869_v20, 16  ;;  %v15486_v32 = vcombine.low %v5228_v29, %v5232_v56  ;;  %v24966_v29 = vrot.slane %v21722_v39, 9  ;;  %v19179_v56 = vld [vmem:[%s24920_s1 + $0x420] sm:$0xff]   ;;  %v21962_v41 = vrot.slane %v5574_v59, 6 }
 0x211   : > { %17883 = vmatprep.subr.bf16.mxu0 %v19176_v31  ;;  %v5533_v10 = vrot.slane %v5532_v18, 4 }
 0x212   : > { %v17683_v45 = vpop.f32.mrb[72].mxu0 }
 0x213   : > { %v3214_v51 = vpop.f32.mrb[73].mxu0  ;;  %v5583_v45 = vshll.u32 %v21686_v17, 16 }
 0x214   : > { %v21920_v27 = vadd.f32 %v3214_v51, %v21675_v28  ;;  %v17684_v48 = vpop.f32.mrb[74].mxu0  ;;  %17884 = vmatpush3.bf16.msra.mxu0 %v19176_v31  ;;  %v5236_v28 = vsel %vm19744_vm7, %v24964_v26, %v24963_v9  ;;  %v24965_v31 = vrot.slane %v21770_v53, 5  ;;  %v21947_v26 = vrot.slane %v5553_v16, 5  ;;  %v19180_v51 = vld [vmem:[%s24920_s1 + $0x428] sm:$0xff]   ;;  %v19182_v9 = vld [vmem:[%s24920_s1 + $0x438] sm:$0xff]  }
 0x215   : > { %v3217_v37 = vpop.f32.mrb[75].mxu0  ;;  %17885 = vmatprep.subr.bf16.mxu0 %v19177_v47  ;;  %v21949_v53 = vrot.slane %v5556_v3, 6  ;;  %v5585_v16 = vrot.slane %v5583_v45, 6  ;;  %v21973_v48 = vld [vmem:[%s19555_s6 + $0x64] sm:$0x3] }
 0x216   : > { %v21925_v44 = vadd.f32 %v3217_v37, %v21692_v35  ;;  %v5240_v17 = vsel %vm19744_vm7, %v24966_v29, %v24965_v31  ;;  %v5452_v37 = vsel %vm19599_vm2, %v21824_v60, %v5451_v1  ;;  %v5470_v35 = vsel %vm19599_vm2, %v21828_v30, %v5469_v24 }
 0x217   : > { %17874 = vmatmul.mubr.bf16.gmra.mrb[4].mxu0 %v15485_v12  ;;  %v21945_v12 = vrot.slane %v5547_v7, 6  ;;  %v21954_v60 = vrot.slane %v5562_v15, 5  ;;  %v21956_v1 = vrot.slane %v5565_v57, 6  ;;  %v5592_v30 = vshll.u32 %v21904_v22, 16 }
 0x218   : > { %17886 = vmatpush3.bf16.msra.mxu0 %v19177_v47  ;;  %17877 = vmatprep.mubr.bf16.mxu0 %v15486_v32  ;;  %v5598_v47 = vshrl.u32 %v21695_v5, 16  ;;  %v21964_v7 = vrot.slane %v5580_v23, 5  ;;  %v15487_v3 = vcombine.low %v5236_v28, %v5240_v17  ;;  %v21969_v15 = vrot.slane %v5589_v14, 5  ;;  %v19181_v14 = vld [vmem:[%s24920_s1 + $0x430] sm:$0xff]  }
 0x219   : > { %17887 = vmatprep.subr.bf16.mxu0 %v19178_v11  ;;  %v5601_v57 = vshll.u32 %v21695_v5, 16  ;;  %v15524_v24 = vcombine.low %v5452_v37, %v5470_v35  ;;  %v21975_v38 = vrot.slane %v5592_v30, 6  ;;  %v5487_v23 = vor.u32 %v21834_v63, %v21832_v54 }
 0x21a   : > { %v5600_v59 = vrot.slane %v5598_v47, 5  ;;  %v5505_v32 = vor.u32 %v21841_v43, %v21839_v19  ;;  %v5610_v19 = vshll.u32 %v21973_v48, 16  ;;  %v5523_v28 = vor.u32 %v21895_v61, %v21858_v40  ;;  %v22024_v47 = vld [vmem:[%s19555_s6 + $0x74] sm:$0x3] }
 0x21b   : > { %v5603_v5 = vrot.slane %v5601_v57, 6  ;;  %v5488_v54 = vsel %vm19599_vm2, %v21830_v34, %v5487_v23  ;;  %v5541_v34 = vor.u32 %v21899_v2, %v21897_v62  ;;  %v5616_v31 = vshrl.u32 %v21701_v4, 16 }
 0x21c   : > { %17888 = vmatpush3.bf16.msra.mxu0 %v19178_v11  ;;  %v5607_v11 = vshrl.u32 %v21973_v48, 16  ;;  %v5506_v63 = vsel %vm19599_vm2, %v21856_v42, %v5505_v32  ;;  %v22004_v42 = vld [vmem:[%s19555_s6 + $0x6c] sm:$0x3]  ;;  %v5550_v40 = vor.u32 %v21945_v12, %v21906_v25  ;;  %v5634_v61 = vshrl.u32 %v21722_v39, 16 }
 0x21d   : > { %17889 = vmatprep.subr.bf16.mxu0 %v19179_v56  ;;  %v15525_v62 = vcombine.low %v5488_v54, %v5506_v63  ;;  %v5568_v2 = vor.u32 %v21956_v1, %v21954_v60  ;;  %v5524_v35 = vsel %vm19599_vm2, %v21893_v6, %v5523_v28  ;;  %v5559_v25 = vor.u32 %v21949_v53, %v21947_v26  ;;  %v19183_v6 = vld [vmem:[%s24920_s1 + $0x440] sm:$0xff]   ;;  %v22050_v28 = vld [vmem:[%s19555_s6 + $0x18] sm:$0xc] }
 0x21e   : > { %v5609_v12 = vrot.slane %v5607_v11, 5  ;;  %v5612_v30 = vrot.slane %v5610_v19, 6  ;;  %v5637_v60 = vshll.u32 %v21722_v39, 16  ;;  %v5551_v1 = vrot.slane %v5550_v40, 4  ;;  %v19184_v39 = vld [vmem:[%s24920_s1 + $0x448] sm:$0xff]  }
 0x21f   : > { %17878 = vmatmul.mubr.bf16.gmra.mrb[128].mxu0 %v15487_v3  ;;  %v5569_v26 = vrot.slane %v5568_v2, 4  ;;  %v5595_v53 = vor.u32 %v21975_v38, %v21969_v15  ;;  %v5618_v3 = vrot.slane %v5616_v31, 5  ;;  %v5643_v23 = vshrl.u32 %v22024_v47, 16 }
 0x220   : > { %17890 = vmatpush3.bf16.msra.mxu0 %v19179_v56  ;;  %17897 = vmatprep.mubr.bf16.mxu0 %v15524_v24  ;;  %v5604_v56 = vor.u32 %v5603_v5, %v5600_v59  ;;  %v5636_v59 = vrot.slane %v5634_v61, 5  ;;  %v5639_v32 = vrot.slane %v5637_v60, 6  ;;  %v5560_v11 = vsel %vm19599_vm2, %v5551_v1, %v5559_v25  ;;  %v19186_v61 = vld [vmem:[%s24920_s1 + $0x458] sm:$0xff]   ;;  %v22068_v60 = vld [vmem:[%s19555_s6 + $0x28] sm:$0xc] }
 0x221   : > { %17891 = vmatprep.subr.bf16.mxu0 %v19180_v51  ;;  %v15550_v2 = vrot.slane %v22050_v28, 10 }
 0x222   : > { %v17703_v18 = vpop.f32.mrb[76].mxu0  ;;  %v5605_v24 = vrot.slane %v5604_v56, 4  ;;  %v5640_v19 = vor.u32 %v5639_v32, %v5636_v59  ;;  %v22102_v59 = vld [vmem:[%s19555_s6 + $0x50] sm:$0xc]  ;;  %v5887_v32 = vrot.slane %v21795_v21, 6 }
 0x223   : > { %v21993_v43 = vadd.f32 %v17703_v18, %v21798_v8  ;;  %v3448_v45 = vpop.f32.mrb[77].mxu0  ;;  %v5619_v8 = vshll.u32 %v21701_v4, 16  ;;  %v5542_v4 = vsel %vm19599_vm2, %v5533_v10, %v5541_v34  ;;  %v5577_v10 = vor.u32 %v21962_v41, %v21960_v36  ;;  %v19185_v34 = vld [vmem:[%s24920_s1 + $0x450] sm:$0xff]  }
 0x224   : > { %v17704_v29 = vpop.f32.mrb[78].mxu0  ;;  %17892 = vmatpush3.bf16.msra.mxu0 %v19180_v51  ;;  %v15526_v36 = vcombine.low %v5524_v35, %v5542_v4  ;;  %v5613_v41 = vor.u32 %v5612_v30, %v5609_v12  ;;  %v5645_v45 = vrot.slane %v5643_v23, 5  ;;  %v5871_v35 = vrot.slane %v21736_v50, 6  ;;  %v19189_v21 = vld [vmem:[%s24920_s1 + $0x470] sm:$0xff]  }
 0x225   : > { %v22008_v17 = vadd.f32 %v17704_v29, %v21804_v52  ;;  %v3451_v37 = vpop.f32.mrb[79].mxu0  ;;  %17893 = vmatprep.subr.bf16.mxu0 %v19181_v14  ;;  %v5586_v52 = vor.u32 %v5585_v16, %v21964_v7  ;;  %v5625_v7 = vshrl.u32 %v22004_v42, 16  ;;  %v5628_v16 = vshll.u32 %v22004_v42, 16 }
 0x226   : > { %v5621_v51 = vrot.slane %v5619_v8, 6  ;;  %v5578_v18 = vsel %vm19599_vm2, %v5569_v26, %v5577_v10  ;;  %v5614_v63 = vsel %vm19599_vm2, %v5605_v24, %v5613_v41  ;;  %v22056_v37 = vld [vmem:[%s19555_s6 + $0x20] sm:$0xc]  ;;  %v5875_v4 = vrot.slane %v21741_v49, 6  ;;  %v22072_v10 = vld [vmem:[%s19555_s6 + $0x30] sm:$0xc] }
 0x227   : > { %v5587_v57 = vrot.slane %v5586_v52, 4  ;;  %v5627_v15 = vrot.slane %v5625_v7, 5  ;;  %v5630_v38 = vrot.slane %v5628_v16, 6  ;;  %v15527_v29 = vcombine.low %v5560_v11, %v5578_v18  ;;  %v22082_v7 = vld [vmem:[%s19555_s6 + $0x38] sm:$0xc] }
 0x228   : > { %17894 = vmatpush3.bf16.msra.mxu0 %v19181_v14  ;;  %v5646_v14 = vshll.u32 %v22024_v47, 16  ;;  %v5622_v5 = vor.u32 %v5621_v51, %v5618_v3  ;;  %v5641_v12 = vrot.slane %v5640_v19, 4  ;;  %v15551_v1 = vrot.slane %v22056_v37, 10  ;;  %v22085_v16 = vld [vmem:[%s19555_s6 + $0x40] sm:$0xc] }
 0x229   : > { %17895 = vmatprep.subr.bf16.mxu0 %v19182_v9  ;;  %v5596_v54 = vsel %vm19599_vm2, %v5587_v57, %v5595_v53  ;;  %v5631_v25 = vor.u32 %v5630_v38, %v5627_v15  ;;  %v5872_v26 = vsel %vm19802_vm8, %v15550_v2, %v5871_v35  ;;  %v15552_v3 = vrot.slane %v22068_v60, 10  ;;  %v22099_v24 = vld [vmem:[%s19555_s6 + $0x48] sm:$0xc]  ;;  %v22118_v11 = vld [vmem:[%s19555_s6 + $0x58] sm:$0xc] }
 0x22a   : > { %v5623_v8 = vrot.slane %v5622_v5, 4  ;;  %v5876_v53 = vsel %vm19802_vm8, %v15551_v1, %v5875_v4  ;;  %v5879_v51 = vrot.slane %v21767_v13, 6  ;;  %v5883_v57 = vrot.slane %v21773_v0, 6  ;;  %v22130_v19 = vld [vmem:[%s19555_s6 + $0x60] sm:$0xc]  ;;  %v19190_v2 = vld [vmem:[%s24920_s1 + $0x478] sm:$0xff]  }
 0x22b   : > { %v15554_v41 = vrot.slane %v22082_v7, 10  ;;  %v15555_v13 = vrot.slane %v22085_v16, 10  ;;  %v5891_v0 = vrot.slane %v21837_v46, 6  ;;  %v5895_v15 = vrot.slane %v21869_v20, 6 }
 0x22c   : > { %17896 = vmatpush3.bf16.msra.mxu0 %v19182_v9  ;;  %v5648_v9 = vrot.slane %v5646_v14, 6  ;;  %v5632_v49 = vsel %vm19599_vm2, %v5623_v8, %v5631_v25  ;;  %v15578_v14 = vcombine.low %v5872_v26, %v5876_v53  ;;  %v15556_v38 = vrot.slane %v22099_v24, 10  ;;  %v22164_v25 = vld [vmem:[%s19555_s6 + $0x1c] sm:$0x7] }
 0x22d   : > { %17909 = vmatprep.subr.bf16.mxu0 %v19183_v6  ;;  %v15557_v5 = vrot.slane %v22102_v59, 10  ;;  %v22122_v46 = vsel %vm19802_vm8, %v15552_v3, %v5879_v51  ;;  %v6115_v8 = vshll.u32 %v22050_v28, 16  ;;  %v5892_v4 = vsel %vm19802_vm8, %v15555_v13, %v5891_v0 }
 0x22e   : > { %v5649_v30 = vor.u32 %v5648_v9, %v5645_v45  ;;  %v15559_v1 = vrot.slane %v22130_v19, 10  ;;  %v6166_v0 = vshrl.u32 %v22072_v10, 16 }
 0x22f   : > { %17898 = vmatmul.mubr.bf16.vlgmr.msra.gmra.mrb[132].mxu0 %v15525_v62  ;;  %v15528_v62 = vcombine.low %v5596_v54, %v5614_v63  ;;  %v24967_v54 = vld [vmem:[#allocation6_spill] sm:$0xff]  ;;  %v6117_v53 = vrot.slane %v6115_v8, 7 }
 0x230   : > { %17910 = vmatpush3.bf16.msra.mxu0 %v19183_v6  ;;  %17901 = vmatprep.mubr.bf16.mxu0 %v15526_v36  ;;  %v19188_v36 = vld [vmem:[%s24920_s1 + $0x468] sm:$0xff]   ;;  %v5899_v63 = vrot.slane %v24967_v54, 6 }
 0x231   : > { %17911 = vmatprep.subr.bf16.mxu0 %v19184_v39 }
 0x232   : > { %v17711_v31 = vpop.f32.mrb[80].mxu0 }
 0x233   : > { %v3480_v40 = vpop.f32.mrb[81].mxu0 }
 0x234   : > { %v22065_v52 = vadd.f32 %v3480_v40, %v21920_v27  ;;  %v17712_v56 = vpop.f32.mrb[82].mxu0  ;;  %17912 = vmatpush3.bf16.msra.mxu0 %v19184_v39  ;;  %v5650_v27 = vsel %vm19599_vm2, %v5641_v12, %v5649_v30  ;;  %v15553_v39 = vrot.slane %v22072_v10, 10  ;;  %v6130_v40 = vshrl.u32 %v22056_v37, 16  ;;  %v22167_v12 = vld [vmem:[%s19555_s6 + $0x24] sm:$0x7] }
 0x235   : > { %v3483_v6 = vpop.f32.mrb[83].mxu0  ;;  %17913 = vmatprep.subr.bf16.mxu0 %v19185_v34  ;;  %v15529_v23 = vcombine.low %v5632_v49, %v5650_v27  ;;  %v15558_v56 = vrot.slane %v22118_v11, 10  ;;  %v19191_v30 = vld [vmem:[%s24920_s1 + $0x480] sm:$0xff]   ;;  %v5907_v49 = vrot.slane %v21973_v48, 6  ;;  %v6139_v48 = vshrl.u32 %v22167_v12, 16 }
 0x236   : > { %v22075_v50 = vadd.f32 %v3483_v6, %v21925_v44  ;;  %v19187_v44 = vld [vmem:[%s24920_s1 + $0x460] sm:$0xff]   ;;  %v22126_v20 = vsel %vm19802_vm8, %v15553_v39, %v5883_v57  ;;  %v5903_v6 = vrot.slane %v21904_v22, 6  ;;  %v6132_v3 = vrot.slane %v6130_v40, 6 }
 0x237   : > { %17902 = vmatmul.mubr.bf16.gmra.mrb[4].mxu0 %v15527_v29  ;;  %v6112_v29 = vshrl.u32 %v22050_v28, 16  ;;  %v15579_v35 = vcombine.low %v22122_v46, %v22126_v20  ;;  %v5888_v28 = vsel %vm19802_vm8, %v15554_v41, %v5887_v32  ;;  %v5911_v39 = vrot.slane %v22004_v42, 6  ;;  %v22190_v42 = vld [vmem:[%s19555_s6 + $0x2c] sm:$0x7] }
 0x238   : > { %17914 = vmatpush3.bf16.msra.mxu0 %v19185_v34  ;;  %17905 = vmatprep.mubr.bf16.mxu0 %v15528_v62  ;;  %v22136_v34 = vld [vmem:[%s19555_s6 + $0x68] sm:$0xc]  ;;  %v6121_v57 = vshrl.u32 %v22164_v25, 16  ;;  %v6124_v22 = vshll.u32 %v22164_v25, 16  ;;  %v6148_v41 = vshrl.u32 %v22068_v60, 16  ;;  %v6151_v32 = vshll.u32 %v22068_v60, 16 }
 0x239   : > { %17915 = vmatprep.subr.bf16.mxu0 %v19186_v61  ;;  %v15560_v27 = vrot.slane %v22136_v34, 10  ;;  %v6114_v26 = vrot.slane %v6112_v29, 6  ;;  %v15580_v13 = vcombine.low %v5888_v28, %v5892_v4  ;;  %v19192_v46 = vld [vmem:[%s24920_s1 + $0x488] sm:$0xff]   ;;  %v6157_v8 = vshrl.u32 %v22190_v42, 16  ;;  %v19193_v28 = vld [vmem:[%s24920_s1 + $0x490] sm:$0xff]  }
 0x23a   : > { %v6123_v20 = vrot.slane %v6121_v57, 6  ;;  %v6126_v54 = vrot.slane %v6124_v22, 7  ;;  %v6153_v29 = vrot.slane %v6151_v32, 7  ;;  %v6160_v40 = vshll.u32 %v22190_v42, 16  ;;  %v22228_v22 = vld [vmem:[%s19555_s6 + $0x44] sm:$0x7] }
 0x23b   : > { %v6118_v60 = vor.u32 %v6117_v53, %v6114_v26  ;;  %v6184_v26 = vshrl.u32 %v22082_v7, 16  ;;  %v6187_v53 = vshll.u32 %v22082_v7, 16  ;;  %v6159_v57 = vrot.slane %v6157_v8, 6 }
 0x23c   : > { %17916 = vmatpush3.bf16.msra.mxu0 %v19186_v61  ;;  %v6133_v61 = vshll.u32 %v22056_v37, 16  ;;  %v22160_v37 = vsel %vm19802_vm8, %v15557_v5, %v5899_v63  ;;  %v22200_v5 = vsel %vm19802_vm8, %v15559_v1, %v5907_v49  ;;  %v6141_v63 = vrot.slane %v6139_v48, 6 }
 0x23d   : > { %17917 = vmatprep.subr.bf16.mxu0 %v19187_v44  ;;  %v22220_v1 = vsel %vm19802_vm8, %v15560_v27, %v5911_v39  ;;  %v6127_v49 = vor.u32 %v6126_v54, %v6123_v20  ;;  %v6202_v48 = vshrl.u32 %v22085_v16, 16  ;;  %v6162_v27 = vrot.slane %v6160_v40, 7 }
 0x23e   : > { %v6135_v51 = vrot.slane %v6133_v61, 7  ;;  %v6168_v61 = vrot.slane %v6166_v0, 6  ;;  %v6189_v20 = vrot.slane %v6187_v53, 7  ;;  %v6211_v54 = vshrl.u32 %v22228_v22, 16 }
 0x23f   : > { %17906 = vmatmul.mubr.bf16.gmra.mrb[136].mxu0 %v15529_v23  ;;  %v5915_v23 = vrot.slane %v22024_v47, 6  ;;  %v19195_v47 = vld [vmem:[%s24920_s1 + $0x4a0] sm:$0xff]   ;;  %v6238_v53 = vshrl.u32 %v22102_v59, 16 }
 0x240   : > { %17918 = vmatpush3.bf16.msra.mxu0 %v19187_v44  ;;  %17925 = vmatprep.mubr.bf16.mxu0 %v15578_v14  ;;  %v22177_v44 = vld [vmem:[%s19555_s6 + $0x70] sm:$0xc] }
 0x241   : > { %17919 = vmatprep.subr.bf16.mxu0 %v19188_v36 }
 0x242   : > { %v17731_v18 = vpop.f32.mrb[84].mxu0 }
 0x243   : > { %v22133_v45 = vadd.f32 %v17731_v18, %v21993_v43  ;;  %v3730_v9 = vpop.f32.mrb[85].mxu0  ;;  %v22203_v18 = vld [vmem:[%s19555_s6 + $0x34] sm:$0x7] }
 0x244   : > { %v17732_v31 = vpop.f32.mrb[86].mxu0  ;;  %17920 = vmatpush3.bf16.msra.mxu0 %v19188_v36  ;;  %v6142_v36 = vshll.u32 %v22167_v12, 16 }
 0x245   : > { %v22143_v62 = vadd.f32 %v17732_v31, %v22008_v17  ;;  %v3733_v43 = vpop.f32.mrb[87].mxu0  ;;  %17921 = vmatprep.subr.bf16.mxu0 %v19189_v21  ;;  %v22156_v17 = vsel %vm19802_vm8, %v15556_v38, %v5895_v15  ;;  %v6169_v15 = vshll.u32 %v22072_v10, 16  ;;  %v22196_v38 = vsel %vm19802_vm8, %v15558_v56, %v5903_v6 }
 0x246   : > { %v15581_v14 = vcombine.low %v22156_v17, %v22160_v37  ;;  %v15561_v10 = vrot.slane %v22177_v44, 10  ;;  %v6144_v9 = vrot.slane %v6142_v36, 7  ;;  %v6150_v31 = vrot.slane %v6148_v41, 6 }
 0x247   : > { %v6171_v43 = vrot.slane %v6169_v15, 7  ;;  %v15582_v4 = vcombine.low %v22196_v38, %v22200_v5  ;;  %v6119_v56 = vrot.slane %v6118_v60, 4  ;;  %v6205_v36 = vshll.u32 %v22085_v16, 16  ;;  %v19194_v16 = vld [vmem:[%s24920_s1 + $0x498] sm:$0xff]  }
 0x248   : > { %17922 = vmatpush3.bf16.msra.mxu0 %v19189_v21  ;;  %v6136_v21 = vor.u32 %v6135_v51, %v6132_v3  ;;  %v6145_v51 = vor.u32 %v6144_v9, %v6141_v63  ;;  %v6154_v32 = vor.u32 %v6153_v29, %v6150_v31  ;;  %v6204_v9 = vrot.slane %v6202_v48, 6 }
 0x249   : > { %17923 = vmatprep.subr.bf16.mxu0 %v19190_v2  ;;  %v6172_v39 = vor.u32 %v6171_v43, %v6168_v61  ;;  %v6207_v31 = vrot.slane %v6205_v36, 7  ;;  %v6128_v8 = vsel %vm19992_vm11, %v6119_v56, %v6127_v49  ;;  %v6163_v61 = vor.u32 %v6162_v27, %v6159_v57  ;;  %v22260_v56 = vld [vmem:[%s19555_s6 + $0x4c] sm:$0x7] }
 0x24a   : > { %v6137_v6 = vrot.slane %v6136_v21, 4  ;;  %v6186_v21 = vrot.slane %v6184_v26, 6  ;;  %v6256_v57 = vshrl.u32 %v22118_v11, 16  ;;  %v6259_v48 = vshll.u32 %v22118_v11, 16 }
 0x24b   : > { %v6277_v27 = vshll.u32 %v22130_v19, 16 }
 0x24c   : > { %17924 = vmatpush3.bf16.msra.mxu0 %v19190_v2  ;;  %v6175_v2 = vshrl.u32 %v22203_v18, 16  ;;  %v6146_v40 = vsel %vm19992_vm11, %v6137_v6, %v6145_v51  ;;  %v6190_v37 = vor.u32 %v6189_v20, %v6186_v21  ;;  %v22293_v21 = vld [vmem:[%s19555_s6 + $0x64] sm:$0x7]  ;;  %v6258_v20 = vrot.slane %v6256_v57, 6 }
 0x24d   : > { %17937 = vmatprep.subr.bf16.mxu0 %v19191_v30  ;;  %v15620_v49 = vcombine.low %v6128_v8, %v6146_v40  ;;  %v6295_v57 = vshll.u32 %v22136_v34, 16 }
 0x24e   : > { %v6191_v36 = vrot.slane %v6190_v37, 4 }
 0x24f   : > { %17926 = vmatmul.mubr.bf16.vlgmr.msra.gmra.mrb[140].mxu0 %v15579_v35  ;;  %v6178_v35 = vshll.u32 %v22203_v18, 16 }
 0x250   : > { %17938 = vmatpush3.bf16.msra.mxu0 %v19191_v30  ;;  %17929 = vmatprep.mubr.bf16.mxu0 %v15580_v13  ;;  %v22223_v30 = vld [vmem:[%s19555_s6 + $0x3c] sm:$0x7]  ;;  %v6177_v13 = vrot.slane %v6175_v2, 6 }
 0x251   : > { %17939 = vmatprep.subr.bf16.mxu0 %v19192_v46  ;;  %v6180_v7 = vrot.slane %v6178_v35, 7  ;;  %v6193_v38 = vshrl.u32 %v22223_v30, 16  ;;  %v6196_v5 = vshll.u32 %v22223_v30, 16  ;;  %v6208_v35 = vor.u32 %v6207_v31, %v6204_v9 }
 0x252   : > { %v17739_v3 = vpop.f32.mrb[88].mxu0  ;;  %v6279_v31 = vrot.slane %v6277_v27, 7 }
 0x253   : > { %v3762_v41 = vpop.f32.mrb[89].mxu0  ;;  %v6195_v43 = vrot.slane %v6193_v38, 6  ;;  %v6198_v17 = vrot.slane %v6196_v5, 7  ;;  %v6241_v3 = vshll.u32 %v22102_v59, 16  ;;  %v6229_v59 = vshrl.u32 %v22260_v56, 16 }
 0x254   : > { %v22233_v0 = vadd.f32 %v3762_v41, %v22065_v52  ;;  %v17740_v15 = vpop.f32.mrb[90].mxu0  ;;  %17940 = vmatpush3.bf16.msra.mxu0 %v19192_v46  ;;  %v6214_v52 = vshll.u32 %v22228_v22, 16  ;;  %v5916_v46 = vsel %vm19802_vm8, %v15561_v10, %v5915_v23  ;;  %v6173_v23 = vrot.slane %v6172_v39, 4  ;;  %v22281_v41 = vld [vmem:[%s19555_s6 + $0x54] sm:$0x7] }
 0x255   : > { %v3765_v60 = vpop.f32.mrb[91].mxu0  ;;  %17941 = vmatprep.subr.bf16.mxu0 %v19193_v28  ;;  %v6181_v10 = vor.u32 %v6180_v7, %v6177_v13  ;;  %v15583_v6 = vcombine.low %v22220_v1, %v5916_v46  ;;  %v19196_v1 = vld [vmem:[%s24920_s1 + $0x4a8] sm:$0xff]   ;;  %v6209_v39 = vrot.slane %v6208_v35, 4  ;;  %v6232_v15 = vshll.u32 %v22260_v56, 16  ;;  %v22288_v7 = vld [vmem:[%s19555_s6 + $0x5c] sm:$0x7] }
 0x256   : > { %v22243_v63 = vadd.f32 %v3765_v60, %v22075_v50  ;;  %v6155_v50 = vrot.slane %v6154_v32, 4  ;;  %v6216_v2 = vrot.slane %v6214_v52, 7  ;;  %v6274_v32 = vshrl.u32 %v22130_v19, 16 }
 0x257   : > { %17930 = vmatmul.mubr.bf16.gmra.mrb[4].mxu0 %v15581_v14  ;;  %v6213_v14 = vrot.slane %v6211_v54, 6  ;;  %v22276_v51 = vsel %vm19992_vm11, %v6173_v23, %v6181_v10  ;;  %v6240_v5 = vrot.slane %v6238_v53, 6  ;;  %v6243_v60 = vrot.slane %v6241_v3, 7  ;;  %v19197_v54 = vld [vmem:[%s24920_s1 + $0x4b0] sm:$0xff]   ;;  %v19198_v53 = vld [vmem:[%s24920_s1 + $0x4b8] sm:$0xff]  }
 0x258   : > { %17942 = vmatpush3.bf16.msra.mxu0 %v19193_v28  ;;  %17933 = vmatprep.mubr.bf16.mxu0 %v15582_v4  ;;  %v6220_v28 = vshrl.u32 %v22099_v24, 16  ;;  %v6223_v4 = vshll.u32 %v22099_v24, 16  ;;  %v22267_v26 = vsel %vm19992_vm11, %v6155_v50, %v6163_v61  ;;  %v6199_v24 = vor.u32 %v6198_v17, %v6195_v43 }
 0x259   : > { %17943 = vmatprep.subr.bf16.mxu0 %v19194_v16  ;;  %v6217_v13 = vor.u32 %v6216_v2, %v6213_v14  ;;  %v6261_v19 = vrot.slane %v6259_v48, 7  ;;  %v22302_v46 = vrot.slane %v6229_v59, 6  ;;  %v6276_v9 = vrot.slane %v6274_v32, 6  ;;  %v22315_v14 = vld [vmem:[%s19555_s6 + $0x6c] sm:$0x7] }
 0x25a   : > { %v6222_v38 = vrot.slane %v6220_v28, 6  ;;  %v6225_v11 = vrot.slane %v6223_v4, 7  ;;  %v22300_v52 = vsel %vm19992_vm11, %v6191_v36, %v6199_v24  ;;  %v6234_v50 = vrot.slane %v6232_v15, 7  ;;  %v22327_v24 = vld [vmem:[%s19555_s6 + $0x74] sm:$0x7] }
 0x25b   : > { %v22306_v40 = vsel %vm19992_vm11, %v6209_v39, %v6217_v13  ;;  %v6247_v61 = vshrl.u32 %v22281_v41, 16  ;;  %v6244_v17 = vor.u32 %v6243_v60, %v6240_v5  ;;  %v6265_v37 = vshrl.u32 %v22288_v7, 16 }
 0x25c   : > { %17944 = vmatpush3.bf16.msra.mxu0 %v19194_v16  ;;  %v15621_v16 = vcombine.low %v22267_v26, %v22276_v51  ;;  %v6226_v43 = vor.u32 %v6225_v11, %v6222_v38  ;;  %v6268_v35 = vshll.u32 %v22288_v7, 16  ;;  %v6283_v28 = vshrl.u32 %v22293_v21, 16  ;;  %v19201_v26 = vld [vmem:[%s24920_s1 + $0x4d0] sm:$0xff]  }
 0x25d   : > { %17945 = vmatprep.subr.bf16.mxu0 %v19195_v47  ;;  %v6286_v4 = vshll.u32 %v22293_v21, 16  ;;  %v6280_v3 = vor.u32 %v6279_v31, %v6276_v9  ;;  %v6249_v48 = vrot.slane %v6247_v61, 6  ;;  %v6301_v36 = vshrl.u32 %v22315_v14, 16 }
 0x25e   : > { %v6304_v59 = vshll.u32 %v22315_v14, 16  ;;  %v6227_v32 = vrot.slane %v6226_v43, 4  ;;  %v6245_v27 = vrot.slane %v6244_v17, 4  ;;  %v6313_v13 = vshll.u32 %v22177_v44, 16 }
 0x25f   : > { %17934 = vmatmul.mubr.bf16.gmra.mrb[144].mxu0 %v15583_v6  ;;  %v6262_v6 = vor.u32 %v6261_v19, %v6258_v20  ;;  %v6267_v38 = vrot.slane %v6265_v37, 6  ;;  %v6270_v11 = vrot.slane %v6268_v35, 7  ;;  %v6285_v5 = vrot.slane %v6283_v28, 6 }
 0x260   : > { %17946 = vmatpush3.bf16.msra.mxu0 %v19195_v47  ;;  %17953 = vmatprep.mubr.bf16.mxu0 %v15620_v49  ;;  %v6250_v47 = vshll.u32 %v22281_v41, 16  ;;  %v6281_v60 = vrot.slane %v6280_v3, 4  ;;  %v6288_v20 = vrot.slane %v6286_v4, 7  ;;  %v6297_v9 = vrot.slane %v6295_v57, 7  ;;  %v15635_v4 = vld [vmem:[%s19555_s6 + $0x20] sm:$0x8] }
 0x261   : > { %17947 = vmatprep.subr.bf16.mxu0 %v19196_v1  ;;  %v6263_v15 = vrot.slane %v6262_v6, 4  ;;  %v6303_v31 = vrot.slane %v6301_v36, 6  ;;  %v6315_v43 = vrot.slane %v6313_v13, 7  ;;  %v6322_v17 = vshll.u32 %v22327_v24, 16  ;;  %v15634_v6 = vld [vmem:[%s19555_s6 + $0x18] sm:$0x8] }
 0x262   : > { %v17759_v8 = vpop.f32.mrb[92].mxu0  ;;  %v6252_v39 = vrot.slane %v6250_v47, 7  ;;  %v6235_v47 = vor.u32 %v6234_v50, %v22302_v46  ;;  %v15622_v37 = vcombine.low %v22300_v52, %v22306_v40  ;;  %v6289_v35 = vor.u32 %v6288_v20, %v6285_v5  ;;  %v22358_v3 = vld [vmem:[%s19555_s6 + $0x28] sm:$0x8]  ;;  %v19202_v13 = vld [vmem:[%s24920_s1 + $0x4d8] sm:$0xff]  }
 0x263   : > { %v22311_v23 = vadd.f32 %v17759_v8, %v22133_v45  ;;  %v4140_v10 = vpop.f32.mrb[93].mxu0  ;;  %v6306_v8 = vrot.slane %v6304_v59, 7  ;;  %v6547_v57 = vrot.slane %v22164_v25, 7  ;;  %v15647_v36 = vrot.slane %v15635_v4, 11  ;;  %v22382_v20 = vld [vmem:[%s19555_s6 + $0x40] sm:$0x8] }
 0x264   : > { %v17760_v2 = vpop.f32.mrb[94].mxu0  ;;  %17948 = vmatpush3.bf16.msra.mxu0 %v19196_v1  ;;  %v6292_v1 = vshrl.u32 %v22136_v34, 16  ;;  %v19199_v34 = vld [vmem:[%s24920_s1 + $0x4c0] sm:$0xff]   ;;  %v6253_v10 = vor.u32 %v6252_v39, %v6249_v48  ;;  %v6236_v46 = vsel %vm19992_vm11, %v6227_v32, %v6235_v47  ;;  %v6290_v51 = vsel %vm19992_vm11, %v6281_v60, %v6289_v35 }
 0x265   : > { %v22321_v45 = vadd.f32 %v17760_v2, %v22143_v62  ;;  %v4143_v49 = vpop.f32.mrb[95].mxu0  ;;  %17949 = vmatprep.subr.bf16.mxu0 %v19197_v54  ;;  %v6310_v62 = vshrl.u32 %v22177_v44, 16  ;;  %v6319_v44 = vshrl.u32 %v22327_v24, 16  ;;  %v6271_v2 = vor.u32 %v6270_v11, %v6267_v38  ;;  %v22376_v38 = vld [vmem:[%s19555_s6 + $0x38] sm:$0x8] }
 0x266   : > { %v6294_v19 = vrot.slane %v6292_v1, 6  ;;  %v6254_v50 = vsel %vm19992_vm11, %v6245_v27, %v6253_v10  ;;  %v15646_v1 = vrot.slane %v15634_v6, 11  ;;  %v6551_v59 = vrot.slane %v22167_v12, 7 }
 0x267   : > { %v6312_v61 = vrot.slane %v6310_v62, 6  ;;  %v6272_v52 = vsel %vm19992_vm11, %v6263_v15, %v6271_v2  ;;  %v6321_v49 = vrot.slane %v6319_v44, 6  ;;  %v22368_v62 = vld [vmem:[%s19555_s6 + $0x30] sm:$0x8]  ;;  %v6555_v32 = vrot.slane %v22190_v42, 7  ;;  %v19203_v2 = vld [vmem:[%s24920_s1 + $0x4e0] sm:$0xff]  }
 0x268   : > { %17950 = vmatpush3.bf16.msra.mxu0 %v19197_v54  ;;  %v19200_v54 = vld [vmem:[%s24920_s1 + $0x4c8] sm:$0xff]   ;;  %v6298_v28 = vor.u32 %v6297_v9, %v6294_v19  ;;  %v15623_v39 = vcombine.low %v6236_v46, %v6254_v50  ;;  %v6307_v15 = vor.u32 %v6306_v8, %v6303_v31  ;;  %v15648_v25 = vrot.slane %v22358_v3, 11  ;;  %v22389_v8 = vld [vmem:[%s19555_s6 + $0x50] sm:$0x8]  ;;  %v22519_v3 = vld [vmem:[%s19555_s6 + $0x54] sm:$0x1] }
 0x269   : > { %17951 = vmatprep.subr.bf16.mxu0 %v19198_v53  ;;  %v6316_v40 = vor.u32 %v6315_v43, %v6312_v61  ;;  %v15624_v5 = vcombine.low %v6272_v52, %v6290_v51  ;;  %v15649_v9 = vrot.slane %v22368_v62, 11  ;;  %v22386_v31 = vld [vmem:[%s19555_s6 + $0x48] sm:$0x8]  ;;  %v22392_v61 = vld [vmem:[%s19555_s6 + $0x58] sm:$0x8]  ;;  %v6548_v47 = vsel %vm20128_vm14, %v15646_v1, %v6547_v57  ;;  %v19205_v1 = vld [vmem:[%s24920_s1 + $0x4f0] sm:$0xff]  }
 0x26a   : > { %v6552_v43 = vsel %vm20128_vm14, %v15647_v36, %v6551_v59  ;;  %v6563_v6 = vrot.slane %v22223_v30, 7  ;;  %v15651_v35 = vrot.slane %v22382_v20, 11  ;;  %v6571_v4 = vrot.slane %v22260_v56, 7  ;;  %v19204_v30 = vld [vmem:[%s24920_s1 + $0x4e8] sm:$0xff]   ;;  %v22435_v57 = vld [vmem:[%s19555_s6 + $0x70] sm:$0x8] }
 0x26b   : > { %v15652_v46 = vrot.slane %v22386_v31, 11  ;;  %v6575_v50 = vrot.slane %v22281_v41, 7  ;;  %v15654_v52 = vrot.slane %v22392_v61, 11  ;;  %v6583_v51 = vrot.slane %v22293_v21, 7  ;;  %v22441_v36 = vld [vmem:[%s19555_s6 + $0x24] sm:$0x1] }
 0x26c   : > { %17952 = vmatpush3.bf16.msra.mxu0 %v19198_v53  ;;  %v6324_v53 = vrot.slane %v6322_v17, 7  ;;  %v6559_v17 = vrot.slane %v22203_v18, 7  ;;  %v15653_v18 = vrot.slane %v22389_v8, 11  ;;  %v22444_v59 = vld [vmem:[%s19555_s6 + $0x28] sm:$0xe]  ;;  %v6591_v20 = vrot.slane %v22327_v24, 7 }
 0x26d   : > { %17965 = vmatprep.subr.bf16.mxu0 %v19199_v34  ;;  %v19208_v56 = vld [vmem:[%s24920_s1 + $0x508] sm:$0xff]   ;;  %v22587_v61 = vld [vmem:[%s19555_s6 + $0x24] sm:$0x3]  ;;  %v7088_v21 = vshrl.u32 %v22444_v59, 16 }
 0x26e   : > { %v6325_v60 = vor.u32 %v6324_v53, %v6321_v49  ;;  %24970 = vst [vmem:[#allocation6_spill] sm:$0xff] %v22587_v61 }
 0x26f   : > { %17954 = vmatmul.mubr.bf16.vlgmr.msra.gmra.mrb[148].mxu0 %v15621_v16  ;;  %v6299_v16 = vrot.slane %v6298_v28, 4  ;;  %v6567_v28 = vrot.slane %v22228_v22, 7  ;;  %v6579_v22 = vrot.slane %v22288_v7, 7  ;;  %v19209_v7 = vld [vmem:[%s24920_s1 + $0x510] sm:$0xff]  }
 0x270   : > { %17966 = vmatpush3.bf16.msra.mxu0 %v19199_v34  ;;  %17957 = vmatprep.mubr.bf16.mxu0 %v15622_v37  ;;  %v6317_v34 = vrot.slane %v6316_v40, 4  ;;  %v22408_v37 = vld [vmem:[%s19555_s6 + $0x60] sm:$0x8]  ;;  %v22422_v40 = vld [vmem:[%s19555_s6 + $0x68] sm:$0x8] }
 0x271   : > { %17967 = vmatprep.subr.bf16.mxu0 %v19200_v54  ;;  %v6308_v44 = vsel %vm19992_vm11, %v6299_v16, %v6307_v15  ;;  %v15655_v53 = vrot.slane %v22408_v37, 11  ;;  %v15656_v16 = vrot.slane %v22422_v40, 11  ;;  %v6587_v15 = vrot.slane %v22315_v14, 7 }
 0x272   : > { %v17767_v48 = vpop.f32.mrb[96].mxu0  ;;  %v6326_v10 = vsel %vm19992_vm11, %v6317_v34, %v6325_v60  ;;  %v19206_v60 = vld [vmem:[%s24920_s1 + $0x4f8] sm:$0xff]   ;;  %v6568_v42 = vsel %vm20128_vm14, %v15651_v35, %v6567_v28  ;;  %v22544_v35 = vsel %vm20128_vm14, %v15653_v18, %v6575_v50  ;;  %v22547_v28 = vld [vmem:[%s19555_s6 + $0x64] sm:$0x1]  ;;  %v7091_v37 = vshll.u32 %v22444_v59, 16 }
 0x273   : > { %v4172_v27 = vpop.f32.mrb[97].mxu0  ;;  %v15625_v49 = vcombine.low %v6308_v44, %v6326_v10  ;;  %v22438_v48 = vld [vmem:[%s19555_s6 + $0x20] sm:$0xe]  ;;  %v22468_v10 = vld [vmem:[%s19555_s6 + $0x3c] sm:$0x1]  ;;  %v7082_v40 = vshll.u32 %v22587_v61, 16 }
 0x274   : > { %v22379_v12 = vadd.f32 %v4172_v27, %v22233_v0  ;;  %v17768_v11 = vpop.f32.mrb[98].mxu0  ;;  %17968 = vmatpush3.bf16.msra.mxu0 %v19200_v54  ;;  %v22447_v27 = vld [vmem:[%s19555_s6 + $0x2c] sm:$0x1]  ;;  %v7070_v8 = vshrl.u32 %v22438_v48, 16  ;;  %v22597_v50 = vld [vmem:[%s19555_s6 + $0x78] sm:$0xe] }
 0x275   : > { %v4175_v19 = vpop.f32.mrb[99].mxu0  ;;  %17969 = vmatprep.subr.bf16.mxu0 %v19201_v26  ;;  %v22454_v11 = vld [vmem:[%s19555_s6 + $0x34] sm:$0x1]  ;;  %v22600_v18 = vld [vmem:[%s19555_s6 + $0x2c] sm:$0x3] }
 0x276   : > { %v22395_v0 = vadd.f32 %v4175_v19, %v22243_v63  ;;  %v15650_v63 = vrot.slane %v22376_v38, 11  ;;  %v22464_v19 = vld [vmem:[%s19555_s6 + $0x38] sm:$0xe]  ;;  %v22528_v38 = vld [vmem:[%s19555_s6 + $0x60] sm:$0xe]  ;;  %24971 = vst [vmem:[#allocation7_spill] sm:$0xff] %v22600_v18 }
 0x277   : > { %17958 = vmatmul.mubr.bf16.gmra.mrb[4].mxu0 %v15623_v39  ;;  %v22450_v39 = vld [vmem:[%s19555_s6 + $0x30] sm:$0xe] }
 0x278   : > { %17970 = vmatpush3.bf16.msra.mxu0 %v19201_v26  ;;  %17961 = vmatprep.mubr.bf16.mxu0 %v15624_v5  ;;  %v15674_v26 = vcombine.low %v6548_v47, %v6552_v43  ;;  %v15657_v47 = vrot.slane %v22435_v57, 11  ;;  %v22471_v43 = vld [vmem:[%s19555_s6 + $0x40] sm:$0xe]  ;;  %v6564_v62 = vsel %vm20128_vm14, %v15650_v63, %v6563_v6  ;;  %v22536_v6 = vsel %vm20128_vm14, %v15652_v46, %v6571_v4  ;;  %v19210_v57 = vld [vmem:[%s24920_s1 + $0x518] sm:$0xff]  }
 0x279   : > { %17971 = vmatprep.subr.bf16.mxu0 %v19202_v13  ;;  %v15676_v63 = vcombine.low %v6564_v62, %v6568_v42  ;;  %v7073_v4 = vshll.u32 %v22438_v48, 16  ;;  %v6580_v42 = vsel %vm20128_vm14, %v15654_v52, %v6579_v22  ;;  %v6584_v62 = vsel %vm20128_vm14, %v15655_v53, %v6583_v51  ;;  %v22592_v52 = vld [vmem:[%s19555_s6 + $0x74] sm:$0x1] }
 0x27a   : > { %v7072_v22 = vrot.slane %v7070_v8, 5  ;;  %v15677_v51 = vcombine.low %v22536_v6, %v22544_v35  ;;  %v22612_v8 = vld [vmem:[%s19555_s6 + $0x7c] sm:$0x1]  ;;  %v7079_v35 = vshrl.u32 %v22587_v61, 16  ;;  %v6592_v14 = vsel %vm20128_vm14, %v15657_v47, %v6591_v20 }
 0x27b   : > { %v7075_v53 = vrot.slane %v7073_v4, 6  ;;  %v7097_v6 = vshrl.u32 %v22600_v18, 16  ;;  %v7106_v24 = vshrl.u32 %v22450_v39, 16  ;;  %v7100_v20 = vshll.u32 %v22600_v18, 16 }
 0x27c   : > { %17972 = vmatpush3.bf16.msra.mxu0 %v19202_v13  ;;  %v24980_v31 = vrot.slane %v22450_v39, 9 }
 0x27d   : > { %17973 = vmatprep.subr.bf16.mxu0 %v19203_v2 }
 0x27f   : > { %17962 = vmatmul.mubr.bf16.gmra.mrb[152].mxu0 %v15625_v49  ;;  %v6556_v49 = vsel %vm20128_vm14, %v15648_v25, %v6555_v32  ;;  %v19207_v32 = vld [vmem:[%s24920_s1 + $0x500] sm:$0xff]   ;;  %v22707_v25 = vld [vmem:[%s19555_s6 + $0x54] sm:$0x3] }
 0x280   : > { %17974 = vmatpush3.bf16.msra.mxu0 %v19203_v2  ;;  %17981 = vmatprep.mubr.bf16.mxu0 %v15674_v26  ;;  %24981 = vst [vmem:[#allocation12_spill] sm:$0xff] %v22707_v25 }
 0x281   : > { %17975 = vmatprep.subr.bf16.mxu0 %v19204_v30 }
 0x282   : > { %v17787_v13 = vpop.f32.mrb[100].mxu0 }
 0x283   : > { %v22457_v5 = vadd.f32 %v17787_v13, %v22311_v23  ;;  %v4406_v34 = vpop.f32.mrb[101].mxu0  ;;  %v22488_v13 = vld [vmem:[%s19555_s6 + $0x44] sm:$0x1] }
 0x284   : > { %v17788_v44 = vpop.f32.mrb[102].mxu0  ;;  %17976 = vmatpush3.bf16.msra.mxu0 %v19204_v30  ;;  %v6560_v30 = vsel %vm20128_vm14, %v15649_v9, %v6559_v17  ;;  %v6829_v34 = vrot.slane %v22441_v36, 5  ;;  %v22516_v17 = vld [vmem:[%s19555_s6 + $0x50] sm:$0xe]  ;;  %v22696_v9 = vld [vmem:[%s19555_s6 + $0x4c] sm:$0x3] }
 0x285   : > { %v22474_v23 = vadd.f32 %v17788_v44, %v22321_v45  ;;  %v4409_v2 = vpop.f32.mrb[103].mxu0  ;;  %17977 = vmatprep.subr.bf16.mxu0 %v19205_v1  ;;  %v22491_v45 = vld [vmem:[%s19555_s6 + $0x48] sm:$0xe]  ;;  %v22504_v44 = vld [vmem:[%s19555_s6 + $0x4c] sm:$0x1]  ;;  %v15675_v26 = vcombine.low %v6556_v49, %v6560_v30  ;;  %24978 = vst [vmem:[#allocation11_spill] sm:$0xff] %v22696_v9 }
 0x286   : > { %v22522_v2 = vld [vmem:[%s19555_s6 + $0x58] sm:$0xe]  ;;  %v22550_v49 = vld [vmem:[%s19555_s6 + $0x68] sm:$0xe]  ;;  %v22581_v30 = vld [vmem:[%s19555_s6 + $0x70] sm:$0xe] }
 0x288   : > { %17978 = vmatpush3.bf16.msra.mxu0 %v19205_v1  ;;  %v22525_v1 = vld [vmem:[%s19555_s6 + $0x5c] sm:$0x1] }
 0x289   : > { %17979 = vmatprep.subr.bf16.mxu0 %v19206_v60 }
 0x28c   : > { %17980 = vmatpush3.bf16.msra.mxu0 %v19206_v60  ;;  %v22563_v60 = vld [vmem:[%s19555_s6 + $0x6c] sm:$0x1] }
 0x28d   : > { %17993 = vmatprep.subr.bf16.mxu0 %v19207_v32 }
 0x28f   : > { %17982 = vmatmul.mubr.bf16.vlgmr.msra.gmra.mrb[156].mxu0 %v15675_v26  ;;  %v15678_v26 = vcombine.low %v6580_v42, %v6584_v62  ;;  %v7076_v62 = vor.u32 %v7075_v53, %v7072_v22  ;;  %v22641_v22 = vld [vmem:[%s19555_s6 + $0x34] sm:$0x3]  ;;  %v7124_v53 = vshrl.u32 %v22464_v19, 16 }
 0x290   : > { %17994 = vmatpush3.bf16.msra.mxu0 %v19207_v32  ;;  %17985 = vmatprep.mubr.bf16.mxu0 %v15676_v63  ;;  %v22608_v32 = vsel %vm20128_vm14, %v15656_v16, %v6587_v15  ;;  %v7090_v16 = vrot.slane %v7088_v21, 5  ;;  %v7093_v15 = vrot.slane %v7091_v37, 6  ;;  %v7109_v21 = vshll.u32 %v22450_v39, 16  ;;  %24972 = vst [vmem:[#allocation8_spill] sm:$0xff] %v22641_v22 }
 0x291   : > { %17995 = vmatprep.subr.bf16.mxu0 %v19208_v56  ;;  %v22638_v37 = vrot.slane %v7079_v35, 5  ;;  %v22663_v36 = vrot.slane %v7076_v62, 4  ;;  %v7142_v62 = vshrl.u32 %v22471_v43, 16  ;;  %v24982_v39 = vrot.slane %v22468_v10, 5 }
 0x292   : > { %v17795_v41 = vpop.f32.mrb[104].mxu0 }
 0x293   : > { %v4438_v4 = vpop.f32.mrb[105].mxu0 }
 0x294   : > { %v22624_v41 = vadd.f32 %v4438_v4, %v22379_v12  ;;  %v17796_v42 = vpop.f32.mrb[106].mxu0  ;;  %17996 = vmatpush3.bf16.msra.mxu0 %v19208_v56  ;;  %v7127_v4 = vshll.u32 %v22464_v19, 16  ;;  %v22657_v12 = vrot.slane %v7082_v40, 6  ;;  %v7115_v40 = vshrl.u32 %v22641_v22, 16 }
 0x295   : > { %v4441_v63 = vpop.f32.mrb[107].mxu0  ;;  %17997 = vmatprep.subr.bf16.mxu0 %v19209_v7  ;;  %v24973_v42 = vrot.slane %v22438_v48, 9  ;;  %v19211_v48 = vld [vmem:[%s24920_s1 + $0x520] sm:$0xff]  }
 0x296   : > { %v22636_v56 = vadd.f32 %v4441_v63, %v22395_v0  ;;  %v24974_v0 = vrot.slane %v22447_v27, 5  ;;  %v24975_v63 = vrot.slane %v22444_v59, 9  ;;  %v22668_v27 = vld [vmem:[%s19555_s6 + $0x3c] sm:$0x3]  ;;  %v7108_v59 = vrot.slane %v7106_v24, 5 }
 0x297   : > { %17986 = vmatmul.mubr.bf16.gmra.mrb[4].mxu0 %v15677_v51  ;;  %v6830_v47 = vsel %vm19744_vm7, %v24973_v42, %v6829_v34  ;;  %v7094_v34 = vor.u32 %v7093_v15, %v7090_v16  ;;  %v22665_v51 = vrot.slane %v7097_v6, 5  ;;  %24976 = vst [vmem:[#allocation9_spill] sm:$0xff] %v22668_v27  ;;  %v7111_v42 = vrot.slane %v7109_v21, 6 }
 0x298   : > { %v6834_v35 = vsel %vm19744_vm7, %v24975_v63, %v24974_v0  ;;  %17998 = vmatpush3.bf16.msra.mxu0 %v19209_v7  ;;  %17989 = vmatprep.mubr.bf16.mxu0 %v15678_v26  ;;  %v22672_v0 = vld [vmem:[%s19555_s6 + $0x44] sm:$0x3]  ;;  %v7126_v7 = vrot.slane %v7124_v53, 5  ;;  %v7129_v26 = vrot.slane %v7127_v4, 6  ;;  %v15679_v63 = vcombine.low %v22608_v32, %v6592_v14  ;;  %v19212_v32 = vld [vmem:[%s24920_s1 + $0x528] sm:$0xff]  }
 0x299   : > { %17999 = vmatprep.subr.bf16.mxu0 %v19210_v57  ;;  %24977 = vst [vmem:[#allocation10_spill] sm:$0xff] %v22672_v0  ;;  %v15740_v46 = vcombine.low %v6830_v47, %v6834_v35  ;;  %v7145_v16 = vshll.u32 %v22471_v43, 16  ;;  %v22677_v6 = vrot.slane %v7094_v34, 4  ;;  %v22679_v15 = vrot.slane %v7100_v20, 6  ;;  %v19213_v34 = vld [vmem:[%s24920_s1 + $0x530] sm:$0xff]  }
 0x29a   : > { %v7160_v24 = vshrl.u32 %v22491_v45, 16  ;;  %v7163_v21 = vshll.u32 %v22491_v45, 16  ;;  %v7112_v14 = vor.u32 %v7111_v42, %v7108_v59  ;;  %v22686_v47 = vrot.slane %v7115_v40, 5 }
 0x29b   : > { %v7133_v53 = vshrl.u32 %v22668_v27, 16  ;;  %v7130_v4 = vor.u32 %v7129_v26, %v7126_v7  ;;  %v7136_v20 = vshll.u32 %v22668_v27, 16  ;;  %v7151_v35 = vshrl.u32 %v22672_v0, 16 }
 0x29c   : > { %18000 = vmatpush3.bf16.msra.mxu0 %v19210_v57  ;;  %v7118_v57 = vshll.u32 %v22641_v22, 16  ;;  %v7144_v59 = vrot.slane %v7142_v62, 5  ;;  %v7147_v42 = vrot.slane %v7145_v16, 6  ;;  %v24979_v40 = vrot.slane %v22454_v11, 5 }
 0x29d   : > { %18001 = vmatprep.subr.bf16.mxu0 %v19211_v48  ;;  %v7162_v26 = vrot.slane %v7160_v24, 5  ;;  %v22709_v54 = vrot.slane %v7112_v14, 4  ;;  %v22713_v62 = vrot.slane %v7133_v53, 5  ;;  %v7154_v11 = vshll.u32 %v22672_v0, 16  ;;  %v19214_v53 = vld [vmem:[%s24920_s1 + $0x538] sm:$0xff]  }
 0x29e   : > { %v22704_v7 = vsel %vm19744_vm7, %v24980_v31, %v24979_v40  ;;  %v22711_v29 = vrot.slane %v7118_v57, 6  ;;  %v24983_v31 = vrot.slane %v22464_v19, 9  ;;  %v22722_v16 = vrot.slane %v7130_v4, 4 }
 0x29f   : > { %17990 = vmatmul.mubr.bf16.gmra.mrb[160].mxu0 %v15679_v63  ;;  %v7165_v63 = vrot.slane %v7163_v21, 6  ;;  %v22724_v24 = vrot.slane %v7136_v20, 6  ;;  %v22726_v21 = vrot.slane %v7151_v35, 5  ;;  %v7148_v10 = vor.u32 %v7147_v42, %v7144_v59  ;;  %v22737_v20 = vld [vmem:[%s19555_s6 + $0x5c] sm:$0x3] }
 0x2a0   : > { %18002 = vmatpush3.bf16.msra.mxu0 %v19211_v48  ;;  %18009 = vmatprep.mubr.bf16.mxu0 %v15740_v46  ;;  %v6842_v48 = vsel %vm19744_vm7, %v24983_v31, %v24982_v39  ;;  %v7169_v19 = vshrl.u32 %v22696_v9, 16  ;;  %v7172_v40 = vshll.u32 %v22696_v9, 16  ;;  %24984 = vst [vmem:[#allocation13_spill] sm:$0xff] %v22737_v20  ;;  %v7178_v35 = vshrl.u32 %v22516_v17, 16 }
 0x2a1   : > { %18003 = vmatprep.subr.bf16.mxu0 %v19212_v32  ;;  %v7166_v4 = vor.u32 %v7165_v63, %v7162_v26  ;;  %v22745_v42 = vrot.slane %v7154_v11, 6  ;;  %v24985_v26 = vrot.slane %v22488_v13, 5  ;;  %v24986_v63 = vrot.slane %v22471_v43, 9 }
 0x2a2   : > { %v17815_v46 = vpop.f32.mrb[108].mxu0  ;;  %v24987_v0 = vrot.slane %v22504_v44, 5  ;;  %v7199_v11 = vshll.u32 %v22522_v2, 16  ;;  %v22766_v27 = vrot.slane %v7148_v10, 4  ;;  %v22768_v13 = vrot.slane %v7169_v19, 5 }
 0x2a3   : > { %v22729_v14 = vadd.f32 %v17815_v46, %v22457_v5  ;;  %v4816_v57 = vpop.f32.mrb[109].mxu0  ;;  %v7181_v5 = vshll.u32 %v22516_v17, 16  ;;  %v7187_v46 = vshrl.u32 %v22707_v25, 16  ;;  %v6846_v9 = vsel %vm19744_vm7, %v24986_v63, %v24985_v26 }
 0x2a4   : > { %v17816_v39 = vpop.f32.mrb[110].mxu0  ;;  %18004 = vmatpush3.bf16.msra.mxu0 %v19212_v32  ;;  %v7190_v57 = vshll.u32 %v22707_v25, 16  ;;  %v7196_v32 = vshrl.u32 %v22522_v2, 16  ;;  %v7214_v25 = vshrl.u32 %v22528_v38, 16  ;;  %v22770_v43 = vrot.slane %v7172_v40, 6 }
 0x2a5   : > { %v22743_v31 = vadd.f32 %v17816_v39, %v22474_v23  ;;  %v4819_v59 = vpop.f32.mrb[111].mxu0  ;;  %18005 = vmatprep.subr.bf16.mxu0 %v19213_v34  ;;  %v24988_v23 = vrot.slane %v22491_v45, 9  ;;  %v7217_v26 = vshll.u32 %v22528_v38, 16  ;;  %v22773_v44 = vrot.slane %v7166_v4, 4 }
 0x2a6   : > { %v22763_v59 = vld [vmem:[%s19555_s6 + $0x64] sm:$0x3]  ;;  %v7180_v45 = vrot.slane %v7178_v35, 5  ;;  %v7183_v63 = vrot.slane %v7181_v5, 6  ;;  %v22780_v10 = vrot.slane %v7190_v57, 6  ;;  %v7198_v19 = vrot.slane %v7196_v32, 5 }
 0x2a7   : > { %v6850_v39 = vsel %vm19744_vm7, %v24988_v23, %v24987_v0  ;;  %v22775_v0 = vrot.slane %v7187_v46, 5  ;;  %v19215_v23 = vld [vmem:[%s24920_s1 + $0x540] sm:$0xff]   ;;  %v7205_v40 = vshrl.u32 %v22737_v20, 16  ;;  %v7208_v22 = vshll.u32 %v22737_v20, 16  ;;  %v19216_v57 = vld [vmem:[%s24920_s1 + $0x548] sm:$0xff]  }
 0x2a8   : > { %18006 = vmatpush3.bf16.msra.mxu0 %v19213_v34  ;;  %24989 = vst [vmem:[#allocation14_spill] sm:$0xff] %v22780_v10  ;;  %v7201_v34 = vrot.slane %v7199_v11, 6  ;;  %v7216_v4 = vrot.slane %v7214_v25, 5  ;;  %v7223_v35 = vshrl.u32 %v22763_v59, 16  ;;  %v7232_v5 = vshrl.u32 %v22550_v49, 16 }
 0x2a9   : > { %18007 = vmatprep.subr.bf16.mxu0 %v19214_v53  ;;  %v15741_v46 = vcombine.low %v22704_v7, %v6842_v48  ;;  %v7219_v55 = vrot.slane %v7217_v26, 6  ;;  %v7235_v32 = vshll.u32 %v22550_v49, 16  ;;  %v15742_v18 = vcombine.low %v6846_v9, %v6850_v39  ;;  %v22794_v20 = vld [vmem:[%s19555_s6 + $0x6c] sm:$0x3] }
 0x2aa   : > { %v7184_v61 = vor.u32 %v7183_v63, %v7180_v45  ;;  %v7250_v11 = vshrl.u32 %v22581_v30, 16  ;;  %v7253_v25 = vshll.u32 %v22581_v30, 16  ;;  %v24990_v10 = vrot.slane %v22519_v3, 5  ;;  %v22809_v45 = vld [vmem:[%s19555_s6 + $0x74] sm:$0x3] }
 0x2ab   : > { %v24991_v7 = vrot.slane %v22516_v17, 9  ;;  %v24992_v26 = vrot.slane %v22525_v1, 5  ;;  %v7202_v39 = vor.u32 %v7201_v34, %v7198_v19  ;;  %v24994_v63 = vrot.slane %v22547_v28, 5 }
 0x2ac   : > { %18008 = vmatpush3.bf16.msra.mxu0 %v19214_v53  ;;  %v24993_v53 = vrot.slane %v22522_v2, 9  ;;  %v24995_v3 = vrot.slane %v22528_v38, 9  ;;  %v24997_v1 = vrot.slane %v22550_v49, 9  ;;  %v7085_v19 = vor.u32 %v22657_v12, %v22638_v37  ;;  %v19217_v49 = vld [vmem:[%s24920_s1 + $0x550] sm:$0xff]  }
 0x2ad   : > { %18021 = vmatprep.subr.bf16.mxu0 %v19215_v23  ;;  %v6854_v48 = vsel %vm19744_vm7, %v24991_v7, %v24990_v10  ;;  %v24996_v10 = vrot.slane %v22563_v60, 5  ;;  %v7103_v34 = vor.u32 %v22679_v15, %v22665_v51  ;;  %v22827_v28 = vrot.slane %v7184_v61, 4 }
 0x2ae   : > { %v6858_v9 = vsel %vm19744_vm7, %v24993_v53, %v24992_v26  ;;  %v6862_v17 = vsel %vm19744_vm7, %v24995_v3, %v24994_v63  ;;  %v22829_v38 = vrot.slane %v7205_v40, 5  ;;  %v7237_v7 = vrot.slane %v7235_v32, 6  ;;  %v22851_v63 = vld [vmem:[%s19555_s6 + $0x7c] sm:$0x3] }
 0x2af   : > { %18010 = vmatmul.mubr.bf16.vlgmr.msra.gmra.mrb[164].mxu0 %v15741_v46  ;;  %v6866_v2 = vsel %vm19744_vm7, %v24997_v1, %v24996_v10  ;;  %v7234_v46 = vrot.slane %v7232_v5, 5  ;;  %v22834_v60 = vrot.slane %v7208_v22, 6  ;;  %v7226_v12 = vshll.u32 %v22763_v59, 16  ;;  %v19218_v22 = vld [vmem:[%s24920_s1 + $0x558] sm:$0xff]  }
 0x2b0   : > { %18022 = vmatpush3.bf16.msra.mxu0 %v19215_v23  ;;  %18013 = vmatprep.mubr.bf16.mxu0 %v15742_v18  ;;  %v7252_v37 = vrot.slane %v7250_v11, 5  ;;  %v7255_v26 = vrot.slane %v7253_v25, 6  ;;  %v22837_v18 = vrot.slane %v7202_v39, 4  ;;  %v22839_v61 = vrot.slane %v7223_v35, 5 }
 0x2b1   : > { %18023 = vmatprep.subr.bf16.mxu0 %v19216_v57  ;;  %v7241_v15 = vshrl.u32 %v22794_v20, 16  ;;  %v7244_v23 = vshll.u32 %v22794_v20, 16  ;;  %v15743_v5 = vcombine.low %v6854_v48, %v6858_v9  ;;  %v7220_v32 = vor.u32 %v7219_v55, %v7216_v4 }
 0x2b2   : > { %v17823_v51 = vpop.f32.mrb[112].mxu0  ;;  %v7259_v11 = vshrl.u32 %v22809_v45, 16  ;;  %v15744_v35 = vcombine.low %v6862_v17, %v6866_v2  ;;  %v7238_v39 = vor.u32 %v7237_v7, %v7234_v46  ;;  %v7262_v3 = vshll.u32 %v22809_v45, 16 }
 0x2b3   : > { %v4848_v40 = vpop.f32.mrb[113].mxu0  ;;  %v24998_v48 = vrot.slane %v22592_v52, 5  ;;  %v24999_v9 = vrot.slane %v22581_v30, 9  ;;  %v7256_v4 = vor.u32 %v7255_v26, %v7252_v37  ;;  %v25000_v17 = vrot.slane %v22612_v8, 5  ;;  %v19219_v37 = vld [vmem:[%s24920_s1 + $0x560] sm:$0xff]  }
 0x2b4   : > { %v22848_v25 = vadd.f32 %v4848_v40, %v22624_v41  ;;  %v17824_v53 = vpop.f32.mrb[114].mxu0  ;;  %18024 = vmatpush3.bf16.msra.mxu0 %v19216_v57  ;;  %v7268_v41 = vshrl.u32 %v22597_v50, 16  ;;  %v25001_v1 = vrot.slane %v22597_v50, 9  ;;  %v7086_v30 = vsel %vm19599_vm2, %v22663_v36, %v7085_v19 }
 0x2b5   : > { %v4851_v10 = vpop.f32.mrb[115].mxu0  ;;  %18025 = vmatprep.subr.bf16.mxu0 %v19217_v49  ;;  %v6870_v55 = vsel %vm19744_vm7, %v24999_v9, %v24998_v48  ;;  %v7104_v52 = vsel %vm19599_vm2, %v22677_v6, %v7103_v34  ;;  %v22876_v46 = vrot.slane %v7220_v32, 4  ;;  %v22880_v7 = vrot.slane %v7241_v15, 5 }
 0x2b6   : > { %v22862_v57 = vadd.f32 %v4851_v10, %v22636_v56  ;;  %v6874_v2 = vsel %vm19744_vm7, %v25001_v1, %v25000_v17  ;;  %v22878_v56 = vrot.slane %v7226_v12, 6  ;;  %v22882_v8 = vrot.slane %v7244_v23, 6  ;;  %v19220_v23 = vld [vmem:[%s24920_s1 + $0x568] sm:$0xff]  }
 0x2b7   : > { %18014 = vmatmul.mubr.bf16.gmra.mrb[4].mxu0 %v15743_v5  ;;  %v7239_v36 = vrot.slane %v7238_v39, 4  ;;  %v22887_v19 = vrot.slane %v7259_v11, 5  ;;  %v22889_v26 = vrot.slane %v7262_v3, 6  ;;  %v7271_v6 = vshll.u32 %v22597_v50, 16  ;;  %v19221_v50 = vld [vmem:[%s24920_s1 + $0x570] sm:$0xff]  }
 0x2b8   : > { %18026 = vmatpush3.bf16.msra.mxu0 %v19217_v49  ;;  %18017 = vmatprep.mubr.bf16.mxu0 %v15744_v35  ;;  %v22892_v34 = vrot.slane %v7256_v4, 4  ;;  %v22894_v12 = vrot.slane %v7268_v41, 5  ;;  %v7277_v49 = vshrl.u32 %v22851_v63, 16  ;;  %v7280_v51 = vshll.u32 %v22851_v63, 16  ;;  %v22905_v5 = vld [vmem:[%s19555_s6 + $0x20] sm:$0xc] }
 0x2b9   : > { %18027 = vmatprep.subr.bf16.mxu0 %v19218_v22  ;;  %v15745_v15 = vcombine.low %v6870_v55, %v6874_v2  ;;  %v15782_v40 = vcombine.low %v7086_v30, %v7104_v52  ;;  %v7273_v11 = vrot.slane %v7271_v6, 6  ;;  %v7121_v10 = vor.u32 %v22711_v29, %v22686_v47  ;;  %v19223_v29 = vld [vmem:[%s24920_s1 + $0x580] sm:$0xff]  }
 0x2ba   : > { %v7279_v39 = vrot.slane %v7277_v49, 5  ;;  %v7139_v48 = vor.u32 %v22724_v24, %v22713_v62  ;;  %v7282_v9 = vrot.slane %v7280_v51, 6  ;;  %v7157_v4 = vor.u32 %v22745_v42, %v22726_v21  ;;  %v19224_v42 = vld [vmem:[%s24920_s1 + $0x588] sm:$0xff]   ;;  %v25004_v6 = vld [vmem:[#allocation7_spill] sm:$0xff] }
 0x2bb   : > { %v7175_v41 = vor.u32 %v22770_v43, %v22768_v13  ;;  %v15808_v17 = vrot.slane %v22905_v5, 10  ;;  %v7122_v47 = vsel %vm19599_vm2, %v22709_v54, %v7121_v10  ;;  %v25002_v54 = vld [vmem:[#allocation14_spill] sm:$0xff]  ;;  %v7274_v2 = vor.u32 %v7273_v11, %v22894_v12  ;;  %v23005_v10 = vld [vmem:[%s19555_s6 + $0x40] sm:$0xc] }
 0x2bc   : > { %18028 = vmatpush3.bf16.msra.mxu0 %v19218_v22  ;;  %v19222_v22 = vld [vmem:[%s24920_s1 + $0x578] sm:$0xff]   ;;  %v7140_v62 = vsel %vm19599_vm2, %v22722_v16, %v7139_v48  ;;  %v7158_v24 = vsel %vm19599_vm2, %v22766_v27, %v7157_v4  ;;  %v7193_v13 = vor.u32 %v25002_v54, %v22775_v0  ;;  %v7211_v16 = vor.u32 %v22834_v60, %v22829_v38  ;;  %v19225_v38 = vld [vmem:[%s24920_s1 + $0x590] sm:$0xff]   ;;  %v23008_v48 = vld [vmem:[%s19555_s6 + $0x48] sm:$0xc] }
 0x2bd   : > { %18029 = vmatprep.subr.bf16.mxu0 %v19219_v37  ;;  %v7176_v21 = vsel %vm19599_vm2, %v22773_v44, %v7175_v41  ;;  %v7229_v27 = vor.u32 %v22878_v56, %v22839_v61  ;;  %v7247_v44 = vor.u32 %v22882_v8, %v22880_v7  ;;  %v19226_v8 = vld [vmem:[%s24920_s1 + $0x598] sm:$0xff]   ;;  %v7265_v12 = vor.u32 %v22889_v26, %v22887_v19  ;;  %v25006_v41 = vld [vmem:[#allocation8_spill] sm:$0xff]  ;;  %v25009_v54 = vld [vmem:[#allocation11_spill] sm:$0xff] }
 0x2be   : > { %v15784_v43 = vcombine.low %v7158_v24, %v7176_v21  ;;  %v7194_v1 = vsel %vm19599_vm2, %v22827_v28, %v7193_v13  ;;  %v7212_v0 = vsel %vm19599_vm2, %v22837_v18, %v7211_v16  ;;  %v22967_v28 = vld [vmem:[%s19555_s6 + $0x28] sm:$0xc]  ;;  %v25003_v18 = vld [vmem:[#allocation6_spill] sm:$0xff]  ;;  %v7275_v51 = vrot.slane %v7274_v2, 4  ;;  %v19229_v16 = vld [vmem:[%s24920_s1 + $0x5b0] sm:$0xff]  }
 0x2bf   : > { %18018 = vmatmul.mubr.bf16.gmra.mrb[168].mxu0 %v15745_v15  ;;  %v7230_v60 = vsel %vm19599_vm2, %v22876_v46, %v7229_v27  ;;  %v7248_v61 = vsel %vm19599_vm2, %v7239_v36, %v7247_v44  ;;  %v7505_v52 = vrot.slane %v25003_v18, 6  ;;  %v15785_v7 = vcombine.low %v7194_v1, %v7212_v0  ;;  %v25008_v21 = vld [vmem:[#allocation10_spill] sm:$0xff]  ;;  %v25010_v27 = vld [vmem:[#allocation12_spill] sm:$0xff]  ;;  %v25011_v0 = vld [vmem:[#allocation13_spill] sm:$0xff] }
 0x2c0   : > { %18030 = vmatpush3.bf16.msra.mxu0 %v19219_v37  ;;  %18037 = vmatprep.mubr.bf16.mxu0 %v15782_v40  ;;  %v15786_v37 = vcombine.low %v7230_v60, %v7248_v61  ;;  %v7509_v46 = vrot.slane %v25004_v6, 6  ;;  %v7283_v15 = vor.u32 %v7282_v9, %v7279_v39  ;;  %v15809_v40 = vrot.slane %v22967_v28, 10  ;;  %v22996_v39 = vld [vmem:[%s19555_s6 + $0x30] sm:$0xc]  ;;  %v23037_v18 = vld [vmem:[%s19555_s6 + $0x60] sm:$0xc] }
 0x2c1   : > { %18031 = vmatprep.subr.bf16.mxu0 %v19220_v23  ;;  %v23011_v9 = vld [vmem:[%s19555_s6 + $0x50] sm:$0xc]  ;;  %v15810_v4 = vrot.slane %v22996_v39, 10  ;;  %v15812_v24 = vrot.slane %v23005_v10, 10  ;;  %v7525_v13 = vrot.slane %v25009_v54, 6  ;;  %v7529_v44 = vrot.slane %v25010_v27, 6 }
 0x2c2   : > { %v17843_v32 = vpop.f32.mrb[116].mxu0  ;;  %v7284_v19 = vsel %vm19599_vm2, %v7275_v51, %v7283_v15  ;;  %v7510_v11 = vsel %vm19802_vm8, %v15809_v40, %v7509_v46  ;;  %v7537_v15 = vrot.slane %v22763_v59, 6  ;;  %v7541_v40 = vrot.slane %v22794_v20, 6  ;;  %v19231_v20 = vld [vmem:[%s24920_s1 + $0x5c0] sm:$0xff]  }
 0x2c3   : > { %v22908_v53 = vadd.f32 %v17843_v32, %v22729_v14  ;;  %v5082_v35 = vpop.f32.mrb[117].mxu0  ;;  %v7506_v32 = vsel %vm19802_vm8, %v15808_v17, %v7505_v52  ;;  %v7513_v17 = vrot.slane %v25006_v41, 6  ;;  %v23040_v52 = vld [vmem:[%s19555_s6 + $0x68] sm:$0xc]  ;;  %v7782_v27 = vshrl.u32 %v22996_v39, 16 }
 0x2c4   : > { %v17844_v3 = vpop.f32.mrb[118].mxu0  ;;  %18032 = vmatpush3.bf16.msra.mxu0 %v19220_v23 }
 0x2c5   : > { %v22918_v55 = vadd.f32 %v17844_v3, %v22743_v31  ;;  %v5085_v14 = vpop.f32.mrb[119].mxu0  ;;  %18033 = vmatprep.subr.bf16.mxu0 %v19221_v50  ;;  %v15783_v31 = vcombine.low %v7122_v47, %v7140_v62  ;;  %v19228_v3 = vld [vmem:[%s24920_s1 + $0x5a8] sm:$0xff]   ;;  %v25007_v47 = vld [vmem:[#allocation9_spill] sm:$0xff] }
 0x2c6   : > { %v23014_v14 = vld [vmem:[%s19555_s6 + $0x58] sm:$0xc]  ;;  %v7517_v62 = vrot.slane %v25007_v47, 6 }
 0x2c7   : > { %v15815_v1 = vrot.slane %v23014_v14, 10  ;;  %v23095_v47 = vld [vmem:[%s19555_s6 + $0x78] sm:$0xc] }
 0x2c8   : > { %18034 = vmatpush3.bf16.msra.mxu0 %v19221_v50 }
 0x2c9   : > { %18035 = vmatprep.subr.bf16.mxu0 %v19222_v22 }
 0x2cc   : > { %18036 = vmatpush3.bf16.msra.mxu0 %v19222_v22  ;;  %v15836_v22 = vcombine.low %v7506_v32, %v7510_v11  ;;  %v7767_v32 = vshll.u32 %v22967_v28, 16 }
 0x2cd   : > { %18049 = vmatprep.subr.bf16.mxu0 %v19223_v29 }
 0x2cf   : > { %18038 = vmatmul.mubr.bf16.vlgmr.msra.gmra.mrb[172].mxu0 %v15783_v31  ;;  %v7521_v31 = vrot.slane %v25008_v21, 6 }
 0x2d0   : > { %18050 = vmatpush3.bf16.msra.mxu0 %v19223_v29  ;;  %18041 = vmatprep.mubr.bf16.mxu0 %v15784_v43  ;;  %v15814_v43 = vrot.slane %v23011_v9, 10 }
 0x2d1   : > { %18051 = vmatprep.subr.bf16.mxu0 %v19224_v42 }
 0x2d2   : > { %v17851_v30 = vpop.f32.mrb[120].mxu0  ;;  %v23058_v51 = vsel %vm19802_vm8, %v15814_v43, %v7529_v44  ;;  %v23103_v43 = vld [vmem:[%s19555_s6 + $0x34] sm:$0x7]  ;;  %v7785_v44 = vshll.u32 %v22996_v39, 16  ;;  %v7818_v39 = vshrl.u32 %v23005_v10, 16 }
 0x2d3   : > { %v5114_v56 = vpop.f32.mrb[121].mxu0  ;;  %v7514_v30 = vsel %vm19802_vm8, %v15810_v4, %v7513_v17 }
 0x2d4   : > { %v22975_v49 = vadd.f32 %v5114_v56, %v22848_v25  ;;  %v17852_v36 = vpop.f32.mrb[122].mxu0  ;;  %18052 = vmatpush3.bf16.msra.mxu0 %v19224_v42  ;;  %v7266_v25 = vsel %vm19599_vm2, %v22892_v34, %v7265_v12  ;;  %v22999_v34 = vld [vmem:[%s19555_s6 + $0x38] sm:$0xc]  ;;  %v15813_v42 = vrot.slane %v23008_v48, 10 }
 0x2d5   : > { %v5117_v23 = vpop.f32.mrb[123].mxu0  ;;  %18053 = vmatprep.subr.bf16.mxu0 %v19225_v38  ;;  %v15787_v35 = vcombine.low %v7266_v25, %v7284_v19  ;;  %v15811_v29 = vrot.slane %v22999_v34, 10  ;;  %v19230_v36 = vld [vmem:[%s24920_s1 + $0x5b8] sm:$0xff]   ;;  %v23069_v25 = vld [vmem:[%s19555_s6 + $0x70] sm:$0xc] }
 0x2d6   : > { %v22981_v50 = vadd.f32 %v5117_v23, %v22862_v57  ;;  %v19227_v57 = vld [vmem:[%s24920_s1 + $0x5a0] sm:$0xff]   ;;  %v7526_v12 = vsel %vm19802_vm8, %v15813_v42, %v7525_v13  ;;  %v15817_v23 = vrot.slane %v23040_v52, 10  ;;  %v15818_v41 = vrot.slane %v23069_v25, 10 }
 0x2d7   : > { %18042 = vmatmul.mubr.bf16.gmra.mrb[4].mxu0 %v15785_v7  ;;  %v7518_v7 = vsel %vm19802_vm8, %v15811_v29, %v7517_v62  ;;  %v23072_v19 = vld [vmem:[%s19555_s6 + $0x24] sm:$0x7]  ;;  %v7549_v13 = vrot.slane %v22851_v63, 6 }
 0x2d8   : > { %18054 = vmatpush3.bf16.msra.mxu0 %v19225_v38  ;;  %18045 = vmatprep.mubr.bf16.mxu0 %v15786_v37  ;;  %v7533_v38 = vrot.slane %v25011_v0, 6  ;;  %v7749_v37 = vshll.u32 %v22905_v5, 16  ;;  %v15837_v11 = vcombine.low %v7514_v30, %v7518_v7  ;;  %v23092_v29 = vsel %vm19802_vm8, %v15817_v23, %v7541_v40  ;;  %v23116_v7 = vld [vmem:[%s19555_s6 + $0x3c] sm:$0x7]  ;;  %v19235_v63 = vld [vmem:[%s24920_s1 + $0x5e0] sm:$0xff]  }
 0x2d9   : > { %18055 = vmatprep.subr.bf16.mxu0 %v19226_v8  ;;  %v7755_v62 = vshrl.u32 %v23072_v19, 16  ;;  %v7794_v23 = vshll.u32 %v23103_v43, 16 }
 0x2db   : > { %v7757_v30 = vrot.slane %v7755_v62, 6 }
 0x2dc   : > { %18056 = vmatpush3.bf16.msra.mxu0 %v19226_v8  ;;  %v7522_v8 = vsel %vm19802_vm8, %v15812_v24, %v7521_v31  ;;  %v7758_v24 = vshll.u32 %v23072_v19, 16  ;;  %v7769_v31 = vrot.slane %v7767_v32, 7  ;;  %v7809_v32 = vshrl.u32 %v23116_v7, 16 }
 0x2dd   : > { %18057 = vmatprep.subr.bf16.mxu0 %v19227_v57  ;;  %v15838_v59 = vcombine.low %v7522_v8, %v7526_v12  ;;  %v7821_v8 = vshll.u32 %v23005_v10, 16  ;;  %v23122_v12 = vld [vmem:[%s19555_s6 + $0x44] sm:$0x7]  ;;  %v19233_v10 = vld [vmem:[%s24920_s1 + $0x5d0] sm:$0xff]  }
 0x2df   : > { %18046 = vmatmul.mubr.bf16.gmra.mrb[176].mxu0 %v15787_v35  ;;  %v23077_v35 = vld [vmem:[%s19555_s6 + $0x2c] sm:$0x7] }
 0x2e0   : > { %18058 = vmatpush3.bf16.msra.mxu0 %v19227_v57  ;;  %18065 = vmatprep.mubr.bf16.mxu0 %v15836_v22  ;;  %v7764_v57 = vshrl.u32 %v22967_v28, 16  ;;  %v7545_v28 = vrot.slane %v22809_v45, 6  ;;  %v7773_v42 = vshrl.u32 %v23077_v35, 16  ;;  %v7776_v54 = vshll.u32 %v23077_v35, 16 }
 0x2e1   : > { %18059 = vmatprep.subr.bf16.mxu0 %v19228_v3 }
 0x2e2   : > { %v17871_v60 = vpop.f32.mrb[124].mxu0  ;;  %v7766_v21 = vrot.slane %v7764_v57, 6 }
 0x2e3   : > { %v23032_v61 = vadd.f32 %v17871_v60, %v22908_v53  ;;  %v5364_v2 = vpop.f32.mrb[125].mxu0  ;;  %v7746_v53 = vshrl.u32 %v22905_v5, 16  ;;  %v23062_v5 = vsel %vm19802_vm8, %v15815_v1, %v7533_v38  ;;  %v19232_v1 = vld [vmem:[%s24920_s1 + $0x5c8] sm:$0xff]   ;;  %v15819_v38 = vrot.slane %v23095_v47, 10 }
 0x2e4   : > { %v17872_v56 = vpop.f32.mrb[126].mxu0  ;;  %18060 = vmatpush3.bf16.msra.mxu0 %v19228_v3  ;;  %v7751_v3 = vrot.slane %v7749_v37, 7  ;;  %v15839_v4 = vcombine.low %v23058_v51, %v23062_v5  ;;  %v7800_v60 = vshrl.u32 %v22999_v34, 16  ;;  %v7803_v2 = vshll.u32 %v22999_v34, 16  ;;  %v19244_v51 = vld [vmem:[%s24920_s1 + $0x628] sm:$0xff]  }
 0x2e5   : > { %v23049_v6 = vadd.f32 %v17872_v56, %v22918_v55  ;;  %v5367_v46 = vpop.f32.mrb[127].mxu0  ;;  %18061 = vmatprep.subr.bf16.mxu0 %v19229_v16  ;;  %v15816_v55 = vrot.slane %v23037_v18, 10  ;;  %v7748_v22 = vrot.slane %v7746_v53, 6  ;;  %v7760_v56 = vrot.slane %v7758_v24, 7 }
 0x2e6   : > { %v7770_v53 = vor.u32 %v7769_v31, %v7766_v21  ;;  %v7775_v37 = vrot.slane %v7773_v42, 6  ;;  %v7778_v46 = vrot.slane %v7776_v54, 7  ;;  %v7784_v34 = vrot.slane %v7782_v27, 6  ;;  %v23136_v27 = vld [vmem:[%s19555_s6 + $0x4c] sm:$0x7] }
 0x2e7   : > { %v23088_v17 = vsel %vm19802_vm8, %v15816_v55, %v7537_v15  ;;  %v7787_v15 = vrot.slane %v7785_v44, 7  ;;  %v7802_v40 = vrot.slane %v7800_v60, 6  ;;  %v7805_v57 = vrot.slane %v7803_v2, 7 }
 0x2e8   : > { %18062 = vmatpush3.bf16.msra.mxu0 %v19229_v16  ;;  %v7752_v16 = vor.u32 %v7751_v3, %v7748_v22  ;;  %v15840_v0 = vcombine.low %v23088_v17, %v23092_v29  ;;  %v7820_v3 = vrot.slane %v7818_v39, 6  ;;  %v7830_v17 = vshll.u32 %v23122_v12, 16 }
 0x2e9   : > { %18063 = vmatprep.subr.bf16.mxu0 %v19230_v36  ;;  %v7761_v62 = vor.u32 %v7760_v56, %v7757_v30  ;;  %v7771_v24 = vrot.slane %v7770_v53, 4  ;;  %v7779_v21 = vor.u32 %v7778_v46, %v7775_v37  ;;  %v7836_v44 = vshrl.u32 %v23008_v48, 16  ;;  %v19234_v30 = vld [vmem:[%s24920_s1 + $0x5d8] sm:$0xff]  }
 0x2ea   : > { %v7753_v55 = vrot.slane %v7752_v16, 4  ;;  %v7788_v16 = vor.u32 %v7787_v15, %v7784_v34  ;;  %v7839_v60 = vshll.u32 %v23008_v48, 16  ;;  %v7796_v56 = vrot.slane %v7794_v23, 7  ;;  %v23169_v23 = vld [vmem:[%s19555_s6 + $0x54] sm:$0x7] }
 0x2eb   : > { %v7806_v39 = vor.u32 %v7805_v57, %v7802_v40  ;;  %v7832_v46 = vrot.slane %v7830_v17, 7  ;;  %v7546_v48 = vsel %vm19802_vm8, %v15818_v41, %v7545_v28  ;;  %v7848_v34 = vshll.u32 %v23136_v27, 16 }
 0x2ec   : > { %18064 = vmatpush3.bf16.msra.mxu0 %v19230_v36  ;;  %v7791_v36 = vshrl.u32 %v23103_v43, 16  ;;  %v7762_v45 = vsel %vm19992_vm11, %v7753_v55, %v7761_v62  ;;  %v7780_v5 = vsel %vm19992_vm11, %v7771_v24, %v7779_v21  ;;  %v7841_v41 = vrot.slane %v7839_v60, 7  ;;  %v23186_v62 = vld [vmem:[%s19555_s6 + $0x5c] sm:$0x7] }
 0x2ed   : > { %18077 = vmatprep.subr.bf16.mxu0 %v19231_v20  ;;  %v7789_v28 = vrot.slane %v7788_v16, 4  ;;  %v7850_v57 = vrot.slane %v7848_v34, 7  ;;  %v7872_v24 = vshrl.u32 %v23014_v14, 16  ;;  %v7893_v16 = vshll.u32 %v23037_v18, 16 }
 0x2ee   : > { %v7793_v31 = vrot.slane %v7791_v36, 6  ;;  %v7845_v36 = vshrl.u32 %v23136_v27, 16 }
 0x2ef   : > { %18066 = vmatmul.mubr.bf16.vlgmr.msra.gmra.mrb[180].mxu0 %v15837_v11  ;;  %v7812_v11 = vshll.u32 %v23116_v7, 16  ;;  %v7895_v34 = vrot.slane %v7893_v16, 7 }
 0x2f0   : > { %18078 = vmatpush3.bf16.msra.mxu0 %v19231_v20  ;;  %18069 = vmatprep.mubr.bf16.mxu0 %v15838_v59  ;;  %v7823_v20 = vrot.slane %v7821_v8, 7  ;;  %v7827_v59 = vshrl.u32 %v23122_v12, 16  ;;  %v7811_v8 = vrot.slane %v7809_v32, 6  ;;  %v7847_v40 = vrot.slane %v7845_v36, 6 }
 0x2f1   : > { %18079 = vmatprep.subr.bf16.mxu0 %v19232_v1  ;;  %v7854_v32 = vshrl.u32 %v23011_v9, 16 }
 0x2f2   : > { %v17879_v22 = vpop.f32.mrb[128].mxu0  ;;  %v7829_v37 = vrot.slane %v7827_v59, 6  ;;  %v19236_v59 = vld [vmem:[%s24920_s1 + $0x5e8] sm:$0xff]   ;;  %v7851_v60 = vor.u32 %v7850_v57, %v7847_v40 }
 0x2f3   : > { %v5396_v29 = vpop.f32.mrb[129].mxu0 }
 0x2f4   : > { %v23133_v42 = vadd.f32 %v5396_v29, %v22975_v49  ;;  %v17880_v54 = vpop.f32.mrb[130].mxu0  ;;  %18080 = vmatpush3.bf16.msra.mxu0 %v19232_v1  ;;  %v7814_v49 = vrot.slane %v7812_v11, 7  ;;  %v7824_v1 = vor.u32 %v7823_v20, %v7820_v3  ;;  %v15878_v11 = vcombine.low %v7762_v45, %v7780_v5 }
 0x2f5   : > { %v5399_v2 = vpop.f32.mrb[131].mxu0  ;;  %18081 = vmatprep.subr.bf16.mxu0 %v19233_v10  ;;  %v7857_v3 = vshll.u32 %v23011_v9, 16  ;;  %v7863_v20 = vshrl.u32 %v23169_v23, 16  ;;  %v7875_v9 = vshll.u32 %v23014_v14, 16  ;;  %v7890_v54 = vshrl.u32 %v23037_v18, 16  ;;  %v19237_v18 = vld [vmem:[%s24920_s1 + $0x5f0] sm:$0xff]  }
 0x2f6   : > { %v23144_v53 = vadd.f32 %v5399_v2, %v22981_v50  ;;  %v7550_v50 = vsel %vm19802_vm8, %v15819_v38, %v7549_v13  ;;  %v7797_v13 = vor.u32 %v7796_v56, %v7793_v31  ;;  %v7807_v38 = vrot.slane %v7806_v39, 4  ;;  %v23195_v31 = vld [vmem:[%s19555_s6 + $0x64] sm:$0x7] }
 0x2f7   : > { %18070 = vmatmul.mubr.bf16.gmra.mrb[4].mxu0 %v15839_v4  ;;  %v7838_v4 = vrot.slane %v7836_v44, 6  ;;  %v7815_v15 = vor.u32 %v7814_v49, %v7811_v8  ;;  %v15841_v55 = vcombine.low %v7546_v48, %v7550_v50  ;;  %v7908_v44 = vshrl.u32 %v23040_v52, 16 }
 0x2f8   : > { %18082 = vmatpush3.bf16.msra.mxu0 %v19233_v10  ;;  %18073 = vmatprep.mubr.bf16.mxu0 %v15840_v0  ;;  %v7825_v0 = vrot.slane %v7824_v1, 4  ;;  %v7833_v10 = vor.u32 %v7832_v46, %v7829_v37  ;;  %v23179_v17 = vsel %vm19992_vm11, %v7789_v28, %v7797_v13  ;;  %v7856_v2 = vrot.slane %v7854_v32, 6  ;;  %v23206_v1 = vld [vmem:[%s19555_s6 + $0x6c] sm:$0x7] }
 0x2f9   : > { %18083 = vmatprep.subr.bf16.mxu0 %v19234_v30  ;;  %v7842_v22 = vor.u32 %v7841_v41, %v7838_v4  ;;  %v23183_v29 = vsel %vm19992_vm11, %v7807_v38, %v7815_v15  ;;  %v7911_v14 = vshll.u32 %v23040_v52, 16  ;;  %v7859_v39 = vrot.slane %v7857_v3, 7 }
 0x2fa   : > { %v23192_v21 = vsel %vm19992_vm11, %v7825_v0, %v7833_v10  ;;  %v23202_v8 = vrot.slane %v7863_v20, 6  ;;  %v7881_v49 = vshrl.u32 %v23186_v62, 16  ;;  %v7874_v37 = vrot.slane %v7872_v24, 6 }
 0x2fb   : > { %v7843_v56 = vrot.slane %v7842_v22, 4  ;;  %v7877_v46 = vrot.slane %v7875_v9, 7  ;;  %v7884_v48 = vshll.u32 %v23186_v62, 16  ;;  %v7899_v52 = vshrl.u32 %v23195_v31, 16 }
 0x2fc   : > { %18084 = vmatpush3.bf16.msra.mxu0 %v19234_v30  ;;  %v7866_v30 = vshll.u32 %v23169_v23, 16  ;;  %v7892_v36 = vrot.slane %v7890_v54, 6  ;;  %v7902_v45 = vshll.u32 %v23195_v31, 16  ;;  %v7910_v5 = vrot.slane %v7908_v44, 6 }
 0x2fd   : > { %18085 = vmatprep.subr.bf16.mxu0 %v19235_v63  ;;  %v7917_v28 = vshrl.u32 %v23206_v1, 16  ;;  %v7920_v13 = vshll.u32 %v23206_v1, 16  ;;  %v7852_v15 = vsel %vm19992_vm11, %v7843_v56, %v7851_v60  ;;  %v7860_v0 = vor.u32 %v7859_v39, %v7856_v2  ;;  %v23233_v60 = vld [vmem:[%s19555_s6 + $0x74] sm:$0x7] }
 0x2fe   : > { %v7868_v10 = vrot.slane %v7866_v30, 7  ;;  %v7878_v32 = vor.u32 %v7877_v46, %v7874_v37  ;;  %v7901_v22 = vrot.slane %v7899_v52, 6  ;;  %v7896_v3 = vor.u32 %v7895_v34, %v7892_v36 }
 0x2ff   : > { %18074 = vmatmul.mubr.bf16.gmra.mrb[184].mxu0 %v15841_v55  ;;  %v7883_v55 = vrot.slane %v7881_v49, 6  ;;  %v7904_v20 = vrot.slane %v7902_v45, 7  ;;  %v7929_v24 = vshll.u32 %v23069_v25, 16  ;;  %v7922_v54 = vrot.slane %v7920_v13, 7  ;;  %v19240_v45 = vld [vmem:[%s24920_s1 + $0x608] sm:$0xff]  }
 0x300   : > { %18086 = vmatpush3.bf16.msra.mxu0 %v19235_v63  ;;  %18093 = vmatprep.mubr.bf16.mxu0 %v15878_v11  ;;  %v7913_v63 = vrot.slane %v7911_v14, 7  ;;  %v7886_v11 = vrot.slane %v7884_v48, 7  ;;  %v15879_v16 = vcombine.low %v23179_v17, %v23183_v29  ;;  %v15880_v44 = vcombine.low %v23192_v21, %v7852_v15 }
 0x301   : > { %18087 = vmatprep.subr.bf16.mxu0 %v19236_v59  ;;  %v7944_v2 = vshrl.u32 %v23095_v47, 16  ;;  %v7947_v30 = vshll.u32 %v23095_v47, 16  ;;  %v7861_v14 = vrot.slane %v7860_v0, 4  ;;  %v7869_v56 = vor.u32 %v7868_v10, %v23202_v8 }
 0x302   : > { %v17899_v50 = vpop.f32.mrb[132].mxu0  ;;  %v7914_v9 = vor.u32 %v7913_v63, %v7910_v5  ;;  %v7879_v39 = vrot.slane %v7878_v32, 4  ;;  %v7887_v49 = vor.u32 %v7886_v11, %v7883_v55  ;;  %v7897_v17 = vrot.slane %v7896_v3, 4  ;;  %v15892_v32 = vld [vmem:[%s19555_s6 + $0x20] sm:$0x8] }
 0x303   : > { %v23215_v4 = vadd.f32 %v17899_v50, %v23032_v61  ;;  %v5774_v41 = vpop.f32.mrb[133].mxu0  ;;  %v19238_v61 = vld [vmem:[%s24920_s1 + $0x5f8] sm:$0xff]   ;;  %v7905_v29 = vor.u32 %v7904_v20, %v7901_v22  ;;  %v7931_v37 = vrot.slane %v7929_v24, 7  ;;  %v7935_v47 = vshrl.u32 %v23233_v60, 16  ;;  %v15893_v11 = vld [vmem:[%s19555_s6 + $0x28] sm:$0x8] }
 0x304   : > { %v17900_v38 = vpop.f32.mrb[134].mxu0  ;;  %18088 = vmatpush3.bf16.msra.mxu0 %v19236_v59  ;;  %v7926_v59 = vshrl.u32 %v23069_v25, 16  ;;  %v19239_v25 = vld [vmem:[%s24920_s1 + $0x600] sm:$0xff]   ;;  %v7915_v46 = vrot.slane %v7914_v9, 4  ;;  %v7938_v52 = vshll.u32 %v23233_v60, 16  ;;  %v7946_v50 = vrot.slane %v7944_v2, 6 }
 0x305   : > { %v23222_v40 = vadd.f32 %v17900_v38, %v23049_v6  ;;  %v5777_v57 = vpop.f32.mrb[135].mxu0  ;;  %18089 = vmatprep.subr.bf16.mxu0 %v19237_v18  ;;  %v7919_v6 = vrot.slane %v7917_v28, 6  ;;  %v7949_v36 = vrot.slane %v7947_v30, 7  ;;  %v7870_v5 = vsel %vm19992_vm11, %v7861_v14, %v7869_v56  ;;  %v19242_v2 = vld [vmem:[%s24920_s1 + $0x618] sm:$0xff]  }
 0x306   : > { %v7928_v21 = vrot.slane %v7926_v59, 6  ;;  %v7888_v41 = vsel %vm19992_vm11, %v7879_v39, %v7887_v49  ;;  %v7906_v63 = vsel %vm19992_vm11, %v7897_v17, %v7905_v29  ;;  %v7937_v13 = vrot.slane %v7935_v47, 6  ;;  %v19241_v57 = vld [vmem:[%s24920_s1 + $0x610] sm:$0xff]   ;;  %v15896_v47 = vld [vmem:[%s19555_s6 + $0x40] sm:$0x8] }
 0x307   : > { %v7923_v48 = vor.u32 %v7922_v54, %v7919_v6  ;;  %v7940_v38 = vrot.slane %v7938_v52, 7  ;;  %v7950_v0 = vor.u32 %v7949_v36, %v7946_v50  ;;  %v15881_v3 = vcombine.low %v7870_v5, %v7888_v41  ;;  %v15897_v50 = vld [vmem:[%s19555_s6 + $0x48] sm:$0x8] }
 0x308   : > { %18090 = vmatpush3.bf16.msra.mxu0 %v19237_v18  ;;  %v23242_v18 = vld [vmem:[%s19555_s6 + $0x7c] sm:$0x7]  ;;  %v7932_v28 = vor.u32 %v7931_v37, %v7928_v21  ;;  %v15904_v30 = vrot.slane %v15892_v32, 11  ;;  %v15905_v14 = vrot.slane %v15893_v11, 11  ;;  %v8185_v56 = vrot.slane %v23077_v35, 7  ;;  %v19245_v37 = vld [vmem:[%s24920_s1 + $0x630] sm:$0xff]  }
 0x309   : > { %18091 = vmatprep.subr.bf16.mxu0 %v19238_v61  ;;  %v7953_v34 = vshrl.u32 %v23242_v18, 16  ;;  %v7956_v8 = vshll.u32 %v23242_v18, 16  ;;  %v7924_v15 = vsel %vm19992_vm11, %v7915_v46, %v7923_v48  ;;  %v7941_v6 = vor.u32 %v7940_v38, %v7937_v13  ;;  %v15894_v46 = vld [vmem:[%s19555_s6 + $0x30] sm:$0x8]  ;;  %v15895_v48 = vld [vmem:[%s19555_s6 + $0x38] sm:$0x8] }
 0x30a   : > { %v15882_v20 = vcombine.low %v7906_v63, %v7924_v15  ;;  %v7933_v59 = vrot.slane %v7932_v28, 4  ;;  %v7951_v54 = vrot.slane %v7950_v0, 4  ;;  %v8186_v17 = vsel %vm20128_vm14, %v15905_v14, %v8185_v56  ;;  %v15901_v32 = vld [vmem:[%s19555_s6 + $0x68] sm:$0x8] }
 0x30b   : > { %v7955_v10 = vrot.slane %v7953_v34, 6  ;;  %v7958_v55 = vrot.slane %v7956_v8, 7  ;;  %v8189_v8 = vrot.slane %v23103_v43, 7  ;;  %v15906_v5 = vrot.slane %v15894_v46, 11 }
 0x30c   : > { %18092 = vmatpush3.bf16.msra.mxu0 %v19238_v61  ;;  %v7942_v39 = vsel %vm19992_vm11, %v7933_v59, %v7941_v6  ;;  %v15907_v41 = vrot.slane %v15895_v48, 11  ;;  %v8193_v63 = vrot.slane %v23116_v7, 7  ;;  %v15908_v28 = vrot.slane %v15896_v47, 11 }
 0x30d   : > { %18105 = vmatprep.subr.bf16.mxu0 %v19239_v25  ;;  %v8197_v43 = vrot.slane %v23122_v12, 7  ;;  %v15909_v15 = vrot.slane %v15897_v50, 11  ;;  %v8201_v0 = vrot.slane %v23136_v27, 7  ;;  %v8190_v7 = vsel %vm20128_vm14, %v15906_v5, %v8189_v8  ;;  %v15900_v12 = vld [vmem:[%s19555_s6 + $0x60] sm:$0x8] }
 0x30e   : > { %v8209_v59 = vrot.slane %v23186_v62, 7  ;;  %v8213_v6 = vrot.slane %v23195_v31, 7 }
 0x30f   : > { %18094 = vmatmul.mubr.bf16.vlgmr.msra.gmra.mrb[188].mxu0 %v15879_v16  ;;  %v7959_v16 = vor.u32 %v7958_v55, %v7955_v10  ;;  %v8194_v10 = vsel %vm20128_vm14, %v15907_v41, %v8193_v63  ;;  %v8198_v55 = vsel %vm20128_vm14, %v15908_v28, %v8197_v43 }
 0x310   : > { %18106 = vmatpush3.bf16.msra.mxu0 %v19239_v25  ;;  %18097 = vmatprep.mubr.bf16.mxu0 %v15880_v44  ;;  %v8181_v25 = vrot.slane %v23072_v19, 7  ;;  %v19243_v19 = vld [vmem:[%s24920_s1 + $0x620] sm:$0xff]   ;;  %v15933_v27 = vcombine.low %v8190_v7, %v8194_v10 }
 0x311   : > { %18107 = vmatprep.subr.bf16.mxu0 %v19240_v45  ;;  %v7960_v49 = vsel %vm19992_vm11, %v7951_v54, %v7959_v16  ;;  %v15913_v54 = vrot.slane %v15901_v32, 11  ;;  %v8217_v16 = vrot.slane %v23206_v1, 7 }
 0x312   : > { %v17907_v61 = vpop.f32.mrb[136].mxu0  ;;  %v15883_v29 = vcombine.low %v7942_v39, %v7960_v49  ;;  %v8221_v39 = vrot.slane %v23233_v60, 7 }
 0x313   : > { %v5806_v22 = vpop.f32.mrb[137].mxu0  ;;  %v15899_v61 = vld [vmem:[%s19555_s6 + $0x58] sm:$0x8]  ;;  %v8218_v62 = vsel %vm20128_vm14, %v15913_v54, %v8217_v16  ;;  %v19251_v16 = vld [vmem:[%s24922_s3 + $0x60] sm:$0xff]  }
 0x314   : > { %v23265_v24 = vadd.f32 %v5806_v22, %v23133_v42  ;;  %v17908_v9 = vpop.f32.mrb[138].mxu0  ;;  %18108 = vmatpush3.bf16.msra.mxu0 %v19240_v45 }
 0x315   : > { %v5809_v44 = vpop.f32.mrb[139].mxu0  ;;  %18109 = vmatprep.subr.bf16.mxu0 %v19241_v57  ;;  %v15912_v9 = vrot.slane %v15900_v12, 11  ;;  %v19248_v12 = vld [vmem:[%s24922_s3 + $0x48] sm:$0xff]  }
 0x316   : > { %v23273_v42 = vadd.f32 %v5809_v44, %v23144_v53  ;;  %v8182_v53 = vsel %vm20128_vm14, %v15904_v30, %v8181_v25  ;;  %v15902_v30 = vld [vmem:[%s19555_s6 + $0x70] sm:$0x8]  ;;  %v15903_v25 = vld [vmem:[%s19555_s6 + $0x78] sm:$0x8] }
 0x317   : > { %18098 = vmatmul.mubr.bf16.gmra.mrb[4].mxu0 %v15881_v3  ;;  %v15932_v21 = vcombine.low %v8182_v53, %v8186_v17  ;;  %v8205_v3 = vrot.slane %v23169_v23, 7  ;;  %v8214_v23 = vsel %vm20128_vm14, %v15912_v9, %v8213_v6  ;;  %v15914_v1 = vrot.slane %v15902_v30, 11  ;;  %v19252_v30 = vld [vmem:[%s24922_s3 + $0x68] sm:$0xff]  }
 0x318   : > { %18110 = vmatpush3.bf16.msra.mxu0 %v19241_v57  ;;  %18101 = vmatprep.mubr.bf16.mxu0 %v15882_v20  ;;  %v8202_v57 = vsel %vm20128_vm14, %v15909_v15, %v8201_v0  ;;  %v15911_v20 = vrot.slane %v15899_v61, 11  ;;  %v15936_v53 = vcombine.low %v8214_v23, %v8218_v62  ;;  %v15915_v17 = vrot.slane %v15903_v25, 11 }
 0x319   : > { %18111 = vmatprep.subr.bf16.mxu0 %v19242_v2  ;;  %v15934_v22 = vcombine.low %v8198_v55, %v8202_v57  ;;  %v19491_v6 = vmov 0  }
 0x31a   : > { %8501 = vst [vmem:[#allocation2] sm:$0x1] %v19491_v6  ;;  %8502 = vst [vmem:[#allocation2 + $0x8] sm:$0x1] %v19491_v6 }
 0x31b   : > { %8503 = vst [vmem:[#allocation2 + $0x10] sm:$0x1] %v19491_v6  ;;  %8504 = vst [vmem:[#allocation2 + $0x18] sm:$0x1] %v19491_v6 }
 0x31c   : > { %18112 = vmatpush3.bf16.msra.mxu0 %v19242_v2  ;;  %v8210_v2 = vsel %vm20128_vm14, %v15911_v20, %v8209_v59  ;;  %v19250_v59 = vld [vmem:[%s24922_s3 + $0x58] sm:$0xff]   ;;  %8505 = vst [vmem:[#allocation2 + $0x20] sm:$0x1] %v19491_v6  ;;  %8506 = vst [vmem:[#allocation2 + $0x28] sm:$0x1] %v19491_v6 }
 0x31d   : > { %18113 = vmatprep.subr.bf16.mxu0 %v19243_v19  ;;  %8507 = vst [vmem:[#allocation2 + $0x30] sm:$0x1] %v19491_v6  ;;  %8508 = vst [vmem:[#allocation2 + $0x38] sm:$0x1] %v19491_v6 }
 0x31e   : > { %8509 = vst [vmem:[#allocation2 + $0x40] sm:$0x1] %v19491_v6  ;;  %8510 = vst [vmem:[#allocation2 + $0x48] sm:$0x1] %v19491_v6 }
 0x31f   : > { %18102 = vmatmul.mubr.bf16.gmra.mrb[192].mxu0 %v15883_v29  ;;  %v8225_v29 = vrot.slane %v23242_v18, 7  ;;  %8511 = vst [vmem:[#allocation2 + $0x50] sm:$0x1] %v19491_v6  ;;  %8512 = vst [vmem:[#allocation2 + $0x58] sm:$0x1] %v19491_v6 }
 0x320   : > { %18114 = vmatpush3.bf16.msra.mxu0 %v19243_v19  ;;  %18121 = vmatprep.mubr.bf16.mxu0 %v15932_v21  ;;  %8513 = vst [vmem:[#allocation2 + $0x4] sm:$0x2] %v19491_v6  ;;  %8514 = vst [vmem:[#allocation2 + $0xc] sm:$0x2] %v19491_v6 }
 0x321   : > { %18115 = vmatprep.subr.bf16.mxu0 %v19244_v51  ;;  %v8226_v46 = vsel %vm20128_vm14, %v15915_v17, %v8225_v29  ;;  %8515 = vst [vmem:[#allocation2 + $0x14] sm:$0x2] %v19491_v6  ;;  %8516 = vst [vmem:[#allocation2 + $0x1c] sm:$0x2] %v19491_v6 }
 0x322   : > { %v17927_v52 = vpop.f32.mrb[140].mxu0  ;;  %8517 = vst [vmem:[#allocation2 + $0x24] sm:$0x2] %v19491_v6  ;;  %8518 = vst [vmem:[#allocation2 + $0x2c] sm:$0x2] %v19491_v6 }
 0x323   : > { %v23297_v36 = vadd.f32 %v17927_v52, %v23215_v4  ;;  %v6040_v34 = vpop.f32.mrb[141].mxu0  ;;  %v19246_v4 = vld [vmem:[%s24920_s1 + $0x638] sm:$0xff]   ;;  %8519 = vst [vmem:[#allocation2 + $0x34] sm:$0x2] %v19491_v6  ;;  %8520 = vst [vmem:[#allocation2 + $0x3c] sm:$0x2] %v19491_v6 }
 0x324   : > { %v17928_v45 = vpop.f32.mrb[142].mxu0  ;;  %18116 = vmatpush3.bf16.msra.mxu0 %v19244_v51  ;;  %8521 = vst [vmem:[#allocation2 + $0x44] sm:$0x2] %v19491_v6  ;;  %8522 = vst [vmem:[#allocation2 + $0x4c] sm:$0x2] %v19491_v6 }
 0x325   : > { %v6090_v13 = vadd.f32 %v17928_v45, %v23222_v40  ;;  %v6043_v38 = vpop.f32.mrb[143].mxu0  ;;  %18117 = vmatprep.subr.bf16.mxu0 %v19245_v37  ;;  %v15898_v40 = vld [vmem:[%s19555_s6 + $0x50] sm:$0x8]  ;;  %8523 = vst [vmem:[#allocation2 + $0x54] sm:$0x2] %v19491_v6 }
 0x326   : > { %v15910_v11 = vrot.slane %v15898_v40, 11  ;;  %v19247_v40 = vld [vmem:[%s24922_s3 + $0x40] sm:$0xff]   ;;  %8524 = vst [vmem:[#allocation2 + $0x5c] sm:$0x2] %v19491_v6 }
 0x327   : > { %18133 = vmatprep.subr.bf16.mxu1 %v19247_v40 }
 0x328   : > { %18118 = vmatpush3.bf16.msra.mxu0 %v19245_v37  ;;  %v8206_v44 = vsel %vm20128_vm14, %v15910_v11, %v8205_v3  ;;  %v8222_v37 = vsel %vm20128_vm14, %v15914_v1, %v8221_v39  ;;  %18134 = vmatpush3.bf16.msra.mxu1 %v19247_v40  ;;  %v19490_v3 = vmov 0.0|0.0  }
 0x329   : > { %18119 = vmatprep.subr.bf16.mxu0 %v19246_v4  ;;  %v15935_v56 = vcombine.low %v8206_v44, %v8210_v2  ;;  %v15937_v48 = vcombine.low %v8222_v37, %v8226_v46  ;;  %18135 = vmatprep.subr.bf16.mxu1 %v19248_v12  ;;  %v15947_v20 = vcombine.low %v19490_v3, %v19490_v3 }
 0x32b   : > { %v8573_v9 = vrot.slane %v15947_v20, 7 }
 0x32c   : > { %18120 = vmatpush3.bf16.msra.mxu0 %v19246_v4  ;;  %18136 = vmatpush3.bf16.msra.mxu1 %v19248_v12 }
 0x32d   : > { %v8574_v54 = vrot.slane %v8573_v9, 4  ;;  %8621 = vst [vmem:[#allocation2] sm:$0xe] %v8573_v9  ;;  %8623 = vst [vmem:[#allocation2 + $0x8] sm:$0xe] %v8573_v9 }
 0x32e   : > { %8641 = vst [vmem:[#allocation2 + $0x50] sm:$0xe] %v8573_v9  ;;  %8643 = vst [vmem:[#allocation2 + $0x58] sm:$0xe] %v8573_v9 }
 0x32f   : > { %18122 = vmatmul.mubr.bf16.vlgmr.msra.gmra.mrb[196].mxu0 %v15933_v27  ;;  %8622 = vst [vmem:[#allocation2 + $0x4] sm:$0x1] %v8574_v54  ;;  %8624 = vst [vmem:[#allocation2 + $0xc] sm:$0x1] %v8574_v54 }
 0x330   : > { %18125 = vmatprep.mubr.bf16.mxu0 %v15934_v22  ;;  %v19249_v22 = vld [vmem:[%s24922_s3 + $0x50] sm:$0xff]   ;;  %8642 = vst [vmem:[#allocation2 + $0x54] sm:$0x1] %v8574_v54  ;;  %8644 = vst [vmem:[#allocation2 + $0x5c] sm:$0x1] %v8574_v54 }
 0x331   : > { %18137 = vmatprep.subr.bf16.mxu1 %v19249_v22 }
 0x332   : > { %v17935_v31 = vpop.f32.mrb[144].mxu0  ;;  %18138 = vmatpush3.bf16.msra.mxu1 %v19249_v22 }
 0x333   : > { %v6072_v14 = vpop.f32.mrb[145].mxu0  ;;  %18139 = vmatprep.subr.bf16.mxu1 %v19250_v59 }
 0x334   : > { %v6095_v49 = vadd.f32 %v6072_v14, %v23265_v24  ;;  %v17936_v19 = vpop.f32.mrb[146].mxu0  ;;  %v23369_v31 = vld [vmem:[#allocation2] sm:$0xf]  ;;  %v23371_v14 = vld [vmem:[#allocation2 + $0x8] sm:$0xf] }
 0x335   : > { %v6075_v21 = vpop.f32.mrb[147].mxu0  ;;  %v8681_v1 = vshrl.u32 %v23369_v31, 16  ;;  %v8684_v39 = vshll.u32 %v23369_v31, 16  ;;  %v19253_v19 = vld [vmem:[%s24922_s3 + $0x70] sm:$0xff]  }
 0x336   : > { %v6096_v51 = vadd.f32 %v6075_v21, %v23273_v42  ;;  %18140 = vmatpush3.bf16.msra.mxu1 %v19250_v59  ;;  %v8670_v37 = vld [vmem:[#allocation2 + $0xc] sm:$0x1] }
 0x337   : > { %18126 = vmatmul.mubr.bf16.gmra.mrb[4].mxu0 %v15935_v56  ;;  %18141 = vmatprep.subr.bf16.mxu1 %v19251_v16  ;;  %v8683_v17 = vrot.slane %v8681_v1, 4  ;;  %v8686_v29 = vrot.slane %v8684_v39, 5 }
 0x338   : > { %18129 = vmatprep.mubr.bf16.mxu0 %v15936_v53  ;;  %v8698_v53 = vshll.u32 %v23371_v14, 16 }
 0x33a   : > { %18142 = vmatpush3.bf16.msra.mxu1 %v19251_v16  ;;  %v8700_v46 = vrot.slane %v8698_v53, 5  ;;  %v9105_v16 = vrot.slane %v8670_v37, 5 }
 0x33b   : > { %18143 = vmatprep.subr.bf16.mxu1 %v19252_v30 }
 0x33e   : > { %18144 = vmatpush3.bf16.msra.mxu1 %v19252_v30 }
 0x33f   : > { %18130 = vmatmul.mubr.bf16.gmra.mrb[200].mxu0 %v15937_v48  ;;  %18145 = vmatprep.subr.bf16.mxu1 %v19253_v19  ;;  %v8687_v48 = vor.u32 %v8686_v29, %v8683_v17 }
 0x342   : > { %v17955_v60 = vpop.f32.mrb[148].mxu0  ;;  %18146 = vmatpush3.bf16.msra.mxu1 %v19253_v19 }
 0x343   : > { %v6499_v24 = vadd.f32 %v17955_v60, %v23297_v36  ;;  %v6450_v47 = vpop.f32.mrb[149].mxu0 }
 0x344   : > { %v17956_v52 = vpop.f32.mrb[150].mxu0  ;;  %v19254_v47 = vld [vmem:[%s24922_s3 + $0x78] sm:$0xff]  }
 0x345   : > { %v6500_v50 = vadd.f32 %v17956_v52, %v6090_v13  ;;  %v6453_v18 = vpop.f32.mrb[151].mxu0  ;;  %18147 = vmatprep.subr.bf16.mxu1 %v19254_v47 }
 0x346   : > { %v8688_v18 = vrot.slane %v8687_v48, 4  ;;  %18148 = vmatpush3.bf16.msra.mxu1 %v19254_v47 }
 0x352   : > { %v17963_v34 = vpop.f32.mrb[152].mxu0 }
 0x353   : > { %v6482_v8 = vpop.f32.mrb[153].mxu0 }
 0x354   : > { %v6505_v42 = vadd.f32 %v6482_v8, %v6095_v49  ;;  %v17964_v45 = vpop.f32.mrb[154].mxu0  ;;  %v8695_v49 = vshrl.u32 %v23371_v14, 16 }
 0x355   : > { %v6485_v5 = vpop.f32.mrb[155].mxu0 }
 0x356   : > { %v6506_v41 = vadd.f32 %v6485_v5, %v6096_v51  ;;  %v8697_v21 = vrot.slane %v8695_v49, 4  ;;  %v8669_v51 = vld [vmem:[#allocation2 + $0x4] sm:$0x1] }
 0x357   : > { %v8690_v60 = vshll.u32 %v8669_v51, 16  ;;  %v9101_v54 = vrot.slane %v8669_v51, 5 }
 0x358   : > { %v8701_v52 = vor.u32 %v8700_v46, %v8697_v21 }
 0x359   : > { %v8692_v34 = vrot.slane %v8690_v60, 5 }
 0x35b   : > { %v8693_v45 = vsel %vm23384_vm1, %v8688_v18, %v8692_v34 }
 0x362   : > { %v17983_v63 = vpop.f32.mrb[156].mxu0 }
 0x363   : > { %v6765_v28 = vadd.f32 %v17983_v63, %v6499_v24  ;;  %v6716_v38 = vpop.f32.mrb[157].mxu0  ;;  %v8704_v24 = vshll.u32 %v8670_v37, 16 }
 0x364   : > { %v17984_v35 = vpop.f32.mrb[158].mxu0 }
 0x365   : > { %v6766_v4 = vadd.f32 %v17984_v35, %v6500_v50  ;;  %v6719_v43 = vpop.f32.mrb[159].mxu0  ;;  %v8706_v8 = vrot.slane %v8704_v24, 5  ;;  %v23421_v24 = vld [vmem:[%s24921_s2] ss:$0 sm:$0xff] }
 0x372   : > { %v17991_v15 = vpop.f32.mrb[160].mxu0 }
 0x373   : > { %v6748_v0 = vpop.f32.mrb[161].mxu0 }
 0x374   : > { %v23342_v7 = vadd.f32 %v6748_v0, %v6505_v42  ;;  %v17992_v36 = vpop.f32.mrb[162].mxu0  ;;  %v8702_v42 = vrot.slane %v8701_v52, 4 }
 0x375   : > { %v6751_v10 = vpop.f32.mrb[163].mxu0 }
 0x376   : > { %v23344_v13 = vadd.f32 %v6751_v10, %v6506_v41  ;;  %v8707_v5 = vsel %vm23384_vm1, %v8702_v42, %v8706_v8  ;;  %v23395_v41 = vld [vmem:[%s24922_s3] sm:$0xff]  }
 0x377   : > { %v15975_v63 = vcombine.low %v8693_v45, %v8707_v5  ;;  %18157 = vmatprep.subr.bf16.mxu1 %v23395_v41 }
 0x379   : > { %18149 = vmatprep.mubr.bf16.mxu1 %v15975_v63 }
 0x382   : > { %v18011_v55 = vpop.f32.mrb[164].mxu0 }
 0x383   : > { %v23349_v57 = vadd.f32 %v18011_v55, %v6765_v28  ;;  %v6998_v61 = vpop.f32.mrb[165].mxu0  ;;  %v15987_v55 = vcombine.low %v23369_v31, %v23371_v14  ;;  %v19264_v31 = vld [vmem:[%s24922_s3 + $0x80] sm:$0xff]  }
 0x384   : > { %v18012_v32 = vpop.f32.mrb[166].mxu0 }
 0x385   : > { %v23354_v27 = vadd.f32 %v18012_v32, %v6766_v4  ;;  %v7001_v11 = vpop.f32.mrb[167].mxu0 }
 0x392   : > { %v18019_v44 = vpop.f32.mrb[168].mxu0 }
 0x393   : > { %v7030_v2 = vpop.f32.mrb[169].mxu0  ;;  %v23402_v44 = vld [vmem:[#allocation2] sm:$0xe] }
 0x394   : > { %v7053_v23 = vadd.f32 %v7030_v2, %v23342_v7  ;;  %v18020_v62 = vpop.f32.mrb[170].mxu0  ;;  %v23404_v2 = vld [vmem:[#allocation2 + $0x8] sm:$0xe]  ;;  %v15999_v30 = vrot.slane %v23402_v44, 9 }
 0x395   : > { %v7033_v25 = vpop.f32.mrb[171].mxu0 }
 0x396   : > { %v7054_v56 = vadd.f32 %v7033_v25, %v23344_v13  ;;  %v23410_v1 = vsel %vm19744_vm7, %v15999_v30, %v9101_v54 }
 0x3a2   : > { %v18039_v28 = vpop.f32.mrb[172].mxu0 }
 0x3a3   : > { %v7457_v38 = vadd.f32 %v18039_v28, %v23349_v57  ;;  %v7408_v35 = vpop.f32.mrb[173].mxu0 }
 0x3a4   : > { %v18040_v4 = vpop.f32.mrb[174].mxu0 }
 0x3a5   : > { %v7458_v43 = vadd.f32 %v18040_v4, %v23354_v27  ;;  %v7411_v15 = vpop.f32.mrb[175].mxu0 }
 0x3b2   : > { %v18047_v0 = vpop.f32.mrb[176].mxu0 }
 0x3b3   : > { %v7440_v7 = vpop.f32.mrb[177].mxu0 }
 0x3b4   : > { %v7463_v36 = vadd.f32 %v7440_v7, %v7053_v23  ;;  %v18048_v10 = vpop.f32.mrb[178].mxu0  ;;  %v16000_v23 = vrot.slane %v23404_v2, 9 }
 0x3b5   : > { %v7443_v13 = vpop.f32.mrb[179].mxu0 }
 0x3b6   : > { %v7464_v40 = vadd.f32 %v7443_v13, %v7054_v56  ;;  %v23414_v39 = vsel %vm19744_vm7, %v16000_v23, %v9105_v16 }
 0x3b7   : > { %v16023_v19 = vcombine.low %v23410_v1, %v23414_v39  ;;  %v9294_v1 = vshrl.u32 %v23402_v44, 16  ;;  %v9297_v39 = vshll.u32 %v23402_v44, 16  ;;  %v19273_v44 = vld [vmem:[%s24922_s3 + $0xb8] sm:$0xff]  }
 0x3c2   : > { %v18067_v61 = vpop.f32.mrb[180].mxu0 }
 0x3c3   : > { %v7723_v12 = vadd.f32 %v18067_v61, %v7457_v38  ;;  %v7674_v32 = vpop.f32.mrb[181].mxu0 }
 0x3c4   : > { %v18068_v11 = vpop.f32.mrb[182].mxu0 }
 0x3c5   : > { %v7724_v22 = vadd.f32 %v18068_v11, %v7458_v43  ;;  %v7677_v57 = vpop.f32.mrb[183].mxu0 }
 0x3d2   : > { %v18075_v3 = vpop.f32.mrb[184].mxu0 }
 0x3d3   : > { %v7706_v20 = vpop.f32.mrb[185].mxu0 }
 0x3d4   : > { %v7729_v59 = vadd.f32 %v7706_v20, %v7463_v36  ;;  %v18076_v27 = vpop.f32.mrb[186].mxu0 }
 0x3d5   : > { %v7709_v9 = vpop.f32.mrb[187].mxu0 }
 0x3d6   : > { %v7730_v6 = vadd.f32 %v7709_v9, %v7464_v40 }
 0x3e2   : > { %v18095_v62 = vpop.f32.mrb[188].mxu0 }
 0x3e3   : > { %v8133_v25 = vadd.f32 %v18095_v62, %v7723_v12  ;;  %v8084_v56 = vpop.f32.mrb[189].mxu0 }
 0x3e4   : > { %v18096_v49 = vpop.f32.mrb[190].mxu0 }
 0x3e5   : > { %v8134_v53 = vadd.f32 %v18096_v49, %v7724_v22  ;;  %v8087_v17 = vpop.f32.mrb[191].mxu0 }
 0x3f2   : > { %v18103_v29 = vpop.f32.mrb[192].mxu0 }
 0x3f3   : > { %v8116_v21 = vpop.f32.mrb[193].mxu0 }
 0x3f4   : > { %v8139_v51 = vadd.f32 %v8116_v21, %v7729_v59  ;;  %v18104_v37 = vpop.f32.mrb[194].mxu0 }
 0x3f5   : > { %v8119_v46 = vpop.f32.mrb[195].mxu0 }
 0x3f6   : > { %v8140_v48 = vadd.f32 %v8119_v46, %v7730_v6 }
 0x402   : > { %v18123_v60 = vpop.f32.mrb[196].mxu0 }
 0x403   : > { %v8399_v47 = vadd.f32 %v18123_v60, %v8133_v25  ;;  %v8350_v52 = vpop.f32.mrb[197].mxu0 }
 0x404   : > { %v18124_v18 = vpop.f32.mrb[198].mxu0 }
 0x405   : > { %v8418_v34 = vadd.f32 %v23421_v24, %v8399_v47  ;;  %v8400_v8 = vadd.f32 %v18124_v18, %v8134_v53  ;;  %v8353_v42 = vpop.f32.mrb[199].mxu0 }
 0x407   : > { %v8430_v45 = vmax.f32 %v8418_v34, 0.0  ;;  %v8419_v5 = vadd.f32 %v23421_v24, %v8400_v8 }
 0x409   : > { %v16752_v63 = vpack.c.bf16 %v8430_v45, %v8430_v45  ;;  %v8431_v28 = vmax.f32 %v8419_v5, 0.0 }
 0x40a   : > { %v18127_v38 = vpop.f32.mrb[4].mxu0 }
 0x40b   : > { %v8577_v35 = vrot.slane %v16752_v63, 7  ;;  %v16753_v4 = vpack.c.bf16 %v8431_v28, %v8431_v28  ;;  %v8422_v43 = vadd.f32 %v18127_v38, %v23421_v24  ;;  %v8366_v15 = vpop.f32.mrb[5].mxu0 }
 0x40c   : > { %v8420_v0 = vadd.f32 %v23421_v24, %v8366_v15  ;;  %v18128_v7 = vpop.f32.mrb[6].mxu0 }
 0x40d   : > { %v8578_v36 = vrot.slane %v8577_v35, 4  ;;  %8625 = vst [vmem:[#allocation2 + $0x10] sm:$0xe] %v8577_v35  ;;  %v8579_v10 = vrot.slane %v16753_v4, 7  ;;  %v8434_v13 = vmax.f32 %v8422_v43, 0.0  ;;  %v8423_v40 = vadd.f32 %v18128_v7, %v23421_v24  ;;  %v8369_v61 = vpop.f32.mrb[7].mxu0 }
 0x40e   : > { %v8432_v12 = vmax.f32 %v8420_v0, 0.0  ;;  %v8421_v32 = vadd.f32 %v23421_v24, %v8369_v61 }
 0x40f   : > { %8626 = vst [vmem:[#allocation2 + $0x14] sm:$0x1] %v8578_v36  ;;  %v8580_v11 = vrot.slane %v8579_v10, 4  ;;  %8627 = vst [vmem:[#allocation2 + $0x18] sm:$0xe] %v8579_v10  ;;  %v16756_v22 = vpack.c.bf16 %v8434_v13, %v8434_v13  ;;  %v8435_v57 = vmax.f32 %v8423_v40, 0.0 }
 0x410   : > { %v16754_v3 = vpack.c.bf16 %v8432_v12, %v8432_v12  ;;  %v8433_v20 = vmax.f32 %v8421_v32, 0.0 }
 0x411   : > { %8628 = vst [vmem:[#allocation2 + $0x1c] sm:$0x1] %v8580_v11  ;;  %v8585_v59 = vrot.slane %v16756_v22, 7  ;;  %v16757_v27 = vpack.c.bf16 %v8435_v57, %v8435_v57 }
 0x412   : > { %v8581_v9 = vrot.slane %v16754_v3, 7  ;;  %v16755_v6 = vpack.c.bf16 %v8433_v20, %v8433_v20  ;;  %v18131_v54 = vpop.f32.mrb[200].mxu0 }
 0x413   : > { %v8586_v16 = vrot.slane %v8585_v59, 4  ;;  %8633 = vst [vmem:[#allocation2 + $0x30] sm:$0xe] %v8585_v59  ;;  %v8587_v30 = vrot.slane %v16757_v27, 7  ;;  %v8382_v23 = vpop.f32.mrb[201].mxu0 }
 0x414   : > { %v8582_v62 = vrot.slane %v8581_v9, 4  ;;  %8629 = vst [vmem:[#allocation2 + $0x20] sm:$0xe] %v8581_v9  ;;  %v8583_v25 = vrot.slane %v16755_v6, 7  ;;  %v8405_v56 = vadd.f32 %v8382_v23, %v8139_v51  ;;  %v18132_v49 = vpop.f32.mrb[202].mxu0 }
 0x415   : > { %v23429_v53 = vld [vmem:[#allocation2 + $0x10] sm:$0xf]  ;;  %8634 = vst [vmem:[#allocation2 + $0x34] sm:$0x1] %v8586_v16  ;;  %v8588_v17 = vrot.slane %v8587_v30, 4  ;;  %v8385_v29 = vpop.f32.mrb[203].mxu0 }
 0x416   : > { %8635 = vst [vmem:[#allocation2 + $0x38] sm:$0xe] %v8587_v30  ;;  %v8709_v21 = vshrl.u32 %v23429_v53, 16  ;;  %v8712_v37 = vshll.u32 %v23429_v53, 16  ;;  %8630 = vst [vmem:[#allocation2 + $0x24] sm:$0x1] %v8582_v62  ;;  %v8424_v60 = vadd.f32 %v23421_v24, %v8405_v56  ;;  %v8406_v47 = vadd.f32 %v8385_v29, %v8140_v48 }
 0x417   : > { %v8584_v46 = vrot.slane %v8583_v25, 4  ;;  %8631 = vst [vmem:[#allocation2 + $0x28] sm:$0xe] %v8583_v25  ;;  %v23434_v52 = vld [vmem:[#allocation2 + $0x18] sm:$0xf] }
 0x418   : > { %v23436_v51 = vld [vmem:[#allocation2 + $0x14] sm:$0x1]  ;;  %8636 = vst [vmem:[#allocation2 + $0x3c] sm:$0x1] %v8588_v17  ;;  %v8711_v18 = vrot.slane %v8709_v21, 4  ;;  %v8714_v34 = vrot.slane %v8712_v37, 5  ;;  %v8425_v45 = vadd.f32 %v23421_v24, %v8406_v47  ;;  %v15988_v14 = vcombine.low %v23429_v53, %v23434_v52 }
 0x419   : > { %v8723_v8 = vshrl.u32 %v23434_v52, 16  ;;  %8632 = vst [vmem:[#allocation2 + $0x2c] sm:$0x1] %v8584_v46  ;;  %v8436_v42 = vmax.f32 %v8424_v60, 0.0  ;;  %v23440_v5 = vld [vmem:[#allocation2 + $0x1c] sm:$0x1] }
 0x41a   : > { %v8726_v63 = vshll.u32 %v23434_v52, 16  ;;  %v8715_v28 = vor.u32 %v8714_v34, %v8711_v18  ;;  %v8718_v48 = vshll.u32 %v23436_v51, 16  ;;  %v8732_v35 = vshll.u32 %v23440_v5, 16  ;;  %v23445_v0 = vld [vmem:[#allocation2 + $0x30] sm:$0xf]  ;;  %v19256_v21 = vld [vmem:[%s24922_s3 + $0x8] sm:$0xff]  }
 0x41b   : > { %v8725_v38 = vrot.slane %v8723_v8, 4  ;;  %v16758_v4 = vpack.c.bf16 %v8436_v42, %v8436_v42  ;;  %v8437_v43 = vmax.f32 %v8425_v45, 0.0  ;;  %v23447_v36 = vld [vmem:[#allocation2 + $0x20] sm:$0xf]  ;;  %v8765_v24 = vshrl.u32 %v23445_v0, 16  ;;  %v19269_v52 = vld [vmem:[%s24922_s3 + $0x98] sm:$0xff]  }
 0x41c   : > { %v8728_v15 = vrot.slane %v8726_v63, 5  ;;  %v8716_v7 = vrot.slane %v8715_v28, 4  ;;  %v8768_v10 = vshll.u32 %v23445_v0, 16  ;;  %v8737_v12 = vshrl.u32 %v23447_v36, 16  ;;  %v23470_v60 = vld [vmem:[#allocation2 + $0x34] sm:$0x1] }
 0x41d   : > { %v8589_v13 = vrot.slane %v16758_v4, 7  ;;  %v16759_v40 = vpack.c.bf16 %v8437_v43, %v8437_v43  ;;  %v8720_v32 = vrot.slane %v8718_v48, 5  ;;  %v8734_v11 = vrot.slane %v8732_v35, 5  ;;  %v23455_v27 = vld [vmem:[#allocation2 + $0x24] sm:$0x1] }
 0x41e   : > { %v8729_v61 = vor.u32 %v8728_v15, %v8725_v38  ;;  %v23452_v22 = vld [vmem:[#allocation2 + $0x28] sm:$0xf]  ;;  %v8740_v57 = vshll.u32 %v23447_v36, 16  ;;  %v8739_v9 = vrot.slane %v8737_v12, 4  ;;  %v8767_v23 = vrot.slane %v8765_v24, 4  ;;  %v19257_v24 = vld [vmem:[%s24922_s3 + $0x10] sm:$0xff]  }
 0x41f   : > { %v8590_v3 = vrot.slane %v8589_v13, 4  ;;  %8637 = vst [vmem:[#allocation2 + $0x40] sm:$0xe] %v8589_v13  ;;  %v8591_v20 = vrot.slane %v16759_v40, 7  ;;  %v8751_v16 = vshrl.u32 %v23452_v22, 16  ;;  %v8754_v30 = vshll.u32 %v23452_v22, 16 }
 0x420   : > { %v8730_v59 = vrot.slane %v8729_v61, 4  ;;  %v23457_v6 = vld [vmem:[#allocation2 + $0x2c] sm:$0x1]  ;;  %v8742_v54 = vrot.slane %v8740_v57, 5  ;;  %v8721_v25 = vsel %vm23384_vm1, %v8716_v7, %v8720_v32  ;;  %v23465_v49 = vld [vmem:[#allocation2 + $0x38] sm:$0xf] }
 0x421   : > { %8638 = vst [vmem:[#allocation2 + $0x44] sm:$0x1] %v8590_v3  ;;  %v8592_v62 = vrot.slane %v8591_v20, 4  ;;  %8639 = vst [vmem:[#allocation2 + $0x48] sm:$0xe] %v8591_v20  ;;  %v8770_v17 = vrot.slane %v8768_v10, 5  ;;  %v15990_v53 = vcombine.low %v23445_v0, %v23465_v49 }
 0x422   : > { %v8735_v56 = vsel %vm23384_vm1, %v8730_v59, %v8734_v11  ;;  %v8743_v37 = vor.u32 %v8742_v54, %v8739_v9  ;;  %v8753_v46 = vrot.slane %v8751_v16, 4  ;;  %v23472_v47 = vld [vmem:[#allocation2 + $0x3c] sm:$0x1]  ;;  %v8746_v18 = vshll.u32 %v23455_v27, 16  ;;  %v23478_v28 = vld [vmem:[#allocation2 + $0x10] sm:$0xe] }
 0x423   : > { %v15976_v29 = vcombine.low %v8721_v25, %v8735_v56  ;;  %8640 = vst [vmem:[#allocation2 + $0x4c] sm:$0x1] %v8592_v62  ;;  %v8756_v34 = vrot.slane %v8754_v30, 5  ;;  %v8760_v8 = vshll.u32 %v23457_v6, 16  ;;  %v8771_v42 = vor.u32 %v8770_v17, %v8767_v23  ;;  %v23483_v43 = vld [vmem:[#allocation2 + $0x18] sm:$0xe] }
 0x424   : > { %v8779_v45 = vshrl.u32 %v23465_v49, 16  ;;  %v8782_v63 = vshll.u32 %v23465_v49, 16  ;;  %v8744_v48 = vrot.slane %v8743_v37, 4  ;;  %v8774_v35 = vshll.u32 %v23470_v60, 16  ;;  %v19258_v54 = vld [vmem:[%s24922_s3 + $0x18] sm:$0xff]   ;;  %v19259_v17 = vld [vmem:[%s24922_s3 + $0x20] sm:$0xff]  }
 0x425   : > { %18150 = vmatmul.mubr.bf16.vlgmr.msra.gmra.mrb[0].mxu1 %v15976_v29  ;;  %v8757_v38 = vor.u32 %v8756_v34, %v8753_v46  ;;  %v8788_v4 = vshll.u32 %v23472_v47, 16  ;;  %v9109_v15 = vrot.slane %v23436_v51, 5  ;;  %v9113_v7 = vrot.slane %v23440_v5, 5  ;;  %v19260_v29 = vld [vmem:[%s24922_s3 + $0x28] sm:$0xff]   ;;  %v19262_v37 = vld [vmem:[%s24922_s3 + $0x38] sm:$0xff]  }
 0x426   : > { %18158 = vmatpush3.bf16.msra.mxu1 %v23395_v41  ;;  %v8781_v10 = vrot.slane %v8779_v45, 4  ;;  %v8784_v13 = vrot.slane %v8782_v63, 5  ;;  %v8748_v41 = vrot.slane %v8746_v18, 5  ;;  %v8762_v61 = vrot.slane %v8760_v8, 5  ;;  %v19268_v18 = vld [vmem:[%s24922_s3 + $0x90] sm:$0xff]   ;;  %v19271_v0 = vld [vmem:[%s24922_s3 + $0xa8] sm:$0xff]  }
 0x427   : > { %18159 = vmatprep.subr.bf16.mxu1 %v19256_v21  ;;  %v8758_v40 = vrot.slane %v8757_v38, 4  ;;  %v8772_v12 = vrot.slane %v8771_v42, 4  ;;  %v16001_v11 = vrot.slane %v23478_v28, 9  ;;  %v16002_v57 = vrot.slane %v23483_v43, 9  ;;  %v23558_v49 = vld [vmem:[#allocation2 + $0x4] sm:$0x3] }
 0x428   : > { %v8785_v32 = vor.u32 %v8784_v13, %v8781_v10  ;;  %v8749_v51 = vsel %vm23384_vm1, %v8744_v48, %v8748_v41  ;;  %v8776_v3 = vrot.slane %v8774_v35, 5  ;;  %v8790_v20 = vrot.slane %v8788_v4, 5 }
 0x429   : > { %v8763_v5 = vsel %vm23384_vm1, %v8758_v40, %v8762_v61  ;;  %v23501_v16 = vsel %vm19744_vm7, %v16001_v11, %v9109_v15  ;;  %v23505_v30 = vsel %vm19744_vm7, %v16002_v57, %v9113_v7  ;;  %v15989_v46 = vcombine.low %v23447_v36, %v23452_v22  ;;  %v19270_v36 = vld [vmem:[%s24922_s3 + $0xa0] sm:$0xff]   ;;  %v19272_v22 = vld [vmem:[%s24922_s3 + $0xb0] sm:$0xff]   ;;  %v23573_v7 = vld [vmem:[#allocation2 + $0x28] sm:$0xe] }
 0x42a   : > { %18160 = vmatpush3.bf16.msra.mxu1 %v19256_v21  ;;  %v15977_v59 = vcombine.low %v8749_v51, %v8763_v5  ;;  %v8786_v9 = vrot.slane %v8785_v32, 4  ;;  %v16024_v23 = vcombine.low %v23501_v16, %v23505_v30  ;;  %v8777_v62 = vsel %vm23384_vm1, %v8772_v12, %v8776_v3  ;;  %v19261_v21 = vld [vmem:[%s24922_s3 + $0x30] sm:$0xff]   ;;  %v19274_v61 = vld [vmem:[%s24922_s3 + $0xc0] sm:$0xff]  }
 0x42b   : > { %18161 = vmatprep.subr.bf16.mxu1 %v19257_v24  ;;  %v9312_v34 = vshrl.u32 %v23404_v2, 16  ;;  %v9315_v8 = vshll.u32 %v23404_v2, 16  ;;  %v9303_v42 = vshrl.u32 %v23558_v49, 16  ;;  %v9296_v45 = vrot.slane %v9294_v1, 5 }
 0x42c   : > { %18153 = vmatprep.mubr.bf16.mxu1 %v15977_v59  ;;  %v8791_v25 = vsel %vm23384_vm1, %v8786_v9, %v8790_v20  ;;  %v9299_v63 = vrot.slane %v9297_v39, 6  ;;  %v9306_v48 = vshll.u32 %v23558_v49, 16  ;;  %v9121_v2 = vrot.slane %v23457_v6, 5  ;;  %v19275_v20 = vld [vmem:[%s24922_s3 + $0xc8] sm:$0xff]  }
 0x42d   : > { %v15978_v56 = vcombine.low %v8777_v62, %v8791_v25  ;;  %v9314_v35 = vrot.slane %v9312_v34, 5  ;;  %v9317_v4 = vrot.slane %v9315_v8, 6  ;;  %v9305_v13 = vrot.slane %v9303_v42, 5  ;;  %v23631_v42 = vld [vmem:[#allocation2 + $0x24] sm:$0x3] }
 0x42e   : > { %18162 = vmatpush3.bf16.msra.mxu1 %v19257_v24  ;;  %v23576_v24 = vld [vmem:[#allocation2 + $0x20] sm:$0xe]  ;;  %v9300_v10 = vor.u32 %v9299_v63, %v9296_v45  ;;  %v9308_v41 = vrot.slane %v9306_v48, 6  ;;  %v9117_v12 = vrot.slane %v23455_v27, 5  ;;  %v16004_v32 = vrot.slane %v23573_v7, 9 }
 0x42f   : > { %18163 = vmatprep.subr.bf16.mxu1 %v19258_v54  ;;  %18154 = vmatmul.mubr.bf16.gmra.mrb[4].mxu1 %v15978_v56  ;;  %v9318_v11 = vor.u32 %v9317_v4, %v9314_v35  ;;  %v16003_v6 = vrot.slane %v23576_v24, 9  ;;  %v23591_v27 = vld [vmem:[#allocation2 + $0x38] sm:$0xe]  ;;  %v9129_v25 = vrot.slane %v23472_v47, 5  ;;  %v23597_v56 = vld [vmem:[#allocation2 + $0x30] sm:$0xe] }
 0x430   : > { %18173 = vmatprep.mubr.bf16.mxu1 %v15987_v55  ;;  %v19266_v55 = vld [vmem:[%s24922_s3 + $0x88] sm:$0xff]   ;;  %v9122_v51 = vsel %vm19744_vm7, %v16004_v32, %v9121_v2  ;;  %v9309_v5 = vor.u32 %v9308_v41, %v9305_v13  ;;  %v9301_v59 = vrot.slane %v9300_v10, 4  ;;  %v16005_v30 = vrot.slane %v23597_v56, 9 }
 0x431   : > { %v9118_v3 = vsel %vm19744_vm7, %v16003_v6, %v9117_v12  ;;  %v9319_v9 = vrot.slane %v9318_v11, 4  ;;  %v9366_v34 = vshrl.u32 %v23576_v24, 16  ;;  %v9369_v8 = vshll.u32 %v23576_v24, 16  ;;  %v19279_v35 = vld [vmem:[%s24922_s3 + $0xe8] sm:$0xff]  }
 0x432   : > { %18164 = vmatpush3.bf16.msra.mxu1 %v19258_v54  ;;  %v16025_v62 = vcombine.low %v9118_v3, %v9122_v51  ;;  %v9310_v47 = vsel %vm19599_vm2, %v9301_v59, %v9309_v5  ;;  %v9384_v45 = vshrl.u32 %v23573_v7, 16  ;;  %v9387_v63 = vshll.u32 %v23573_v7, 16 }
 0x433   : > { %18165 = vmatprep.subr.bf16.mxu1 %v19259_v17  ;;  %v9368_v10 = vrot.slane %v9366_v34, 5  ;;  %v9371_v13 = vrot.slane %v9369_v8, 6  ;;  %v9375_v7 = vshrl.u32 %v23631_v42, 16  ;;  %v9378_v41 = vshll.u32 %v23631_v42, 16  ;;  %v19282_v34 = vld [vmem:[%s24922_s3 + $0x100] sm:$0xff]  }
 0x435   : > { %v9377_v59 = vrot.slane %v9375_v7, 5 }
 0x436   : > { %18166 = vmatpush3.bf16.msra.mxu1 %v19259_v17  ;;  %v9125_v17 = vrot.slane %v23470_v60, 5 }
 0x437   : > { %18167 = vmatprep.subr.bf16.mxu1 %v19260_v29 }
 0x438   : > { %v9126_v60 = vsel %vm19744_vm7, %v16005_v30, %v9125_v17  ;;  %v9405_v30 = vshll.u32 %v23597_v56, 16 }
 0x43a   : > { %18168 = vmatpush3.bf16.msra.mxu1 %v19260_v29  ;;  %v16006_v29 = vrot.slane %v23591_v27, 9 }
 0x43b   : > { %18169 = vmatprep.subr.bf16.mxu1 %v19261_v21 }
 0x43e   : > { %18170 = vmatpush3.bf16.msra.mxu1 %v19261_v21  ;;  %v19276_v21 = vld [vmem:[%s24922_s3 + $0xd0] sm:$0xff]  }
 0x43f   : > { %18171 = vmatprep.subr.bf16.mxu1 %v19262_v37 }
 0x442   : > { %18172 = vmatpush3.bf16.msra.mxu1 %v19262_v37 }
 0x443   : > { %18181 = vmatprep.subr.bf16.mxu1 %v19264_v31 }
 0x445   : > { %18174 = vmatmul.mubr.bf16.vlgmr.msra.gmra.mrb[0].mxu1 %v15988_v14  ;;  %v19277_v14 = vld [vmem:[%s24922_s3 + $0xd8] sm:$0xff]  }
 0x446   : > { %18177 = vmatprep.mubr.bf16.mxu1 %v15989_v46  ;;  %18182 = vmatpush3.bf16.msra.mxu1 %v19264_v31  ;;  %v9351_v46 = vshll.u32 %v23483_v43, 16 }
 0x447   : > { %18183 = vmatprep.subr.bf16.mxu1 %v19266_v55 }
 0x448   : > { %v9353_v1 = vrot.slane %v9351_v46, 6 }
 0x44a   : > { %18184 = vmatpush3.bf16.msra.mxu1 %v19266_v55  ;;  %v9348_v55 = vshrl.u32 %v23483_v43, 16 }
 0x44b   : > { %18185 = vmatprep.subr.bf16.mxu1 %v19268_v18 }
 0x44d   : > { %18178 = vmatmul.mubr.bf16.gmra.mrb[4].mxu1 %v15990_v53  ;;  %v19278_v53 = vld [vmem:[%s24922_s3 + $0xe0] sm:$0xff]  }
 0x44e   : > { %18186 = vmatpush3.bf16.msra.mxu1 %v19268_v18  ;;  %18197 = vmatprep.mubr.bf16.mxu1 %v16023_v19  ;;  %v23562_v19 = vld [vmem:[#allocation2 + $0xc] sm:$0x3]  ;;  %v23618_v18 = vld [vmem:[#allocation2 + $0x1c] sm:$0x3] }
 0x44f   : > { %18187 = vmatprep.subr.bf16.mxu1 %v19269_v52  ;;  %v9321_v38 = vshrl.u32 %v23562_v19, 16  ;;  %v9324_v15 = vshll.u32 %v23562_v19, 16  ;;  %v9357_v43 = vshrl.u32 %v23618_v18, 16  ;;  %v9360_v39 = vshll.u32 %v23618_v18, 16 }
 0x451   : > { %v9323_v40 = vrot.slane %v9321_v38, 5  ;;  %v9326_v57 = vrot.slane %v9324_v15, 6  ;;  %v9359_v2 = vrot.slane %v9357_v43, 5  ;;  %v9362_v24 = vrot.slane %v9360_v39, 6 }
 0x452   : > { %18188 = vmatpush3.bf16.msra.mxu1 %v19269_v52  ;;  %v9330_v52 = vshrl.u32 %v23478_v28, 16 }
 0x453   : > { %18189 = vmatprep.subr.bf16.mxu1 %v19270_v36  ;;  %v9327_v54 = vor.u32 %v9326_v57, %v9323_v40  ;;  %v9386_v40 = vrot.slane %v9384_v45, 5  ;;  %v19280_v57 = vld [vmem:[%s24922_s3 + $0xf0] sm:$0xff]   ;;  %v9363_v3 = vor.u32 %v9362_v24, %v9359_v2 }
 0x455   : > { %v9328_v16 = vsel %vm19599_vm2, %v9319_v9, %v9327_v54  ;;  %v9420_v9 = vshrl.u32 %v23591_v27, 16  ;;  %v9423_v54 = vshll.u32 %v23591_v27, 16 }
 0x456   : > { %18190 = vmatpush3.bf16.msra.mxu1 %v19270_v36  ;;  %v16051_v37 = vcombine.low %v9310_v47, %v9328_v16  ;;  %v9333_v36 = vshll.u32 %v23478_v28, 16  ;;  %v9332_v28 = vrot.slane %v9330_v52, 5  ;;  %v23653_v47 = vld [vmem:[#allocation2 + $0x34] sm:$0x3]  ;;  %v9402_v16 = vshrl.u32 %v23597_v56, 16 }
 0x457   : > { %18191 = vmatprep.subr.bf16.mxu1 %v19271_v0  ;;  %v9411_v43 = vshrl.u32 %v23653_v47, 16  ;;  %v9414_v39 = vshll.u32 %v23653_v47, 16 }
 0x458   : > { %v9335_v4 = vrot.slane %v9333_v36, 6 }
 0x459   : > { %v9413_v24 = vrot.slane %v9411_v43, 5 }
 0x45a   : > { %18192 = vmatpush3.bf16.msra.mxu1 %v19271_v0  ;;  %v23625_v0 = vld [vmem:[#allocation2 + $0x14] sm:$0x3]  ;;  %v9336_v6 = vor.u32 %v9335_v4, %v9332_v28 }
 0x45b   : > { %18193 = vmatprep.subr.bf16.mxu1 %v19272_v22  ;;  %v9339_v48 = vshrl.u32 %v23625_v0, 16  ;;  %v9342_v38 = vshll.u32 %v23625_v0, 16 }
 0x45d   : > { %v9341_v11 = vrot.slane %v9339_v48, 5  ;;  %v9344_v51 = vrot.slane %v9342_v38, 6  ;;  %v9591_v48 = vld [vmem:[#allocation2] sm:$0xc]  ;;  %v9592_v38 = vld [vmem:[#allocation2 + $0x8] sm:$0xc] }
 0x45e   : > { %18194 = vmatpush3.bf16.msra.mxu1 %v19272_v22  ;;  %v9350_v22 = vrot.slane %v9348_v55, 5  ;;  %v16063_v7 = vrot.slane %v9591_v48, 10 }
 0x45f   : > { %18195 = vmatprep.subr.bf16.mxu1 %v19273_v44  ;;  %v9345_v27 = vor.u32 %v9344_v51, %v9341_v11  ;;  %v19284_v51 = vld [vmem:[%s24922_s3 + $0x110] sm:$0xff]  }
 0x460   : > { %v9354_v15 = vor.u32 %v9353_v1, %v9350_v22  ;;  %v9404_v22 = vrot.slane %v9402_v16, 5  ;;  %v9407_v1 = vrot.slane %v9405_v30, 6  ;;  %v9629_v16 = vrot.slane %v23618_v18, 6  ;;  %v9596_v30 = vld [vmem:[#allocation2 + $0x28] sm:$0xc] }
 0x462   : > { %18196 = vmatpush3.bf16.msra.mxu1 %v19273_v44  ;;  %v23637_v44 = vld [vmem:[#allocation2 + $0x2c] sm:$0x3]  ;;  %v9355_v5 = vrot.slane %v9354_v15, 4  ;;  %v9408_v2 = vor.u32 %v9407_v1, %v9404_v22  ;;  %v9598_v22 = vld [vmem:[#allocation2 + $0x38] sm:$0xc] }
 0x463   : > { %18205 = vmatprep.subr.bf16.mxu1 %v19274_v61  ;;  %v9393_v12 = vshrl.u32 %v23637_v44, 16  ;;  %v9396_v32 = vshll.u32 %v23637_v44, 16 }
 0x465   : > { %18198 = vmatmul.mubr.bf16.vlgmr.msra.gmra.mrb[0].mxu1 %v16024_v23  ;;  %v9130_v23 = vsel %vm19744_vm7, %v16006_v29, %v9129_v25  ;;  %v9395_v17 = vrot.slane %v9393_v12, 5  ;;  %v9398_v29 = vrot.slane %v9396_v32, 6 }
 0x466   : > { %18201 = vmatprep.mubr.bf16.mxu1 %v16025_v62  ;;  %18206 = vmatpush3.bf16.msra.mxu1 %v19274_v61  ;;  %v16026_v31 = vcombine.low %v9126_v60, %v9130_v23  ;;  %v9389_v61 = vrot.slane %v9387_v63, 6  ;;  %v9380_v62 = vrot.slane %v9378_v41, 6  ;;  %v19281_v23 = vld [vmem:[%s24922_s3 + $0xf8] sm:$0xff]   ;;  %v9337_v60 = vrot.slane %v9336_v6, 4 }
 0x467   : > { %18207 = vmatprep.subr.bf16.mxu1 %v19275_v20  ;;  %v9399_v56 = vor.u32 %v9398_v29, %v9395_v17  ;;  %v9617_v41 = vrot.slane %v23558_v49, 6  ;;  %v19289_v17 = vld [vmem:[%s24922_s3 + $0x138] sm:$0xff]  }
 0x468   : > { %v9390_v25 = vor.u32 %v9389_v61, %v9386_v40  ;;  %v9381_v52 = vor.u32 %v9380_v62, %v9377_v59  ;;  %v9346_v8 = vsel %vm19599_vm2, %v9337_v60, %v9345_v27  ;;  %v16064_v40 = vrot.slane %v9592_v38, 10  ;;  %v19287_v62 = vld [vmem:[%s24922_s3 + $0x128] sm:$0xff]   ;;  %v9594_v29 = vld [vmem:[#allocation2 + $0x18] sm:$0xc] }
 0x469   : > { %v9621_v61 = vrot.slane %v23562_v19, 6  ;;  %v9637_v60 = vrot.slane %v23637_v44, 6  ;;  %v9625_v27 = vrot.slane %v23625_v0, 6  ;;  %v19293_v38 = vld [vmem:[#allocation2 + $0x8] ss:$8 sps:$4 sm:$0xff]  }
 0x46a   : > { %18208 = vmatpush3.bf16.msra.mxu1 %v19275_v20  ;;  %v9372_v20 = vor.u32 %v9371_v13, %v9368_v10  ;;  %v9391_v36 = vrot.slane %v9390_v25, 4  ;;  %v9416_v10 = vrot.slane %v9414_v39, 6  ;;  %v19283_v13 = vld [vmem:[%s24922_s3 + $0x108] sm:$0xff]   ;;  %v19288_v25 = vld [vmem:[%s24922_s3 + $0x130] sm:$0xff]  }
 0x46b   : > { %18209 = vmatprep.subr.bf16.mxu1 %v19276_v21  ;;  %v9622_v49 = vsel %vm19802_vm8, %v16064_v40, %v9621_v61  ;;  %v9597_v39 = vld [vmem:[#allocation2 + $0x30] sm:$0xc]  ;;  %v19298_v40 = vld [vmem:[%s24922_s3 + $0x178] sm:$0xff]  }
 0x46c   : > { %v9400_v4 = vsel %vm19599_vm2, %v9391_v36, %v9399_v56  ;;  %v9417_v6 = vor.u32 %v9416_v10, %v9413_v24  ;;  %v19297_v24 = vld [vmem:[%s24922_s3 + $0x170] sm:$0xff]  }
 0x46d   : > { %18202 = vmatmul.mubr.bf16.gmra.mrb[4].mxu1 %v16026_v31  ;;  %v9422_v31 = vrot.slane %v9420_v9, 5  ;;  %v19285_v9 = vld [vmem:[%s24922_s3 + $0x118] sm:$0xff]  }
 0x46e   : > { %18210 = vmatpush3.bf16.msra.mxu1 %v19276_v21  ;;  %18221 = vmatprep.mubr.bf16.mxu1 %v16051_v37  ;;  %v23651_v21 = vld [vmem:[#allocation2 + $0x3c] sm:$0x3]  ;;  %v9364_v37 = vsel %vm19599_vm2, %v9355_v5, %v9363_v3  ;;  %v9618_v5 = vsel %vm19802_vm8, %v16063_v7, %v9617_v41 }
 0x46f   : > { %18211 = vmatprep.subr.bf16.mxu1 %v19277_v14  ;;  %v9429_v55 = vshrl.u32 %v23651_v21, 16  ;;  %v9432_v46 = vshll.u32 %v23651_v21, 16  ;;  %v9645_v43 = vrot.slane %v23651_v21, 6 }
 0x471   : > { %v9431_v63 = vrot.slane %v9429_v55, 5  ;;  %v9434_v28 = vrot.slane %v9432_v46, 6  ;;  %v9633_v55 = vrot.slane %v23631_v42, 6  ;;  %v16068_v46 = vrot.slane %v9596_v30, 10  ;;  %v19291_v42 = vld [vmem:[%s24922_s3 + $0x148] sm:$0xff]  }
 0x472   : > { %18212 = vmatpush3.bf16.msra.mxu1 %v19277_v14  ;;  %v9425_v14 = vrot.slane %v9423_v54, 6  ;;  %v19286_v54 = vld [vmem:[%s24922_s3 + $0x120] sm:$0xff]  }
 0x473   : > { %18213 = vmatprep.subr.bf16.mxu1 %v19278_v53  ;;  %v9435_v11 = vor.u32 %v9434_v28, %v9431_v63  ;;  %v9638_v44 = vsel %vm19802_vm8, %v16068_v46, %v9637_v60  ;;  %v16069_v63 = vrot.slane %v9597_v39, 10  ;;  %v19305_v60 = vld [vmem:[%s24922_s3 + $0x198] sm:$0xff]  }
 0x474   : > { %v9426_v45 = vor.u32 %v9425_v14, %v9422_v31  ;;  %v9595_v31 = vld [vmem:[#allocation2 + $0x20] sm:$0xc] }
 0x475   : > { %v19290_v14 = vld [vmem:[%s24922_s3 + $0x140] sm:$0xff]  }
 0x476   : > { %18214 = vmatpush3.bf16.msra.mxu1 %v19278_v53  ;;  %v9373_v53 = vrot.slane %v9372_v20, 4  ;;  %v9427_v32 = vrot.slane %v9426_v45, 4  ;;  %v16087_v20 = vcombine.low %v9618_v5, %v9622_v49  ;;  %v19292_v45 = vld [vmem:[%s24922_s3 + $0x150] sm:$0xff]  }
 0x477   : > { %18215 = vmatprep.subr.bf16.mxu1 %v19279_v35 }
 0x478   : > { %v9382_v15 = vsel %vm19599_vm2, %v9373_v53, %v9381_v52  ;;  %v9436_v19 = vsel %vm19599_vm2, %v9427_v32, %v9435_v11  ;;  %v16067_v52 = vrot.slane %v9595_v31, 10  ;;  %v9980_v31 = vld [vmem:[#allocation2 + $0x28] sm:$0xf] }
 0x479   : > { %v16053_v12 = vcombine.low %v9382_v15, %v9400_v4  ;;  %v19296_v4 = vld [vmem:[%s24922_s3 + $0x168] sm:$0xff]  }
 0x47a   : > { %18216 = vmatpush3.bf16.msra.mxu1 %v19279_v35  ;;  %v16052_v35 = vcombine.low %v9346_v8, %v9364_v37  ;;  %v16066_v37 = vrot.slane %v9594_v29, 10  ;;  %v9634_v56 = vsel %vm19802_vm8, %v16067_v52, %v9633_v55  ;;  %v16070_v8 = vrot.slane %v9598_v22, 10  ;;  %v9972_v15 = vld [vmem:[#allocation2 + $0x8] sm:$0xf]  ;;  %v9976_v55 = vld [vmem:[#allocation2 + $0x18] sm:$0xf] }
 0x47b   : > { %18217 = vmatprep.subr.bf16.mxu1 %v19280_v57  ;;  %v16089_v1 = vcombine.low %v9634_v56, %v9638_v44  ;;  %v9989_v10 = vshrl.u32 %v9972_v15, 16  ;;  %v10045_v52 = vshrl.u32 %v9980_v31, 16  ;;  %v10048_v44 = vshll.u32 %v9980_v31, 16  ;;  %v19307_v56 = vld [vmem:[%s24922_s3 + $0x1a8] sm:$0xff]   ;;  %v23803_v31 = vld [vmem:[#allocation2 + $0x3c] sm:$0x1] }
 0x47c   : > { %v9630_v18 = vsel %vm19802_vm8, %v16066_v37, %v9629_v16  ;;  %v9646_v28 = vsel %vm19802_vm8, %v16070_v8, %v9645_v43  ;;  %v9978_v37 = vld [vmem:[#allocation2 + $0x20] sm:$0xf] }
 0x47d   : > { %v9991_v61 = vrot.slane %v9989_v10, 4  ;;  %v10031_v46 = vshrl.u32 %v9978_v37, 16  ;;  %v10047_v39 = vrot.slane %v10045_v52, 4  ;;  %v9986_v8 = vld [vmem:[#allocation2 + $0x40] sm:$0xf]  ;;  %v19311_v52 = vld [vmem:[%s24922_s3 + $0x1c8] sm:$0xff]  }
 0x47e   : > { %18218 = vmatpush3.bf16.msra.mxu1 %v19280_v57  ;;  %v9409_v57 = vrot.slane %v9408_v2, 4  ;;  %v9974_v2 = vld [vmem:[#allocation2 + $0x10] sm:$0xf] }
 0x47f   : > { %18219 = vmatprep.subr.bf16.mxu1 %v19281_v23  ;;  %v10003_v7 = vshrl.u32 %v9974_v2, 16  ;;  %v10006_v41 = vshll.u32 %v9974_v2, 16  ;;  %v10090_v2 = vshll.u32 %v9986_v8, 16 }
 0x480   : > { %v9418_v3 = vsel %vm19599_vm2, %v9409_v57, %v9417_v6  ;;  %v19300_v57 = vld [vmem:[%s24922_s3 + $0x180] sm:$0xff]   ;;  %v23751_v6 = vld [vmem:[#allocation2 + $0xc] sm:$0x1] }
 0x481   : > { %v16054_v59 = vcombine.low %v9418_v3, %v9436_v19  ;;  %v10005_v32 = vrot.slane %v10003_v7, 4  ;;  %v10008_v11 = vrot.slane %v10006_v41, 5  ;;  %v9998_v49 = vshll.u32 %v23751_v6, 16  ;;  %v19299_v3 = vld [vmem:[#allocation2 + $0x18] ss:$8 sps:$4 sm:$0xff]  }
 0x482   : > { %18220 = vmatpush3.bf16.msra.mxu1 %v19281_v23  ;;  %v9593_v23 = vld [vmem:[#allocation2 + $0x10] sm:$0xc]  ;;  %v23786_v41 = vld [vmem:[#allocation2 + $0x34] sm:$0x1] }
 0x483   : > { %18229 = vmatprep.subr.bf16.mxu1 %v19282_v34  ;;  %v16065_v53 = vrot.slane %v9593_v23, 10  ;;  %v10009_v19 = vor.u32 %v10008_v11, %v10005_v32  ;;  %v19303_v23 = vld [vmem:[#allocation2 + $0x38] ss:$8 sps:$4 sm:$0xff]  }
 0x485   : > { %18222 = vmatmul.mubr.bf16.vlgmr.msra.gmra.mrb[0].mxu1 %v16052_v35  ;;  %v9626_v0 = vsel %vm19802_vm8, %v16065_v53, %v9625_v27  ;;  %v19295_v35 = vld [vmem:[%s24922_s3 + $0x160] sm:$0xff]   ;;  %v10034_v53 = vshll.u32 %v9978_v37, 16 }
 0x486   : > { %18225 = vmatprep.mubr.bf16.mxu1 %v16053_v12  ;;  %18230 = vmatpush3.bf16.msra.mxu1 %v19282_v34  ;;  %v16088_v36 = vcombine.low %v9626_v0, %v9630_v18  ;;  %v9641_v34 = vrot.slane %v23653_v47, 6  ;;  %v19294_v47 = vld [vmem:[%s24922_s3 + $0x158] sm:$0xff]   ;;  %v9982_v18 = vld [vmem:[#allocation2 + $0x30] sm:$0xf]  ;;  %v10017_v0 = vshrl.u32 %v9976_v55, 16 }
 0x487   : > { %18231 = vmatprep.subr.bf16.mxu1 %v19283_v13  ;;  %v10062_v22 = vshll.u32 %v9982_v18, 16  ;;  %v10036_v43 = vrot.slane %v10034_v53, 5 }
 0x488   : > { %v9642_v21 = vsel %vm19802_vm8, %v16069_v63, %v9641_v34  ;;  %v10050_v34 = vrot.slane %v10048_v44, 5  ;;  %v10019_v63 = vrot.slane %v10017_v0, 4  ;;  %v10082_v0 = vshll.u32 %v23803_v31, 16 }
 0x489   : > { %v16090_v48 = vcombine.low %v9642_v21, %v9646_v28  ;;  %v19308_v21 = vld [vmem:[%s24922_s3 + $0x1b0] sm:$0xff]  }
 0x48a   : > { %18232 = vmatpush3.bf16.msra.mxu1 %v19283_v13  ;;  %v9992_v13 = vshll.u32 %v9972_v15, 16  ;;  %v10087_v15 = vshrl.u32 %v9986_v8, 16  ;;  %v10051_v10 = vor.u32 %v10050_v34, %v10047_v39  ;;  %v19312_v8 = vld [vmem:[%s24922_s3 + $0x1d0] sm:$0xff]  }
 0x48b   : > { %18233 = vmatprep.subr.bf16.mxu1 %v19284_v51 }
 0x48c   : > { %v9994_v12 = vrot.slane %v9992_v13, 5 }
 0x48d   : > { %18226 = vmatmul.mubr.bf16.gmra.mrb[4].mxu1 %v16054_v59 }
 0x48e   : > { %18234 = vmatpush3.bf16.msra.mxu1 %v19284_v51  ;;  %18245 = vmatprep.mubr.bf16.mxu1 %v16087_v20  ;;  %v23753_v51 = vld [vmem:[#allocation2 + $0x14] sm:$0x1]  ;;  %v9995_v5 = vor.u32 %v9994_v12, %v9991_v61  ;;  %v19302_v20 = vld [vmem:[%s24922_s3 + $0x188] sm:$0xff]   ;;  %v19309_v12 = vld [vmem:[%s24922_s3 + $0x1b8] sm:$0xff]  }
 0x48f   : > { %18235 = vmatprep.subr.bf16.mxu1 %v19285_v9  ;;  %v10012_v59 = vshll.u32 %v23753_v51, 16 }
 0x491   : > { %v10014_v29 = vrot.slane %v10012_v59, 5 }
 0x492   : > { %18236 = vmatpush3.bf16.msra.mxu1 %v19285_v9  ;;  %v19301_v9 = vld [vmem:[#allocation2 + $0x28] ss:$8 sps:$4 sm:$0xff]  }
 0x493   : > { %18237 = vmatprep.subr.bf16.mxu1 %v19286_v54 }
 0x496   : > { %18238 = vmatpush3.bf16.msra.mxu1 %v19286_v54  ;;  %v9996_v54 = vrot.slane %v9995_v5, 4 }
 0x497   : > { %18239 = vmatprep.subr.bf16.mxu1 %v19287_v62 }
 0x49a   : > { %18240 = vmatpush3.bf16.msra.mxu1 %v19287_v62  ;;  %v10000_v62 = vrot.slane %v9998_v49, 5  ;;  %v10089_v49 = vrot.slane %v10087_v15, 4  ;;  %v19314_v15 = vld [vmem:[%s24922_s3 + $0x1e0] sm:$0xff]  }
 0x49b   : > { %18241 = vmatprep.subr.bf16.mxu1 %v19288_v25 }
 0x49c   : > { %v10001_v16 = vsel %vm23384_vm1, %v9996_v54, %v10000_v62 }
 0x49e   : > { %18242 = vmatpush3.bf16.msra.mxu1 %v19288_v25  ;;  %v10010_v25 = vrot.slane %v10009_v19, 4  ;;  %v10092_v19 = vrot.slane %v10090_v2, 5  ;;  %v19315_v2 = vld [vmem:[%s24922_s3 + $0x1e8] sm:$0xff]  }
 0x49f   : > { %18243 = vmatprep.subr.bf16.mxu1 %v19289_v17 }
 0x4a0   : > { %v10015_v30 = vsel %vm23384_vm1, %v10010_v25, %v10014_v29  ;;  %v19310_v25 = vld [vmem:[%s24922_s3 + $0x1c0] sm:$0xff]  }
 0x4a1   : > { %v16143_v27 = vcombine.low %v10001_v16, %v10015_v30  ;;  %v23797_v16 = vld [vmem:[#allocation2 + $0x44] sm:$0x1] }
 0x4a2   : > { %18244 = vmatpush3.bf16.msra.mxu1 %v19289_v17  ;;  %v19304_v17 = vld [vmem:[%s24922_s3 + $0x190] sm:$0xff]  }
 0x4a3   : > { %18253 = vmatprep.subr.bf16.mxu1 %v19290_v14 }
 0x4a5   : > { %18246 = vmatmul.mubr.bf16.vlgmr.msra.gmra.mrb[0].mxu1 %v16088_v36  ;;  %v10020_v36 = vshll.u32 %v9976_v55, 16 }
 0x4a6   : > { %18249 = vmatprep.mubr.bf16.mxu1 %v16089_v1  ;;  %18254 = vmatpush3.bf16.msra.mxu1 %v19290_v14  ;;  %v19306_v14 = vld [vmem:[%s24922_s3 + $0x1a0] sm:$0xff]   ;;  %v10033_v1 = vrot.slane %v10031_v46, 4  ;;  %v10096_v46 = vshll.u32 %v23797_v16, 16 }
 0x4a7   : > { %18255 = vmatprep.subr.bf16.mxu1 %v19291_v42  ;;  %v10022_v28 = vrot.slane %v10020_v36, 5 }
 0x4a8   : > { %v10098_v34 = vrot.slane %v10096_v46, 5 }
 0x4a9   : > { %v10023_v13 = vor.u32 %v10022_v28, %v10019_v63  ;;  %v10084_v28 = vrot.slane %v10082_v0, 5 }
 0x4aa   : > { %18256 = vmatpush3.bf16.msra.mxu1 %v19291_v42  ;;  %v10059_v42 = vshrl.u32 %v9982_v18, 16 }
 0x4ab   : > { %18257 = vmatprep.subr.bf16.mxu1 %v19292_v45  ;;  %v10024_v59 = vrot.slane %v10023_v13, 4  ;;  %v19316_v13 = vld [vmem:[%s24922_s3 + $0x1f0] sm:$0xff]  }
 0x4ad   : > { %18250 = vmatmul.mubr.bf16.gmra.mrb[4].mxu1 %v16090_v48  ;;  %v10061_v48 = vrot.slane %v10059_v42, 4  ;;  %v10255_v42 = vld [vmem:[#allocation2 + $0x10] sm:$0xe] }
 0x4ae   : > { %18258 = vmatpush3.bf16.msra.mxu1 %v19292_v45  ;;  %18269 = vmatprep.mubr.bf16.mxu1 %v19293_v38  ;;  %v23776_v45 = vld [vmem:[#allocation2 + $0x24] sm:$0x1]  ;;  %v9984_v38 = vld [vmem:[#allocation2 + $0x38] sm:$0xf]  ;;  %v16156_v63 = vrot.slane %v10255_v42, 9 }
 0x4af   : > { %18259 = vmatprep.subr.bf16.mxu1 %v19294_v47  ;;  %v10040_v7 = vshll.u32 %v23776_v45, 16  ;;  %v10076_v61 = vshll.u32 %v9984_v38, 16 }
 0x4b1   : > { %v10078_v62 = vrot.slane %v10076_v61, 5  ;;  %v10491_v61 = vshrl.u32 %v10255_v42, 16 }
 0x4b2   : > { %18260 = vmatpush3.bf16.msra.mxu1 %v19294_v47  ;;  %v10064_v47 = vrot.slane %v10062_v22, 5 }
 0x4b3   : > { %18261 = vmatprep.subr.bf16.mxu1 %v19295_v35 }
 0x4b4   : > { %v10065_v11 = vor.u32 %v10064_v47, %v10061_v48 }
 0x4b6   : > { %18262 = vmatpush3.bf16.msra.mxu1 %v19295_v35  ;;  %v10037_v35 = vor.u32 %v10036_v43, %v10033_v1  ;;  %v10066_v29 = vrot.slane %v10065_v11, 4  ;;  %v10280_v1 = vrot.slane %v23751_v6, 5  ;;  %v10284_v43 = vrot.slane %v23753_v51, 5 }
 0x4b7   : > { %18263 = vmatprep.subr.bf16.mxu1 %v19296_v4 }
 0x4b8   : > { %v10038_v5 = vrot.slane %v10037_v35, 4  ;;  %v10285_v6 = vsel %vm19744_vm7, %v16156_v63, %v10284_v43  ;;  %v10308_v43 = vrot.slane %v23797_v16, 5 }
 0x4ba   : > { %18264 = vmatpush3.bf16.msra.mxu1 %v19296_v4  ;;  %v23781_v4 = vld [vmem:[#allocation2 + $0x2c] sm:$0x1] }
 0x4bb   : > { %18265 = vmatprep.subr.bf16.mxu1 %v19297_v24  ;;  %v10054_v32 = vshll.u32 %v23781_v4, 16 }
 0x4be   : > { %18266 = vmatpush3.bf16.msra.mxu1 %v19297_v24  ;;  %v23783_v24 = vld [vmem:[#allocation2 + $0x1c] sm:$0x1] }
 0x4bf   : > { %18267 = vmatprep.subr.bf16.mxu1 %v19298_v40 }
 0x4c2   : > { %18268 = vmatpush3.bf16.msra.mxu1 %v19298_v40  ;;  %v10073_v40 = vshrl.u32 %v9984_v38, 16  ;;  %v19313_v38 = vld [vmem:[%s24922_s3 + $0x1d8] sm:$0xff]  }
 0x4c3   : > { %18277 = vmatprep.subr.bf16.mxu1 %v19300_v57 }
 0x4c4   : > { %v10075_v54 = vrot.slane %v10073_v40, 4  ;;  %v23839_v40 = vld [vmem:[#allocation2 + $0xc] sm:$0x3] }
 0x4c5   : > { %18270 = vmatmul.mubr.bf16.vlgmr.msra.gmra.mrb[0].mxu1 %v19299_v3  ;;  %v10052_v3 = vrot.slane %v10051_v10, 4 }
 0x4c6   : > { %18273 = vmatprep.mubr.bf16.mxu1 %v19301_v9  ;;  %18278 = vmatpush3.bf16.msra.mxu1 %v19300_v57  ;;  %v10026_v57 = vshll.u32 %v23783_v24, 16  ;;  %v10042_v9 = vrot.slane %v10040_v7, 5  ;;  %v10079_v55 = vor.u32 %v10078_v62, %v10075_v54  ;;  %v10296_v54 = vrot.slane %v23781_v4, 5  ;;  %v23856_v62 = vld [vmem:[#allocation2 + $0x30] sm:$0xe] }
 0x4c7   : > { %18279 = vmatprep.subr.bf16.mxu1 %v19302_v20 }
 0x4c8   : > { %v10028_v30 = vrot.slane %v10026_v57, 5  ;;  %v10080_v39 = vrot.slane %v10079_v55, 4  ;;  %v19317_v57 = vld [vmem:[%s24922_s3 + $0x1f8] sm:$0xff]  }
 0x4ca   : > { %18280 = vmatpush3.bf16.msra.mxu1 %v19302_v20  ;;  %v10068_v20 = vshll.u32 %v23786_v41, 16  ;;  %v10085_v51 = vsel %vm23384_vm1, %v10080_v39, %v10084_v28  ;;  %v23883_v39 = vld [vmem:[#allocation2 + $0x38] sm:$0xe] }
 0x4cb   : > { %18281 = vmatprep.subr.bf16.mxu1 %v19304_v17  ;;  %v16161_v16 = vrot.slane %v23883_v39, 9 }
 0x4cc   : > { %v10070_v37 = vrot.slane %v10068_v20, 5  ;;  %v23850_v20 = vld [vmem:[#allocation2 + $0x18] sm:$0xe] }
 0x4cd   : > { %18274 = vmatmul.mubr.bf16.gmra.mrb[4].mxu1 %v19303_v23  ;;  %v10043_v23 = vsel %vm23384_vm1, %v10038_v5, %v10042_v9  ;;  %v23846_v5 = vld [vmem:[#allocation2 + $0x20] sm:$0xe]  ;;  %v23853_v9 = vld [vmem:[#allocation2 + $0x28] sm:$0xe]  ;;  %v16157_v55 = vrot.slane %v23850_v20, 9 }
 0x4ce   : > { %18282 = vmatpush3.bf16.msra.mxu1 %v19304_v17  ;;  %18293 = vmatprep.mubr.bf16.mxu1 %v16143_v27  ;;  %v10056_v17 = vrot.slane %v10054_v32, 5  ;;  %v10071_v18 = vsel %vm23384_vm1, %v10066_v29, %v10070_v37  ;;  %v23841_v32 = vld [vmem:[#allocation2 + $0x14] sm:$0x3]  ;;  %v16159_v4 = vrot.slane %v23853_v9, 9 }
 0x4cf   : > { %18283 = vmatprep.subr.bf16.mxu1 %v19305_v60  ;;  %v10500_v29 = vshrl.u32 %v23841_v32, 16 }
 0x4d0   : > { %v10057_v27 = vsel %vm23384_vm1, %v10052_v3, %v10056_v17  ;;  %v10485_v3 = vshll.u32 %v23839_v40, 16 }
 0x4d1   : > { %v16145_v44 = vcombine.low %v10057_v27, %v10071_v18  ;;  %v10300_v27 = vrot.slane %v23786_v41, 5  ;;  %v10297_v18 = vsel %vm19744_vm7, %v16159_v4, %v10296_v54 }
 0x4d2   : > { %18284 = vmatpush3.bf16.msra.mxu1 %v19305_v60  ;;  %v10093_v60 = vor.u32 %v10092_v19, %v10089_v49  ;;  %v10482_v19 = vshrl.u32 %v23839_v40, 16 }
 0x4d3   : > { %18285 = vmatprep.subr.bf16.mxu1 %v19306_v14 }
 0x4d4   : > { %v10094_v36 = vrot.slane %v10093_v60, 4  ;;  %v16158_v60 = vrot.slane %v23846_v5, 9 }
 0x4d6   : > { %18286 = vmatpush3.bf16.msra.mxu1 %v19306_v14  ;;  %v10029_v14 = vsel %vm23384_vm1, %v10024_v59, %v10028_v30  ;;  %v10292_v59 = vrot.slane %v23776_v45, 5  ;;  %v10503_v30 = vshll.u32 %v23841_v32, 16  ;;  %v19318_v45 = vld [vmem:[%s24922_s3 + $0x200] sm:$0xff]  }
 0x4d7   : > { %18287 = vmatprep.subr.bf16.mxu1 %v19307_v56  ;;  %v16144_v53 = vcombine.low %v10029_v14, %v10043_v23  ;;  %v10288_v23 = vrot.slane %v23783_v24, 5  ;;  %v10484_v14 = vrot.slane %v10482_v19, 5  ;;  %v16160_v24 = vrot.slane %v23856_v62, 9 }
 0x4d8   : > { %v10293_v46 = vsel %vm19744_vm7, %v16158_v60, %v10292_v59  ;;  %v10505_v0 = vrot.slane %v10503_v30, 6  ;;  %v10548_v19 = vshll.u32 %v23853_v9, 16 }
 0x4d9   : > { %v10289_v41 = vsel %vm19744_vm7, %v16157_v55, %v10288_v23 }
 0x4da   : > { %18288 = vmatpush3.bf16.msra.mxu1 %v19307_v56  ;;  %v10254_v56 = vld [vmem:[#allocation2 + $0x8] sm:$0xe] }
 0x4db   : > { %18289 = vmatprep.subr.bf16.mxu1 %v19308_v21  ;;  %v16155_v22 = vrot.slane %v10254_v56, 9  ;;  %v10473_v10 = vshrl.u32 %v10254_v56, 16  ;;  %v10476_v7 = vshll.u32 %v10254_v56, 16  ;;  %v10301_v56 = vsel %vm19744_vm7, %v16160_v24, %v10300_v27 }
 0x4dc   : > { %v10550_v27 = vrot.slane %v10548_v19, 6  ;;  %v19326_v19 = vld [vmem:[%s24922_s3 + $0x240] sm:$0xff]  }
 0x4dd   : > { %v10281_v48 = vsel %vm19744_vm7, %v16155_v22, %v10280_v1  ;;  %v10475_v11 = vrot.slane %v10473_v10, 5  ;;  %v10478_v49 = vrot.slane %v10476_v7, 6  ;;  %v23880_v22 = vld [vmem:[#allocation2 + $0x40] sm:$0xe]  ;;  %v16181_v1 = vcombine.low %v10297_v18, %v10301_v56 }
 0x4de   : > { %18290 = vmatpush3.bf16.msra.mxu1 %v19308_v21  ;;  %v10099_v21 = vsel %vm23384_vm1, %v10094_v36, %v10098_v34  ;;  %v16179_v35 = vcombine.low %v10281_v48, %v10285_v6  ;;  %v16180_v36 = vcombine.low %v10289_v41, %v10293_v46  ;;  %v16162_v48 = vrot.slane %v23880_v22, 9  ;;  %v19320_v6 = vld [vmem:[%s24922_s3 + $0x210] sm:$0xff]   ;;  %v19322_v7 = vld [vmem:[%s24922_s3 + $0x220] sm:$0xff]  }
 0x4df   : > { %18291 = vmatprep.subr.bf16.mxu1 %v19309_v12  ;;  %v16146_v47 = vcombine.low %v10085_v51, %v10099_v21  ;;  %v10479_v37 = vor.u32 %v10478_v49, %v10475_v11  ;;  %v10304_v21 = vrot.slane %v23803_v31, 5  ;;  %v10527_v10 = vshrl.u32 %v23846_v5, 16 }
 0x4e0   : > { %v10309_v51 = vsel %vm19744_vm7, %v16162_v48, %v10308_v43  ;;  %v10512_v11 = vshll.u32 %v23850_v20, 16  ;;  %v10545_v49 = vshrl.u32 %v23853_v9, 16  ;;  %v10602_v56 = vshll.u32 %v23880_v22, 16  ;;  %v19325_v48 = vld [vmem:[%s24922_s3 + $0x238] sm:$0xff]  }
 0x4e1   : > { %v10480_v34 = vrot.slane %v10479_v37, 4  ;;  %v10305_v31 = vsel %vm19744_vm7, %v16161_v16, %v10304_v21  ;;  %v10584_v21 = vshll.u32 %v23883_v39, 16 }
 0x4e2   : > { %18292 = vmatpush3.bf16.msra.mxu1 %v19309_v12  ;;  %v10494_v12 = vshll.u32 %v10255_v42, 16  ;;  %v19319_v42 = vld [vmem:[%s24922_s3 + $0x208] sm:$0xff]   ;;  %v10514_v9 = vrot.slane %v10512_v11, 6  ;;  %v10547_v4 = vrot.slane %v10545_v49, 5 }
 0x4e3   : > { %18301 = vmatprep.subr.bf16.mxu1 %v19310_v25 }
 0x4e4   : > { %v10496_v17 = vrot.slane %v10494_v12, 6  ;;  %v10509_v12 = vshrl.u32 %v23850_v20, 16  ;;  %v19323_v20 = vld [vmem:[%s24922_s3 + $0x228] sm:$0xff]  }
 0x4e5   : > { %18294 = vmatmul.mubr.bf16.vlgmr.msra.gmra.mrb[0].mxu1 %v16144_v53  ;;  %v10487_v53 = vrot.slane %v10485_v3, 6  ;;  %v10529_v3 = vrot.slane %v10527_v10, 5 }
 0x4e6   : > { %18297 = vmatprep.mubr.bf16.mxu1 %v16145_v44  ;;  %18302 = vmatpush3.bf16.msra.mxu1 %v19310_v25  ;;  %v10493_v25 = vrot.slane %v10491_v61, 5  ;;  %v10502_v44 = vrot.slane %v10500_v29, 5  ;;  %v23907_v61 = vld [vmem:[#allocation2 + $0x24] sm:$0x3]  ;;  %v10566_v29 = vshll.u32 %v23856_v62, 16  ;;  %v10511_v30 = vrot.slane %v10509_v12, 5 }
 0x4e7   : > { %18303 = vmatprep.subr.bf16.mxu1 %v19311_v52  ;;  %v10536_v59 = vshrl.u32 %v23907_v61, 16  ;;  %v10539_v54 = vshll.u32 %v23907_v61, 16  ;;  %v10586_v12 = vrot.slane %v10584_v21, 6  ;;  %v19332_v21 = vld [vmem:[%s24922_s3 + $0x270] sm:$0xff]  }
 0x4e8   : > { %v10506_v28 = vor.u32 %v10505_v0, %v10502_v44  ;;  %v10568_v18 = vrot.slane %v10566_v29, 6  ;;  %v10515_v0 = vor.u32 %v10514_v9, %v10511_v30 }
 0x4e9   : > { %v10538_v46 = vrot.slane %v10536_v59, 5  ;;  %v10541_v24 = vrot.slane %v10539_v54, 6 }
 0x4ea   : > { %18304 = vmatpush3.bf16.msra.mxu1 %v19311_v52  ;;  %v10497_v52 = vor.u32 %v10496_v17, %v10493_v25  ;;  %v23917_v25 = vld [vmem:[#allocation2 + $0x2c] sm:$0x3]  ;;  %v10563_v17 = vshrl.u32 %v23856_v62, 16  ;;  %v19324_v62 = vld [vmem:[%s24922_s3 + $0x230] sm:$0xff]  }
 0x4eb   : > { %18305 = vmatprep.subr.bf16.mxu1 %v19312_v8  ;;  %v10554_v37 = vshrl.u32 %v23917_v25, 16 }
 0x4ec   : > { %v10498_v63 = vrot.slane %v10497_v52, 4 }
 0x4ed   : > { %18298 = vmatmul.mubr.bf16.gmra.mrb[4].mxu1 %v16146_v47  ;;  %v10556_v43 = vrot.slane %v10554_v37, 5 }
 0x4ee   : > { %18306 = vmatpush3.bf16.msra.mxu1 %v19312_v8  ;;  %18317 = vmatprep.mubr.bf16.mxu1 %v16179_v35  ;;  %v10488_v8 = vor.u32 %v10487_v53, %v10484_v14  ;;  %v16182_v35 = vcombine.low %v10305_v31, %v10309_v51  ;;  %v10557_v14 = vshll.u32 %v23917_v25, 16  ;;  %v10565_v53 = vrot.slane %v10563_v17, 5 }
 0x4ef   : > { %18307 = vmatprep.subr.bf16.mxu1 %v19313_v38  ;;  %v10604_v31 = vrot.slane %v10602_v56, 6 }
 0x4f0   : > { %v10489_v47 = vsel %vm19599_vm2, %v10480_v34, %v10488_v8  ;;  %v10559_v34 = vrot.slane %v10557_v14, 6  ;;  %v23937_v8 = vld [vmem:[#allocation2 + $0x44] sm:$0x3]  ;;  %v10569_v16 = vor.u32 %v10568_v18, %v10565_v53  ;;  %v19327_v14 = vld [vmem:[%s24922_s3 + $0x248] sm:$0xff]   ;;  %v10796_v18 = vrot.slane %v23839_v40, 6 }
 0x4f2   : > { %18308 = vmatpush3.bf16.msra.mxu1 %v19313_v38  ;;  %v10507_v38 = vsel %vm19599_vm2, %v10498_v63, %v10506_v28  ;;  %v10542_v63 = vor.u32 %v10541_v24, %v10538_v46  ;;  %v10581_v28 = vshrl.u32 %v23883_v39, 16 }
 0x4f3   : > { %18309 = vmatprep.subr.bf16.mxu1 %v19314_v15 }
 0x4f6   : > { %18310 = vmatpush3.bf16.msra.mxu1 %v19314_v15  ;;  %v19321_v15 = vld [vmem:[%s24922_s3 + $0x218] sm:$0xff]  }
 0x4f7   : > { %18311 = vmatprep.subr.bf16.mxu1 %v19315_v2 }
 0x4fa   : > { %18312 = vmatpush3.bf16.msra.mxu1 %v19315_v2  ;;  %v16207_v2 = vcombine.low %v10489_v47, %v10507_v38  ;;  %v23944_v47 = vld [vmem:[#allocation2 + $0x3c] sm:$0x3] }
 0x4fb   : > { %18313 = vmatprep.subr.bf16.mxu1 %v19316_v13  ;;  %v10590_v11 = vshrl.u32 %v23944_v47, 16  ;;  %v10593_v49 = vshll.u32 %v23944_v47, 16 }
 0x4fe   : > { %18314 = vmatpush3.bf16.msra.mxu1 %v19316_v13  ;;  %v10530_v13 = vshll.u32 %v23846_v5, 16 }
 0x4ff   : > { %18315 = vmatprep.subr.bf16.mxu1 %v19317_v57 }
 0x500   : > { %v10532_v5 = vrot.slane %v10530_v13, 6  ;;  %v10560_v13 = vor.u32 %v10559_v34, %v10556_v43  ;;  %v19329_v43 = vld [vmem:[%s24922_s3 + $0x258] sm:$0xff]  }
 0x502   : > { %18316 = vmatpush3.bf16.msra.mxu1 %v19317_v57  ;;  %v23911_v57 = vld [vmem:[#allocation2 + $0x1c] sm:$0x3]  ;;  %v10533_v55 = vor.u32 %v10532_v5, %v10529_v3  ;;  %v10570_v3 = vrot.slane %v10569_v16, 4  ;;  %v10808_v16 = vrot.slane %v23907_v61, 6 }
 0x503   : > { %18325 = vmatprep.subr.bf16.mxu1 %v19318_v45  ;;  %v10518_v23 = vshrl.u32 %v23911_v57, 16  ;;  %v10521_v60 = vshll.u32 %v23911_v57, 16 }
 0x505   : > { %18318 = vmatmul.mubr.bf16.vlgmr.msra.gmra.mrb[0].mxu1 %v16180_v36  ;;  %v10520_v41 = vrot.slane %v10518_v23, 5  ;;  %v10599_v36 = vshrl.u32 %v23880_v22, 16  ;;  %v10592_v23 = vrot.slane %v10590_v11, 5 }
 0x506   : > { %18321 = vmatprep.mubr.bf16.mxu1 %v16181_v1  ;;  %18326 = vmatpush3.bf16.msra.mxu1 %v19318_v45  ;;  %v23926_v45 = vld [vmem:[#allocation2 + $0x34] sm:$0x3]  ;;  %v10551_v1 = vor.u32 %v10550_v27, %v10547_v4  ;;  %v10770_v4 = vld [vmem:[#allocation2 + $0x8] sm:$0xc] }
 0x507   : > { %18327 = vmatprep.subr.bf16.mxu1 %v19319_v42  ;;  %v10572_v52 = vshrl.u32 %v23926_v45, 16  ;;  %v10575_v44 = vshll.u32 %v23926_v45, 16  ;;  %v10601_v38 = vrot.slane %v10599_v36, 5  ;;  %v16219_v53 = vrot.slane %v10770_v4, 10  ;;  %v11153_v4 = vld [vmem:[#allocation2 + $0x18] sm:$0xf] }
 0x508   : > { %v10552_v39 = vrot.slane %v10551_v1, 4 }
 0x509   : > { %v10574_v22 = vrot.slane %v10572_v52, 5  ;;  %v10577_v51 = vrot.slane %v10575_v44, 6  ;;  %v10605_v54 = vor.u32 %v10604_v31, %v10601_v38  ;;  %v10800_v52 = vrot.slane %v23841_v32, 6 }
 0x50a   : > { %18328 = vmatpush3.bf16.msra.mxu1 %v19319_v42  ;;  %v10523_v42 = vrot.slane %v10521_v60, 6  ;;  %v10561_v29 = vsel %vm19599_vm2, %v10552_v39, %v10560_v13  ;;  %v10595_v60 = vrot.slane %v10593_v49, 6  ;;  %v10812_v38 = vrot.slane %v23917_v25, 6  ;;  %v10777_v49 = vld [vmem:[#allocation2 + $0x40] sm:$0xc] }
 0x50b   : > { %18329 = vmatprep.subr.bf16.mxu1 %v19320_v6  ;;  %v10578_v5 = vor.u32 %v10577_v51, %v10574_v22  ;;  %v10606_v46 = vrot.slane %v10605_v54, 4  ;;  %v10774_v22 = vld [vmem:[#allocation2 + $0x28] sm:$0xc]  ;;  %v10772_v51 = vld [vmem:[#allocation2 + $0x18] sm:$0xc]  ;;  %v10804_v31 = vrot.slane %v23911_v57, 6 }
 0x50c   : > { %v10524_v10 = vor.u32 %v10523_v42, %v10520_v41  ;;  %v19328_v41 = vld [vmem:[%s24922_s3 + $0x250] sm:$0xff]   ;;  %v10797_v42 = vsel %vm19802_vm8, %v16219_v53, %v10796_v18  ;;  %v10816_v39 = vrot.slane %v23926_v45, 6  ;;  %v16221_v13 = vrot.slane %v10772_v51, 10  ;;  %v19335_v45 = vld [vmem:[%s24922_s3 + $0x288] sm:$0xff]  }
 0x50d   : > { %18322 = vmatmul.mubr.bf16.gmra.mrb[4].mxu1 %v16182_v35  ;;  %v10608_v35 = vshrl.u32 %v23937_v8, 16  ;;  %v10579_v37 = vsel %vm19599_vm2, %v10570_v3, %v10578_v5  ;;  %v10824_v3 = vrot.slane %v23937_v8, 6  ;;  %v10776_v5 = vld [vmem:[#allocation2 + $0x38] sm:$0xc]  ;;  %v16226_v54 = vrot.slane %v10777_v49, 10 }
 0x50e   : > { %18330 = vmatpush3.bf16.msra.mxu1 %v19320_v6  ;;  %18341 = vmatprep.mubr.bf16.mxu1 %v16207_v2  ;;  %v10534_v6 = vrot.slane %v10533_v55, 4  ;;  %v10516_v2 = vrot.slane %v10515_v0, 4  ;;  %v16209_v55 = vcombine.low %v10561_v29, %v10579_v37  ;;  %v10596_v0 = vor.u32 %v10595_v60, %v10592_v23  ;;  %v19339_v23 = vld [vmem:[%s24922_s3 + $0x2a0] sm:$0xff]   ;;  %v19340_v60 = vld [vmem:[%s24922_s3 + $0x2a8] sm:$0xff]   ;;  %v11151_v37 = vld [vmem:[#allocation2 + $0x10] sm:$0xf] }
 0x50f   : > { %18331 = vmatprep.subr.bf16.mxu1 %v19321_v15  ;;  %v10805_v57 = vsel %vm19802_vm8, %v16221_v13, %v10804_v31  ;;  %v10825_v29 = vsel %vm19802_vm8, %v16226_v54, %v10824_v3  ;;  %v11165_v54 = vld [vmem:[#allocation2 + $0x48] sm:$0xf] }
 0x510   : > { %v10543_v59 = vsel %vm19599_vm2, %v10534_v6, %v10542_v63  ;;  %v10525_v30 = vsel %vm19599_vm2, %v10516_v2, %v10524_v10  ;;  %v19330_v63 = vld [vmem:[%s24922_s3 + $0x260] sm:$0xff]   ;;  %v16223_v10 = vrot.slane %v10774_v22, 10 }
 0x511   : > { %v16208_v27 = vcombine.low %v10525_v30, %v10543_v59  ;;  %v10773_v6 = vld [vmem:[#allocation2 + $0x20] sm:$0xc]  ;;  %v10820_v59 = vrot.slane %v23944_v47, 6  ;;  %v19338_v47 = vld [vmem:[%s24922_s3 + $0x298] sm:$0xff]  }
 0x512   : > { %18332 = vmatpush3.bf16.msra.mxu1 %v19321_v15  ;;  %v10611_v15 = vshll.u32 %v23937_v8, 16  ;;  %v19334_v2 = vld [vmem:[%s24922_s3 + $0x280] sm:$0xff]   ;;  %v10813_v25 = vsel %vm19802_vm8, %v16223_v10, %v10812_v38  ;;  %v19349_v38 = vld [vmem:[%s24922_s3 + $0x2d8] sm:$0xff]  }
 0x513   : > { %18333 = vmatprep.subr.bf16.mxu1 %v19322_v7  ;;  %v19347_v22 = vld [vmem:[#allocation2 + $0x40] ss:$8 sps:$4 sm:$0xff]  }
 0x514   : > { %v10613_v17 = vrot.slane %v10611_v15, 6  ;;  %v10775_v15 = vld [vmem:[#allocation2 + $0x30] sm:$0xc]  ;;  %v11155_v10 = vld [vmem:[#allocation2 + $0x20] sm:$0xf] }
 0x516   : > { %18334 = vmatpush3.bf16.msra.mxu1 %v19322_v7  ;;  %v10583_v7 = vrot.slane %v10581_v28, 5  ;;  %v19331_v28 = vld [vmem:[%s24922_s3 + $0x268] sm:$0xff]  }
 0x517   : > { %18335 = vmatprep.subr.bf16.mxu1 %v19323_v20 }
 0x518   : > { %v10587_v9 = vor.u32 %v10586_v12, %v10583_v7  ;;  %v16224_v7 = vrot.slane %v10775_v15, 10  ;;  %v11161_v15 = vld [vmem:[#allocation2 + $0x38] sm:$0xf] }
 0x51a   : > { %18336 = vmatpush3.bf16.msra.mxu1 %v19323_v20  ;;  %v10610_v20 = vrot.slane %v10608_v35, 5  ;;  %v10588_v44 = vrot.slane %v10587_v9, 4  ;;  %v16222_v35 = vrot.slane %v10773_v6, 10  ;;  %v10817_v11 = vsel %vm19802_vm8, %v16224_v7, %v10816_v39  ;;  %v19337_v9 = vld [vmem:[#allocation2 + $0x10] ss:$8 sps:$4 sm:$0xff]  }
 0x51b   : > { %18337 = vmatprep.subr.bf16.mxu1 %v19324_v62  ;;  %v11241_v7 = vshll.u32 %v11161_v15, 16 }
 0x51c   : > { %v10614_v24 = vor.u32 %v10613_v17, %v10610_v20  ;;  %v10597_v32 = vsel %vm19599_vm2, %v10588_v44, %v10596_v0  ;;  %v10809_v61 = vsel %vm19802_vm8, %v16222_v35, %v10808_v16  ;;  %v19336_v20 = vld [vmem:[%s24922_s3 + $0x290] sm:$0xff]   ;;  %v16225_v17 = vrot.slane %v10776_v5, 10  ;;  %v11157_v35 = vld [vmem:[#allocation2 + $0x28] sm:$0xf] }
 0x51d   : > { %v16244_v12 = vcombine.low %v10805_v57, %v10809_v61  ;;  %v11210_v39 = vshrl.u32 %v11157_v35, 16  ;;  %v11213_v13 = vshll.u32 %v11157_v35, 16  ;;  %v11159_v61 = vld [vmem:[#allocation2 + $0x30] sm:$0xf]  ;;  %v11196_v57 = vshrl.u32 %v11155_v10, 16 }
 0x51e   : > { %18338 = vmatpush3.bf16.msra.mxu1 %v19324_v62  ;;  %v10771_v62 = vld [vmem:[#allocation2 + $0x10] sm:$0xc]  ;;  %v10615_v56 = vsel %vm19599_vm2, %v10606_v46, %v10614_v24  ;;  %v10821_v8 = vsel %vm19802_vm8, %v16225_v17, %v10820_v59  ;;  %v19342_v46 = vld [vmem:[%s24922_s3 + $0x2b8] sm:$0xff]   ;;  %v11168_v24 = vshrl.u32 %v11151_v37, 16  ;;  %v11227_v49 = vshll.u32 %v11159_v61, 16 }
 0x51f   : > { %18339 = vmatprep.subr.bf16.mxu1 %v19325_v48  ;;  %v16220_v36 = vrot.slane %v10771_v62, 10  ;;  %v16210_v1 = vcombine.low %v10597_v32, %v10615_v56  ;;  %v16246_v30 = vcombine.low %v10821_v8, %v10825_v29  ;;  %v11171_v62 = vshll.u32 %v11151_v37, 16  ;;  %v24039_v56 = vld [vmem:[#allocation2 + $0x14] sm:$0x1]  ;;  %v24069_v37 = vld [vmem:[#allocation2 + $0x24] sm:$0x1] }
 0x520   : > { %v11170_v44 = vrot.slane %v11168_v24, 4  ;;  %v11215_v3 = vrot.slane %v11213_v13, 5  ;;  %v11243_v59 = vrot.slane %v11241_v7, 5  ;;  %v11198_v17 = vrot.slane %v11196_v57, 4  ;;  %v19352_v8 = vld [vmem:[%s24922_s3 + $0x2f0] sm:$0xff]  }
 0x521   : > { %v10801_v40 = vsel %vm19802_vm8, %v16220_v36, %v10800_v52  ;;  %v19344_v52 = vld [vmem:[%s24922_s3 + $0x2c0] sm:$0xff]   ;;  %v11173_v0 = vrot.slane %v11171_v62, 5  ;;  %v24072_v24 = vld [vmem:[#allocation2 + $0x34] sm:$0x1] }
 0x522   : > { %18340 = vmatpush3.bf16.msra.mxu1 %v19325_v48  ;;  %v16243_v34 = vcombine.low %v10797_v42, %v10801_v40  ;;  %v19333_v48 = vld [vmem:[%s24922_s3 + $0x278] sm:$0xff]   ;;  %v19343_v42 = vld [vmem:[#allocation2 + $0x20] ss:$8 sps:$4 sm:$0xff]  }
 0x523   : > { %18349 = vmatprep.subr.bf16.mxu1 %v19326_v19  ;;  %v19346_v40 = vld [vmem:[%s24922_s3 + $0x2c8] sm:$0xff]   ;;  %v11174_v32 = vor.u32 %v11173_v0, %v11170_v44  ;;  %v11205_v0 = vshll.u32 %v24069_v37, 16 }
 0x525   : > { %18342 = vmatmul.mubr.bf16.vlgmr.msra.gmra.mrb[0].mxu1 %v16208_v27  ;;  %v19341_v27 = vld [vmem:[%s24922_s3 + $0x2b0] sm:$0xff]  }
 0x526   : > { %18345 = vmatprep.mubr.bf16.mxu1 %v16209_v55  ;;  %18350 = vmatpush3.bf16.msra.mxu1 %v19326_v19  ;;  %v16245_v19 = vcombine.low %v10813_v25, %v10817_v11  ;;  %v11185_v55 = vshll.u32 %v11153_v4, 16  ;;  %v11238_v25 = vshrl.u32 %v11161_v15, 16  ;;  %v19351_v11 = vld [vmem:[%s24922_s3 + $0x2e8] sm:$0xff]   ;;  %v24089_v15 = vld [vmem:[#allocation2 + $0x44] sm:$0x1] }
 0x527   : > { %18351 = vmatprep.subr.bf16.mxu1 %v19327_v14  ;;  %v11261_v57 = vshll.u32 %v24089_v15, 16 }
 0x528   : > { %v11187_v18 = vrot.slane %v11185_v55, 5  ;;  %v11240_v5 = vrot.slane %v11238_v25, 4  ;;  %v19355_v25 = vld [vmem:[%s24922_s3 + $0x308] sm:$0xff]  }
 0x52a   : > { %18352 = vmatpush3.bf16.msra.mxu1 %v19327_v14  ;;  %v11182_v14 = vshrl.u32 %v11153_v4, 16  ;;  %v11266_v4 = vshrl.u32 %v11165_v54, 16 }
 0x52b   : > { %18353 = vmatprep.subr.bf16.mxu1 %v19328_v41 }
 0x52c   : > { %v11184_v53 = vrot.slane %v11182_v14, 4  ;;  %v11244_v14 = vor.u32 %v11243_v59, %v11240_v5  ;;  %v19356_v5 = vld [vmem:[%s24922_s3 + $0x310] sm:$0xff]   ;;  %v11459_v59 = vrot.slane %v24039_v56, 5 }
 0x52d   : > { %18346 = vmatmul.mubr.bf16.gmra.mrb[4].mxu1 %v16210_v1 }
 0x52e   : > { %18354 = vmatpush3.bf16.msra.mxu1 %v19328_v41  ;;  %18365 = vmatprep.mubr.bf16.mxu1 %v16243_v34  ;;  %v24037_v41 = vld [vmem:[#allocation2 + $0x1c] sm:$0x1]  ;;  %v11188_v36 = vor.u32 %v11187_v18, %v11184_v53  ;;  %v11177_v34 = vshll.u32 %v24039_v56, 16 }
 0x52f   : > { %18355 = vmatprep.subr.bf16.mxu1 %v19329_v43  ;;  %v11191_v1 = vshll.u32 %v24037_v41, 16  ;;  %v19353_v18 = vld [vmem:[%s24922_s3 + $0x2f8] sm:$0xff]  }
 0x530   : > { %v11179_v6 = vrot.slane %v11177_v34, 5  ;;  %v19357_v56 = vld [vmem:[%s24922_s3 + $0x318] sm:$0xff]  }
 0x532   : > { %18356 = vmatpush3.bf16.msra.mxu1 %v19329_v43  ;;  %v19345_v43 = vld [vmem:[#allocation2 + $0x30] ss:$8 sps:$4 sm:$0xff]  }
 0x533   : > { %18357 = vmatprep.subr.bf16.mxu1 %v19330_v63 }
 0x536   : > { %18358 = vmatpush3.bf16.msra.mxu1 %v19330_v63  ;;  %v11189_v63 = vrot.slane %v11188_v36, 4 }
 0x537   : > { %18359 = vmatprep.subr.bf16.mxu1 %v19331_v28 }
 0x53a   : > { %18360 = vmatpush3.bf16.msra.mxu1 %v19331_v28  ;;  %v19348_v28 = vld [vmem:[%s24922_s3 + $0x2d0] sm:$0xff]  }
 0x53b   : > { %18361 = vmatprep.subr.bf16.mxu1 %v19332_v21 }
 0x53e   : > { %18362 = vmatpush3.bf16.msra.mxu1 %v19332_v21  ;;  %v11175_v21 = vrot.slane %v11174_v32, 4  ;;  %v11233_v32 = vshll.u32 %v24072_v24, 16 }
 0x53f   : > { %18363 = vmatprep.subr.bf16.mxu1 %v19333_v48 }
 0x540   : > { %v11180_v51 = vsel %vm23384_vm1, %v11175_v21, %v11179_v6  ;;  %v19354_v21 = vld [vmem:[%s24922_s3 + $0x300] sm:$0xff]  }
 0x542   : > { %18364 = vmatpush3.bf16.msra.mxu1 %v19333_v48  ;;  %v11193_v48 = vrot.slane %v11191_v1, 5  ;;  %v11245_v1 = vrot.slane %v11244_v14, 4  ;;  %v19360_v14 = vld [vmem:[%s24922_s3 + $0x330] sm:$0xff]  }
 0x543   : > { %18373 = vmatprep.subr.bf16.mxu1 %v19334_v2 }
 0x544   : > { %v11194_v16 = vsel %vm23384_vm1, %v11189_v63, %v11193_v48 }
 0x545   : > { %18366 = vmatmul.mubr.bf16.vlgmr.msra.gmra.mrb[0].mxu1 %v16244_v12  ;;  %v16299_v31 = vcombine.low %v11180_v51, %v11194_v16  ;;  %v11199_v12 = vshll.u32 %v11155_v10, 16  ;;  %v24083_v16 = vld [vmem:[#allocation2 + $0x4c] sm:$0x1] }
 0x546   : > { %18369 = vmatprep.mubr.bf16.mxu1 %v16245_v19  ;;  %18374 = vmatpush3.bf16.msra.mxu1 %v19334_v2  ;;  %v19350_v2 = vld [vmem:[%s24922_s3 + $0x2e0] sm:$0xff]   ;;  %v11212_v19 = vrot.slane %v11210_v39, 4  ;;  %v11275_v39 = vshll.u32 %v24083_v16, 16 }
 0x547   : > { %18375 = vmatprep.subr.bf16.mxu1 %v19335_v45  ;;  %v11201_v29 = vrot.slane %v11199_v12, 5 }
 0x549   : > { %v11202_v55 = vor.u32 %v11201_v29, %v11198_v17  ;;  %v11263_v17 = vrot.slane %v11261_v57, 5  ;;  %v19363_v57 = vld [vmem:[%s24922_s3 + $0x348] sm:$0xff]  }
 0x54a   : > { %18376 = vmatpush3.bf16.msra.mxu1 %v19335_v45  ;;  %v11224_v45 = vshrl.u32 %v11159_v61, 16 }
 0x54b   : > { %18377 = vmatprep.subr.bf16.mxu1 %v19336_v20 }
 0x54d   : > { %18370 = vmatmul.mubr.bf16.gmra.mrb[4].mxu1 %v16246_v30  ;;  %v11226_v30 = vrot.slane %v11224_v45, 4  ;;  %v11463_v45 = vrot.slane %v24037_v41, 5 }
 0x54e   : > { %18378 = vmatpush3.bf16.msra.mxu1 %v19336_v20  ;;  %18389 = vmatprep.mubr.bf16.mxu1 %v19337_v9  ;;  %v24062_v20 = vld [vmem:[#allocation2 + $0x2c] sm:$0x1]  ;;  %v11163_v9 = vld [vmem:[#allocation2 + $0x40] sm:$0xf] }
 0x54f   : > { %18379 = vmatprep.subr.bf16.mxu1 %v19338_v47  ;;  %v11252_v62 = vshrl.u32 %v11163_v9, 16  ;;  %v11255_v53 = vshll.u32 %v11163_v9, 16 }
 0x551   : > { %v11254_v63 = vrot.slane %v11252_v62, 4 }
 0x552   : > { %18380 = vmatpush3.bf16.msra.mxu1 %v19338_v47  ;;  %v11229_v47 = vrot.slane %v11227_v49, 5 }
 0x553   : > { %18381 = vmatprep.subr.bf16.mxu1 %v19339_v23 }
 0x556   : > { %18382 = vmatpush3.bf16.msra.mxu1 %v19339_v23  ;;  %v11216_v23 = vor.u32 %v11215_v3, %v11212_v19  ;;  %v11277_v19 = vrot.slane %v11275_v39, 5  ;;  %v11433_v3 = vld [vmem:[#allocation2 + $0x10] sm:$0xe] }
 0x557   : > { %18383 = vmatprep.subr.bf16.mxu1 %v19340_v60 }
 0x558   : > { %v11217_v36 = vrot.slane %v11216_v23, 4 }
 0x55a   : > { %18384 = vmatpush3.bf16.msra.mxu1 %v19340_v60  ;;  %v24067_v60 = vld [vmem:[#allocation2 + $0x3c] sm:$0x1] }
 0x55b   : > { %18385 = vmatprep.subr.bf16.mxu1 %v19341_v27  ;;  %v11247_v44 = vshll.u32 %v24067_v60, 16 }
 0x55d   : > { %v11249_v6 = vrot.slane %v11247_v44, 5  ;;  %v19361_v44 = vld [vmem:[%s24922_s3 + $0x338] sm:$0xff]  }
 0x55e   : > { %18386 = vmatpush3.bf16.msra.mxu1 %v19341_v27  ;;  %v11269_v27 = vshll.u32 %v11165_v54, 16 }
 0x55f   : > { %18387 = vmatprep.subr.bf16.mxu1 %v19342_v46  ;;  %v11250_v35 = vsel %vm23384_vm1, %v11245_v1, %v11249_v6  ;;  %v11479_v1 = vrot.slane %v24067_v60, 5  ;;  %v11475_v6 = vrot.slane %v24072_v24, 5 }
 0x562   : > { %18388 = vmatpush3.bf16.msra.mxu1 %v19342_v46  ;;  %v11219_v46 = vshll.u32 %v24062_v20, 16 }
 0x563   : > { %18397 = vmatprep.subr.bf16.mxu1 %v19344_v52 }
 0x564   : > { %v11221_v34 = vrot.slane %v11219_v46, 5 }
 0x565   : > { %18390 = vmatmul.mubr.bf16.vlgmr.msra.gmra.mrb[0].mxu1 %v19343_v42  ;;  %v11268_v42 = vrot.slane %v11266_v4, 4  ;;  %v19358_v4 = vld [vmem:[%s24922_s3 + $0x320] sm:$0xff]  }
 0x566   : > { %18393 = vmatprep.mubr.bf16.mxu1 %v19345_v43  ;;  %18398 = vmatpush3.bf16.msra.mxu1 %v19344_v52  ;;  %v11230_v52 = vor.u32 %v11229_v47, %v11226_v30  ;;  %v11203_v43 = vrot.slane %v11202_v55, 4  ;;  %v11222_v51 = vsel %vm23384_vm1, %v11217_v36, %v11221_v34  ;;  %v24125_v55 = vld [vmem:[#allocation2 + $0x28] sm:$0xe]  ;;  %v11652_v36 = vshrl.u32 %v11433_v3, 16 }
 0x567   : > { %18399 = vmatprep.subr.bf16.mxu1 %v19346_v40 }
 0x568   : > { %v11231_v48 = vrot.slane %v11230_v52, 4  ;;  %v24130_v52 = vld [vmem:[#allocation2 + $0x1c] sm:$0x3] }
 0x56a   : > { %18400 = vmatpush3.bf16.msra.mxu1 %v19346_v40  ;;  %v11271_v40 = vrot.slane %v11269_v27, 5  ;;  %v19359_v27 = vld [vmem:[%s24922_s3 + $0x328] sm:$0xff]  }
 0x56b   : > { %18401 = vmatprep.subr.bf16.mxu1 %v19348_v28 }
 0x56d   : > { %18394 = vmatmul.mubr.bf16.gmra.mrb[4].mxu1 %v19347_v22  ;;  %v11207_v22 = vrot.slane %v11205_v0, 5  ;;  %v24135_v0 = vld [vmem:[#allocation2 + $0x38] sm:$0xe] }
 0x56e   : > { %18402 = vmatpush3.bf16.msra.mxu1 %v19348_v28  ;;  %18413 = vmatprep.mubr.bf16.mxu1 %v16299_v31  ;;  %v11257_v28 = vrot.slane %v11255_v53, 5  ;;  %v11235_v31 = vrot.slane %v11233_v32, 5  ;;  %v24127_v53 = vld [vmem:[#allocation2 + $0x20] sm:$0xe]  ;;  %v16314_v32 = vrot.slane %v24125_v55, 9  ;;  %v16316_v60 = vrot.slane %v24135_v0, 9 }
 0x56f   : > { %18403 = vmatprep.subr.bf16.mxu1 %v19349_v38 }
 0x570   : > { %v11258_v10 = vor.u32 %v11257_v28, %v11254_v63  ;;  %v11236_v61 = vsel %vm23384_vm1, %v11231_v48, %v11235_v31  ;;  %v11679_v28 = vshrl.u32 %v24130_v52, 16  ;;  %v16313_v48 = vrot.slane %v24127_v53, 9 }
 0x571   : > { %v16301_v7 = vcombine.low %v11236_v61, %v11250_v35  ;;  %v11480_v24 = vsel %vm19744_vm7, %v16316_v60, %v11479_v1 }
 0x572   : > { %18404 = vmatpush3.bf16.msra.mxu1 %v19349_v38  ;;  %v11272_v38 = vor.u32 %v11271_v40, %v11268_v42  ;;  %v11259_v49 = vrot.slane %v11258_v10, 4  ;;  %v11655_v42 = vshll.u32 %v11433_v3, 16  ;;  %v11467_v40 = vrot.slane %v24069_v37, 5 }
 0x573   : > { %18405 = vmatprep.subr.bf16.mxu1 %v19350_v2 }
 0x574   : > { %v11273_v12 = vrot.slane %v11272_v38, 4  ;;  %v11264_v30 = vsel %vm23384_vm1, %v11259_v49, %v11263_v17  ;;  %v11657_v38 = vrot.slane %v11655_v42, 6  ;;  %v11483_v17 = vrot.slane %v24089_v15, 5  ;;  %v24197_v42 = vld [vmem:[#allocation2 + $0x24] sm:$0x3] }
 0x575   : > { %v11700_v60 = vshll.u32 %v24197_v42, 16 }
 0x576   : > { %18406 = vmatpush3.bf16.msra.mxu1 %v19350_v2  ;;  %v11208_v2 = vsel %vm23384_vm1, %v11203_v43, %v11207_v22  ;;  %v11278_v29 = vsel %vm23384_vm1, %v11273_v12, %v11277_v19  ;;  %v24140_v43 = vld [vmem:[#allocation2 + $0x14] sm:$0x3]  ;;  %v19362_v22 = vld [vmem:[%s24922_s3 + $0x340] sm:$0xff]   ;;  %v24166_v12 = vld [vmem:[#allocation2 + $0x48] sm:$0xe] }
 0x577   : > { %18407 = vmatprep.subr.bf16.mxu1 %v19351_v11  ;;  %v16300_v13 = vcombine.low %v11208_v2, %v11222_v51  ;;  %v16302_v47 = vcombine.low %v11264_v30, %v11278_v29  ;;  %v11654_v51 = vrot.slane %v11652_v36, 5  ;;  %v11661_v31 = vshrl.u32 %v24140_v43, 16 }
 0x578   : > { %v11664_v35 = vshll.u32 %v24140_v43, 16  ;;  %v11468_v2 = vsel %vm19744_vm7, %v16313_v48, %v11467_v40  ;;  %v16318_v29 = vrot.slane %v24166_v12, 9  ;;  %v11691_v36 = vshll.u32 %v24127_v53, 16 }
 0x579   : > { %v11742_v40 = vshrl.u32 %v24135_v0, 16 }
 0x57a   : > { %18408 = vmatpush3.bf16.msra.mxu1 %v19351_v11  ;;  %v11434_v11 = vld [vmem:[#allocation2 + $0x18] sm:$0xe]  ;;  %v11666_v49 = vrot.slane %v11664_v35, 6 }
 0x57b   : > { %18409 = vmatprep.subr.bf16.mxu1 %v19352_v8  ;;  %v16312_v54 = vrot.slane %v11434_v11, 9  ;;  %v11670_v46 = vshrl.u32 %v11434_v11, 16  ;;  %v11673_v62 = vshll.u32 %v11434_v11, 16  ;;  %v11658_v11 = vor.u32 %v11657_v38, %v11654_v51 }
 0x57c   : > { %v11744_v51 = vrot.slane %v11742_v40, 5 }
 0x57d   : > { %v11464_v41 = vsel %vm19744_vm7, %v16312_v54, %v11463_v45  ;;  %v11672_v34 = vrot.slane %v11670_v46, 5  ;;  %v11675_v63 = vrot.slane %v11673_v62, 6  ;;  %v11663_v45 = vrot.slane %v11661_v31, 5  ;;  %v19366_v62 = vld [vmem:[%s24922_s3 + $0x360] sm:$0xff]  }
 0x57e   : > { %18410 = vmatpush3.bf16.msra.mxu1 %v19352_v8  ;;  %v16311_v8 = vrot.slane %v11433_v3, 9  ;;  %v11487_v3 = vrot.slane %v24083_v16, 5  ;;  %v11709_v46 = vshll.u32 %v24125_v55, 16 }
 0x57f   : > { %18411 = vmatprep.subr.bf16.mxu1 %v19353_v18  ;;  %v11676_v39 = vor.u32 %v11675_v63, %v11672_v34  ;;  %v11667_v30 = vor.u32 %v11666_v49, %v11663_v45  ;;  %v11781_v45 = vshll.u32 %v24166_v12, 16  ;;  %v11702_v49 = vrot.slane %v11700_v60, 6 }
 0x580   : > { %v11460_v9 = vsel %vm19744_vm7, %v16311_v8, %v11459_v59  ;;  %v19364_v8 = vld [vmem:[%s24922_s3 + $0x350] sm:$0xff]  }
 0x581   : > { %v16335_v23 = vcombine.low %v11460_v9, %v11464_v41  ;;  %v11677_v59 = vrot.slane %v11676_v39, 4  ;;  %v11659_v41 = vrot.slane %v11658_v11, 4  ;;  %v11778_v11 = vshrl.u32 %v24166_v12, 16 }
 0x582   : > { %18412 = vmatpush3.bf16.msra.mxu1 %v19353_v18  ;;  %v11471_v18 = vrot.slane %v24062_v20, 5  ;;  %v24142_v20 = vld [vmem:[#allocation2 + $0x30] sm:$0xe] }
 0x583   : > { %18421 = vmatprep.subr.bf16.mxu1 %v19354_v21  ;;  %v16315_v10 = vrot.slane %v24142_v20, 9  ;;  %v11727_v48 = vshll.u32 %v24142_v20, 16 }
 0x584   : > { %v11472_v37 = vsel %vm19744_vm7, %v16314_v32, %v11471_v18  ;;  %v24193_v18 = vld [vmem:[#allocation2 + $0x2c] sm:$0x3]  ;;  %v11745_v32 = vshll.u32 %v24135_v0, 16  ;;  %v11693_v0 = vrot.slane %v11691_v36, 6 }
 0x585   : > { %18414 = vmatmul.mubr.bf16.vlgmr.msra.gmra.mrb[0].mxu1 %v16300_v13  ;;  %v11681_v13 = vrot.slane %v11679_v28, 5  ;;  %v11715_v34 = vshrl.u32 %v24193_v18, 16  ;;  %v11718_v63 = vshll.u32 %v24193_v18, 16  ;;  %v24203_v28 = vld [vmem:[#allocation2 + $0x3c] sm:$0x3] }
 0x586   : > { %18417 = vmatprep.mubr.bf16.mxu1 %v16301_v7  ;;  %18422 = vmatpush3.bf16.msra.mxu1 %v19354_v21  ;;  %v11682_v21 = vshll.u32 %v24130_v52, 16  ;;  %v11476_v7 = vsel %vm19744_vm7, %v16315_v10, %v11475_v6  ;;  %v11697_v6 = vshrl.u32 %v24197_v42, 16  ;;  %v11747_v38 = vrot.slane %v11745_v32, 6  ;;  %v19370_v32 = vld [vmem:[%s24922_s3 + $0x380] sm:$0xff]  }
 0x587   : > { %18423 = vmatprep.subr.bf16.mxu1 %v19355_v25  ;;  %v16337_v19 = vcombine.low %v11476_v7, %v11480_v24  ;;  %v11751_v31 = vshrl.u32 %v24203_v28, 16  ;;  %v11754_v35 = vshll.u32 %v24203_v28, 16  ;;  %v11717_v10 = vrot.slane %v11715_v34, 5 }
 0x588   : > { %v11684_v61 = vrot.slane %v11682_v21, 6  ;;  %v11724_v21 = vshrl.u32 %v24142_v20, 16  ;;  %v11720_v24 = vrot.slane %v11718_v63, 6  ;;  %v19368_v20 = vld [vmem:[%s24922_s3 + $0x370] sm:$0xff]  }
 0x58a   : > { %18424 = vmatpush3.bf16.msra.mxu1 %v19355_v25  ;;  %v16336_v25 = vcombine.low %v11468_v2, %v11472_v37  ;;  %v11685_v54 = vor.u32 %v11684_v61, %v11681_v13  ;;  %v11726_v39 = vrot.slane %v11724_v21, 5  ;;  %v11729_v13 = vrot.slane %v11727_v48, 6 }
 0x58b   : > { %18425 = vmatprep.subr.bf16.mxu1 %v19356_v5 }
 0x58c   : > { %v11686_v9 = vsel %vm19599_vm2, %v11677_v59, %v11685_v54  ;;  %v11756_v59 = vrot.slane %v11754_v35, 6  ;;  %v24223_v54 = vld [vmem:[#allocation2 + $0x4c] sm:$0x3] }
 0x58d   : > { %18418 = vmatmul.mubr.bf16.gmra.mrb[4].mxu1 %v16302_v47  ;;  %v11488_v47 = vsel %vm19744_vm7, %v16318_v29, %v11487_v3  ;;  %v11753_v3 = vrot.slane %v11751_v31, 5  ;;  %v19371_v31 = vld [vmem:[%s24922_s3 + $0x388] sm:$0xff]  }
 0x58e   : > { %18426 = vmatpush3.bf16.msra.mxu1 %v19356_v5  ;;  %18437 = vmatprep.mubr.bf16.mxu1 %v16335_v23  ;;  %v24169_v5 = vld [vmem:[#allocation2 + $0x40] sm:$0xe]  ;;  %v11668_v23 = vsel %vm19599_vm2, %v11659_v41, %v11667_v30  ;;  %v19369_v41 = vld [vmem:[%s24922_s3 + $0x378] sm:$0xff]  }
 0x58f   : > { %18427 = vmatprep.subr.bf16.mxu1 %v19357_v56  ;;  %v16317_v16 = vrot.slane %v24169_v5, 9  ;;  %v11760_v29 = vshrl.u32 %v24169_v5, 16 }
 0x591   : > { %v11484_v15 = vsel %vm19744_vm7, %v16317_v16, %v11483_v17  ;;  %v11721_v17 = vor.u32 %v11720_v24, %v11717_v10  ;;  %v11730_v16 = vor.u32 %v11729_v13, %v11726_v39  ;;  %v11950_v24 = vld [vmem:[#allocation2 + $0x18] sm:$0xc] }
 0x592   : > { %18428 = vmatpush3.bf16.msra.mxu1 %v19357_v56  ;;  %v16338_v56 = vcombine.low %v11484_v15, %v11488_v47  ;;  %v11780_v15 = vrot.slane %v11778_v11, 5 }
 0x593   : > { %18429 = vmatprep.subr.bf16.mxu1 %v19358_v4 }
 0x596   : > { %18430 = vmatpush3.bf16.msra.mxu1 %v19358_v4  ;;  %v19365_v4 = vld [vmem:[%s24922_s3 + $0x358] sm:$0xff]  }
 0x597   : > { %18431 = vmatprep.subr.bf16.mxu1 %v19359_v27 }
 0x59a   : > { %18432 = vmatpush3.bf16.msra.mxu1 %v19359_v27  ;;  %v16363_v27 = vcombine.low %v11668_v23, %v11686_v9  ;;  %v24230_v9 = vld [vmem:[#allocation2 + $0x44] sm:$0x3]  ;;  %v11787_v23 = vshrl.u32 %v24223_v54, 16 }
 0x59b   : > { %18433 = vmatprep.subr.bf16.mxu1 %v19360_v14  ;;  %v11769_v36 = vshrl.u32 %v24230_v9, 16  ;;  %v11772_v40 = vshll.u32 %v24230_v9, 16 }
 0x59d   : > { %v11774_v60 = vrot.slane %v11772_v40, 6  ;;  %v11956_v40 = vld [vmem:[#allocation2 + $0x48] sm:$0xc] }
 0x59e   : > { %18434 = vmatpush3.bf16.msra.mxu1 %v19360_v14  ;;  %v11706_v14 = vshrl.u32 %v24125_v55, 16  ;;  %v11711_v55 = vrot.slane %v11709_v46, 6  ;;  %v11757_v46 = vor.u32 %v11756_v59, %v11753_v3 }
 0x59f   : > { %18435 = vmatprep.subr.bf16.mxu1 %v19361_v44 }
 0x5a0   : > { %v11708_v1 = vrot.slane %v11706_v14, 5 }
 0x5a2   : > { %18436 = vmatpush3.bf16.msra.mxu1 %v19361_v44  ;;  %v11688_v44 = vshrl.u32 %v24127_v53, 16  ;;  %v19367_v53 = vld [vmem:[%s24922_s3 + $0x368] sm:$0xff]   ;;  %v11712_v2 = vor.u32 %v11711_v55, %v11708_v1  ;;  %v11731_v1 = vrot.slane %v11730_v16, 4  ;;  %v11987_v16 = vrot.slane %v24193_v18, 6 }
 0x5a3   : > { %18445 = vmatprep.subr.bf16.mxu1 %v19362_v22 }
 0x5a4   : > { %v11690_v37 = vrot.slane %v11688_v44, 5  ;;  %v11713_v30 = vrot.slane %v11712_v2, 4 }
 0x5a5   : > { %18438 = vmatmul.mubr.bf16.vlgmr.msra.gmra.mrb[0].mxu1 %v16336_v25 }
 0x5a6   : > { %18441 = vmatprep.mubr.bf16.mxu1 %v16337_v19  ;;  %18446 = vmatpush3.bf16.msra.mxu1 %v19362_v22  ;;  %v24212_v22 = vld [vmem:[#allocation2 + $0x34] sm:$0x3]  ;;  %v11694_v7 = vor.u32 %v11693_v0, %v11690_v37  ;;  %v11748_v19 = vor.u32 %v11747_v38, %v11744_v51  ;;  %v11722_v34 = vsel %vm19599_vm2, %v11713_v30, %v11721_v17  ;;  %v19374_v17 = vld [vmem:[%s24922_s3 + $0x3a0] sm:$0xff]   ;;  %v11952_v30 = vld [vmem:[#allocation2 + $0x28] sm:$0xc] }
 0x5a7   : > { %18447 = vmatprep.subr.bf16.mxu1 %v19363_v57  ;;  %v11733_v61 = vshrl.u32 %v24212_v22, 16  ;;  %v11736_v25 = vshll.u32 %v24212_v22, 16 }
 0x5a9   : > { %v11735_v12 = vrot.slane %v11733_v61, 5  ;;  %v11738_v47 = vrot.slane %v11736_v25, 6  ;;  %v11949_v61 = vld [vmem:[#allocation2 + $0x10] sm:$0xc] }
 0x5aa   : > { %18448 = vmatpush3.bf16.msra.mxu1 %v19363_v57  ;;  %v11699_v57 = vrot.slane %v11697_v6, 5  ;;  %v11771_v6 = vrot.slane %v11769_v36, 5  ;;  %v19372_v25 = vld [vmem:[%s24922_s3 + $0x390] sm:$0xff]  }
 0x5ab   : > { %18449 = vmatprep.subr.bf16.mxu1 %v19364_v8  ;;  %v11739_v55 = vor.u32 %v11738_v47, %v11735_v12  ;;  %v11954_v12 = vld [vmem:[#allocation2 + $0x38] sm:$0xc]  ;;  %v11951_v47 = vld [vmem:[#allocation2 + $0x20] sm:$0xc] }
 0x5ac   : > { %v11703_v14 = vor.u32 %v11702_v49, %v11699_v57  ;;  %v11775_v13 = vor.u32 %v11774_v60, %v11771_v6  ;;  %v16376_v57 = vrot.slane %v11950_v24, 10  ;;  %v19383_v6 = vld [vmem:[%s24922_s3 + $0x3e0] sm:$0xff]   ;;  %v19384_v60 = vld [vmem:[%s24922_s3 + $0x3e8] sm:$0xff]  }
 0x5ad   : > { %18442 = vmatmul.mubr.bf16.gmra.mrb[4].mxu1 %v16338_v56  ;;  %v11783_v56 = vrot.slane %v11781_v45, 6  ;;  %v11740_v38 = vsel %vm19599_vm2, %v11731_v1, %v11739_v55  ;;  %v16375_v45 = vrot.slane %v11949_v61, 10  ;;  %v12003_v1 = vrot.slane %v24223_v54, 6  ;;  %v11955_v55 = vld [vmem:[#allocation2 + $0x40] sm:$0xc] }
 0x5ae   : > { %18450 = vmatpush3.bf16.msra.mxu1 %v19364_v8  ;;  %18461 = vmatprep.mubr.bf16.mxu1 %v16363_v27  ;;  %v11763_v8 = vshll.u32 %v24169_v5, 16  ;;  %v11695_v27 = vrot.slane %v11694_v7, 4  ;;  %v11749_v5 = vrot.slane %v11748_v19, 4  ;;  %v11975_v7 = vrot.slane %v24140_v43, 6  ;;  %v19373_v43 = vld [vmem:[%s24922_s3 + $0x398] sm:$0xff]   ;;  %v19388_v61 = vld [vmem:[%s24922_s3 + $0x400] sm:$0xff]  }
 0x5af   : > { %18451 = vmatprep.subr.bf16.mxu1 %v19365_v4  ;;  %v11784_v63 = vor.u32 %v11783_v56, %v11780_v15  ;;  %v11995_v15 = vrot.slane %v24203_v28, 6  ;;  %v11983_v56 = vrot.slane %v24197_v42, 6 }
 0x5b0   : > { %v11765_v44 = vrot.slane %v11763_v8, 6  ;;  %v11758_v48 = vsel %vm19599_vm2, %v11749_v5, %v11757_v46  ;;  %v11704_v37 = vsel %vm19599_vm2, %v11695_v27, %v11703_v14  ;;  %v11976_v3 = vsel %vm19802_vm8, %v16375_v45, %v11975_v7  ;;  %v19376_v8 = vld [vmem:[%s24922_s3 + $0x3b0] sm:$0xff]   ;;  %v19378_v27 = vld [vmem:[%s24922_s3 + $0x3c0] sm:$0xff]   ;;  %v24325_v45 = vld [vmem:[#allocation2 + $0x1c] sm:$0x1] }
 0x5b1   : > { %v16364_v51 = vcombine.low %v11704_v37, %v11722_v34  ;;  %v16365_v35 = vcombine.low %v11740_v38, %v11758_v48  ;;  %v11785_v2 = vrot.slane %v11784_v63, 4  ;;  %v11991_v14 = vrot.slane %v24212_v22, 6  ;;  %v19379_v22 = vld [vmem:[%s24922_s3 + $0x3c8] sm:$0xff]   ;;  %v19385_v38 = vld [vmem:[%s24922_s3 + $0x3f0] sm:$0xff]  }
 0x5b2   : > { %18452 = vmatpush3.bf16.msra.mxu1 %v19365_v4  ;;  %v11790_v4 = vshll.u32 %v24223_v54, 16  ;;  %v16380_v5 = vrot.slane %v11954_v12, 10  ;;  %v16377_v46 = vrot.slane %v11951_v47, 10  ;;  %v11999_v34 = vrot.slane %v24230_v9, 6  ;;  %v19382_v9 = vld [vmem:[%s24922_s3 + $0x3d8] sm:$0xff]  }
 0x5b3   : > { %18453 = vmatprep.subr.bf16.mxu1 %v19366_v62  ;;  %v16382_v63 = vrot.slane %v11956_v40, 10  ;;  %v19391_v12 = vld [vmem:[#allocation2 + $0x48] ss:$8 sps:$4 sm:$0xff]  }
 0x5b4   : > { %v11792_v21 = vrot.slane %v11790_v4, 6  ;;  %v11953_v4 = vld [vmem:[#allocation2 + $0x30] sm:$0xc]  ;;  %v11996_v28 = vsel %vm19802_vm8, %v16380_v5, %v11995_v15  ;;  %v11984_v42 = vsel %vm19802_vm8, %v16377_v46, %v11983_v56  ;;  %v19393_v15 = vld [vmem:[%s24922_s3 + $0x418] sm:$0xff]  }
 0x5b5   : > { %v12004_v48 = vsel %vm19802_vm8, %v16382_v63, %v12003_v1  ;;  %v12342_v63 = vld [vmem:[#allocation2 + $0x48] sm:$0xf] }
 0x5b6   : > { %18454 = vmatpush3.bf16.msra.mxu1 %v19366_v62  ;;  %v11762_v62 = vrot.slane %v11760_v29, 5  ;;  %v19375_v29 = vld [vmem:[%s24922_s3 + $0x3a8] sm:$0xff]  }
 0x5b7   : > { %18455 = vmatprep.subr.bf16.mxu1 %v19367_v53 }
 0x5b8   : > { %v11766_v0 = vor.u32 %v11765_v44, %v11762_v62  ;;  %v16379_v62 = vrot.slane %v11953_v4, 10  ;;  %v12340_v4 = vld [vmem:[#allocation2 + $0x40] sm:$0xf] }
 0x5ba   : > { %18456 = vmatpush3.bf16.msra.mxu1 %v19367_v53  ;;  %v11789_v53 = vrot.slane %v11787_v23, 5  ;;  %v11767_v39 = vrot.slane %v11766_v0, 4  ;;  %v16378_v23 = vrot.slane %v11952_v30, 10  ;;  %v11992_v36 = vsel %vm19802_vm8, %v16379_v62, %v11991_v14  ;;  %v19381_v0 = vld [vmem:[#allocation2 + $0x18] ss:$8 sps:$4 sm:$0xff]  }
 0x5bb   : > { %18457 = vmatprep.subr.bf16.mxu1 %v19368_v20  ;;  %v12336_v14 = vld [vmem:[#allocation2 + $0x30] sm:$0xf]  ;;  %v12417_v62 = vshrl.u32 %v12340_v4, 16 }
 0x5bc   : > { %v11793_v10 = vor.u32 %v11792_v21, %v11789_v53  ;;  %v11776_v49 = vsel %vm19599_vm2, %v11767_v39, %v11775_v13  ;;  %v11988_v18 = vsel %vm19802_vm8, %v16378_v23, %v11987_v16  ;;  %v19380_v53 = vld [vmem:[%s24922_s3 + $0x3d0] sm:$0xff]   ;;  %v16381_v21 = vrot.slane %v11955_v55, 10  ;;  %v12334_v23 = vld [vmem:[#allocation2 + $0x28] sm:$0xf] }
 0x5bd   : > { %v16400_v44 = vcombine.low %v11984_v42, %v11988_v18  ;;  %v12375_v5 = vshrl.u32 %v12334_v23, 16  ;;  %v12378_v46 = vshll.u32 %v12334_v23, 16  ;;  %v12338_v18 = vld [vmem:[#allocation2 + $0x38] sm:$0xf]  ;;  %v12389_v42 = vshrl.u32 %v12336_v14, 16 }
 0x5be   : > { %18458 = vmatpush3.bf16.msra.mxu1 %v19368_v20  ;;  %v11979_v20 = vrot.slane %v24130_v52, 6  ;;  %v11794_v11 = vsel %vm19599_vm2, %v11785_v2, %v11793_v10  ;;  %v12000_v54 = vsel %vm19802_vm8, %v16381_v21, %v11999_v34  ;;  %v19386_v10 = vld [vmem:[%s24922_s3 + $0x3f8] sm:$0xff]   ;;  %v12406_v1 = vshll.u32 %v12338_v18, 16  ;;  %v24348_v21 = vld [vmem:[#allocation2 + $0x2c] sm:$0x1] }
 0x5bf   : > { %18459 = vmatprep.subr.bf16.mxu1 %v19369_v41  ;;  %v16366_v19 = vcombine.low %v11776_v49, %v11794_v11  ;;  %v16402_v37 = vcombine.low %v12000_v54, %v12004_v48  ;;  %v19390_v49 = vld [vmem:[%s24922_s3 + $0x408] sm:$0xff]   ;;  %v12380_v40 = vrot.slane %v12378_v46, 5  ;;  %v12419_v55 = vrot.slane %v12417_v62, 4 }
 0x5c0   : > { %v11980_v52 = vsel %vm19802_vm8, %v16376_v57, %v11979_v20  ;;  %v24323_v57 = vld [vmem:[#allocation2 + $0x24] sm:$0x1]  ;;  %v12391_v48 = vrot.slane %v12389_v42, 4 }
 0x5c1   : > { %v16399_v59 = vcombine.low %v11976_v3, %v11980_v52  ;;  %v19387_v52 = vld [vmem:[#allocation2 + $0x28] ss:$8 sps:$4 sm:$0xff]   ;;  %v12370_v3 = vshll.u32 %v24323_v57, 16 }
 0x5c2   : > { %18460 = vmatpush3.bf16.msra.mxu1 %v19369_v41  ;;  %v19377_v41 = vld [vmem:[%s24922_s3 + $0x3b8] sm:$0xff]  }
 0x5c3   : > { %18469 = vmatprep.subr.bf16.mxu1 %v19370_v32 }
 0x5c5   : > { %18462 = vmatmul.mubr.bf16.vlgmr.msra.gmra.mrb[0].mxu1 %v16364_v51  ;;  %v12332_v51 = vld [vmem:[#allocation2 + $0x20] sm:$0xf] }
 0x5c6   : > { %18465 = vmatprep.mubr.bf16.mxu1 %v16365_v35  ;;  %18470 = vmatpush3.bf16.msra.mxu1 %v19370_v32  ;;  %v16401_v32 = vcombine.low %v11992_v36, %v11996_v28  ;;  %v12361_v35 = vshrl.u32 %v12332_v51, 16  ;;  %v12364_v2 = vshll.u32 %v12332_v51, 16  ;;  %v12420_v28 = vshll.u32 %v12340_v4, 16  ;;  %v19395_v36 = vld [vmem:[%s24922_s3 + $0x428] sm:$0xff]   ;;  %v24355_v51 = vld [vmem:[#allocation2 + $0x44] sm:$0x1] }
 0x5c7   : > { %18471 = vmatprep.subr.bf16.mxu1 %v19371_v31 }
 0x5c8   : > { %v12363_v39 = vrot.slane %v12361_v35, 4  ;;  %v12366_v13 = vrot.slane %v12364_v2, 5  ;;  %v12422_v34 = vrot.slane %v12420_v28, 5  ;;  %v19399_v28 = vld [vmem:[%s24922_s3 + $0x448] sm:$0xff]  }
 0x5ca   : > { %18472 = vmatpush3.bf16.msra.mxu1 %v19371_v31  ;;  %v12330_v31 = vld [vmem:[#allocation2 + $0x18] sm:$0xf]  ;;  %v12367_v11 = vor.u32 %v12366_v13, %v12363_v39  ;;  %v24358_v39 = vld [vmem:[#allocation2 + $0x3c] sm:$0x1] }
 0x5cb   : > { %18473 = vmatprep.subr.bf16.mxu1 %v19372_v25  ;;  %v12347_v24 = vshrl.u32 %v12330_v31, 16  ;;  %v12350_v20 = vshll.u32 %v12330_v31, 16  ;;  %v12434_v31 = vshll.u32 %v12342_v63, 16  ;;  %v19397_v13 = vld [vmem:[%s24922_s3 + $0x438] sm:$0xff]  }
 0x5cd   : > { %18466 = vmatmul.mubr.bf16.gmra.mrb[4].mxu1 %v16366_v19  ;;  %v12352_v7 = vrot.slane %v12350_v20, 5 }
 0x5ce   : > { %18474 = vmatpush3.bf16.msra.mxu1 %v19372_v25  ;;  %18485 = vmatprep.mubr.bf16.mxu1 %v16399_v59  ;;  %v12349_v25 = vrot.slane %v12347_v24, 4  ;;  %v12356_v59 = vshll.u32 %v24325_v45, 16  ;;  %v12384_v24 = vshll.u32 %v24348_v21, 16 }
 0x5cf   : > { %18475 = vmatprep.subr.bf16.mxu1 %v19373_v43 }
 0x5d0   : > { %v12353_v19 = vor.u32 %v12352_v7, %v12349_v25  ;;  %v12358_v30 = vrot.slane %v12356_v59, 5 }
 0x5d2   : > { %18476 = vmatpush3.bf16.msra.mxu1 %v19373_v43  ;;  %v19389_v43 = vld [vmem:[#allocation2 + $0x38] ss:$8 sps:$4 sm:$0xff]  }
 0x5d3   : > { %18477 = vmatprep.subr.bf16.mxu1 %v19374_v17 }
 0x5d6   : > { %18478 = vmatpush3.bf16.msra.mxu1 %v19374_v17  ;;  %v12368_v17 = vrot.slane %v12367_v11, 4  ;;  %v12426_v11 = vshll.u32 %v24355_v51, 16 }
 0x5d7   : > { %18479 = vmatprep.subr.bf16.mxu1 %v19375_v29 }
 0x5da   : > { %18480 = vmatpush3.bf16.msra.mxu1 %v19375_v29  ;;  %v19392_v29 = vld [vmem:[%s24922_s3 + $0x410] sm:$0xff]  }
 0x5db   : > { %18481 = vmatprep.subr.bf16.mxu1 %v19376_v8 }
 0x5de   : > { %18482 = vmatpush3.bf16.msra.mxu1 %v19376_v8  ;;  %v12354_v8 = vrot.slane %v12353_v19, 4 }
 0x5df   : > { %18483 = vmatprep.subr.bf16.mxu1 %v19377_v41 }
 0x5e0   : > { %v12359_v47 = vsel %vm23384_vm1, %v12354_v8, %v12358_v30  ;;  %v24366_v8 = vld [vmem:[#allocation2 + $0x4c] sm:$0x1]  ;;  %v19398_v30 = vld [vmem:[%s24922_s3 + $0x440] sm:$0xff]  }
 0x5e1   : > { %v12440_v46 = vshll.u32 %v24366_v8, 16 }
 0x5e2   : > { %18484 = vmatpush3.bf16.msra.mxu1 %v19377_v41  ;;  %v12372_v41 = vrot.slane %v12370_v3, 5 }
 0x5e3   : > { %18493 = vmatprep.subr.bf16.mxu1 %v19378_v27 }
 0x5e4   : > { %v12373_v16 = vsel %vm23384_vm1, %v12368_v17, %v12372_v41  ;;  %v12386_v17 = vrot.slane %v12384_v24, 5 }
 0x5e5   : > { %18486 = vmatmul.mubr.bf16.vlgmr.msra.gmra.mrb[0].mxu1 %v16400_v44  ;;  %v16455_v56 = vcombine.low %v12359_v47, %v12373_v16  ;;  %v12392_v44 = vshll.u32 %v12336_v14, 16  ;;  %v24371_v47 = vld [vmem:[#allocation2 + $0x54] sm:$0x1] }
 0x5e6   : > { %18489 = vmatprep.mubr.bf16.mxu1 %v16401_v32  ;;  %18494 = vmatpush3.bf16.msra.mxu1 %v19378_v27  ;;  %v19394_v27 = vld [vmem:[%s24922_s3 + $0x420] sm:$0xff]   ;;  %v12403_v32 = vshrl.u32 %v12338_v18, 16  ;;  %v12454_v4 = vshll.u32 %v24371_v47, 16 }
 0x5e7   : > { %18495 = vmatprep.subr.bf16.mxu1 %v19379_v22  ;;  %v12394_v54 = vrot.slane %v12392_v44, 5 }
 0x5e9   : > { %v12395_v20 = vor.u32 %v12394_v54, %v12391_v48 }
 0x5ea   : > { %18496 = vmatpush3.bf16.msra.mxu1 %v19379_v22  ;;  %v12377_v22 = vrot.slane %v12375_v5, 4 }
 0x5eb   : > { %18497 = vmatprep.subr.bf16.mxu1 %v19380_v53 }
 0x5ed   : > { %18490 = vmatmul.mubr.bf16.gmra.mrb[4].mxu1 %v16402_v37  ;;  %v19396_v37 = vld [vmem:[%s24922_s3 + $0x430] sm:$0xff]  }
 0x5ee   : > { %18498 = vmatpush3.bf16.msra.mxu1 %v19380_v53  ;;  %18509 = vmatprep.mubr.bf16.mxu1 %v19381_v0  ;;  %v12344_v53 = vld [vmem:[#allocation2 + $0x50] sm:$0xf]  ;;  %v12381_v0 = vor.u32 %v12380_v40, %v12377_v22  ;;  %v12456_v22 = vrot.slane %v12454_v4, 5  ;;  %v12613_v40 = vld [vmem:[#allocation2 + $0x20] sm:$0xe] }
 0x5ef   : > { %18499 = vmatprep.subr.bf16.mxu1 %v19382_v9  ;;  %v12445_v35 = vshrl.u32 %v12344_v53, 16  ;;  %v12448_v2 = vshll.u32 %v12344_v53, 16  ;;  %v16468_v53 = vrot.slane %v12613_v40, 9  ;;  %v12852_v24 = vshll.u32 %v12613_v40, 16 }
 0x5f1   : > { %v12447_v19 = vrot.slane %v12445_v35, 4  ;;  %v12450_v3 = vrot.slane %v12448_v2, 5  ;;  %v19404_v35 = vld [vmem:[%s24922_s3 + $0x470] sm:$0xff]   ;;  %v24411_v2 = vld [vmem:[#allocation2 + $0x28] sm:$0xe] }
 0x5f2   : > { %18500 = vmatpush3.bf16.msra.mxu1 %v19382_v9  ;;  %v24353_v9 = vld [vmem:[#allocation2 + $0x34] sm:$0x1] }
 0x5f3   : > { %18501 = vmatprep.subr.bf16.mxu1 %v19383_v6  ;;  %v12398_v25 = vshll.u32 %v24353_v9, 16  ;;  %v12451_v23 = vor.u32 %v12450_v3, %v12447_v19  ;;  %v12650_v19 = vrot.slane %v24353_v9, 5  ;;  %v12658_v3 = vrot.slane %v24355_v51, 5 }
 0x5f4   : > { %v12654_v9 = vrot.slane %v24358_v39, 5 }
 0x5f5   : > { %v12400_v41 = vrot.slane %v12398_v25, 5  ;;  %v19405_v25 = vld [vmem:[%s24922_s3 + $0x478] sm:$0xff]  }
 0x5f6   : > { %18502 = vmatpush3.bf16.msra.mxu1 %v19383_v6  ;;  %v12405_v6 = vrot.slane %v12403_v32, 4  ;;  %v12642_v32 = vrot.slane %v24323_v57, 5 }
 0x5f7   : > { %18503 = vmatprep.subr.bf16.mxu1 %v19384_v60 }
 0x5f8   : > { %v12643_v57 = vsel %vm19744_vm7, %v16468_v53, %v12642_v32 }
 0x5fa   : > { %18504 = vmatpush3.bf16.msra.mxu1 %v19384_v60  ;;  %v12408_v60 = vrot.slane %v12406_v1, 5  ;;  %v12442_v1 = vrot.slane %v12440_v46, 5 }
 0x5fb   : > { %18505 = vmatprep.subr.bf16.mxu1 %v19385_v38 }
 0x5fc   : > { %v12409_v7 = vor.u32 %v12408_v60, %v12405_v6 }
 0x5fe   : > { %18506 = vmatpush3.bf16.msra.mxu1 %v19385_v38  ;;  %v12431_v38 = vshrl.u32 %v12342_v63, 16  ;;  %v12410_v16 = vrot.slane %v12409_v7, 4  ;;  %v12638_v63 = vrot.slane %v24325_v45, 5  ;;  %v19401_v45 = vld [vmem:[%s24922_s3 + $0x458] sm:$0xff]   ;;  %v24421_v7 = vld [vmem:[#allocation2 + $0x40] sm:$0xe] }
 0x5ff   : > { %18507 = vmatprep.subr.bf16.mxu1 %v19386_v10  ;;  %v16472_v51 = vrot.slane %v24421_v7, 9 }
 0x602   : > { %18508 = vmatpush3.bf16.msra.mxu1 %v19386_v10  ;;  %v12423_v10 = vor.u32 %v12422_v34, %v12419_v55  ;;  %v12612_v55 = vld [vmem:[#allocation2 + $0x18] sm:$0xe]  ;;  %v19400_v34 = vld [vmem:[%s24922_s3 + $0x450] sm:$0xff]  }
 0x603   : > { %18517 = vmatprep.subr.bf16.mxu1 %v19388_v61 }
 0x604   : > { %v12424_v59 = vrot.slane %v12423_v10, 4  ;;  %v12849_v10 = vshrl.u32 %v12613_v40, 16 }
 0x605   : > { %18510 = vmatmul.mubr.bf16.vlgmr.msra.gmra.mrb[0].mxu1 %v19387_v52  ;;  %v12433_v52 = vrot.slane %v12431_v38, 4  ;;  %v19402_v38 = vld [vmem:[%s24922_s3 + $0x460] sm:$0xff]  }
 0x606   : > { %18513 = vmatprep.mubr.bf16.mxu1 %v19389_v43  ;;  %18518 = vmatpush3.bf16.msra.mxu1 %v19388_v61  ;;  %v12382_v61 = vrot.slane %v12381_v0, 4  ;;  %v12412_v43 = vshll.u32 %v24358_v39, 16  ;;  %v12659_v39 = vsel %vm19744_vm7, %v16472_v51, %v12658_v3  ;;  %v12924_v3 = vshll.u32 %v24421_v7, 16 }
 0x607   : > { %18519 = vmatprep.subr.bf16.mxu1 %v19390_v49 }
 0x60a   : > { %18520 = vmatpush3.bf16.msra.mxu1 %v19390_v49  ;;  %v12436_v49 = vrot.slane %v12434_v31, 5  ;;  %v19403_v31 = vld [vmem:[%s24922_s3 + $0x468] sm:$0xff]  }
 0x60b   : > { %18521 = vmatprep.subr.bf16.mxu1 %v19392_v29 }
 0x60d   : > { %18514 = vmatmul.mubr.bf16.gmra.mrb[4].mxu1 %v19391_v12  ;;  %v12428_v12 = vrot.slane %v12426_v11, 5  ;;  %v12831_v11 = vshrl.u32 %v12612_v55, 16 }
 0x60e   : > { %18522 = vmatpush3.bf16.msra.mxu1 %v19392_v29  ;;  %18533 = vmatprep.mubr.bf16.mxu1 %v16455_v56  ;;  %v12396_v29 = vrot.slane %v12395_v20, 4  ;;  %v12437_v56 = vor.u32 %v12436_v49, %v12433_v52  ;;  %v24413_v20 = vld [vmem:[#allocation2 + $0x30] sm:$0xe]  ;;  %v12834_v52 = vshll.u32 %v12612_v55, 16  ;;  %v16469_v49 = vrot.slane %v24411_v2, 9 }
 0x60f   : > { %18523 = vmatprep.subr.bf16.mxu1 %v19393_v15  ;;  %v12429_v14 = vsel %vm23384_vm1, %v12424_v59, %v12428_v12  ;;  %v12851_v59 = vrot.slane %v12849_v10, 5  ;;  %v19406_v12 = vld [vmem:[%s24922_s3 + $0x480] sm:$0xff]   ;;  %v12870_v10 = vshll.u32 %v24411_v2, 16 }
 0x610   : > { %v12401_v5 = vsel %vm23384_vm1, %v12396_v29, %v12400_v41  ;;  %v12438_v44 = vrot.slane %v12437_v56, 4  ;;  %v12836_v56 = vrot.slane %v12834_v52, 6 }
 0x612   : > { %18524 = vmatpush3.bf16.msra.mxu1 %v19393_v15  ;;  %v12387_v15 = vsel %vm23384_vm1, %v12382_v61, %v12386_v17  ;;  %v12443_v48 = vsel %vm23384_vm1, %v12438_v44, %v12442_v1  ;;  %v24416_v61 = vld [vmem:[#allocation2 + $0x24] sm:$0x3]  ;;  %v12854_v17 = vrot.slane %v12852_v24, 6  ;;  %v19407_v44 = vld [vmem:[%s24922_s3 + $0x488] sm:$0xff]  }
 0x613   : > { %18525 = vmatprep.subr.bf16.mxu1 %v19394_v27  ;;  %v16456_v18 = vcombine.low %v12387_v15, %v12401_v5  ;;  %v12858_v29 = vshrl.u32 %v24416_v61, 16  ;;  %v12861_v41 = vshll.u32 %v24416_v61, 16  ;;  %v12833_v15 = vrot.slane %v12831_v11, 5  ;;  %v19410_v11 = vld [vmem:[%s24922_s3 + $0x4a0] sm:$0xff]  }
 0x614   : > { %v12855_v5 = vor.u32 %v12854_v17, %v12851_v59  ;;  %v12885_v59 = vshrl.u32 %v24413_v20, 16  ;;  %v24488_v17 = vld [vmem:[#allocation2 + $0x34] sm:$0x3] }
 0x615   : > { %v12860_v46 = vrot.slane %v12858_v29, 5  ;;  %v12888_v29 = vshll.u32 %v24413_v20, 16 }
 0x616   : > { %18526 = vmatpush3.bf16.msra.mxu1 %v19394_v27  ;;  %v12414_v27 = vrot.slane %v12412_v43, 5  ;;  %v24426_v43 = vld [vmem:[#allocation2 + $0x1c] sm:$0x3]  ;;  %v12856_v53 = vrot.slane %v12855_v5, 4 }
 0x617   : > { %18527 = vmatprep.subr.bf16.mxu1 %v19395_v36  ;;  %v12843_v4 = vshll.u32 %v24426_v43, 16 }
 0x618   : > { %v12415_v62 = vsel %vm23384_vm1, %v12410_v16, %v12414_v27  ;;  %v16470_v16 = vrot.slane %v24413_v20, 9  ;;  %v12926_v20 = vrot.slane %v12924_v3, 6 }
 0x619   : > { %v16457_v42 = vcombine.low %v12415_v62, %v12429_v14  ;;  %v12845_v32 = vrot.slane %v12843_v4, 6  ;;  %v12887_v4 = vrot.slane %v12885_v59, 5  ;;  %v19414_v59 = vld [vmem:[%s24922_s3 + $0x4c0] sm:$0xff]  }
 0x61a   : > { %18528 = vmatpush3.bf16.msra.mxu1 %v19395_v36  ;;  %v12452_v36 = vrot.slane %v12451_v23, 4  ;;  %v12840_v23 = vshrl.u32 %v24426_v43, 16  ;;  %v12651_v27 = vsel %vm19744_vm7, %v16470_v16, %v12650_v19  ;;  %v12921_v19 = vshrl.u32 %v24421_v7, 16  ;;  %v19411_v7 = vld [vmem:[%s24922_s3 + $0x4a8] sm:$0xff]  }
 0x61b   : > { %18529 = vmatprep.subr.bf16.mxu1 %v19396_v37 }
 0x61c   : > { %v12457_v54 = vsel %vm23384_vm1, %v12452_v36, %v12456_v22  ;;  %v24454_v36 = vld [vmem:[#allocation2 + $0x50] sm:$0xe]  ;;  %v12837_v22 = vor.u32 %v12836_v56, %v12833_v15  ;;  %v12842_v40 = vrot.slane %v12840_v23, 5  ;;  %v12923_v56 = vrot.slane %v12921_v19, 5 }
 0x61d   : > { %v16458_v0 = vcombine.low %v12443_v48, %v12457_v54 }
 0x61e   : > { %18530 = vmatpush3.bf16.msra.mxu1 %v19396_v37  ;;  %v16467_v37 = vrot.slane %v12612_v55, 9  ;;  %v12662_v55 = vrot.slane %v24366_v8, 5 }
 0x61f   : > { %18531 = vmatprep.subr.bf16.mxu1 %v19397_v13 }
 0x620   : > { %v12639_v6 = vsel %vm19744_vm7, %v16467_v37, %v12638_v63  ;;  %v12666_v63 = vrot.slane %v24371_v47, 5  ;;  %v19408_v37 = vld [vmem:[%s24922_s3 + $0x490] sm:$0xff]  }
 0x621   : > { %v16491_v60 = vcombine.low %v12639_v6, %v12643_v57  ;;  %v12838_v57 = vrot.slane %v12837_v22, 4  ;;  %v19412_v22 = vld [vmem:[%s24922_s3 + $0x4b0] sm:$0xff]  }
 0x622   : > { %18532 = vmatpush3.bf16.msra.mxu1 %v19397_v13  ;;  %v12646_v13 = vrot.slane %v24348_v21, 5  ;;  %v24428_v21 = vld [vmem:[#allocation2 + $0x38] sm:$0xe] }
 0x623   : > { %18541 = vmatprep.subr.bf16.mxu1 %v19398_v30  ;;  %v16471_v14 = vrot.slane %v24428_v21, 9  ;;  %v12906_v16 = vshll.u32 %v24428_v21, 16 }
 0x625   : > { %18534 = vmatmul.mubr.bf16.vlgmr.msra.gmra.mrb[0].mxu1 %v16456_v18  ;;  %v12863_v18 = vrot.slane %v12861_v41, 6  ;;  %v12903_v41 = vshrl.u32 %v24428_v21, 16  ;;  %v12890_v21 = vrot.slane %v12888_v29, 6 }
 0x626   : > { %18537 = vmatprep.mubr.bf16.mxu1 %v16457_v42  ;;  %18542 = vmatpush3.bf16.msra.mxu1 %v19398_v30  ;;  %v12647_v30 = vsel %vm19744_vm7, %v16469_v49, %v12646_v13  ;;  %v12655_v42 = vsel %vm19744_vm7, %v16471_v14, %v12654_v9  ;;  %v12872_v49 = vrot.slane %v12870_v10, 6  ;;  %v12897_v14 = vshll.u32 %v24488_v17, 16 }
 0x627   : > { %18543 = vmatprep.subr.bf16.mxu1 %v19399_v28  ;;  %v16492_v62 = vcombine.low %v12647_v30, %v12651_v27  ;;  %v16493_v1 = vcombine.low %v12655_v42, %v12659_v39  ;;  %v12864_v48 = vor.u32 %v12863_v18, %v12860_v46  ;;  %v24492_v30 = vld [vmem:[#allocation2 + $0x3c] sm:$0x3]  ;;  %v12894_v27 = vshrl.u32 %v24488_v17, 16 }
 0x628   : > { %v12905_v39 = vrot.slane %v12903_v41, 5  ;;  %v12912_v5 = vshrl.u32 %v24492_v30, 16  ;;  %v12915_v46 = vshll.u32 %v24492_v30, 16  ;;  %v12908_v18 = vrot.slane %v12906_v16, 6 }
 0x629   : > { %v12865_v6 = vsel %vm19599_vm2, %v12856_v53, %v12864_v48  ;;  %v12960_v53 = vshll.u32 %v24454_v36, 16  ;;  %v12891_v48 = vor.u32 %v12890_v21, %v12887_v4  ;;  %v19415_v4 = vld [vmem:[%s24922_s3 + $0x4c8] sm:$0xff]  }
 0x62a   : > { %18544 = vmatpush3.bf16.msra.mxu1 %v19399_v28  ;;  %v24447_v28 = vld [vmem:[#allocation2 + $0x48] sm:$0xe] }
 0x62b   : > { %18545 = vmatprep.subr.bf16.mxu1 %v19400_v34  ;;  %v16473_v54 = vrot.slane %v24447_v28, 9 }
 0x62d   : > { %18538 = vmatmul.mubr.bf16.gmra.mrb[4].mxu1 %v16458_v0  ;;  %v12846_v0 = vor.u32 %v12845_v32, %v12842_v40  ;;  %v12663_v8 = vsel %vm19744_vm7, %v16473_v54, %v12662_v55  ;;  %v12927_v40 = vor.u32 %v12926_v20, %v12923_v56  ;;  %v12942_v32 = vshll.u32 %v24447_v28, 16 }
 0x62e   : > { %18546 = vmatpush3.bf16.msra.mxu1 %v19400_v34  ;;  %18557 = vmatprep.mubr.bf16.mxu1 %v16491_v60  ;;  %v16474_v34 = vrot.slane %v24454_v36, 9  ;;  %v12896_v54 = vrot.slane %v12894_v27, 5 }
 0x62f   : > { %18547 = vmatprep.subr.bf16.mxu1 %v19401_v45  ;;  %v12847_v60 = vsel %vm19599_vm2, %v12838_v57, %v12846_v0  ;;  %v12914_v57 = vrot.slane %v12912_v5, 5  ;;  %v24513_v0 = vld [vmem:[#allocation2 + $0x54] sm:$0x3]  ;;  %v13129_v5 = vld [vmem:[#allocation2 + $0x20] sm:$0xc] }
 0x630   : > { %v12667_v47 = vsel %vm19744_vm7, %v16474_v34, %v12666_v63  ;;  %v16519_v24 = vcombine.low %v12847_v60, %v12865_v6  ;;  %v24509_v34 = vld [vmem:[#allocation2 + $0x4c] sm:$0x3]  ;;  %v12957_v63 = vshrl.u32 %v24454_v36, 16  ;;  %v12928_v60 = vrot.slane %v12927_v40, 4 }
 0x631   : > { %v12948_v36 = vshrl.u32 %v24509_v34, 16 }
 0x632   : > { %18548 = vmatpush3.bf16.msra.mxu1 %v19401_v45  ;;  %v16494_v45 = vcombine.low %v12663_v8, %v12667_v47  ;;  %v12909_v8 = vor.u32 %v12908_v18, %v12905_v39  ;;  %v12917_v47 = vrot.slane %v12915_v46, 6  ;;  %v12959_v10 = vrot.slane %v12957_v63, 5  ;;  %v13128_v18 = vld [vmem:[#allocation2 + $0x18] sm:$0xc] }
 0x633   : > { %18549 = vmatprep.subr.bf16.mxu1 %v19402_v38  ;;  %v12950_v41 = vrot.slane %v12948_v36, 5  ;;  %v13158_v46 = vrot.slane %v24416_v61, 6  ;;  %v19422_v36 = vld [vmem:[%s24922_s3 + $0x500] sm:$0xff]  }
 0x634   : > { %v12910_v19 = vrot.slane %v12909_v8, 4  ;;  %v12918_v3 = vor.u32 %v12917_v47, %v12914_v57  ;;  %v13130_v57 = vld [vmem:[#allocation2 + $0x28] sm:$0xc]  ;;  %v13133_v47 = vld [vmem:[#allocation2 + $0x40] sm:$0xc] }
 0x636   : > { %18550 = vmatpush3.bf16.msra.mxu1 %v19402_v38  ;;  %v19409_v38 = vld [vmem:[%s24922_s3 + $0x498] sm:$0xff]   ;;  %v12919_v56 = vsel %vm19599_vm2, %v12910_v19, %v12918_v3  ;;  %v13134_v19 = vld [vmem:[#allocation2 + $0x48] sm:$0xc] }
 0x637   : > { %18551 = vmatprep.subr.bf16.mxu1 %v19403_v31 }
 0x63a   : > { %18552 = vmatpush3.bf16.msra.mxu1 %v19403_v31  ;;  %v24474_v31 = vld [vmem:[#allocation2 + $0x2c] sm:$0x3] }
 0x63b   : > { %18553 = vmatprep.subr.bf16.mxu1 %v19404_v35  ;;  %v12876_v13 = vshrl.u32 %v24474_v31, 16  ;;  %v13162_v8 = vrot.slane %v24474_v31, 6 }
 0x63d   : > { %v12878_v15 = vrot.slane %v12876_v13, 5  ;;  %v12966_v13 = vshrl.u32 %v24513_v0, 16 }
 0x63e   : > { %18554 = vmatpush3.bf16.msra.mxu1 %v19404_v35  ;;  %v12867_v35 = vshrl.u32 %v24411_v2, 16  ;;  %v12879_v2 = vshll.u32 %v24474_v31, 16 }
 0x63f   : > { %18555 = vmatprep.subr.bf16.mxu1 %v19405_v25 }
 0x640   : > { %v12869_v52 = vrot.slane %v12867_v35, 5  ;;  %v12881_v23 = vrot.slane %v12879_v2, 6  ;;  %v12951_v35 = vshll.u32 %v24509_v34, 16 }
 0x642   : > { %18556 = vmatpush3.bf16.msra.mxu1 %v19405_v25  ;;  %v24479_v25 = vld [vmem:[#allocation2 + $0x44] sm:$0x3]  ;;  %v12882_v55 = vor.u32 %v12881_v23, %v12878_v15  ;;  %v12953_v16 = vrot.slane %v12951_v35, 6  ;;  %v13170_v35 = vrot.slane %v24492_v30, 6  ;;  %v19423_v30 = vld [vmem:[%s24922_s3 + $0x508] sm:$0xff]  }
 0x643   : > { %18565 = vmatprep.subr.bf16.mxu1 %v19406_v12  ;;  %v12930_v9 = vshrl.u32 %v24479_v25, 16  ;;  %v12933_v51 = vshll.u32 %v24479_v25, 16 }
 0x645   : > { %18558 = vmatmul.mubr.bf16.vlgmr.msra.gmra.mrb[0].mxu1 %v16492_v62  ;;  %v12932_v62 = vrot.slane %v12930_v9, 5  ;;  %v12935_v42 = vrot.slane %v12933_v51, 6 }
 0x646   : > { %18561 = vmatprep.mubr.bf16.mxu1 %v16493_v1  ;;  %18566 = vmatpush3.bf16.msra.mxu1 %v19406_v12  ;;  %v12873_v12 = vor.u32 %v12872_v49, %v12869_v52  ;;  %v12892_v52 = vrot.slane %v12891_v48, 4  ;;  %v19419_v48 = vld [vmem:[%s24922_s3 + $0x4e8] sm:$0xff]  }
 0x647   : > { %18567 = vmatprep.subr.bf16.mxu1 %v19407_v44  ;;  %v12936_v6 = vor.u32 %v12935_v42, %v12932_v62  ;;  %v19416_v62 = vld [vmem:[%s24922_s3 + $0x4d0] sm:$0xff]   ;;  %v13154_v42 = vrot.slane %v24426_v43, 6  ;;  %v19417_v43 = vld [vmem:[%s24922_s3 + $0x4d8] sm:$0xff]  }
 0x648   : > { %v12874_v1 = vrot.slane %v12873_v12, 4 }
 0x649   : > { %v12937_v29 = vsel %vm19599_vm2, %v12928_v60, %v12936_v6  ;;  %v13131_v6 = vld [vmem:[#allocation2 + $0x30] sm:$0xc]  ;;  %v13166_v60 = vrot.slane %v24488_v17, 6 }
 0x64a   : > { %18568 = vmatpush3.bf16.msra.mxu1 %v19407_v44  ;;  %v12939_v44 = vshrl.u32 %v24447_v28, 16  ;;  %v19413_v28 = vld [vmem:[%s24922_s3 + $0x4b8] sm:$0xff]   ;;  %v12883_v2 = vsel %vm19599_vm2, %v12874_v1, %v12882_v55  ;;  %v16521_v23 = vcombine.low %v12919_v56, %v12937_v29  ;;  %v13182_v29 = vrot.slane %v24513_v0, 6  ;;  %v13511_v56 = vld [vmem:[#allocation2 + $0x28] sm:$0xf] }
 0x64b   : > { %18569 = vmatprep.subr.bf16.mxu1 %v19408_v37 }
 0x64d   : > { %18562 = vmatmul.mubr.bf16.gmra.mrb[4].mxu1 %v16494_v45  ;;  %v12941_v45 = vrot.slane %v12939_v44, 5  ;;  %v16532_v44 = vrot.slane %v13129_v5, 10 }
 0x64e   : > { %18570 = vmatpush3.bf16.msra.mxu1 %v19408_v37  ;;  %18581 = vmatprep.mubr.bf16.mxu1 %v16519_v24  ;;  %v12899_v37 = vrot.slane %v12897_v14, 6  ;;  %v12962_v24 = vrot.slane %v12960_v53, 6  ;;  %v12954_v14 = vor.u32 %v12953_v16, %v12950_v41  ;;  %v19418_v53 = vld [vmem:[%s24922_s3 + $0x4e0] sm:$0xff]   ;;  %v16537_v41 = vrot.slane %v13134_v19, 10  ;;  %v19424_v16 = vld [vmem:[%s24922_s3 + $0x510] sm:$0xff]  }
 0x64f   : > { %18571 = vmatprep.subr.bf16.mxu1 %v19409_v38  ;;  %v13159_v61 = vsel %vm19802_vm8, %v16532_v44, %v13158_v46  ;;  %v24609_v44 = vld [vmem:[#allocation2 + $0x2c] sm:$0x1]  ;;  %v13521_v19 = vld [vmem:[#allocation2 + $0x50] sm:$0xf] }
 0x650   : > { %v12900_v49 = vor.u32 %v12899_v37, %v12896_v54  ;;  %v12963_v51 = vor.u32 %v12962_v24, %v12959_v10  ;;  %v19420_v54 = vld [vmem:[%s24922_s3 + $0x4f0] sm:$0xff]   ;;  %v19421_v37 = vld [vmem:[%s24922_s3 + $0x4f8] sm:$0xff]   ;;  %v16536_v10 = vrot.slane %v13133_v47, 10  ;;  %v16534_v24 = vrot.slane %v13131_v6, 10 }
 0x652   : > { %18572 = vmatpush3.bf16.msra.mxu1 %v19409_v38  ;;  %v12944_v38 = vrot.slane %v12942_v32, 6  ;;  %v12901_v15 = vsel %vm19599_vm2, %v12892_v52, %v12900_v49  ;;  %v12964_v21 = vrot.slane %v12963_v51, 4  ;;  %v16531_v32 = vrot.slane %v13128_v18, 10  ;;  %v19432_v18 = vld [vmem:[%s24922_s3 + $0x540] sm:$0xff]  }
 0x653   : > { %18573 = vmatprep.subr.bf16.mxu1 %v19410_v11  ;;  %v16520_v20 = vcombine.low %v12883_v2, %v12901_v15  ;;  %v13167_v17 = vsel %vm19802_vm8, %v16534_v24, %v13166_v60  ;;  %v13178_v2 = vrot.slane %v24509_v34, 6  ;;  %v19428_v15 = vld [vmem:[%s24922_s3 + $0x528] sm:$0xff]   ;;  %v13515_v60 = vld [vmem:[#allocation2 + $0x38] sm:$0xf] }
 0x654   : > { %v12945_v9 = vor.u32 %v12944_v38, %v12941_v45  ;;  %v13155_v55 = vsel %vm19802_vm8, %v16531_v32, %v13154_v42  ;;  %v13174_v45 = vrot.slane %v24479_v25, 6  ;;  %v13132_v38 = vld [vmem:[#allocation2 + $0x38] sm:$0xc]  ;;  %v13571_v24 = vshll.u32 %v13515_v60, 16 }
 0x655   : > { %v16555_v63 = vcombine.low %v13155_v55, %v13159_v61  ;;  %v19431_v32 = vld [vmem:[#allocation2 + $0x30] ss:$8 sps:$4 sm:$0xff]   ;;  %v19434_v61 = vld [vmem:[%s24922_s3 + $0x548] sm:$0xff]   ;;  %v13549_v55 = vshll.u32 %v24609_v44, 16 }
 0x656   : > { %18574 = vmatpush3.bf16.msra.mxu1 %v19410_v11  ;;  %v12969_v11 = vshll.u32 %v24513_v0, 16  ;;  %v12946_v27 = vrot.slane %v12945_v9, 4  ;;  %v13175_v25 = vsel %vm19802_vm8, %v16536_v10, %v13174_v45  ;;  %v13179_v9 = vsel %vm19802_vm8, %v16537_v41, %v13178_v2  ;;  %v19426_v0 = vld [vmem:[%s24922_s3 + $0x518] sm:$0xff]   ;;  %v13517_v10 = vld [vmem:[#allocation2 + $0x40] sm:$0xf] }
 0x657   : > { %18575 = vmatprep.subr.bf16.mxu1 %v19411_v7  ;;  %v19437_v45 = vld [vmem:[%s24922_s3 + $0x558] sm:$0xff]  }
 0x658   : > { %v12971_v12 = vrot.slane %v12969_v11, 6  ;;  %v13135_v11 = vld [vmem:[#allocation2 + $0x50] sm:$0xc] }
 0x65a   : > { %18576 = vmatpush3.bf16.msra.mxu1 %v19411_v7  ;;  %v12968_v7 = vrot.slane %v12966_v13, 5  ;;  %v16535_v13 = vrot.slane %v13132_v38, 10  ;;  %v13513_v38 = vld [vmem:[#allocation2 + $0x30] sm:$0xf] }
 0x65b   : > { %18577 = vmatprep.subr.bf16.mxu1 %v19412_v22 }
 0x65c   : > { %v12972_v39 = vor.u32 %v12971_v12, %v12968_v7  ;;  %v13171_v49 = vsel %vm19802_vm8, %v16535_v13, %v13170_v35  ;;  %v19425_v7 = vld [vmem:[#allocation2 + $0x20] ss:$8 sps:$4 sm:$0xff]   ;;  %v13554_v13 = vshrl.u32 %v13513_v38, 16 }
 0x65d   : > { %v16557_v3 = vcombine.low %v13171_v49, %v13175_v25  ;;  %v19427_v12 = vld [vmem:[%s24922_s3 + $0x520] sm:$0xff]   ;;  %v13557_v25 = vshll.u32 %v13513_v38, 16  ;;  %v19439_v49 = vld [vmem:[%s24922_s3 + $0x568] sm:$0xff]  }
 0x65e   : > { %18578 = vmatpush3.bf16.msra.mxu1 %v19412_v22  ;;  %v12955_v22 = vsel %vm19599_vm2, %v12946_v27, %v12954_v14  ;;  %v12973_v40 = vsel %vm19599_vm2, %v12964_v21, %v12972_v39  ;;  %v13543_v27 = vshll.u32 %v13511_v56, 16  ;;  %v19430_v14 = vld [vmem:[%s24922_s3 + $0x538] sm:$0xff]   ;;  %v19438_v35 = vld [vmem:[%s24922_s3 + $0x560] sm:$0xff]   ;;  %v13556_v41 = vrot.slane %v13554_v13, 4 }
 0x65f   : > { %18579 = vmatprep.subr.bf16.mxu1 %v19413_v28  ;;  %v16522_v1 = vcombine.low %v12955_v22, %v12973_v40  ;;  %v24611_v40 = vld [vmem:[#allocation2 + $0x24] sm:$0x1] }
 0x660   : > { %v13545_v46 = vrot.slane %v13543_v27, 5  ;;  %v24641_v27 = vld [vmem:[#allocation2 + $0x4c] sm:$0x1] }
 0x662   : > { %18580 = vmatpush3.bf16.msra.mxu1 %v19413_v28  ;;  %v16533_v28 = vrot.slane %v13130_v57, 10  ;;  %v19435_v57 = vld [vmem:[#allocation2 + $0x50] ss:$8 sps:$4 sm:$0xff]  }
 0x663   : > { %18589 = vmatprep.subr.bf16.mxu1 %v19414_v59 }
 0x664   : > { %v13163_v31 = vsel %vm19802_vm8, %v16533_v28, %v13162_v8 }
 0x665   : > { %18582 = vmatmul.mubr.bf16.vlgmr.msra.gmra.mrb[0].mxu1 %v16520_v20  ;;  %v16556_v52 = vcombine.low %v13163_v31, %v13167_v17  ;;  %v19429_v20 = vld [vmem:[%s24922_s3 + $0x530] sm:$0xff]   ;;  %v13568_v31 = vshrl.u32 %v13515_v60, 16 }
 0x666   : > { %18585 = vmatprep.mubr.bf16.mxu1 %v16521_v23  ;;  %18590 = vmatpush3.bf16.msra.mxu1 %v19414_v59  ;;  %v16538_v59 = vrot.slane %v13135_v11, 10  ;;  %v13509_v23 = vld [vmem:[#allocation2 + $0x20] sm:$0xf] }
 0x667   : > { %18591 = vmatprep.subr.bf16.mxu1 %v19415_v4  ;;  %v13526_v21 = vshrl.u32 %v13509_v23, 16  ;;  %v13529_v39 = vshll.u32 %v13509_v23, 16  ;;  %v13570_v2 = vrot.slane %v13568_v31, 4 }
 0x668   : > { %v13183_v51 = vsel %vm19802_vm8, %v16538_v59, %v13182_v29  ;;  %v13573_v59 = vrot.slane %v13571_v24, 5  ;;  %v24634_v29 = vld [vmem:[#allocation2 + $0x34] sm:$0x1] }
 0x669   : > { %v16558_v34 = vcombine.low %v13179_v9, %v13183_v51  ;;  %v13531_v42 = vrot.slane %v13529_v39, 5 }
 0x66a   : > { %18592 = vmatpush3.bf16.msra.mxu1 %v19415_v4  ;;  %v13540_v4 = vshrl.u32 %v13511_v56, 16  ;;  %v19440_v56 = vld [vmem:[%s24922_s3 + $0x570] sm:$0xff]  }
 0x66b   : > { %18593 = vmatprep.subr.bf16.mxu1 %v19416_v62 }
 0x66c   : > { %v13542_v5 = vrot.slane %v13540_v4, 4  ;;  %v13574_v4 = vor.u32 %v13573_v59, %v13570_v2 }
 0x66d   : > { %18586 = vmatmul.mubr.bf16.gmra.mrb[4].mxu1 %v16522_v1 }
 0x66e   : > { %18594 = vmatpush3.bf16.msra.mxu1 %v19416_v62  ;;  %18605 = vmatprep.mubr.bf16.mxu1 %v16555_v63  ;;  %v13528_v62 = vrot.slane %v13526_v21, 4  ;;  %v13546_v22 = vor.u32 %v13545_v46, %v13542_v5  ;;  %v13535_v63 = vshll.u32 %v24611_v40, 16  ;;  %v13563_v21 = vshll.u32 %v24634_v29, 16  ;;  %v24645_v46 = vld [vmem:[#allocation2 + $0x44] sm:$0x1] }
 0x66f   : > { %18595 = vmatprep.subr.bf16.mxu1 %v19417_v43 }
 0x670   : > { %v13532_v1 = vor.u32 %v13531_v42, %v13528_v62  ;;  %v13537_v8 = vrot.slane %v13535_v63, 5  ;;  %v13575_v63 = vrot.slane %v13574_v4, 4 }
 0x672   : > { %18596 = vmatpush3.bf16.msra.mxu1 %v19417_v43  ;;  %v19433_v43 = vld [vmem:[#allocation2 + $0x40] ss:$8 sps:$4 sm:$0xff]  }
 0x673   : > { %18597 = vmatprep.subr.bf16.mxu1 %v19418_v53 }
 0x676   : > { %18598 = vmatpush3.bf16.msra.mxu1 %v19418_v53  ;;  %v13547_v53 = vrot.slane %v13546_v22, 4 }
 0x677   : > { %18599 = vmatprep.subr.bf16.mxu1 %v19419_v48 }
 0x67a   : > { %18600 = vmatpush3.bf16.msra.mxu1 %v19419_v48  ;;  %v19436_v48 = vld [vmem:[%s24922_s3 + $0x550] sm:$0xff]  }
 0x67b   : > { %18601 = vmatprep.subr.bf16.mxu1 %v19420_v54 }
 0x67e   : > { %18602 = vmatpush3.bf16.msra.mxu1 %v19420_v54  ;;  %v13533_v54 = vrot.slane %v13532_v1, 4  ;;  %v13605_v1 = vshll.u32 %v24641_v27, 16 }
 0x67f   : > { %18603 = vmatprep.subr.bf16.mxu1 %v19421_v37 }
 0x680   : > { %v13538_v6 = vsel %vm23384_vm1, %v13533_v54, %v13537_v8  ;;  %v13591_v54 = vshll.u32 %v24645_v46, 16  ;;  %v13607_v38 = vrot.slane %v13605_v1, 5 }
 0x682   : > { %18604 = vmatpush3.bf16.msra.mxu1 %v19421_v37  ;;  %v13551_v37 = vrot.slane %v13549_v55, 5  ;;  %v24651_v55 = vld [vmem:[#allocation2 + $0x54] sm:$0x1] }
 0x683   : > { %18613 = vmatprep.subr.bf16.mxu1 %v19422_v36  ;;  %v13619_v8 = vshll.u32 %v24651_v55, 16 }
 0x684   : > { %v13552_v47 = vsel %vm23384_vm1, %v13547_v53, %v13551_v37 }
 0x685   : > { %18606 = vmatmul.mubr.bf16.vlgmr.msra.gmra.mrb[0].mxu1 %v16556_v52  ;;  %v16611_v28 = vcombine.low %v13538_v6, %v13552_v47  ;;  %v13582_v52 = vshrl.u32 %v13517_v10, 16  ;;  %v13621_v13 = vrot.slane %v13619_v8, 5 }
 0x686   : > { %18609 = vmatprep.mubr.bf16.mxu1 %v16557_v3  ;;  %18614 = vmatpush3.bf16.msra.mxu1 %v19422_v36  ;;  %v13519_v36 = vld [vmem:[#allocation2 + $0x48] sm:$0xf]  ;;  %v13523_v3 = vld [vmem:[#allocation2 + $0x58] sm:$0xf] }
 0x687   : > { %18615 = vmatprep.subr.bf16.mxu1 %v19423_v30  ;;  %v13596_v11 = vshrl.u32 %v13519_v36, 16  ;;  %v13599_v17 = vshll.u32 %v13519_v36, 16 }
 0x689   : > { %v13598_v9 = vrot.slane %v13596_v11, 4  ;;  %v13601_v51 = vrot.slane %v13599_v17, 5 }
 0x68a   : > { %18616 = vmatpush3.bf16.msra.mxu1 %v19423_v30  ;;  %v13585_v30 = vshll.u32 %v13517_v10, 16  ;;  %v13593_v10 = vrot.slane %v13591_v54, 5  ;;  %v24718_v54 = vld [vmem:[#allocation2 + $0x40] sm:$0xe] }
 0x68b   : > { %18617 = vmatprep.subr.bf16.mxu1 %v19424_v16  ;;  %v13602_v5 = vor.u32 %v13601_v51, %v13598_v9  ;;  %v13817_v9 = vrot.slane %v24611_v40, 5  ;;  %v19446_v40 = vld [vmem:[%s24922_s3 + $0x5a0] sm:$0xff]  }
 0x68c   : > { %v13587_v23 = vrot.slane %v13585_v30, 5 }
 0x68d   : > { %18610 = vmatmul.mubr.bf16.gmra.mrb[4].mxu1 %v16558_v34  ;;  %v24636_v34 = vld [vmem:[#allocation2 + $0x3c] sm:$0x1]  ;;  %v13603_v37 = vrot.slane %v13602_v5, 4 }
 0x68e   : > { %18618 = vmatpush3.bf16.msra.mxu1 %v19424_v16  ;;  %18629 = vmatprep.mubr.bf16.mxu1 %v19425_v7  ;;  %v13559_v16 = vrot.slane %v13557_v25, 5  ;;  %v13613_v7 = vshll.u32 %v13521_v19, 16  ;;  %v13577_v39 = vshll.u32 %v24636_v34, 16  ;;  %v13829_v4 = vrot.slane %v24636_v34, 5  ;;  %v24711_v34 = vld [vmem:[#allocation2 + $0x24] sm:$0x3] }
 0x68f   : > { %18619 = vmatprep.subr.bf16.mxu1 %v19426_v0  ;;  %v13608_v31 = vsel %vm23384_vm1, %v13603_v37, %v13607_v38  ;;  %v24731_v38 = vld [vmem:[#allocation2 + $0x58] sm:$0xe] }
 0x690   : > { %v13615_v62 = vrot.slane %v13613_v7, 5 }
 0x692   : > { %18620 = vmatpush3.bf16.msra.mxu1 %v19426_v0  ;;  %v13610_v0 = vshrl.u32 %v13521_v19, 16  ;;  %v13792_v19 = vld [vmem:[#allocation2 + $0x28] sm:$0xe] }
 0x693   : > { %18621 = vmatprep.subr.bf16.mxu1 %v19427_v12  ;;  %v16624_v51 = vrot.slane %v13792_v19, 9 }
 0x696   : > { %18622 = vmatpush3.bf16.msra.mxu1 %v19427_v12  ;;  %v13624_v12 = vshrl.u32 %v13523_v3, 16 }
 0x697   : > { %18623 = vmatprep.subr.bf16.mxu1 %v19428_v15 }
 0x698   : > { %v13626_v42 = vrot.slane %v13624_v12, 4  ;;  %v19445_v12 = vld [vmem:[%s24922_s3 + $0x598] sm:$0xff]  }
 0x69a   : > { %18624 = vmatpush3.bf16.msra.mxu1 %v19428_v15  ;;  %v13627_v15 = vshll.u32 %v13523_v3, 16  ;;  %v13821_v3 = vrot.slane %v24609_v44, 5 }
 0x69b   : > { %18625 = vmatprep.subr.bf16.mxu1 %v19429_v20 }
 0x69c   : > { %v13629_v22 = vrot.slane %v13627_v15, 5  ;;  %v13822_v44 = vsel %vm19744_vm7, %v16624_v51, %v13821_v3  ;;  %v19452_v51 = vld [vmem:[%s24922_s3 + $0x5d0] sm:$0xff]  }
 0x69e   : > { %18626 = vmatpush3.bf16.msra.mxu1 %v19429_v20  ;;  %v13584_v20 = vrot.slane %v13582_v52, 4  ;;  %v13630_v47 = vor.u32 %v13629_v22, %v13626_v42  ;;  %v19449_v22 = vld [vmem:[%s24922_s3 + $0x5b8] sm:$0xff]  }
 0x69f   : > { %18627 = vmatprep.subr.bf16.mxu1 %v19430_v14 }
 0x6a0   : > { %v13631_v25 = vrot.slane %v13630_v47, 4 }
 0x6a2   : > { %18628 = vmatpush3.bf16.msra.mxu1 %v19430_v14  ;;  %v13560_v14 = vor.u32 %v13559_v16, %v13556_v41  ;;  %v13791_v41 = vld [vmem:[#allocation2 + $0x20] sm:$0xe]  ;;  %v19444_v16 = vld [vmem:[%s24922_s3 + $0x590] sm:$0xff]  }
 0x6a3   : > { %18637 = vmatprep.subr.bf16.mxu1 %v19432_v18  ;;  %v16623_v7 = vrot.slane %v13791_v41, 9  ;;  %v14013_v42 = vshll.u32 %v13791_v41, 16 }
 0x6a4   : > { %v13561_v53 = vrot.slane %v13560_v14, 4  ;;  %v24700_v14 = vld [vmem:[#allocation2 + $0x30] sm:$0xe] }
 0x6a5   : > { %18630 = vmatmul.mubr.bf16.vlgmr.msra.gmra.mrb[0].mxu1 %v19431_v32  ;;  %v19441_v32 = vld [vmem:[%s24922_s3 + $0x578] sm:$0xff]   ;;  %v13818_v50 = vsel %vm19744_vm7, %v16623_v7, %v13817_v9  ;;  %v16625_v1 = vrot.slane %v24700_v14, 9 }
 0x6a6   : > { %18633 = vmatprep.mubr.bf16.mxu1 %v19433_v43  ;;  %18638 = vmatpush3.bf16.msra.mxu1 %v19432_v18  ;;  %v13612_v18 = vrot.slane %v13610_v0, 4  ;;  %v24653_v43 = vld [vmem:[#allocation2 + $0x5c] sm:$0x1]  ;;  %v16647_v15 = vcombine.low %v13818_v50, %v13822_v44 }
 0x6a7   : > { %18639 = vmatprep.subr.bf16.mxu1 %v19434_v61  ;;  %v13633_v6 = vshll.u32 %v24653_v43, 16 }
 0x6a9   : > { %v13635_v11 = vrot.slane %v13633_v6, 5 }
 0x6aa   : > { %18640 = vmatpush3.bf16.msra.mxu1 %v19434_v61  ;;  %v13588_v61 = vor.u32 %v13587_v23, %v13584_v20  ;;  %v19448_v20 = vld [vmem:[%s24922_s3 + $0x5b0] sm:$0xff]   ;;  %v24697_v23 = vld [vmem:[#allocation2 + $0x38] sm:$0xe] }
 0x6ab   : > { %18641 = vmatprep.subr.bf16.mxu1 %v19436_v48  ;;  %v13636_v59 = vsel %vm23384_vm1, %v13631_v25, %v13635_v11  ;;  %v16626_v5 = vrot.slane %v24697_v23, 9 }
 0x6ac   : > { %v13589_v60 = vrot.slane %v13588_v61, 4  ;;  %v24709_v61 = vld [vmem:[#allocation2 + $0x48] sm:$0xe] }
 0x6ad   : > { %18634 = vmatmul.mubr.bf16.gmra.mrb[4].mxu1 %v19435_v57  ;;  %v13616_v57 = vor.u32 %v13615_v62, %v13612_v18  ;;  %v24703_v18 = vld [vmem:[#allocation2 + $0x2c] sm:$0x3]  ;;  %v14010_v62 = vshrl.u32 %v13791_v41, 16  ;;  %v16628_v47 = vrot.slane %v24709_v61, 9 }
 0x6ae   : > { %18642 = vmatpush3.bf16.msra.mxu1 %v19436_v48  ;;  %18653 = vmatprep.mubr.bf16.mxu1 %v16611_v28  ;;  %v13579_v48 = vrot.slane %v13577_v39, 5  ;;  %v19442_v28 = vld [vmem:[%s24922_s3 + $0x580] sm:$0xff]   ;;  %v13594_v52 = vsel %vm23384_vm1, %v13589_v60, %v13593_v10  ;;  %v14031_v39 = vshll.u32 %v13792_v19, 16  ;;  %v14037_v8 = vshrl.u32 %v24703_v18, 16  ;;  %v24729_v60 = vld [vmem:[#allocation2 + $0x50] sm:$0xe] }
 0x6af   : > { %18643 = vmatprep.subr.bf16.mxu1 %v19437_v45  ;;  %v13617_v24 = vrot.slane %v13616_v57, 4  ;;  %v16613_v30 = vcombine.low %v13594_v52, %v13608_v31  ;;  %v14012_v6 = vrot.slane %v14010_v62, 5  ;;  %v16627_v10 = vrot.slane %v24718_v54, 9 }
 0x6b0   : > { %v13580_v36 = vsel %vm23384_vm1, %v13575_v63, %v13579_v48  ;;  %v13830_v63 = vsel %vm19744_vm7, %v16626_v5, %v13829_v4  ;;  %v13837_v48 = vrot.slane %v24641_v27, 5  ;;  %v14033_v57 = vrot.slane %v14031_v39, 6  ;;  %v19450_v27 = vld [vmem:[%s24922_s3 + $0x5c0] sm:$0xff]   ;;  %v24768_v39 = vld [vmem:[#allocation2 + $0x3c] sm:$0x3] }
 0x6b1   : > { %v13622_v2 = vsel %vm23384_vm1, %v13617_v24, %v13621_v13  ;;  %v14039_v13 = vrot.slane %v14037_v8, 5  ;;  %v16629_v11 = vrot.slane %v24729_v60, 9  ;;  %v16630_v52 = vrot.slane %v24731_v38, 9 }
 0x6b2   : > { %18644 = vmatpush3.bf16.msra.mxu1 %v19437_v45  ;;  %v13565_v45 = vrot.slane %v13563_v21, 5  ;;  %v16614_v0 = vcombine.low %v13622_v2, %v13636_v59  ;;  %v14028_v21 = vshrl.u32 %v13792_v19, 16  ;;  %v13838_v31 = vsel %vm19744_vm7, %v16628_v47, %v13837_v48  ;;  %v19451_v19 = vld [vmem:[%s24922_s3 + $0x5c8] sm:$0xff]   ;;  %v24786_v47 = vld [vmem:[#allocation2 + $0x44] sm:$0x3] }
 0x6b3   : > { %18645 = vmatprep.subr.bf16.mxu1 %v19438_v35  ;;  %v14064_v5 = vshrl.u32 %v24697_v23, 16  ;;  %v14067_v62 = vshll.u32 %v24697_v23, 16  ;;  %v14073_v48 = vshrl.u32 %v24768_v39, 16  ;;  %v19455_v23 = vld [vmem:[%s24922_s3 + $0x5e8] sm:$0xff]   ;;  %v14076_v8 = vshll.u32 %v24768_v39, 16 }
 0x6b4   : > { %v14030_v37 = vrot.slane %v14028_v21, 5  ;;  %v19454_v21 = vld [vmem:[%s24922_s3 + $0x5e0] sm:$0xff]  }
 0x6b6   : > { %18646 = vmatpush3.bf16.msra.mxu1 %v19438_v35  ;;  %v13566_v35 = vsel %vm23384_vm1, %v13561_v53, %v13565_v45  ;;  %v13833_v53 = vrot.slane %v24645_v46, 5  ;;  %v14015_v45 = vrot.slane %v14013_v42, 6  ;;  %v14034_v24 = vor.u32 %v14033_v57, %v14030_v37 }
 0x6b7   : > { %18647 = vmatprep.subr.bf16.mxu1 %v19439_v49  ;;  %v16612_v17 = vcombine.low %v13566_v35, %v13580_v36  ;;  %v14022_v36 = vshll.u32 %v24711_v34, 16  ;;  %v14100_v42 = vshrl.u32 %v24709_v61, 16  ;;  %v14082_v37 = vshrl.u32 %v24718_v54, 16 }
 0x6b8   : > { %v14016_v3 = vor.u32 %v14015_v45, %v14012_v6  ;;  %v14066_v57 = vrot.slane %v14064_v5, 5 }
 0x6b9   : > { %v14024_v59 = vrot.slane %v14022_v36, 6  ;;  %v14102_v6 = vrot.slane %v14100_v42, 5 }
 0x6ba   : > { %18648 = vmatpush3.bf16.msra.mxu1 %v19439_v49  ;;  %v19443_v49 = vld [vmem:[%s24922_s3 + $0x588] sm:$0xff]  }
 0x6bb   : > { %18649 = vmatprep.subr.bf16.mxu1 %v19440_v56 }
 0x6be   : > { %18650 = vmatpush3.bf16.msra.mxu1 %v19440_v56  ;;  %v19447_v56 = vld [vmem:[%s24922_s3 + $0x5a8] sm:$0xff]  }
 0x6bf   : > { %18651 = vmatprep.subr.bf16.mxu1 %v19441_v32 }
 0x6c2   : > { %18652 = vmatpush3.bf16.msra.mxu1 %v19441_v32  ;;  %v13825_v32 = vrot.slane %v24634_v29, 5  ;;  %v14040_v29 = vshll.u32 %v24703_v18, 16 }
 0x6c3   : > { %18661 = vmatprep.subr.bf16.mxu1 %v19442_v28 }
 0x6c4   : > { %v13826_v46 = vsel %vm19744_vm7, %v16625_v1, %v13825_v32  ;;  %v14042_v25 = vrot.slane %v14040_v29, 6  ;;  %v14085_v29 = vshll.u32 %v24718_v54, 16  ;;  %v14136_v54 = vshrl.u32 %v24731_v38, 16 }
 0x6c5   : > { %18654 = vmatmul.mubr.bf16.vlgmr.msra.gmra.mrb[0].mxu1 %v16612_v17  ;;  %v16648_v35 = vcombine.low %v13826_v46, %v13830_v63  ;;  %v13841_v17 = vrot.slane %v24651_v55, 5  ;;  %v24775_v63 = vld [vmem:[#allocation2 + $0x4c] sm:$0x3] }
 0x6c6   : > { %18657 = vmatprep.mubr.bf16.mxu1 %v16613_v30  ;;  %18662 = vmatpush3.bf16.msra.mxu1 %v19442_v28  ;;  %v14019_v28 = vshrl.u32 %v24711_v34, 16  ;;  %v13834_v30 = vsel %vm19744_vm7, %v16627_v10, %v13833_v53  ;;  %v14043_v9 = vor.u32 %v14042_v25, %v14039_v13  ;;  %v14112_v46 = vshll.u32 %v24775_v63, 16  ;;  %v24792_v13 = vld [vmem:[#allocation2 + $0x54] sm:$0x3] }
 0x6c7   : > { %18663 = vmatprep.subr.bf16.mxu1 %v19443_v49  ;;  %v16649_v41 = vcombine.low %v13834_v30, %v13838_v31  ;;  %v13842_v55 = vsel %vm19744_vm7, %v16629_v11, %v13841_v17  ;;  %v14121_v10 = vshll.u32 %v24729_v60, 16  ;;  %v14075_v31 = vrot.slane %v14073_v48, 5  ;;  %v19456_v11 = vld [vmem:[%s24922_s3 + $0x5f0] sm:$0xff]   ;;  %v24801_v30 = vld [vmem:[#allocation2 + $0x5c] sm:$0x3] }
 0x6c8   : > { %v14021_v2 = vrot.slane %v14019_v28, 5  ;;  %v14109_v28 = vshrl.u32 %v24775_v63, 16  ;;  %v14139_v25 = vshll.u32 %v24731_v38, 16  ;;  %v14127_v38 = vshrl.u32 %v24792_v13, 16 }
 0x6ca   : > { %18664 = vmatpush3.bf16.msra.mxu1 %v19443_v49  ;;  %v13845_v49 = vrot.slane %v24653_v43, 5  ;;  %v14025_v7 = vor.u32 %v14024_v59, %v14021_v2  ;;  %v14111_v2 = vrot.slane %v14109_v28, 5  ;;  %v14114_v59 = vrot.slane %v14112_v46, 6  ;;  %v19459_v46 = vld [vmem:[%s24922_s3 + $0x608] sm:$0xff]  }
 0x6cb   : > { %18665 = vmatprep.subr.bf16.mxu1 %v19444_v16  ;;  %v14129_v5 = vrot.slane %v14127_v38, 5  ;;  %v14312_v38 = vld [vmem:[#allocation2 + $0x48] sm:$0xc] }
 0x6cc   : > { %v13846_v43 = vsel %vm19744_vm7, %v16630_v52, %v13845_v49  ;;  %v14087_v52 = vrot.slane %v14085_v29, 6  ;;  %v14091_v49 = vshrl.u32 %v24786_v47, 16 }
 0x6cd   : > { %18658 = vmatmul.mubr.bf16.gmra.mrb[4].mxu1 %v16614_v0  ;;  %v14017_v0 = vrot.slane %v14016_v3, 4  ;;  %v16650_v44 = vcombine.low %v13842_v55, %v13846_v43  ;;  %v14138_v55 = vrot.slane %v14136_v54, 5  ;;  %v14141_v43 = vrot.slane %v14139_v25, 6  ;;  %v19460_v54 = vld [vmem:[%s24922_s3 + $0x610] sm:$0xff]  }
 0x6ce   : > { %18666 = vmatpush3.bf16.msra.mxu1 %v19444_v16  ;;  %18677 = vmatprep.mubr.bf16.mxu1 %v16647_v15  ;;  %v14035_v16 = vrot.slane %v14034_v24, 4  ;;  %v24760_v15 = vld [vmem:[#allocation2 + $0x34] sm:$0x3]  ;;  %v14084_v24 = vrot.slane %v14082_v37, 5  ;;  %v14333_v25 = vrot.slane %v24711_v34, 6  ;;  %v19462_v34 = vld [vmem:[%s24922_s3 + $0x620] sm:$0xff]  }
 0x6cf   : > { %18667 = vmatprep.subr.bf16.mxu1 %v19445_v12  ;;  %v14055_v4 = vshrl.u32 %v24760_v15, 16  ;;  %v14058_v1 = vshll.u32 %v24760_v15, 16 }
 0x6d0   : > { %v14044_v50 = vsel %vm19599_vm2, %v14035_v16, %v14043_v9  ;;  %v14123_v16 = vrot.slane %v14121_v10, 6  ;;  %v14130_v9 = vshll.u32 %v24792_v13, 16 }
 0x6d1   : > { %v24777_v53 = vrot.slane %v14055_v4, 5  ;;  %v14060_v36 = vrot.slane %v14058_v1, 6  ;;  %v19458_v1 = vld [vmem:[%s24922_s3 + $0x600] sm:$0xff]  }
 0x6d2   : > { %18668 = vmatpush3.bf16.msra.mxu1 %v19445_v12  ;;  %v14026_v12 = vsel %vm19599_vm2, %v14017_v0, %v14025_v7  ;;  %v14148_v0 = vshll.u32 %v24801_v30, 16  ;;  %v19457_v7 = vld [vmem:[%s24922_s3 + $0x5f8] sm:$0xff]  }
 0x6d3   : > { %18669 = vmatprep.subr.bf16.mxu1 %v19446_v40 }
 0x6d6   : > { %18670 = vmatpush3.bf16.msra.mxu1 %v19446_v40  ;;  %v16675_v40 = vcombine.low %v14026_v12, %v14044_v50  ;;  %v14093_v50 = vrot.slane %v14091_v49, 5  ;;  %v19461_v49 = vld [vmem:[%s24922_s3 + $0x618] sm:$0xff]  }
 0x6d7   : > { %18671 = vmatprep.subr.bf16.mxu1 %v19447_v56 }
 0x6da   : > { %18672 = vmatpush3.bf16.msra.mxu1 %v19447_v56  ;;  %v14046_v56 = vshrl.u32 %v24700_v14, 16 }
 0x6db   : > { %18673 = vmatprep.subr.bf16.mxu1 %v19448_v20 }
 0x6de   : > { %18674 = vmatpush3.bf16.msra.mxu1 %v19448_v20  ;;  %v14049_v20 = vshll.u32 %v24700_v14, 16  ;;  %v14048_v14 = vrot.slane %v14046_v56, 5 }
 0x6df   : > { %18675 = vmatprep.subr.bf16.mxu1 %v19449_v22 }
 0x6e0   : > { %v14051_v32 = vrot.slane %v14049_v20, 6 }
 0x6e2   : > { %18676 = vmatpush3.bf16.msra.mxu1 %v19449_v22  ;;  %v14103_v22 = vshll.u32 %v24709_v61, 16  ;;  %v14069_v61 = vrot.slane %v14067_v62, 6  ;;  %v14132_v62 = vrot.slane %v14130_v9, 6  ;;  %v14341_v9 = vrot.slane %v24760_v15, 6 }
 0x6e3   : > { %18685 = vmatprep.subr.bf16.mxu1 %v19450_v27 }
 0x6e4   : > { %v14105_v45 = vrot.slane %v14103_v22, 6  ;;  %v14070_v17 = vor.u32 %v14069_v61, %v14066_v57  ;;  %v14142_v22 = vor.u32 %v14141_v43, %v14138_v55  ;;  %v14353_v55 = vrot.slane %v24775_v63, 6 }
 0x6e5   : > { %18678 = vmatmul.mubr.bf16.vlgmr.msra.gmra.mrb[0].mxu1 %v16648_v35  ;;  %v14118_v35 = vshrl.u32 %v24729_v60, 16  ;;  %v14094_v60 = vshll.u32 %v24786_v47, 16 }
 0x6e6   : > { %18681 = vmatprep.mubr.bf16.mxu1 %v16649_v41  ;;  %18686 = vmatpush3.bf16.msra.mxu1 %v19450_v27  ;;  %v14052_v27 = vor.u32 %v14051_v32, %v14048_v14  ;;  %v14106_v3 = vor.u32 %v14105_v45, %v14102_v6  ;;  %v14071_v56 = vrot.slane %v14070_v17, 4  ;;  %v14150_v32 = vrot.slane %v14148_v0, 6  ;;  %v14311_v0 = vld [vmem:[#allocation2 + $0x40] sm:$0xc] }
 0x6e7   : > { %18687 = vmatprep.subr.bf16.mxu1 %v19451_v19  ;;  %v14120_v41 = vrot.slane %v14118_v35, 5  ;;  %v14096_v12 = vrot.slane %v14094_v60, 6  ;;  %v14143_v29 = vrot.slane %v14142_v22, 4  ;;  %v14337_v35 = vrot.slane %v24703_v18, 6  ;;  %v16727_v22 = vld [vmem:[%s19555_s6 + $0x30] sm:$0xc] }
 0x6e8   : > { %v14107_v4 = vrot.slane %v14106_v3, 4  ;;  %v19464_v3 = vld [vmem:[%s24922_s3 + $0x630] sm:$0xff]  }
 0x6e9   : > { %v14124_v42 = vor.u32 %v14123_v16, %v14120_v41  ;;  %v14097_v37 = vor.u32 %v14096_v12, %v14093_v50  ;;  %v14310_v41 = vld [vmem:[#allocation2 + $0x38] sm:$0xc]  ;;  %v14345_v16 = vrot.slane %v24768_v39, 6  ;;  %v14313_v50 = vld [vmem:[#allocation2 + $0x50] sm:$0xc] }
 0x6ea   : > { %18688 = vmatpush3.bf16.msra.mxu1 %v19451_v19  ;;  %v14078_v19 = vrot.slane %v14076_v8, 6  ;;  %v14133_v8 = vor.u32 %v14132_v62, %v14129_v5  ;;  %v14314_v12 = vld [vmem:[#allocation2 + $0x58] sm:$0xc]  ;;  %v16693_v63 = vrot.slane %v14313_v50, 10 }
 0x6eb   : > { %18689 = vmatprep.subr.bf16.mxu1 %v19452_v51  ;;  %v14125_v61 = vrot.slane %v14124_v42, 4 }
 0x6ec   : > { %v14079_v20 = vor.u32 %v14078_v19, %v14075_v31  ;;  %v19463_v19 = vld [vmem:[%s24922_s3 + $0x628] sm:$0xff]  }
 0x6ed   : > { %18682 = vmatmul.mubr.bf16.gmra.mrb[4].mxu1 %v16650_v44  ;;  %v14088_v44 = vor.u32 %v14087_v52, %v14084_v24  ;;  %v14134_v10 = vsel %vm19599_vm2, %v14125_v61, %v14133_v8  ;;  %v14307_v24 = vld [vmem:[#allocation2 + $0x20] sm:$0xc] }
 0x6ee   : > { %18690 = vmatpush3.bf16.msra.mxu1 %v19452_v51  ;;  %18701 = vmatprep.mubr.bf16.mxu1 %v16675_v40  ;;  %v14145_v51 = vshrl.u32 %v24801_v30, 16  ;;  %v14061_v40 = vor.u32 %v14060_v36, %v24777_v53  ;;  %v14080_v53 = vsel %vm19599_vm2, %v14071_v56, %v14079_v20  ;;  %v14308_v36 = vld [vmem:[#allocation2 + $0x28] sm:$0xc]  ;;  %v16687_v52 = vrot.slane %v14307_v24, 10  ;;  %v16731_v24 = vld [vmem:[%s19555_s6 + $0x40] sm:$0xc] }
 0x6ef   : > { %18691 = vmatprep.subr.bf16.mxu1 %v19453_v58  ;;  %v14089_v48 = vrot.slane %v14088_v44, 4  ;;  %v16692_v44 = vrot.slane %v14312_v38, 10  ;;  %v16694_v56 = vrot.slane %v14314_v12, 10  ;;  %v14361_v20 = vrot.slane %v24801_v30, 6  ;;  %v16723_v30 = vld [vmem:[%s19555_s6 + $0x20] sm:$0xc] }
 0x6f0   : > { %v14147_v14 = vrot.slane %v14145_v51, 5  ;;  %v14334_v33 = vsel %vm19802_vm8, %v16687_v52, %v14333_v25  ;;  %v16690_v51 = vrot.slane %v14310_v41, 10  ;;  %v16739_v61 = vrot.slane %v16723_v30, 10  ;;  %v16732_v25 = vld [vmem:[%s19555_s6 + $0x44] sm:$0x3] }
 0x6f1   : > { %v14098_v28 = vsel %vm19599_vm2, %v14089_v48, %v14097_v37  ;;  %v14354_v15 = vsel %vm19802_vm8, %v16692_v44, %v14353_v55  ;;  %v16730_v48 = vld [vmem:[%s19555_s6 + $0x3c] sm:$0x3]  ;;  %v16741_v37 = vrot.slane %v16727_v22, 10  ;;  %v16743_v41 = vrot.slane %v16731_v24, 10 }
 0x6f2   : > { %18692 = vmatpush3.bf16.msra.mxu1 %v19453_v58  ;;  %v14053_v58 = vrot.slane %v14052_v27, 4  ;;  %v14151_v6 = vor.u32 %v14150_v32, %v14147_v14  ;;  %v16728_v14 = vld [vmem:[%s19555_s6 + $0x34] sm:$0x3]  ;;  %v16724_v32 = vld [vmem:[%s19555_s6 + $0x24] sm:$0x3] }
 0x6f3   : > { %18693 = vmatprep.subr.bf16.mxu1 %v19454_v21  ;;  %v14551_v8 = vrot.slane %v16724_v32, 6 }
 0x6f4   : > { %v14152_v31 = vsel %vm19599_vm2, %v14143_v29, %v14151_v6  ;;  %v14563_v6 = vrot.slane %v16730_v48, 6 }
 0x6f5   : > { %v16678_v17 = vcombine.low %v14134_v10, %v14152_v31  ;;  %v16735_v10 = vld [vmem:[%s19555_s6 + $0x50] sm:$0xc]  ;;  %v16736_v31 = vld [vmem:[%s19555_s6 + $0x54] sm:$0x3] }
 0x6f6   : > { %18694 = vmatpush3.bf16.msra.mxu1 %v19454_v21  ;;  %v14115_v21 = vor.u32 %v14114_v59, %v14111_v2  ;;  %v19465_v2 = vld [vmem:[%s24922_s3 + $0x638] sm:$0xff]   ;;  %v14309_v59 = vld [vmem:[#allocation2 + $0x30] sm:$0xc] }
 0x6f7   : > { %18695 = vmatprep.subr.bf16.mxu1 %v19455_v23  ;;  %v16689_v43 = vrot.slane %v14309_v59, 10  ;;  %v14575_v59 = vrot.slane %v16736_v31, 6 }
 0x6f8   : > { %v14116_v57 = vsel %vm19599_vm2, %v14107_v4, %v14115_v21 }
 0x6f9   : > { %v16677_v27 = vcombine.low %v14098_v28, %v14116_v57  ;;  %v14342_v39 = vsel %vm19802_vm8, %v16689_v43, %v14341_v9  ;;  %v16726_v57 = vld [vmem:[%s19555_s6 + $0x2c] sm:$0x3] }
 0x6fa   : > { %18696 = vmatpush3.bf16.msra.mxu1 %v19455_v23  ;;  %v14062_v23 = vsel %vm19599_vm2, %v14053_v58, %v14061_v40  ;;  %v14346_v58 = vsel %vm19802_vm8, %v16690_v51, %v14345_v16  ;;  %v16691_v40 = vrot.slane %v14311_v0, 10  ;;  %v14555_v28 = vrot.slane %v16726_v57, 6 }
 0x6fb   : > { %18697 = vmatprep.subr.bf16.mxu1 %v19456_v11  ;;  %v16676_v45 = vcombine.low %v14062_v23, %v14080_v53  ;;  %v16712_v4 = vcombine.low %v14342_v39, %v14346_v58  ;;  %v14559_v53 = vrot.slane %v16728_v14, 6  ;;  %v16725_v23 = vld [vmem:[%s19555_s6 + $0x28] sm:$0xc] }
 0x6fe   : > { %18698 = vmatpush3.bf16.msra.mxu1 %v19456_v11  ;;  %v16688_v11 = vrot.slane %v14308_v36, 10  ;;  %v14552_v36 = vsel %vm19802_vm8, %v16739_v61, %v14551_v8 }
 0x6ff   : > { %18699 = vmatprep.subr.bf16.mxu1 %v19457_v7 }
 0x700   : > { %v14338_v18 = vsel %vm19802_vm8, %v16688_v11, %v14337_v35  ;;  %v16737_v11 = vld [vmem:[%s19555_s6 + $0x58] sm:$0xc] }
 0x701   : > { %v16711_v60 = vcombine.low %v14334_v33, %v14338_v18  ;;  %v14604_v33 = vunpack.c.l.bf16 %v14552_v36  ;;  %v16746_v55 = vrot.slane %v16737_v11, 10 }
 0x702   : > { %18700 = vmatpush3.bf16.msra.mxu1 %v19457_v7  ;;  %v14349_v7 = vrot.slane %v24786_v47, 6  ;;  %v14357_v47 = vrot.slane %v24792_v13, 6  ;;  %v14362_v13 = vsel %vm19802_vm8, %v16694_v56, %v14361_v20 }
 0x703   : > { %18709 = vmatprep.subr.bf16.mxu1 %v19458_v1 }
 0x704   : > { %v14350_v21 = vsel %vm19802_vm8, %v16691_v40, %v14349_v7  ;;  %v14358_v62 = vsel %vm19802_vm8, %v16693_v63, %v14357_v47  ;;  %v14567_v7 = vrot.slane %v16732_v25, 6 }
 0x705   : > { %18702 = vmatmul.mubr.bf16.vlgmr.msra.gmra.mrb[0].mxu1 %v16676_v45  ;;  %v16713_v5 = vcombine.low %v14350_v21, %v14354_v15  ;;  %v16714_v42 = vcombine.low %v14358_v62, %v14362_v13  ;;  %v16740_v45 = vrot.slane %v16725_v23, 10 }
 0x706   : > { %18705 = vmatprep.mubr.bf16.mxu1 %v16677_v27  ;;  %18710 = vmatpush3.bf16.msra.mxu1 %v19458_v1  ;;  %v16729_v1 = vld [vmem:[%s19555_s6 + $0x38] sm:$0xc]  ;;  %v16747_v27 = vld [vmem:[%s24923_s4] ss:$0 sm:$0xff]  ;;  %v14568_v20 = vsel %vm19802_vm8, %v16743_v41, %v14567_v7 }
 0x707   : > { %18711 = vmatprep.subr.bf16.mxu1 %v19459_v46  ;;  %v16742_v29 = vrot.slane %v16729_v1, 10  ;;  %v14608_v30 = vunpack.c.l.bf16 %v14568_v20 }
 0x709   : > { %v14564_v35 = vsel %vm19802_vm8, %v16742_v29, %v14563_v6 }
 0x70a   : > { %18712 = vmatpush3.bf16.msra.mxu1 %v19459_v46  ;;  %v14560_v46 = vsel %vm19802_vm8, %v16741_v37, %v14559_v53 }
 0x70b   : > { %18713 = vmatprep.subr.bf16.mxu1 %v19460_v54  ;;  %v14606_v18 = vunpack.c.l.bf16 %v14560_v46 }
 0x70d   : > { %18706 = vmatmul.mubr.bf16.gmra.mrb[4].mxu1 %v16678_v17  ;;  %v16738_v17 = vld [vmem:[%s19555_s6 + $0x5c] sm:$0x3] }
 0x70e   : > { %18714 = vmatpush3.bf16.msra.mxu1 %v19460_v54  ;;  %18725 = vmatprep.mubr.bf16.mxu1 %v16711_v60  ;;  %v14556_v54 = vsel %vm19802_vm8, %v16740_v45, %v14555_v28  ;;  %v16733_v60 = vld [vmem:[%s19555_s6 + $0x48] sm:$0xc]  ;;  %v14579_v43 = vrot.slane %v16738_v17, 6 }
 0x70f   : > { %18715 = vmatprep.subr.bf16.mxu1 %v19461_v49  ;;  %v14605_v9 = vunpack.c.l.bf16 %v14556_v54  ;;  %v16744_v44 = vrot.slane %v16733_v60, 10 }
 0x710   : > { %v14580_v47 = vsel %vm19802_vm8, %v16746_v55, %v14579_v43 }
 0x711   : > { %v14611_v22 = vunpack.c.l.bf16 %v14580_v47 }
 0x712   : > { %18716 = vmatpush3.bf16.msra.mxu1 %v19461_v49  ;;  %v14607_v49 = vunpack.c.l.bf16 %v14564_v35 }
 0x713   : > { %18717 = vmatprep.subr.bf16.mxu1 %v19462_v34 }
 0x716   : > { %18718 = vmatpush3.bf16.msra.mxu1 %v19462_v34  ;;  %v16734_v34 = vld [vmem:[%s19555_s6 + $0x4c] sm:$0x3] }
 0x717   : > { %18719 = vmatprep.subr.bf16.mxu1 %v19463_v19  ;;  %v14571_v50 = vrot.slane %v16734_v34, 6 }
 0x71a   : > { %18720 = vmatpush3.bf16.msra.mxu1 %v19463_v19 }
 0x71b   : > { %18721 = vmatprep.subr.bf16.mxu1 %v19464_v3 }
 0x71e   : > { %18722 = vmatpush3.bf16.msra.mxu1 %v19464_v3 }
 0x71f   : > { %18723 = vmatprep.subr.bf16.mxu1 %v19465_v2 }
 0x722   : > { %18724 = vmatpush3.bf16.msra.mxu1 %v19465_v2  ;;  %v16745_v2 = vrot.slane %v16735_v10, 10 }
 0x724   : > { %v14576_v63 = vsel %vm19802_vm8, %v16745_v2, %v14575_v59 }
 0x725   : > { %18726 = vmatmul.mubr.bf16.vlgmr.msra.gmra.mrb[0].mxu1 %v16712_v4  ;;  %v14572_v4 = vsel %vm19802_vm8, %v16744_v44, %v14571_v50  ;;  %v14610_v13 = vunpack.c.l.bf16 %v14576_v63 }
 0x726   : > { %18729 = vmatprep.mubr.bf16.mxu1 %v16713_v5  ;;  %v14609_v1 = vunpack.c.l.bf16 %v14572_v4 }
 0x72d   : > { %18730 = vmatmul.mubr.bf16.gmra.mrb[4].mxu1 %v16714_v42 }
 0x7f8   : > { %v18727_v52 = vpop.f32.mrb[0].mxu1 }
 0x7f9   : > { %v14598_v19 = vadd.f32 %v18727_v52, %v16747_v27  ;;  %v14478_v3 = vpop.f32.mrb[1].mxu1 }
 0x7fa   : > { %v14596_v16 = vadd.f32 %v16747_v27, %v14478_v3  ;;  %v18728_v38 = vpop.f32.mrb[2].mxu1 }
 0x7fb   : > { %v14599_v51 = vadd.f32 %v18728_v38, %v16747_v27  ;;  %v14481_v0 = vpop.f32.mrb[3].mxu1  ;;  %v14614_v58 = vadd.f32 %v14606_v18, %v14598_v19 }
 0x7fc   : > { %v14597_v12 = vadd.f32 %v16747_v27, %v14481_v0  ;;  %v14612_v40 = vadd.f32 %v14604_v33, %v14596_v16 }
 0x7fd   : > { %v14615_v39 = vadd.f32 %v14607_v49, %v14599_v51 }
 0x7fe   : > { %v14613_v15 = vadd.f32 %v14605_v9, %v14597_v12 }
 0x7ff   : > { %v16768_v56 = vpack.c.bf16 %v14615_v39, %v14614_v58 }
 0x800   : > { %v16763_v21 = vpack.c.bf16 %v14613_v15, %v14612_v40  ;;  %v18731_v5 = vpop.f32.mrb[4].mxu1 }
 0x801   : > { %16780 = vst [vmem:[%s246_s7 + $0x8] sm:$0xff] %v16768_v56   ;;  %v14602_v62 = vadd.f32 %v18731_v5, %v16747_v27  ;;  %v14494_v42 = vpop.f32.mrb[5].mxu1 }
 0x802   : > { %16764 = vst [vmem:[%s246_s7] sm:$0xff] %v16763_v21   ;;  %v14600_v14 = vadd.f32 %v16747_v27, %v14494_v42  ;;  %v18732_v32 = vpop.f32.mrb[6].mxu1 }
 0x803   : > { %v14603_v48 = vadd.f32 %v18732_v32, %v16747_v27  ;;  %v14497_v37 = vpop.f32.mrb[7].mxu1  ;;  %v14618_v23 = vadd.f32 %v14610_v13, %v14602_v62 }
 0x804   : > { %v14601_v53 = vadd.f32 %v16747_v27, %v14497_v37  ;;  %v14616_v61 = vadd.f32 %v14608_v30, %v14600_v14 }
 0x805   : > { %v14619_v57 = vadd.f32 %v14611_v22, %v14603_v48 }
 0x806   : > { %v14617_v26 = vadd.f32 %v14609_v1, %v14601_v53 }
 0x807   : > { %v16778_v8 = vpack.c.bf16 %v14619_v57, %v14618_v23 }
 0x808   : > { %v16773_v29 = vpack.c.bf16 %v14617_v26, %v14616_v61 }
 0x809   : > { %16782 = vst [vmem:[%s246_s7 + $0x18] sm:$0xff] %v16778_v8  }
 0x80a   : > { %16781 = vst [vmem:[%s246_s7 + $0x10] sm:$0xff] %v16773_v29  }
 0x80b PF: > { %s15_s20 = sadd.s32 1, %s19488_s20   ;;  %s25016_s18 = smov %s19484_s19 }
 0x80c   : > { %p12_p5 = scmp.ge.s32.totalorder %s15_s20, 4   ;;  %s25017_s19 = smov %s25019_s21 }
 0x80e   :  { %14 = sbr.rel (!%p12_p5) target bundleno = 2 (0x2), region = 127 }

</bundles_post_ra>
